<compile_context>
chip_gen: v7x
topology: tpu7x:2x2x1
jax: 0.10.0
libtpu: 0.0.40
codegen_flags: <defaults>
</compile_context>

<pallas_src>
import functools

import jax
import jax.numpy as jnp
from jax.experimental import pallas as pl
from jax.experimental.pallas import tpu as pltpu


_PHASES = ((0, 0), (0, 1), (1, 0), (1, 1))                 # 2x2 pool-window positions (p, q)
_TAPS = tuple((dy, dx) for dy in range(3) for dx in range(3))  # 3x3 conv taps, dy-major


def _pick_group(batch, cap=8):
    """Images per grid step: largest divisor of batch <= min(cap, batch//2)."""
    if batch < 2:
        return 1
    target = min(cap, batch // 2)
    g = 1
    for d in range(1, target + 1):
        if batch % d == 0:
            g = d
    return g


# ------------------------------ Pallas kernels ------------------------------


def _conv_pool_kernel(x_ref, w_ref, b_ref, o_ref, acc_scr, *, G, rows):
    """conv3x3(+pad1) + bias + ReLU + 2x2 maxpool for G images.

    x_ref : (G*4*rows, K) bf16 im2col, rows ordered (image g, pool phase k, r)
    w_ref : (K, cout) bf16
    b_ref : (1, cout) f32
    o_ref : (G*rows, cout) bf16, row g*rows + u*(S/2)+v = pooled output (u, v)
    """
    acc_scr[...] = jnp.dot(x_ref[...], w_ref[...], preferred_element_type=jnp.float32)
    for g in range(G):
        b0 = g * 4 * rows
        pooled = jnp.maximum(
            jnp.maximum(acc_scr[b0:b0 + rows, :], acc_scr[b0 + rows:b0 + 2 * rows, :]),
            jnp.maximum(acc_scr[b0 + 2 * rows:b0 + 3 * rows, :],
                        acc_scr[b0 + 3 * rows:b0 + 4 * rows, :]))
        o_ref[g * rows:(g + 1) * rows, :] = (
            jnp.maximum(pooled + b_ref[...], 0.0).astype(o_ref.dtype))


def _tail_kernel(x_ref, w3, b3, w4, b4, w5, b5, d1, db1, d2, db2, d3, db3,
                 o_ref, acc3, p3s, a4s, lhs4, acc4, p4s, a5s, lhs5, acc5, *, G):
    """Fused conv3 + conv4 + conv5 (+pools) + dense1/2/3 for G images per step."""
    R3 = 16                                   # pooled 4x4 positions per image (conv3)
    # ---------------- conv3 (wrapper-built pool-phase-major im2col) ----------
    acc3[...] = jnp.dot(x_ref[...], w3[...], preferred_element_type=jnp.float32)
    a4s[...] = jnp.zeros(a4s.shape, a4s.dtype)
    a5s[...] = jnp.zeros(a5s.shape, a5s.dtype)
    lhs4[...] = jnp.zeros(lhs4.shape, lhs4.dtype)
    lhs5[...] = jnp.zeros(lhs5.shape, lhs5.dtype)
    for g in range(G):
        b0 = g * 4 * R3
        pooled = jnp.maximum(
            jnp.maximum(acc3[b0:b0 + R3, :], acc3[b0 + R3:b0 + 2 * R3, :]),
            jnp.maximum(acc3[b0 + 2 * R3:b0 + 3 * R3, :],
                        acc3[b0 + 3 * R3:b0 + 4 * R3, :]))
        p3s[g * R3:(g + 1) * R3, :] = (
            jnp.maximum(pooled + b3[...], 0.0).astype(p3s.dtype))
    # scatter pooled conv3 output (4x4) into conv4's padded phase-split layout (6x6, sp2=3)
    for g in range(G):
        for u in range(4):
            for v in range(4):
                ph = 2 * ((u + 1) % 2) + (v + 1) % 2
                idx = ((u + 1) // 2) * 3 + (v + 1) // 2
                r = g * R3 + u * 4 + v
                a4s[g, ph, idx:idx + 1, :] = p3s[r:r + 1, :]
    # ---------------- conv4 (ring-layout im2col assembled in VMEM) -----------
    RS4, RP4, SP4, C4 = 5, 8, 3, 128
    Q4 = G * RP4
    for k, (p, q) in enumerate(_PHASES):
        for g in range(G):
            base = (k * G + g) * RP4
            for t, (dy, dx) in enumerate(_TAPS):
                ph = 2 * ((p + dy) % 2) + (q + dx) % 2
                off = ((p + dy) // 2) * SP4 + (q + dx) // 2
                lhs4[base:base + RS4, t * C4:(t + 1) * C4] = a4s[g, ph, off:off + RS4, :]
    acc4[...] = jnp.dot(lhs4[...], w4[...], preferred_element_type=jnp.float32)
    pooled = jnp.maximum(jnp.maximum(acc4[0:Q4, :], acc4[Q4:2 * Q4, :]),
                         jnp.maximum(acc4[2 * Q4:3 * Q4, :], acc4[3 * Q4:4 * Q4, :]))
    p4s[...] = jnp.maximum(pooled + b4[...], 0.0).astype(p4s.dtype)
    # scatter pooled conv4 output (2x2) into conv5's padded phase-split layout (4x4, sp2=2)
    for g in range(G):
        for u in range(2):
            for v in range(2):
                r = g * RP4 + u * SP4 + v
                ph = 2 * ((u + 1) % 2) + (v + 1) % 2
                idx = ((u + 1) // 2) * 2 + (v + 1) // 2
                a5s[g, ph, idx:idx + 1, :] = p4s[r:r + 1, :]
    # ---------------- conv5 ---------------------------------------------------
    RS5, RP5, SP5, C5 = 1, 8, 2, 256
    Q5 = G * RP5
    for k, (p, q) in enumerate(_PHASES):
        for g in range(G):
            base = (k * G + g) * RP5
            for t, (dy, dx) in enumerate(_TAPS):
                ph = 2 * ((p + dy) % 2) + (q + dx) % 2
                off = ((p + dy) // 2) * SP5 + (q + dx) // 2
                lhs5[base:base + RS5, t * C5:(t + 1) * C5] = a5s[g, ph, off:off + RS5, :]
    acc5[...] = jnp.dot(lhs5[...], w5[...], preferred_element_type=jnp.float32)
    pooled = jnp.maximum(jnp.maximum(acc5[0:Q5, :], acc5[Q5:2 * Q5, :]),
                         jnp.maximum(acc5[2 * Q5:3 * Q5, :], acc5[3 * Q5:4 * Q5, :]))
    feat = jnp.maximum(pooled + b5[...], 0.0).astype(jnp.bfloat16)  # (G*8, 512); row g*8 valid
    # ---------------- MLP head (M = G*8; padded rows are ignored downstream) --
    h = jnp.maximum(jnp.dot(feat, d1[...], preferred_element_type=jnp.float32)
                    + db1[...], 0.0).astype(jnp.bfloat16)
    h = jnp.maximum(jnp.dot(h, d2[...], preferred_element_type=jnp.float32)
                    + db2[...], 0.0).astype(jnp.bfloat16)
    o_ref[...] = jnp.dot(h, d3[...], preferred_element_type=jnp.float32) + db3[...]


# ------------------------------ wrappers ------------------------------------


def _im2col_pool_layout(x):
    """(B, S, S, C) NHWC -> (B*4*(S/2)^2, 9*C) lane-dense im2col.

    Rows ordered (image b, pool-window position k=2p+q, pooled position
    r=u*(S/2)+v); the row is the 3x3 patch of conv output position (2u+p, 2v+q),
    columns tap-major (t*C + c, t = dy*3 + dx) to match w.reshape(9*C, cout)."""
    bsz, s, _, c = x.shape
    xp = jnp.pad(x, ((0, 0), (1, 1), (1, 1), (0, 0)))
    cols = jnp.concatenate(
        [xp[:, dy:dy + s, dx:dx + s, :] for dy in range(3) for dx in range(3)],
        axis=-1)                                           # (B, S, S, 9C)
    h = s // 2
    cols = cols.reshape(bsz, h, 2, h, 2, 9 * c).transpose(0, 2, 4, 1, 3, 5)
    return cols.reshape(bsz * 4 * h * h, 9 * c)


def conv_relu_pool(x, w_mat, bias, *, k_pad=0):
    """Fused conv3x3(pad=1) + bias + ReLU + maxpool2x2, one pallas_call."""
    bsz, s, _, c = x.shape
    cout = w_mat.shape[1]
    rows = (s // 2) ** 2
    k_dim = 9 * c + k_pad
    cols = _im2col_pool_layout(x)
    if k_pad:
        cols = jnp.pad(cols, ((0, 0), (0, k_pad)))
    cols = cols.astype(jnp.bfloat16)
    g = _pick_group(bsz)
    out = pl.pallas_call(
        functools.partial(_conv_pool_kernel, G=g, rows=rows),
        out_shape=jax.ShapeDtypeStruct((bsz * rows, cout), jnp.bfloat16),
        grid=(bsz // g,),
        in_specs=[
            pl.BlockSpec((g * 4 * rows, k_dim), lambda i: (i, 0)),
            pl.BlockSpec((k_dim, cout), lambda i: (0, 0)),
            pl.BlockSpec((1, cout), lambda i: (0, 0)),
        ],
        out_specs=pl.BlockSpec((g * rows, cout), lambda i: (i, 0)),
        scratch_shapes=[pltpu.VMEM((g * 4 * rows, cout), jnp.float32)],
        compiler_params=pltpu.CompilerParams(dimension_semantics=("parallel",)),
    )(cols, w_mat, bias)
    return out.reshape(bsz, s // 2, s // 2, cout)


def conv345_mlp(x, prep):
    """Fused tail: conv3 + conv4 + conv5 (+pools) + dense1/2/3, one pallas_call."""
    bsz = x.shape[0]
    cols = _im2col_pool_layout(x).astype(jnp.bfloat16)     # (B*64, 576)
    g = _pick_group(bsz)
    w3, b3 = prep["convs"][2]
    w4, b4 = prep["convs"][3]
    w5, b5 = prep["convs"][4]
    operands = (cols, w3, b3, w4, b4, w5, b5, prep["d1"], prep["db1"],
                prep["d2"], prep["db2"], prep["d3"], prep["db3"])
    in_specs = [pl.BlockSpec((g * 64, 576), lambda i: (i, 0))]
    for op in operands[1:]:
        in_specs.append(pl.BlockSpec(op.shape, lambda i: (0, 0)))
    out = pl.pallas_call(
        functools.partial(_tail_kernel, G=g),
        out_shape=jax.ShapeDtypeStruct((bsz * 8, 16), jnp.float32),
        grid=(bsz // g,),
        in_specs=in_specs,
        out_specs=pl.BlockSpec((g * 8, 16), lambda i: (i, 0)),
        scratch_shapes=[
            pltpu.VMEM((g * 64, 128), jnp.float32),    # acc3
            pltpu.VMEM((g * 16, 128), jnp.bfloat16),   # pooled conv3
            pltpu.VMEM((g, 4, 9, 128), jnp.bfloat16),  # conv4 phase-split input
            pltpu.VMEM((g * 32, 1152), jnp.bfloat16),  # conv4 im2col lhs
            pltpu.VMEM((g * 32, 256), jnp.float32),    # acc4
            pltpu.VMEM((g * 8, 256), jnp.bfloat16),    # pooled conv4
            pltpu.VMEM((g, 4, 4, 256), jnp.bfloat16),  # conv5 phase-split input
            pltpu.VMEM((g * 32, 2304), jnp.bfloat16),  # conv5 im2col lhs
            pltpu.VMEM((g * 32, 512), jnp.float32),    # acc5
        ],
        compiler_params=pltpu.CompilerParams(dimension_semantics=("parallel",)),
    )(*operands)
    return out.reshape(bsz, 8, 16)[:, 0, :10]


# ------------------------------ parameters -----------------------------------


def init_params(key):
    """Random parameters at the PyTorch module's logical shapes (HWIO convs)."""
    chans = [3, 32, 64, 128, 256, 512]
    keys = jax.random.split(key, 8)
    params = {"convs": [], "dense": []}
    for i in range(5):
        cin, cout = chans[i], chans[i + 1]
        w = jax.random.normal(keys[i], (3, 3, cin, cout), jnp.float32) * 0.05
        params["convs"].append((w, jnp.full((cout,), 0.01, jnp.float32)))
    for j, (din, dout) in enumerate([(512, 120), (120, 32), (32, 10)]):
        w = jax.random.normal(keys[5 + j], (din, dout), jnp.float32) * 0.05
        params["dense"].append((w, jnp.full((dout,), 0.01, jnp.float32)))
    return params


def prepare_params(params):
    """One-time conversion to kernel formats: bf16 (9*cin, cout) conv matrices
    (conv1 K padded 27->32), f32 (1, N) biases, MLP dims padded to 128/16 lanes."""
    conv_mats = []
    for i, (w, b) in enumerate(params["convs"]):
        cin, cout = w.shape[2], w.shape[3]
        wm = w.reshape(9 * cin, cout)
        if i == 0:
            wm = jnp.pad(wm, ((0, 5), (0, 0)))            # K 27 -> 32
        conv_mats.append((wm.astype(jnp.bfloat16),
                          b.reshape(1, cout).astype(jnp.float32)))
    (w1, b1), (w2, b2), (w3, b3) = params["dense"]
    return {
        "convs": conv_mats,
        "d1": jnp.pad(w1, ((0, 0), (0, 8))).astype(jnp.bfloat16),      # (512, 128)
        "db1": jnp.pad(b1, (0, 8)).reshape(1, 128).astype(jnp.float32),
        "d2": jnp.pad(w2, ((0, 8), (0, 96))).astype(jnp.bfloat16),     # (128, 128)
        "db2": jnp.pad(b2, (0, 96)).reshape(1, 128).astype(jnp.float32),
        "d3": jnp.pad(w3, ((0, 96), (0, 6))).astype(jnp.bfloat16),     # (128, 16)
        "db3": jnp.pad(b3, (0, 6)).reshape(1, 16).astype(jnp.float32),
    }


# ------------------------------ forward pass ---------------------------------


@jax.jit
def net_forward(x_nchw, prep):
    x = jnp.transpose(x_nchw, (0, 2, 3, 1))                            # NCHW -> NHWC
    x = conv_relu_pool(x, prep["convs"][0][0], prep["convs"][0][1], k_pad=5)  # conv1
    x = conv_relu_pool(x, prep["convs"][1][0], prep["convs"][1][1])           # conv2
    return conv345_mlp(x, prep)                                        # conv3..5 + MLP


@jax.jit
def net_reference(x_nchw, params):
    """Pure-JAX f32 reference of the PyTorch module (sanity check only)."""
    x = jnp.transpose(x_nchw, (0, 2, 3, 1))
    for w, b in params["convs"]:
        y = jax.lax.conv_general_dilated(
            x, w, window_strides=(1, 1), padding="SAME",
            dimension_numbers=("NHWC", "HWIO", "NHWC"))
        y = jax.nn.relu(y + b)
        x = jax.lax.reduce_window(y, -jnp.inf, jax.lax.max,
                                  (1, 2, 2, 1), (1, 2, 2, 1), "VALID")
    h = x.reshape(x.shape[0], -1)
    (w1, b1), (w2, b2), (w3, b3) = params["dense"]
    h = jax.nn.relu(h @ w1 + b1)
    h = jax.nn.relu(h @ w2 + b2)
    return h @ w3 + b3


if __name__ == "__main__":
    key = jax.random.PRNGKey(0)
    pkey, xkey = jax.random.split(key)
    params = init_params(pkey)
    prep = prepare_params(params)
    # PyTorch-style NCHW input; spatial 32 so five 2x2 pools leave 1x1 -> 512 feats.
    x = jax.random.normal(xkey, (2, 3, 32, 32), jnp.float32)
    out = net_forward(x, prep)
    jax.block_until_ready(out)
    assert out.shape == (2, 10) and out.dtype == jnp.float32
    ref = net_reference(x, params)
    assert bool(jnp.all(jnp.isfinite(out)))
    assert bool(jnp.allclose(out, ref, rtol=1e-1, atol=1e-1))   # bf16 vs f32 tolerance
    print("KERNEL_OK")
</pallas_src>

<mosaic_0001>
module attributes {stable_mosaic.version = 11 : i64} {
  func.func @_conv_pool_kernel(%arg0: i32, %arg1: memref<1024x32xbf16, #tpu.memory_space<vmem>>, %arg2: memref<32x32xbf16, #tpu.memory_space<vmem>>, %arg3: memref<1x32xf32, #tpu.memory_space<vmem>>, %arg4: memref<256x32xbf16, #tpu.memory_space<vmem>>, %arg5: memref<1024x32xf32, #tpu.memory_space<vmem>>) attributes {dimension_semantics = [#tpu.dimension_semantics<parallel>], iteration_bounds = array<i64: 2>, scalar_prefetch = 0 : i64, scratch_operands = 1 : i64, tpu.core_type = #tpu.core_type<tc>, window_params = [{transform_indices = @transform_0, window_bounds = array<i64: 1024, 32>}, {pipeline_mode = #tpu.pipeline_mode<synchronous>, transform_indices = @transform_1, window_bounds = array<i64: 32, 32>}, {pipeline_mode = #tpu.pipeline_mode<synchronous>, transform_indices = @transform_2, window_bounds = array<i64: 1, 32>}, {transform_indices = @transform_3, window_bounds = array<i64: 256, 32>}]} {
    %c0 = arith.constant 0 : index
    %c0_0 = arith.constant 0 : index
    %0 = vector.load %arg1[%c0, %c0_0] : memref<1024x32xbf16, #tpu.memory_space<vmem>>, vector<1024x32xbf16>
    %c0_1 = arith.constant 0 : index
    %c0_2 = arith.constant 0 : index
    %1 = vector.load %arg2[%c0_1, %c0_2] : memref<32x32xbf16, #tpu.memory_space<vmem>>, vector<32x32xbf16>
    %cst = arith.constant dense<0.000000e+00> : vector<1024x32xf32>
    %2 = tpu.matmul %0, %1, %cst {dimension_numbers = #tpu.dot_dimension_numbers<[1], [0], [0], [1], [0, 0, 1, 1], [], []>} : vector<1024x32xbf16>, vector<32x32xbf16>, vector<1024x32xf32> -> vector<1024x32xf32>
    %c0_3 = arith.constant 0 : index
    %c0_4 = arith.constant 0 : index
    %3 = vector.load %arg5[%c0_3, %c0_4] : memref<1024x32xf32, #tpu.memory_space<vmem>>, vector<1024x32xf32>
    tpu.vector_store %arg5[%c0_3, %c0_4], %2 {strides = array<i32>} : memref<1024x32xf32, #tpu.memory_space<vmem>>, vector<1024x32xf32>,
    %c0_5 = arith.constant 0 : index
    %c0_6 = arith.constant 0 : index
    %4 = vector.load %arg5[%c0_5, %c0_6] : memref<1024x32xf32, #tpu.memory_space<vmem>>, vector<256x32xf32>
    %c256 = arith.constant 256 : index
    %c0_7 = arith.constant 0 : index
    %5 = vector.load %arg5[%c256, %c0_7] : memref<1024x32xf32, #tpu.memory_space<vmem>>, vector<256x32xf32>
    %6 = arith.maximumf %4, %5 : vector<256x32xf32>
    %c512 = arith.constant 512 : index
    %c0_8 = arith.constant 0 : index
    %7 = vector.load %arg5[%c512, %c0_8] : memref<1024x32xf32, #tpu.memory_space<vmem>>, vector<256x32xf32>
    %c768 = arith.constant 768 : index
    %c0_9 = arith.constant 0 : index
    %8 = vector.load %arg5[%c768, %c0_9] : memref<1024x32xf32, #tpu.memory_space<vmem>>, vector<256x32xf32>
    %9 = arith.maximumf %7, %8 : vector<256x32xf32>
    %10 = arith.maximumf %6, %9 : vector<256x32xf32>
    %c0_10 = arith.constant 0 : index
    %c0_11 = arith.constant 0 : index
    %11 = vector.load %arg3[%c0_10, %c0_11] : memref<1x32xf32, #tpu.memory_space<vmem>>, vector<1x32xf32>
    %12 = vector.broadcast %11 : vector<1x32xf32> to vector<256x32xf32>
    %13 = arith.addf %10, %12 : vector<256x32xf32>
    %cst_12 = arith.constant 0.000000e+00 : f32
    %14 = vector.broadcast %cst_12 : f32 to vector<256x32xf32>
    %15 = arith.maximumf %13, %14 : vector<256x32xf32>
    %16 = arith.truncf %15 : vector<256x32xf32> to vector<256x32xbf16>
    %c0_13 = arith.constant 0 : index
    %c0_14 = arith.constant 0 : index
    %17 = vector.load %arg4[%c0_13, %c0_14] : memref<256x32xbf16, #tpu.memory_space<vmem>>, vector<256x32xbf16>
    tpu.vector_store %arg4[%c0_13, %c0_14], %16 {strides = array<i32>} : memref<256x32xbf16, #tpu.memory_space<vmem>>, vector<256x32xbf16>,
    return
  }
  func.func @transform_0(%arg0: i32) -> (i32, i32) {
    %c0_i32 = arith.constant 0 : i32
    %c0_i32_0 = arith.constant 0 : i32
    return %arg0, %c0_i32 : i32, i32
  }
  func.func @transform_1(%arg0: i32) -> (i32, i32) {
    %c0_i32 = arith.constant 0 : i32
    %c0_i32_0 = arith.constant 0 : i32
    %c0_i32_1 = arith.constant 0 : i32
    return %c0_i32, %c0_i32_0 : i32, i32
  }
  func.func @transform_2(%arg0: i32) -> (i32, i32) {
    %c0_i32 = arith.constant 0 : i32
    %c0_i32_0 = arith.constant 0 : i32
    %c0_i32_1 = arith.constant 0 : i32
    return %c0_i32, %c0_i32_0 : i32, i32
  }
  func.func @transform_3(%arg0: i32) -> (i32, i32) {
    %c0_i32 = arith.constant 0 : i32
    %c0_i32_0 = arith.constant 0 : i32
    return %arg0, %c0_i32 : i32, i32
  }
}

module attributes {stable_mosaic.version = 11 : i64} {
  func.func @_conv_pool_kernel(%arg0: i32, %arg1: memref<256x288xbf16, #tpu.memory_space<vmem>>, %arg2: memref<288x64xbf16, #tpu.memory_space<vmem>>, %arg3: memref<1x64xf32, #tpu.memory_space<vmem>>, %arg4: memref<64x64xbf16, #tpu.memory_space<vmem>>, %arg5: memref<256x64xf32, #tpu.memory_space<vmem>>) attributes {dimension_semantics = [#tpu.dimension_semantics<parallel>], iteration_bounds = array<i64: 2>, scalar_prefetch = 0 : i64, scratch_operands = 1 : i64, tpu.core_type = #tpu.core_type<tc>, window_params = [{transform_indices = @transform_0, window_bounds = array<i64: 256, 288>}, {pipeline_mode = #tpu.pipeline_mode<synchronous>, transform_indices = @transform_1, window_bounds = array<i64: 288, 64>}, {pipeline_mode = #tpu.pipeline_mode<synchronous>, transform_indices = @transform_2, window_bounds = array<i64: 1, 64>}, {transform_indices = @transform_3, window_bounds = array<i64: 64, 64>}]} {
    %c0 = arith.constant 0 : index
    %c0_0 = arith.constant 0 : index
    %0 = vector.load %arg1[%c0, %c0_0] : memref<256x288xbf16, #tpu.memory_space<vmem>>, vector<256x288xbf16>
    %c0_1 = arith.constant 0 : index
    %c0_2 = arith.constant 0 : index
    %1 = vector.load %arg2[%c0_1, %c0_2] : memref<288x64xbf16, #tpu.memory_space<vmem>>, vector<288x64xbf16>
    %cst = arith.constant dense<0.000000e+00> : vector<256x64xf32>
    %2 = tpu.matmul %0, %1, %cst {dimension_numbers = #tpu.dot_dimension_numbers<[1], [0], [0], [1], [0, 0, 1, 1], [], []>} : vector<256x288xbf16>, vector<288x64xbf16>, vector<256x64xf32> -> vector<256x64xf32>
    %c0_3 = arith.constant 0 : index
    %c0_4 = arith.constant 0 : index
    %3 = vector.load %arg5[%c0_3, %c0_4] : memref<256x64xf32, #tpu.memory_space<vmem>>, vector<256x64xf32>
    tpu.vector_store %arg5[%c0_3, %c0_4], %2 {strides = array<i32>} : memref<256x64xf32, #tpu.memory_space<vmem>>, vector<256x64xf32>,
    %c0_5 = arith.constant 0 : index
    %c0_6 = arith.constant 0 : index
    %4 = vector.load %arg5[%c0_5, %c0_6] : memref<256x64xf32, #tpu.memory_space<vmem>>, vector<64x64xf32>
    %c64 = arith.constant 64 : index
    %c0_7 = arith.constant 0 : index
    %5 = vector.load %arg5[%c64, %c0_7] : memref<256x64xf32, #tpu.memory_space<vmem>>, vector<64x64xf32>
    %6 = arith.maximumf %4, %5 : vector<64x64xf32>
    %c128 = arith.constant 128 : index
    %c0_8 = arith.constant 0 : index
    %7 = vector.load %arg5[%c128, %c0_8] : memref<256x64xf32, #tpu.memory_space<vmem>>, vector<64x64xf32>
    %c192 = arith.constant 192 : index
    %c0_9 = arith.constant 0 : index
    %8 = vector.load %arg5[%c192, %c0_9] : memref<256x64xf32, #tpu.memory_space<vmem>>, vector<64x64xf32>
    %9 = arith.maximumf %7, %8 : vector<64x64xf32>
    %10 = arith.maximumf %6, %9 : vector<64x64xf32>
    %c0_10 = arith.constant 0 : index
    %c0_11 = arith.constant 0 : index
    %11 = vector.load %arg3[%c0_10, %c0_11] : memref<1x64xf32, #tpu.memory_space<vmem>>, vector<1x64xf32>
    %12 = vector.broadcast %11 : vector<1x64xf32> to vector<64x64xf32>
    %13 = arith.addf %10, %12 : vector<64x64xf32>
    %cst_12 = arith.constant 0.000000e+00 : f32
    %14 = vector.broadcast %cst_12 : f32 to vector<64x64xf32>
    %15 = arith.maximumf %13, %14 : vector<64x64xf32>
    %16 = arith.truncf %15 : vector<64x64xf32> to vector<64x64xbf16>
    %c0_13 = arith.constant 0 : index
    %c0_14 = arith.constant 0 : index
    %17 = vector.load %arg4[%c0_13, %c0_14] : memref<64x64xbf16, #tpu.memory_space<vmem>>, vector<64x64xbf16>
    tpu.vector_store %arg4[%c0_13, %c0_14], %16 {strides = array<i32>} : memref<64x64xbf16, #tpu.memory_space<vmem>>, vector<64x64xbf16>,
    return
  }
  func.func @transform_0(%arg0: i32) -> (i32, i32) {
    %c0_i32 = arith.constant 0 : i32
    %c0_i32_0 = arith.constant 0 : i32
    return %arg0, %c0_i32 : i32, i32
  }
  func.func @transform_1(%arg0: i32) -> (i32, i32) {
    %c0_i32 = arith.constant 0 : i32
    %c0_i32_0 = arith.constant 0 : i32
    %c0_i32_1 = arith.constant 0 : i32
    return %c0_i32, %c0_i32_0 : i32, i32
  }
  func.func @transform_2(%arg0: i32) -> (i32, i32) {
    %c0_i32 = arith.constant 0 : i32
    %c0_i32_0 = arith.constant 0 : i32
    %c0_i32_1 = arith.constant 0 : i32
    return %c0_i32, %c0_i32_0 : i32, i32
  }
  func.func @transform_3(%arg0: i32) -> (i32, i32) {
    %c0_i32 = arith.constant 0 : i32
    %c0_i32_0 = arith.constant 0 : i32
    return %arg0, %c0_i32 : i32, i32
  }
}

module attributes {stable_mosaic.version = 11 : i64} {
  func.func @_tail_kernel(%arg0: i32, %arg1: memref<64x576xbf16, #tpu.memory_space<vmem>>, %arg2: memref<576x128xbf16, #tpu.memory_space<vmem>>, %arg3: memref<1x128xf32, #tpu.memory_space<vmem>>, %arg4: memref<1152x256xbf16, #tpu.memory_space<vmem>>, %arg5: memref<1x256xf32, #tpu.memory_space<vmem>>, %arg6: memref<2304x512xbf16, #tpu.memory_space<vmem>>, %arg7: memref<1x512xf32, #tpu.memory_space<vmem>>, %arg8: memref<512x128xbf16, #tpu.memory_space<vmem>>, %arg9: memref<1x128xf32, #tpu.memory_space<vmem>>, %arg10: memref<128x128xbf16, #tpu.memory_space<vmem>>, %arg11: memref<1x128xf32, #tpu.memory_space<vmem>>, %arg12: memref<128x16xbf16, #tpu.memory_space<vmem>>, %arg13: memref<1x16xf32, #tpu.memory_space<vmem>>, %arg14: memref<8x16xf32, #tpu.memory_space<vmem>>, %arg15: memref<64x128xf32, #tpu.memory_space<vmem>>, %arg16: memref<16x128xbf16, #tpu.memory_space<vmem>>, %arg17: memref<1x4x9x128xbf16, #tpu.memory_space<vmem>>, %arg18: memref<32x1152xbf16, #tpu.memory_space<vmem>>, %arg19: memref<32x256xf32, #tpu.memory_space<vmem>>, %arg20: memref<8x256xbf16, #tpu.memory_space<vmem>>, %arg21: memref<1x4x4x256xbf16, #tpu.memory_space<vmem>>, %arg22: memref<32x2304xbf16, #tpu.memory_space<vmem>>, %arg23: memref<32x512xf32, #tpu.memory_space<vmem>>) attributes {dimension_semantics = [#tpu.dimension_semantics<parallel>], iteration_bounds = array<i64: 2>, scalar_prefetch = 0 : i64, scratch_operands = 9 : i64, tpu.core_type = #tpu.core_type<tc>, window_params = [{transform_indices = @transform_0, window_bounds = array<i64: 64, 576>}, {pipeline_mode = #tpu.pipeline_mode<synchronous>, transform_indices = @transform_1, window_bounds = array<i64: 576, 128>}, {pipeline_mode = #tpu.pipeline_mode<synchronous>, transform_indices = @transform_2, window_bounds = array<i64: 1, 128>}, {pipeline_mode = #tpu.pipeline_mode<synchronous>, transform_indices = @transform_3, window_bounds = array<i64: 1152, 256>}, {pipeline_mode = #tpu.pipeline_mode<synchronous>, transform_indices = @transform_4, window_bounds = array<i64: 1, 256>}, {pipeline_mode = #tpu.pipeline_mode<synchronous>, transform_indices = @transform_5, window_bounds = array<i64: 2304, 512>}, {pipeline_mode = #tpu.pipeline_mode<synchronous>, transform_indices = @transform_6, window_bounds = array<i64: 1, 512>}, {pipeline_mode = #tpu.pipeline_mode<synchronous>, transform_indices = @transform_7, window_bounds = array<i64: 512, 128>}, {pipeline_mode = #tpu.pipeline_mode<synchronous>, transform_indices = @transform_8, window_bounds = array<i64: 1, 128>}, {pipeline_mode = #tpu.pipeline_mode<synchronous>, transform_indices = @transform_9, window_bounds = array<i64: 128, 128>}, {pipeline_mode = #tpu.pipeline_mode<synchronous>, transform_indices = @transform_10, window_bounds = array<i64: 1, 128>}, {pipeline_mode = #tpu.pipeline_mode<synchronous>, transform_indices = @transform_11, window_bounds = array<i64: 128, 16>}, {pipeline_mode = #tpu.pipeline_mode<synchronous>, transform_indices = @transform_12, window_bounds = array<i64: 1, 16>}, {transform_indices = @transform_13, window_bounds = array<i64: 8, 16>}]} {
    %c0 = arith.constant 0 : index
    %c0_0 = arith.constant 0 : index
    %0 = vector.load %arg1[%c0, %c0_0] : memref<64x576xbf16, #tpu.memory_space<vmem>>, vector<64x576xbf16>
    %c0_1 = arith.constant 0 : index
    %c0_2 = arith.constant 0 : index
    %1 = vector.load %arg2[%c0_1, %c0_2] : memref<576x128xbf16, #tpu.memory_space<vmem>>, vector<576x128xbf16>
    %cst = arith.constant dense<0.000000e+00> : vector<64x128xf32>
    %2 = tpu.matmul %0, %1, %cst {dimension_numbers = #tpu.dot_dimension_numbers<[1], [0], [0], [1], [0, 0, 1, 1], [], []>} : vector<64x576xbf16>, vector<576x128xbf16>, vector<64x128xf32> -> vector<64x128xf32>
    %c0_3 = arith.constant 0 : index
    %c0_4 = arith.constant 0 : index
    %3 = vector.load %arg15[%c0_3, %c0_4] : memref<64x128xf32, #tpu.memory_space<vmem>>, vector<64x128xf32>
    tpu.vector_store %arg15[%c0_3, %c0_4], %2 {strides = array<i32>} : memref<64x128xf32, #tpu.memory_space<vmem>>, vector<64x128xf32>,
    %cst_5 = arith.constant 0.000000e+00 : bf16
    %4 = vector.broadcast %cst_5 : bf16 to vector<1x4x9x128xbf16>
    %c0_6 = arith.constant 0 : index
    %c0_7 = arith.constant 0 : index
    %c0_8 = arith.constant 0 : index
    %c0_9 = arith.constant 0 : index
    %5 = vector.load %arg17[%c0_6, %c0_7, %c0_8, %c0_9] : memref<1x4x9x128xbf16, #tpu.memory_space<vmem>>, vector<1x4x9x128xbf16>
    tpu.vector_store %arg17[%c0_6, %c0_7, %c0_8, %c0_9], %4 {strides = array<i32>} : memref<1x4x9x128xbf16, #tpu.memory_space<vmem>>, vector<1x4x9x128xbf16>,
    %cst_10 = arith.constant 0.000000e+00 : bf16
    %6 = vector.broadcast %cst_10 : bf16 to vector<1x4x4x256xbf16>
    %c0_11 = arith.constant 0 : index
    %c0_12 = arith.constant 0 : index
    %c0_13 = arith.constant 0 : index
    %c0_14 = arith.constant 0 : index
    %7 = vector.load %arg21[%c0_11, %c0_12, %c0_13, %c0_14] : memref<1x4x4x256xbf16, #tpu.memory_space<vmem>>, vector<1x4x4x256xbf16>
    tpu.vector_store %arg21[%c0_11, %c0_12, %c0_13, %c0_14], %6 {strides = array<i32>} : memref<1x4x4x256xbf16, #tpu.memory_space<vmem>>, vector<1x4x4x256xbf16>,
    %cst_15 = arith.constant 0.000000e+00 : bf16
    %8 = vector.broadcast %cst_15 : bf16 to vector<32x1152xbf16>
    %c0_16 = arith.constant 0 : index
    %c0_17 = arith.constant 0 : index
    %9 = vector.load %arg18[%c0_16, %c0_17] : memref<32x1152xbf16, #tpu.memory_space<vmem>>, vector<32x1152xbf16>
    tpu.vector_store %arg18[%c0_16, %c0_17], %8 {strides = array<i32>} : memref<32x1152xbf16, #tpu.memory_space<vmem>>, vector<32x1152xbf16>,
    %cst_18 = arith.constant 0.000000e+00 : bf16
    %10 = vector.broadcast %cst_18 : bf16 to vector<32x2304xbf16>
    %c0_19 = arith.constant 0 : index
    %c0_20 = arith.constant 0 : index
    %11 = vector.load %arg22[%c0_19, %c0_20] : memref<32x2304xbf16, #tpu.memory_space<vmem>>, vector<32x2304xbf16>
    tpu.vector_store %arg22[%c0_19, %c0_20], %10 {strides = array<i32>} : memref<32x2304xbf16, #tpu.memory_space<vmem>>, vector<32x2304xbf16>,
    %c0_21 = arith.constant 0 : index
    %c0_22 = arith.constant 0 : index
    %12 = vector.load %arg15[%c0_21, %c0_22] : memref<64x128xf32, #tpu.memory_space<vmem>>, vector<16x128xf32>
    %c16 = arith.constant 16 : index
    %c0_23 = arith.constant 0 : index
    %13 = vector.load %arg15[%c16, %c0_23] : memref<64x128xf32, #tpu.memory_space<vmem>>, vector<16x128xf32>
    %14 = arith.maximumf %12, %13 : vector<16x128xf32>
    %c32 = arith.constant 32 : index
    %c0_24 = arith.constant 0 : index
    %15 = vector.load %arg15[%c32, %c0_24] : memref<64x128xf32, #tpu.memory_space<vmem>>, vector<16x128xf32>
    %c48 = arith.constant 48 : index
    %c0_25 = arith.constant 0 : index
    %16 = vector.load %arg15[%c48, %c0_25] : memref<64x128xf32, #tpu.memory_space<vmem>>, vector<16x128xf32>
    %17 = arith.maximumf %15, %16 : vector<16x128xf32>
    %18 = arith.maximumf %14, %17 : vector<16x128xf32>
    %c0_26 = arith.constant 0 : index
    %c0_27 = arith.constant 0 : index
    %19 = vector.load %arg3[%c0_26, %c0_27] : memref<1x128xf32, #tpu.memory_space<vmem>>, vector<1x128xf32>
    %20 = vector.broadcast %19 : vector<1x128xf32> to vector<16x128xf32>
    %21 = arith.addf %18, %20 : vector<16x128xf32>
    %cst_28 = arith.constant 0.000000e+00 : f32
    %22 = vector.broadcast %cst_28 : f32 to vector<16x128xf32>
    %23 = arith.maximumf %21, %22 : vector<16x128xf32>
    %24 = arith.truncf %23 : vector<16x128xf32> to vector<16x128xbf16>
    %c0_29 = arith.constant 0 : index
    %c0_30 = arith.constant 0 : index
    %25 = vector.load %arg16[%c0_29, %c0_30] : memref<16x128xbf16, #tpu.memory_space<vmem>>, vector<16x128xbf16>
    tpu.vector_store %arg16[%c0_29, %c0_30], %24 {strides = array<i32>} : memref<16x128xbf16, #tpu.memory_space<vmem>>, vector<16x128xbf16>,
    %c0_31 = arith.constant 0 : index
    %c0_32 = arith.constant 0 : index
    %26 = vector.load %arg16[%c0_31, %c0_32] : memref<16x128xbf16, #tpu.memory_space<vmem>>, vector<1x128xbf16>
    %c0_33 = arith.constant 0 : index
    %c3 = arith.constant 3 : index
    %c0_34 = arith.constant 0 : index
    %c0_35 = arith.constant 0 : index
    %27 = vector.load %arg17[%c0_33, %c3, %c0_34, %c0_35] : memref<1x4x9x128xbf16, #tpu.memory_space<vmem>>, vector<1x1x1x128xbf16>
    %28 = vector.shape_cast %27 : vector<1x1x1x128xbf16> to vector<1x128xbf16>
    %29 = vector.shape_cast %26 : vector<1x128xbf16> to vector<1x1x1x128xbf16>
    tpu.vector_store %arg17[%c0_33, %c3, %c0_34, %c0_35], %29 {strides = array<i32>} : memref<1x4x9x128xbf16, #tpu.memory_space<vmem>>, vector<1x1x1x128xbf16>,
    %c1 = arith.constant 1 : index
    %c0_36 = arith.constant 0 : index
    %30 = vector.load %arg16[%c1, %c0_36] : memref<16x128xbf16, #tpu.memory_space<vmem>>, vector<1x128xbf16>
    %c0_37 = arith.constant 0 : index
    %c2 = arith.constant 2 : index
    %c1_38 = arith.constant 1 : index
    %c0_39 = arith.constant 0 : index
    %31 = vector.load %arg17[%c0_37, %c2, %c1_38, %c0_39] : memref<1x4x9x128xbf16, #tpu.memory_space<vmem>>, vector<1x1x1x128xbf16>
    %32 = vector.shape_cast %31 : vector<1x1x1x128xbf16> to vector<1x128xbf16>
    %33 = vector.shape_cast %30 : vector<1x128xbf16> to vector<1x1x1x128xbf16>
    tpu.vector_store %arg17[%c0_37, %c2, %c1_38, %c0_39], %33 {strides = array<i32>} : memref<1x4x9x128xbf16, #tpu.memory_space<vmem>>, vector<1x1x1x128xbf16>,
    %c2_40 = arith.constant 2 : index
    %c0_41 = arith.constant 0 : index
    %34 = vector.load %arg16[%c2_40, %c0_41] : memref<16x128xbf16, #tpu.memory_space<vmem>>, vector<1x128xbf16>
    %c0_42 = arith.constant 0 : index
    %c3_43 = arith.constant 3 : index
    %c1_44 = arith.constant 1 : index
    %c0_45 = arith.constant 0 : index
    %35 = vector.load %arg17[%c0_42, %c3_43, %c1_44, %c0_45] : memref<1x4x9x128xbf16, #tpu.memory_space<vmem>>, vector<1x1x1x128xbf16>
    %36 = vector.shape_cast %35 : vector<1x1x1x128xbf16> to vector<1x128xbf16>
    %37 = vector.shape_cast %34 : vector<1x128xbf16> to vector<1x1x1x128xbf16>
    tpu.vector_store %arg17[%c0_42, %c3_43, %c1_44, %c0_45], %37 {strides = array<i32>} : memref<1x4x9x128xbf16, #tpu.memory_space<vmem>>, vector<1x1x1x128xbf16>,
    %c3_46 = arith.constant 3 : index
    %c0_47 = arith.constant 0 : index
    %38 = vector.load %arg16[%c3_46, %c0_47] : memref<16x128xbf16, #tpu.memory_space<vmem>>, vector<1x128xbf16>
    %c0_48 = arith.constant 0 : index
    %c2_49 = arith.constant 2 : index
    %c2_50 = arith.constant 2 : index
    %c0_51 = arith.constant 0 : index
    %39 = vector.load %arg17[%c0_48, %c2_49, %c2_50, %c0_51] : memref<1x4x9x128xbf16, #tpu.memory_space<vmem>>, vector<1x1x1x128xbf16>
    %40 = vector.shape_cast %39 : vector<1x1x1x128xbf16> to vector<1x128xbf16>
    %41 = vector.shape_cast %38 : vector<1x128xbf16> to vector<1x1x1x128xbf16>
    tpu.vector_store %arg17[%c0_48, %c2_49, %c2_50, %c0_51], %41 {strides = array<i32>} : memref<1x4x9x128xbf16, #tpu.memory_space<vmem>>, vector<1x1x1x128xbf16>,
    %c4 = arith.constant 4 : index
    %c0_52 = arith.constant 0 : index
    %42 = vector.load %arg16[%c4, %c0_52] : memref<16x128xbf16, #tpu.memory_space<vmem>>, vector<1x128xbf16>
    %c0_53 = arith.constant 0 : index
    %c1_54 = arith.constant 1 : index
    %c3_55 = arith.constant 3 : index
    %c0_56 = arith.constant 0 : index
    %43 = vector.load %arg17[%c0_53, %c1_54, %c3_55, %c0_56] : memref<1x4x9x128xbf16, #tpu.memory_space<vmem>>, vector<1x1x1x128xbf16>
    %44 = vector.shape_cast %43 : vector<1x1x1x128xbf16> to vector<1x128xbf16>
    %45 = vector.shape_cast %42 : vector<1x128xbf16> to vector<1x1x1x128xbf16>
    tpu.vector_store %arg17[%c0_53, %c1_54, %c3_55, %c0_56], %45 {strides = array<i32>} : memref<1x4x9x128xbf16, #tpu.memory_space<vmem>>, vector<1x1x1x128xbf16>,
    %c5 = arith.constant 5 : index
    %c0_57 = arith.constant 0 : index
    %46 = vector.load %arg16[%c5, %c0_57] : memref<16x128xbf16, #tpu.memory_space<vmem>>, vector<1x128xbf16>
    %c0_58 = arith.constant 0 : index
    %c0_59 = arith.constant 0 : index
    %c4_60 = arith.constant 4 : index
    %c0_61 = arith.constant 0 : index
    %47 = vector.load %arg17[%c0_58, %c0_59, %c4_60, %c0_61] : memref<1x4x9x128xbf16, #tpu.memory_space<vmem>>, vector<1x1x1x128xbf16>
    %48 = vector.shape_cast %47 : vector<1x1x1x128xbf16> to vector<1x128xbf16>
    %49 = vector.shape_cast %46 : vector<1x128xbf16> to vector<1x1x1x128xbf16>
    tpu.vector_store %arg17[%c0_58, %c0_59, %c4_60, %c0_61], %49 {strides = array<i32>} : memref<1x4x9x128xbf16, #tpu.memory_space<vmem>>, vector<1x1x1x128xbf16>,
    %c6 = arith.constant 6 : index
    %c0_62 = arith.constant 0 : index
    %50 = vector.load %arg16[%c6, %c0_62] : memref<16x128xbf16, #tpu.memory_space<vmem>>, vector<1x128xbf16>
    %c0_63 = arith.constant 0 : index
    %c1_64 = arith.constant 1 : index
    %c4_65 = arith.constant 4 : index
    %c0_66 = arith.constant 0 : index
    %51 = vector.load %arg17[%c0_63, %c1_64, %c4_65, %c0_66] : memref<1x4x9x128xbf16, #tpu.memory_space<vmem>>, vector<1x1x1x128xbf16>
    %52 = vector.shape_cast %51 : vector<1x1x1x128xbf16> to vector<1x128xbf16>
    %53 = vector.shape_cast %50 : vector<1x128xbf16> to vector<1x1x1x128xbf16>
    tpu.vector_store %arg17[%c0_63, %c1_64, %c4_65, %c0_66], %53 {strides = array<i32>} : memref<1x4x9x128xbf16, #tpu.memory_space<vmem>>, vector<1x1x1x128xbf16>,
    %c7 = arith.constant 7 : index
    %c0_67 = arith.constant 0 : index
    %54 = vector.load %arg16[%c7, %c0_67] : memref<16x128xbf16, #tpu.memory_space<vmem>>, vector<1x128xbf16>
    %c0_68 = arith.constant 0 : index
    %c0_69 = arith.constant 0 : index
    %c5_70 = arith.constant 5 : index
    %c0_71 = arith.constant 0 : index
    %55 = vector.load %arg17[%c0_68, %c0_69, %c5_70, %c0_71] : memref<1x4x9x128xbf16, #tpu.memory_space<vmem>>, vector<1x1x1x128xbf16>
    %56 = vector.shape_cast %55 : vector<1x1x1x128xbf16> to vector<1x128xbf16>
    %57 = vector.shape_cast %54 : vector<1x128xbf16> to vector<1x1x1x128xbf16>
    tpu.vector_store %arg17[%c0_68, %c0_69, %c5_70, %c0_71], %57 {strides = array<i32>} : memref<1x4x9x128xbf16, #tpu.memory_space<vmem>>, vector<1x1x1x128xbf16>,
    %c8 = arith.constant 8 : index
    %c0_72 = arith.constant 0 : index
    %58 = vector.load %arg16[%c8, %c0_72] : memref<16x128xbf16, #tpu.memory_space<vmem>>, vector<1x128xbf16>
    %c0_73 = arith.constant 0 : index
    %c3_74 = arith.constant 3 : index
    %c3_75 = arith.constant 3 : index
    %c0_76 = arith.constant 0 : index
    %59 = vector.load %arg17[%c0_73, %c3_74, %c3_75, %c0_76] : memref<1x4x9x128xbf16, #tpu.memory_space<vmem>>, vector<1x1x1x128xbf16>
    %60 = vector.shape_cast %59 : vector<1x1x1x128xbf16> to vector<1x128xbf16>
    %61 = vector.shape_cast %58 : vector<1x128xbf16> to vector<1x1x1x128xbf16>
    tpu.vector_store %arg17[%c0_73, %c3_74, %c3_75, %c0_76], %61 {strides = array<i32>} : memref<1x4x9x128xbf16, #tpu.memory_space<vmem>>, vector<1x1x1x128xbf16>,
    %c9 = arith.constant 9 : index
    %c0_77 = arith.constant 0 : index
    %62 = vector.load %arg16[%c9, %c0_77] : memref<16x128xbf16, #tpu.memory_space<vmem>>, vector<1x128xbf16>
    %c0_78 = arith.constant 0 : index
    %c2_79 = arith.constant 2 : index
    %c4_80 = arith.constant 4 : index
    %c0_81 = arith.constant 0 : index
    %63 = vector.load %arg17[%c0_78, %c2_79, %c4_80, %c0_81] : memref<1x4x9x128xbf16, #tpu.memory_space<vmem>>, vector<1x1x1x128xbf16>
    %64 = vector.shape_cast %63 : vector<1x1x1x128xbf16> to vector<1x128xbf16>
    %65 = vector.shape_cast %62 : vector<1x128xbf16> to vector<1x1x1x128xbf16>
    tpu.vector_store %arg17[%c0_78, %c2_79, %c4_80, %c0_81], %65 {strides = array<i32>} : memref<1x4x9x128xbf16, #tpu.memory_space<vmem>>, vector<1x1x1x128xbf16>,
    %c10 = arith.constant 10 : index
    %c0_82 = arith.constant 0 : index
    %66 = vector.load %arg16[%c10, %c0_82] : memref<16x128xbf16, #tpu.memory_space<vmem>>, vector<1x128xbf16>
    %c0_83 = arith.constant 0 : index
    %c3_84 = arith.constant 3 : index
    %c4_85 = arith.constant 4 : index
    %c0_86 = arith.constant 0 : index
    %67 = vector.load %arg17[%c0_83, %c3_84, %c4_85, %c0_86] : memref<1x4x9x128xbf16, #tpu.memory_space<vmem>>, vector<1x1x1x128xbf16>
    %68 = vector.shape_cast %67 : vector<1x1x1x128xbf16> to vector<1x128xbf16>
    %69 = vector.shape_cast %66 : vector<1x128xbf16> to vector<1x1x1x128xbf16>
    tpu.vector_store %arg17[%c0_83, %c3_84, %c4_85, %c0_86], %69 {strides = array<i32>} : memref<1x4x9x128xbf16, #tpu.memory_space<vmem>>, vector<1x1x1x128xbf16>,
    %c11 = arith.constant 11 : index
    %c0_87 = arith.constant 0 : index
    %70 = vector.load %arg16[%c11, %c0_87] : memref<16x128xbf16, #tpu.memory_space<vmem>>, vector<1x128xbf16>
    %c0_88 = arith.constant 0 : index
    %c2_89 = arith.constant 2 : index
    %c5_90 = arith.constant 5 : index
    %c0_91 = arith.constant 0 : index
    %71 = vector.load %arg17[%c0_88, %c2_89, %c5_90, %c0_91] : memref<1x4x9x128xbf16, #tpu.memory_space<vmem>>, vector<1x1x1x128xbf16>
    %72 = vector.shape_cast %71 : vector<1x1x1x128xbf16> to vector<1x128xbf16>
    %73 = vector.shape_cast %70 : vector<1x128xbf16> to vector<1x1x1x128xbf16>
    tpu.vector_store %arg17[%c0_88, %c2_89, %c5_90, %c0_91], %73 {strides = array<i32>} : memref<1x4x9x128xbf16, #tpu.memory_space<vmem>>, vector<1x1x1x128xbf16>,
    %c12 = arith.constant 12 : index
    %c0_92 = arith.constant 0 : index
    %74 = vector.load %arg16[%c12, %c0_92] : memref<16x128xbf16, #tpu.memory_space<vmem>>, vector<1x128xbf16>
    %c0_93 = arith.constant 0 : index
    %c1_94 = arith.constant 1 : index
    %c6_95 = arith.constant 6 : index
    %c0_96 = arith.constant 0 : index
    %75 = vector.load %arg17[%c0_93, %c1_94, %c6_95, %c0_96] : memref<1x4x9x128xbf16, #tpu.memory_space<vmem>>, vector<1x1x1x128xbf16>
    %76 = vector.shape_cast %75 : vector<1x1x1x128xbf16> to vector<1x128xbf16>
    %77 = vector.shape_cast %74 : vector<1x128xbf16> to vector<1x1x1x128xbf16>
    tpu.vector_store %arg17[%c0_93, %c1_94, %c6_95, %c0_96], %77 {strides = array<i32>} : memref<1x4x9x128xbf16, #tpu.memory_space<vmem>>, vector<1x1x1x128xbf16>,
    %c13 = arith.constant 13 : index
    %c0_97 = arith.constant 0 : index
    %78 = vector.load %arg16[%c13, %c0_97] : memref<16x128xbf16, #tpu.memory_space<vmem>>, vector<1x128xbf16>
    %c0_98 = arith.constant 0 : index
    %c0_99 = arith.constant 0 : index
    %c7_100 = arith.constant 7 : index
    %c0_101 = arith.constant 0 : index
    %79 = vector.load %arg17[%c0_98, %c0_99, %c7_100, %c0_101] : memref<1x4x9x128xbf16, #tpu.memory_space<vmem>>, vector<1x1x1x128xbf16>
    %80 = vector.shape_cast %79 : vector<1x1x1x128xbf16> to vector<1x128xbf16>
    %81 = vector.shape_cast %78 : vector<1x128xbf16> to vector<1x1x1x128xbf16>
    tpu.vector_store %arg17[%c0_98, %c0_99, %c7_100, %c0_101], %81 {strides = array<i32>} : memref<1x4x9x128xbf16, #tpu.memory_space<vmem>>, vector<1x1x1x128xbf16>,
    %c14 = arith.constant 14 : index
    %c0_102 = arith.constant 0 : index
    %82 = vector.load %arg16[%c14, %c0_102] : memref<16x128xbf16, #tpu.memory_space<vmem>>, vector<1x128xbf16>
    %c0_103 = arith.constant 0 : index
    %c1_104 = arith.constant 1 : index
    %c7_105 = arith.constant 7 : index
    %c0_106 = arith.constant 0 : index
    %83 = vector.load %arg17[%c0_103, %c1_104, %c7_105, %c0_106] : memref<1x4x9x128xbf16, #tpu.memory_space<vmem>>, vector<1x1x1x128xbf16>
    %84 = vector.shape_cast %83 : vector<1x1x1x128xbf16> to vector<1x128xbf16>
    %85 = vector.shape_cast %82 : vector<1x128xbf16> to vector<1x1x1x128xbf16>
    tpu.vector_store %arg17[%c0_103, %c1_104, %c7_105, %c0_106], %85 {strides = array<i32>} : memref<1x4x9x128xbf16, #tpu.memory_space<vmem>>, vector<1x1x1x128xbf16>,
    %c15 = arith.constant 15 : index
    %c0_107 = arith.constant 0 : index
    %86 = vector.load %arg16[%c15, %c0_107] : memref<16x128xbf16, #tpu.memory_space<vmem>>, vector<1x128xbf16>
    %c0_108 = arith.constant 0 : index
    %c0_109 = arith.constant 0 : index
    %c8_110 = arith.constant 8 : index
    %c0_111 = arith.constant 0 : index
    %87 = vector.load %arg17[%c0_108, %c0_109, %c8_110, %c0_111] : memref<1x4x9x128xbf16, #tpu.memory_space<vmem>>, vector<1x1x1x128xbf16>
    %88 = vector.shape_cast %87 : vector<1x1x1x128xbf16> to vector<1x128xbf16>
    %89 = vector.shape_cast %86 : vector<1x128xbf16> to vector<1x1x1x128xbf16>
    tpu.vector_store %arg17[%c0_108, %c0_109, %c8_110, %c0_111], %89 {strides = array<i32>} : memref<1x4x9x128xbf16, #tpu.memory_space<vmem>>, vector<1x1x1x128xbf16>,
    %c0_112 = arith.constant 0 : index
    %c0_113 = arith.constant 0 : index
    %c0_114 = arith.constant 0 : index
    %c0_115 = arith.constant 0 : index
    %90 = vector.load %arg17[%c0_112, %c0_113, %c0_114, %c0_115] : memref<1x4x9x128xbf16, #tpu.memory_space<vmem>>, vector<1x1x5x128xbf16>
    %91 = vector.shape_cast %90 : vector<1x1x5x128xbf16> to vector<5x128xbf16>
    %c0_116 = arith.constant 0 : index
    %c0_117 = arith.constant 0 : index
    %92 = vector.load %arg18[%c0_116, %c0_117] : memref<32x1152xbf16, #tpu.memory_space<vmem>>, vector<5x128xbf16>
    tpu.vector_store %arg18[%c0_116, %c0_117], %91 {strides = array<i32>} : memref<32x1152xbf16, #tpu.memory_space<vmem>>, vector<5x128xbf16>,
    %c0_118 = arith.constant 0 : index
    %c1_119 = arith.constant 1 : index
    %c0_120 = arith.constant 0 : index
    %c0_121 = arith.constant 0 : index
    %93 = vector.load %arg17[%c0_118, %c1_119, %c0_120, %c0_121] : memref<1x4x9x128xbf16, #tpu.memory_space<vmem>>, vector<1x1x5x128xbf16>
    %94 = vector.shape_cast %93 : vector<1x1x5x128xbf16> to vector<5x128xbf16>
    %c0_122 = arith.constant 0 : index
    %c128 = arith.constant 128 : index
    %95 = vector.load %arg18[%c0_122, %c128] : memref<32x1152xbf16, #tpu.memory_space<vmem>>, vector<5x128xbf16>
    tpu.vector_store %arg18[%c0_122, %c128], %94 {strides = array<i32>} : memref<32x1152xbf16, #tpu.memory_space<vmem>>, vector<5x128xbf16>,
    %c0_123 = arith.constant 0 : index
    %c0_124 = arith.constant 0 : index
    %c1_125 = arith.constant 1 : index
    %c0_126 = arith.constant 0 : index
    %96 = vector.load %arg17[%c0_123, %c0_124, %c1_125, %c0_126] : memref<1x4x9x128xbf16, #tpu.memory_space<vmem>>, vector<1x1x5x128xbf16>
    %97 = vector.shape_cast %96 : vector<1x1x5x128xbf16> to vector<5x128xbf16>
    %c0_127 = arith.constant 0 : index
    %c256 = arith.constant 256 : index
    %98 = vector.load %arg18[%c0_127, %c256] : memref<32x1152xbf16, #tpu.memory_space<vmem>>, vector<5x128xbf16>
    tpu.vector_store %arg18[%c0_127, %c256], %97 {strides = array<i32>} : memref<32x1152xbf16, #tpu.memory_space<vmem>>, vector<5x128xbf16>,
    %c0_128 = arith.constant 0 : index
    %c2_129 = arith.constant 2 : index
    %c0_130 = arith.constant 0 : index
    %c0_131 = arith.constant 0 : index
    %99 = vector.load %arg17[%c0_128, %c2_129, %c0_130, %c0_131] : memref<1x4x9x128xbf16, #tpu.memory_space<vmem>>, vector<1x1x5x128xbf16>
    %100 = vector.shape_cast %99 : vector<1x1x5x128xbf16> to vector<5x128xbf16>
    %c0_132 = arith.constant 0 : index
    %c384 = arith.constant 384 : index
    %101 = vector.load %arg18[%c0_132, %c384] : memref<32x1152xbf16, #tpu.memory_space<vmem>>, vector<5x128xbf16>
    tpu.vector_store %arg18[%c0_132, %c384], %100 {strides = array<i32>} : memref<32x1152xbf16, #tpu.memory_space<vmem>>, vector<5x128xbf16>,
    %c0_133 = arith.constant 0 : index
    %c3_134 = arith.constant 3 : index
    %c0_135 = arith.constant 0 : index
    %c0_136 = arith.constant 0 : index
    %102 = vector.load %arg17[%c0_133, %c3_134, %c0_135, %c0_136] : memref<1x4x9x128xbf16, #tpu.memory_space<vmem>>, vector<1x1x5x128xbf16>
    %103 = vector.shape_cast %102 : vector<1x1x5x128xbf16> to vector<5x128xbf16>
    %c0_137 = arith.constant 0 : index
    %c512 = arith.constant 512 : index
    %104 = vector.load %arg18[%c0_137, %c512] : memref<32x1152xbf16, #tpu.memory_space<vmem>>, vector<5x128xbf16>
    tpu.vector_store %arg18[%c0_137, %c512], %103 {strides = array<i32>} : memref<32x1152xbf16, #tpu.memory_space<vmem>>, vector<5x128xbf16>,
    %c0_138 = arith.constant 0 : index
    %c2_139 = arith.constant 2 : index
    %c1_140 = arith.constant 1 : index
    %c0_141 = arith.constant 0 : index
    %105 = vector.load %arg17[%c0_138, %c2_139, %c1_140, %c0_141] : memref<1x4x9x128xbf16, #tpu.memory_space<vmem>>, vector<1x1x5x128xbf16>
    %106 = vector.shape_cast %105 : vector<1x1x5x128xbf16> to vector<5x128xbf16>
    %c0_142 = arith.constant 0 : index
    %c640 = arith.constant 640 : index
    %107 = vector.load %arg18[%c0_142, %c640] : memref<32x1152xbf16, #tpu.memory_space<vmem>>, vector<5x128xbf16>
    tpu.vector_store %arg18[%c0_142, %c640], %106 {strides = array<i32>} : memref<32x1152xbf16, #tpu.memory_space<vmem>>, vector<5x128xbf16>,
    %c0_143 = arith.constant 0 : index
    %c0_144 = arith.constant 0 : index
    %c3_145 = arith.constant 3 : index
    %c0_146 = arith.constant 0 : index
    %108 = vector.load %arg17[%c0_143, %c0_144, %c3_145, %c0_146] : memref<1x4x9x128xbf16, #tpu.memory_space<vmem>>, vector<1x1x5x128xbf16>
    %109 = vector.shape_cast %108 : vector<1x1x5x128xbf16> to vector<5x128xbf16>
    %c0_147 = arith.constant 0 : index
    %c768 = arith.constant 768 : index
    %110 = vector.load %arg18[%c0_147, %c768] : memref<32x1152xbf16, #tpu.memory_space<vmem>>, vector<5x128xbf16>
    tpu.vector_store %arg18[%c0_147, %c768], %109 {strides = array<i32>} : memref<32x1152xbf16, #tpu.memory_space<vmem>>, vector<5x128xbf16>,
    %c0_148 = arith.constant 0 : index
    %c1_149 = arith.constant 1 : index
    %c3_150 = arith.constant 3 : index
    %c0_151 = arith.constant 0 : index
    %111 = vector.load %arg17[%c0_148, %c1_149, %c3_150, %c0_151] : memref<1x4x9x128xbf16, #tpu.memory_space<vmem>>, vector<1x1x5x128xbf16>
    %112 = vector.shape_cast %111 : vector<1x1x5x128xbf16> to vector<5x128xbf16>
    %c0_152 = arith.constant 0 : index
    %c896 = arith.constant 896 : index
    %113 = vector.load %arg18[%c0_152, %c896] : memref<32x1152xbf16, #tpu.memory_space<vmem>>, vector<5x128xbf16>
    tpu.vector_store %arg18[%c0_152, %c896], %112 {strides = array<i32>} : memref<32x1152xbf16, #tpu.memory_space<vmem>>, vector<5x128xbf16>,
    %c0_153 = arith.constant 0 : index
    %c0_154 = arith.constant 0 : index
    %c4_155 = arith.constant 4 : index
    %c0_156 = arith.constant 0 : index
    %114 = vector.load %arg17[%c0_153, %c0_154, %c4_155, %c0_156] : memref<1x4x9x128xbf16, #tpu.memory_space<vmem>>, vector<1x1x5x128xbf16>
    %115 = vector.shape_cast %114 : vector<1x1x5x128xbf16> to vector<5x128xbf16>
    %c0_157 = arith.constant 0 : index
    %c1024 = arith.constant 1024 : index
    %116 = vector.load %arg18[%c0_157, %c1024] : memref<32x1152xbf16, #tpu.memory_space<vmem>>, vector<5x128xbf16>
    tpu.vector_store %arg18[%c0_157, %c1024], %115 {strides = array<i32>} : memref<32x1152xbf16, #tpu.memory_space<vmem>>, vector<5x128xbf16>,
    %c0_158 = arith.constant 0 : index
    %c1_159 = arith.constant 1 : index
    %c0_160 = arith.constant 0 : index
    %c0_161 = arith.constant 0 : index
    %117 = vector.load %arg17[%c0_158, %c1_159, %c0_160, %c0_161] : memref<1x4x9x128xbf16, #tpu.memory_space<vmem>>, vector<1x1x5x128xbf16>
    %118 = vector.shape_cast %117 : vector<1x1x5x128xbf16> to vector<5x128xbf16>
    %c8_162 = arith.constant 8 : index
    %c0_163 = arith.constant 0 : index
    %119 = vector.load %arg18[%c8_162, %c0_163] : memref<32x1152xbf16, #tpu.memory_space<vmem>>, vector<5x128xbf16>
    tpu.vector_store %arg18[%c8_162, %c0_163], %118 {strides = array<i32>} : memref<32x1152xbf16, #tpu.memory_space<vmem>>, vector<5x128xbf16>,
    %c0_164 = arith.constant 0 : index
    %c0_165 = arith.constant 0 : index
    %c1_166 = arith.constant 1 : index
    %c0_167 = arith.constant 0 : index
    %120 = vector.load %arg17[%c0_164, %c0_165, %c1_166, %c0_167] : memref<1x4x9x128xbf16, #tpu.memory_space<vmem>>, vector<1x1x5x128xbf16>
    %121 = vector.shape_cast %120 : vector<1x1x5x128xbf16> to vector<5x128xbf16>
    %c8_168 = arith.constant 8 : index
    %c128_169 = arith.constant 128 : index
    %122 = vector.load %arg18[%c8_168, %c128_169] : memref<32x1152xbf16, #tpu.memory_space<vmem>>, vector<5x128xbf16>
    tpu.vector_store %arg18[%c8_168, %c128_169], %121 {strides = array<i32>} : memref<32x1152xbf16, #tpu.memory_space<vmem>>, vector<5x128xbf16>,
    %c0_170 = arith.constant 0 : index
    %c1_171 = arith.constant 1 : index
    %c1_172 = arith.constant 1 : index
    %c0_173 = arith.constant 0 : index
    %123 = vector.load %arg17[%c0_170, %c1_171, %c1_172, %c0_173] : memref<1x4x9x128xbf16, #tpu.memory_space<vmem>>, vector<1x1x5x128xbf16>
    %124 = vector.shape_cast %123 : vector<1x1x5x128xbf16> to vector<5x128xbf16>
    %c8_174 = arith.constant 8 : index
    %c256_175 = arith.constant 256 : index
    %125 = vector.load %arg18[%c8_174, %c256_175] : memref<32x1152xbf16, #tpu.memory_space<vmem>>, vector<5x128xbf16>
    tpu.vector_store %arg18[%c8_174, %c256_175], %124 {strides = array<i32>} : memref<32x1152xbf16, #tpu.memory_space<vmem>>, vector<5x128xbf16>,
    %c0_176 = arith.constant 0 : index
    %c3_177 = arith.constant 3 : index
    %c0_178 = arith.constant 0 : index
    %c0_179 = arith.constant 0 : index
    %126 = vector.load %arg17[%c0_176, %c3_177, %c0_178, %c0_179] : memref<1x4x9x128xbf16, #tpu.memory_space<vmem>>, vector<1x1x5x128xbf16>
    %127 = vector.shape_cast %126 : vector<1x1x5x128xbf16> to vector<5x128xbf16>
    %c8_180 = arith.constant 8 : index
    %c384_181 = arith.constant 384 : index
    %128 = vector.load %arg18[%c8_180, %c384_181] : memref<32x1152xbf16, #tpu.memory_space<vmem>>, vector<5x128xbf16>
    tpu.vector_store %arg18[%c8_180, %c384_181], %127 {strides = array<i32>} : memref<32x1152xbf16, #tpu.memory_space<vmem>>, vector<5x128xbf16>,
    %c0_182 = arith.constant 0 : index
    %c2_183 = arith.constant 2 : index
    %c1_184 = arith.constant 1 : index
    %c0_185 = arith.constant 0 : index
    %129 = vector.load %arg17[%c0_182, %c2_183, %c1_184, %c0_185] : memref<1x4x9x128xbf16, #tpu.memory_space<vmem>>, vector<1x1x5x128xbf16>
    %130 = vector.shape_cast %129 : vector<1x1x5x128xbf16> to vector<5x128xbf16>
    %c8_186 = arith.constant 8 : index
    %c512_187 = arith.constant 512 : index
    %131 = vector.load %arg18[%c8_186, %c512_187] : memref<32x1152xbf16, #tpu.memory_space<vmem>>, vector<5x128xbf16>
    tpu.vector_store %arg18[%c8_186, %c512_187], %130 {strides = array<i32>} : memref<32x1152xbf16, #tpu.memory_space<vmem>>, vector<5x128xbf16>,
    %c0_188 = arith.constant 0 : index
    %c3_189 = arith.constant 3 : index
    %c1_190 = arith.constant 1 : index
    %c0_191 = arith.constant 0 : index
    %132 = vector.load %arg17[%c0_188, %c3_189, %c1_190, %c0_191] : memref<1x4x9x128xbf16, #tpu.memory_space<vmem>>, vector<1x1x5x128xbf16>
    %133 = vector.shape_cast %132 : vector<1x1x5x128xbf16> to vector<5x128xbf16>
    %c8_192 = arith.constant 8 : index
    %c640_193 = arith.constant 640 : index
    %134 = vector.load %arg18[%c8_192, %c640_193] : memref<32x1152xbf16, #tpu.memory_space<vmem>>, vector<5x128xbf16>
    tpu.vector_store %arg18[%c8_192, %c640_193], %133 {strides = array<i32>} : memref<32x1152xbf16, #tpu.memory_space<vmem>>, vector<5x128xbf16>,
    %c0_194 = arith.constant 0 : index
    %c1_195 = arith.constant 1 : index
    %c3_196 = arith.constant 3 : index
    %c0_197 = arith.constant 0 : index
    %135 = vector.load %arg17[%c0_194, %c1_195, %c3_196, %c0_197] : memref<1x4x9x128xbf16, #tpu.memory_space<vmem>>, vector<1x1x5x128xbf16>
    %136 = vector.shape_cast %135 : vector<1x1x5x128xbf16> to vector<5x128xbf16>
    %c8_198 = arith.constant 8 : index
    %c768_199 = arith.constant 768 : index
    %137 = vector.load %arg18[%c8_198, %c768_199] : memref<32x1152xbf16, #tpu.memory_space<vmem>>, vector<5x128xbf16>
    tpu.vector_store %arg18[%c8_198, %c768_199], %136 {strides = array<i32>} : memref<32x1152xbf16, #tpu.memory_space<vmem>>, vector<5x128xbf16>,
    %c0_200 = arith.constant 0 : index
    %c0_201 = arith.constant 0 : index
    %c4_202 = arith.constant 4 : index
    %c0_203 = arith.constant 0 : index
    %138 = vector.load %arg17[%c0_200, %c0_201, %c4_202, %c0_203] : memref<1x4x9x128xbf16, #tpu.memory_space<vmem>>, vector<1x1x5x128xbf16>
    %139 = vector.shape_cast %138 : vector<1x1x5x128xbf16> to vector<5x128xbf16>
    %c8_204 = arith.constant 8 : index
    %c896_205 = arith.constant 896 : index
    %140 = vector.load %arg18[%c8_204, %c896_205] : memref<32x1152xbf16, #tpu.memory_space<vmem>>, vector<5x128xbf16>
    tpu.vector_store %arg18[%c8_204, %c896_205], %139 {strides = array<i32>} : memref<32x1152xbf16, #tpu.memory_space<vmem>>, vector<5x128xbf16>,
    %c0_206 = arith.constant 0 : index
    %c1_207 = arith.constant 1 : index
    %c4_208 = arith.constant 4 : index
    %c0_209 = arith.constant 0 : index
    %141 = vector.load %arg17[%c0_206, %c1_207, %c4_208, %c0_209] : memref<1x4x9x128xbf16, #tpu.memory_space<vmem>>, vector<1x1x5x128xbf16>
    %142 = vector.shape_cast %141 : vector<1x1x5x128xbf16> to vector<5x128xbf16>
    %c8_210 = arith.constant 8 : index
    %c1024_211 = arith.constant 1024 : index
    %143 = vector.load %arg18[%c8_210, %c1024_211] : memref<32x1152xbf16, #tpu.memory_space<vmem>>, vector<5x128xbf16>
    tpu.vector_store %arg18[%c8_210, %c1024_211], %142 {strides = array<i32>} : memref<32x1152xbf16, #tpu.memory_space<vmem>>, vector<5x128xbf16>,
    %c0_212 = arith.constant 0 : index
    %c2_213 = arith.constant 2 : index
    %c0_214 = arith.constant 0 : index
    %c0_215 = arith.constant 0 : index
    %144 = vector.load %arg17[%c0_212, %c2_213, %c0_214, %c0_215] : memref<1x4x9x128xbf16, #tpu.memory_space<vmem>>, vector<1x1x5x128xbf16>
    %145 = vector.shape_cast %144 : vector<1x1x5x128xbf16> to vector<5x128xbf16>
    %c16_216 = arith.constant 16 : index
    %c0_217 = arith.constant 0 : index
    %146 = vector.load %arg18[%c16_216, %c0_217] : memref<32x1152xbf16, #tpu.memory_space<vmem>>, vector<5x128xbf16>
    tpu.vector_store %arg18[%c16_216, %c0_217], %145 {strides = array<i32>} : memref<32x1152xbf16, #tpu.memory_space<vmem>>, vector<5x128xbf16>,
    %c0_218 = arith.constant 0 : index
    %c3_219 = arith.constant 3 : index
    %c0_220 = arith.constant 0 : index
    %c0_221 = arith.constant 0 : index
    %147 = vector.load %arg17[%c0_218, %c3_219, %c0_220, %c0_221] : memref<1x4x9x128xbf16, #tpu.memory_space<vmem>>, vector<1x1x5x128xbf16>
    %148 = vector.shape_cast %147 : vector<1x1x5x128xbf16> to vector<5x128xbf16>
    %c16_222 = arith.constant 16 : index
    %c128_223 = arith.constant 128 : index
    %149 = vector.load %arg18[%c16_222, %c128_223] : memref<32x1152xbf16, #tpu.memory_space<vmem>>, vector<5x128xbf16>
    tpu.vector_store %arg18[%c16_222, %c128_223], %148 {strides = array<i32>} : memref<32x1152xbf16, #tpu.memory_space<vmem>>, vector<5x128xbf16>,
    %c0_224 = arith.constant 0 : index
    %c2_225 = arith.constant 2 : index
    %c1_226 = arith.constant 1 : index
    %c0_227 = arith.constant 0 : index
    %150 = vector.load %arg17[%c0_224, %c2_225, %c1_226, %c0_227] : memref<1x4x9x128xbf16, #tpu.memory_space<vmem>>, vector<1x1x5x128xbf16>
    %151 = vector.shape_cast %150 : vector<1x1x5x128xbf16> to vector<5x128xbf16>
    %c16_228 = arith.constant 16 : index
    %c256_229 = arith.constant 256 : index
    %152 = vector.load %arg18[%c16_228, %c256_229] : memref<32x1152xbf16, #tpu.memory_space<vmem>>, vector<5x128xbf16>
    tpu.vector_store %arg18[%c16_228, %c256_229], %151 {strides = array<i32>} : memref<32x1152xbf16, #tpu.memory_space<vmem>>, vector<5x128xbf16>,
    %c0_230 = arith.constant 0 : index
    %c0_231 = arith.constant 0 : index
    %c3_232 = arith.constant 3 : index
    %c0_233 = arith.constant 0 : index
    %153 = vector.load %arg17[%c0_230, %c0_231, %c3_232, %c0_233] : memref<1x4x9x128xbf16, #tpu.memory_space<vmem>>, vector<1x1x5x128xbf16>
    %154 = vector.shape_cast %153 : vector<1x1x5x128xbf16> to vector<5x128xbf16>
    %c16_234 = arith.constant 16 : index
    %c384_235 = arith.constant 384 : index
    %155 = vector.load %arg18[%c16_234, %c384_235] : memref<32x1152xbf16, #tpu.memory_space<vmem>>, vector<5x128xbf16>
    tpu.vector_store %arg18[%c16_234, %c384_235], %154 {strides = array<i32>} : memref<32x1152xbf16, #tpu.memory_space<vmem>>, vector<5x128xbf16>,
    %c0_236 = arith.constant 0 : index
    %c1_237 = arith.constant 1 : index
    %c3_238 = arith.constant 3 : index
    %c0_239 = arith.constant 0 : index
    %156 = vector.load %arg17[%c0_236, %c1_237, %c3_238, %c0_239] : memref<1x4x9x128xbf16, #tpu.memory_space<vmem>>, vector<1x1x5x128xbf16>
    %157 = vector.shape_cast %156 : vector<1x1x5x128xbf16> to vector<5x128xbf16>
    %c16_240 = arith.constant 16 : index
    %c512_241 = arith.constant 512 : index
    %158 = vector.load %arg18[%c16_240, %c512_241] : memref<32x1152xbf16, #tpu.memory_space<vmem>>, vector<5x128xbf16>
    tpu.vector_store %arg18[%c16_240, %c512_241], %157 {strides = array<i32>} : memref<32x1152xbf16, #tpu.memory_space<vmem>>, vector<5x128xbf16>,
    %c0_242 = arith.constant 0 : index
    %c0_243 = arith.constant 0 : index
    %c4_244 = arith.constant 4 : index
    %c0_245 = arith.constant 0 : index
    %159 = vector.load %arg17[%c0_242, %c0_243, %c4_244, %c0_245] : memref<1x4x9x128xbf16, #tpu.memory_space<vmem>>, vector<1x1x5x128xbf16>
    %160 = vector.shape_cast %159 : vector<1x1x5x128xbf16> to vector<5x128xbf16>
    %c16_246 = arith.constant 16 : index
    %c640_247 = arith.constant 640 : index
    %161 = vector.load %arg18[%c16_246, %c640_247] : memref<32x1152xbf16, #tpu.memory_space<vmem>>, vector<5x128xbf16>
    tpu.vector_store %arg18[%c16_246, %c640_247], %160 {strides = array<i32>} : memref<32x1152xbf16, #tpu.memory_space<vmem>>, vector<5x128xbf16>,
    %c0_248 = arith.constant 0 : index
    %c2_249 = arith.constant 2 : index
    %c3_250 = arith.constant 3 : index
    %c0_251 = arith.constant 0 : index
    %162 = vector.load %arg17[%c0_248, %c2_249, %c3_250, %c0_251] : memref<1x4x9x128xbf16, #tpu.memory_space<vmem>>, vector<1x1x5x128xbf16>
    %163 = vector.shape_cast %162 : vector<1x1x5x128xbf16> to vector<5x128xbf16>
    %c16_252 = arith.constant 16 : index
    %c768_253 = arith.constant 768 : index
    %164 = vector.load %arg18[%c16_252, %c768_253] : memref<32x1152xbf16, #tpu.memory_space<vmem>>, vector<5x128xbf16>
    tpu.vector_store %arg18[%c16_252, %c768_253], %163 {strides = array<i32>} : memref<32x1152xbf16, #tpu.memory_space<vmem>>, vector<5x128xbf16>,
    %c0_254 = arith.constant 0 : index
    %c3_255 = arith.constant 3 : index
    %c3_256 = arith.constant 3 : index
    %c0_257 = arith.constant 0 : index
    %165 = vector.load %arg17[%c0_254, %c3_255, %c3_256, %c0_257] : memref<1x4x9x128xbf16, #tpu.memory_space<vmem>>, vector<1x1x5x128xbf16>
    %166 = vector.shape_cast %165 : vector<1x1x5x128xbf16> to vector<5x128xbf16>
    %c16_258 = arith.constant 16 : index
    %c896_259 = arith.constant 896 : index
    %167 = vector.load %arg18[%c16_258, %c896_259] : memref<32x1152xbf16, #tpu.memory_space<vmem>>, vector<5x128xbf16>
    tpu.vector_store %arg18[%c16_258, %c896_259], %166 {strides = array<i32>} : memref<32x1152xbf16, #tpu.memory_space<vmem>>, vector<5x128xbf16>,
    %c0_260 = arith.constant 0 : index
    %c2_261 = arith.constant 2 : index
    %c4_262 = arith.constant 4 : index
    %c0_263 = arith.constant 0 : index
    %168 = vector.load %arg17[%c0_260, %c2_261, %c4_262, %c0_263] : memref<1x4x9x128xbf16, #tpu.memory_space<vmem>>, vector<1x1x5x128xbf16>
    %169 = vector.shape_cast %168 : vector<1x1x5x128xbf16> to vector<5x128xbf16>
    %c16_264 = arith.constant 16 : index
    %c1024_265 = arith.constant 1024 : index
    %170 = vector.load %arg18[%c16_264, %c1024_265] : memref<32x1152xbf16, #tpu.memory_space<vmem>>, vector<5x128xbf16>
    tpu.vector_store %arg18[%c16_264, %c1024_265], %169 {strides = array<i32>} : memref<32x1152xbf16, #tpu.memory_space<vmem>>, vector<5x128xbf16>,
    %c0_266 = arith.constant 0 : index
    %c3_267 = arith.constant 3 : index
    %c0_268 = arith.constant 0 : index
    %c0_269 = arith.constant 0 : index
    %171 = vector.load %arg17[%c0_266, %c3_267, %c0_268, %c0_269] : memref<1x4x9x128xbf16, #tpu.memory_space<vmem>>, vector<1x1x5x128xbf16>
    %172 = vector.shape_cast %171 : vector<1x1x5x128xbf16> to vector<5x128xbf16>
    %c24 = arith.constant 24 : index
    %c0_270 = arith.constant 0 : index
    %173 = vector.load %arg18[%c24, %c0_270] : memref<32x1152xbf16, #tpu.memory_space<vmem>>, vector<5x128xbf16>
    tpu.vector_store %arg18[%c24, %c0_270], %172 {strides = array<i32>} : memref<32x1152xbf16, #tpu.memory_space<vmem>>, vector<5x128xbf16>,
    %c0_271 = arith.constant 0 : index
    %c2_272 = arith.constant 2 : index
    %c1_273 = arith.constant 1 : index
    %c0_274 = arith.constant 0 : index
    %174 = vector.load %arg17[%c0_271, %c2_272, %c1_273, %c0_274] : memref<1x4x9x128xbf16, #tpu.memory_space<vmem>>, vector<1x1x5x128xbf16>
    %175 = vector.shape_cast %174 : vector<1x1x5x128xbf16> to vector<5x128xbf16>
    %c24_275 = arith.constant 24 : index
    %c128_276 = arith.constant 128 : index
    %176 = vector.load %arg18[%c24_275, %c128_276] : memref<32x1152xbf16, #tpu.memory_space<vmem>>, vector<5x128xbf16>
    tpu.vector_store %arg18[%c24_275, %c128_276], %175 {strides = array<i32>} : memref<32x1152xbf16, #tpu.memory_space<vmem>>, vector<5x128xbf16>,
    %c0_277 = arith.constant 0 : index
    %c3_278 = arith.constant 3 : index
    %c1_279 = arith.constant 1 : index
    %c0_280 = arith.constant 0 : index
    %177 = vector.load %arg17[%c0_277, %c3_278, %c1_279, %c0_280] : memref<1x4x9x128xbf16, #tpu.memory_space<vmem>>, vector<1x1x5x128xbf16>
    %178 = vector.shape_cast %177 : vector<1x1x5x128xbf16> to vector<5x128xbf16>
    %c24_281 = arith.constant 24 : index
    %c256_282 = arith.constant 256 : index
    %179 = vector.load %arg18[%c24_281, %c256_282] : memref<32x1152xbf16, #tpu.memory_space<vmem>>, vector<5x128xbf16>
    tpu.vector_store %arg18[%c24_281, %c256_282], %178 {strides = array<i32>} : memref<32x1152xbf16, #tpu.memory_space<vmem>>, vector<5x128xbf16>,
    %c0_283 = arith.constant 0 : index
    %c1_284 = arith.constant 1 : index
    %c3_285 = arith.constant 3 : index
    %c0_286 = arith.constant 0 : index
    %180 = vector.load %arg17[%c0_283, %c1_284, %c3_285, %c0_286] : memref<1x4x9x128xbf16, #tpu.memory_space<vmem>>, vector<1x1x5x128xbf16>
    %181 = vector.shape_cast %180 : vector<1x1x5x128xbf16> to vector<5x128xbf16>
    %c24_287 = arith.constant 24 : index
    %c384_288 = arith.constant 384 : index
    %182 = vector.load %arg18[%c24_287, %c384_288] : memref<32x1152xbf16, #tpu.memory_space<vmem>>, vector<5x128xbf16>
    tpu.vector_store %arg18[%c24_287, %c384_288], %181 {strides = array<i32>} : memref<32x1152xbf16, #tpu.memory_space<vmem>>, vector<5x128xbf16>,
    %c0_289 = arith.constant 0 : index
    %c0_290 = arith.constant 0 : index
    %c4_291 = arith.constant 4 : index
    %c0_292 = arith.constant 0 : index
    %183 = vector.load %arg17[%c0_289, %c0_290, %c4_291, %c0_292] : memref<1x4x9x128xbf16, #tpu.memory_space<vmem>>, vector<1x1x5x128xbf16>
    %184 = vector.shape_cast %183 : vector<1x1x5x128xbf16> to vector<5x128xbf16>
    %c24_293 = arith.constant 24 : index
    %c512_294 = arith.constant 512 : index
    %185 = vector.load %arg18[%c24_293, %c512_294] : memref<32x1152xbf16, #tpu.memory_space<vmem>>, vector<5x128xbf16>
    tpu.vector_store %arg18[%c24_293, %c512_294], %184 {strides = array<i32>} : memref<32x1152xbf16, #tpu.memory_space<vmem>>, vector<5x128xbf16>,
    %c0_295 = arith.constant 0 : index
    %c1_296 = arith.constant 1 : index
    %c4_297 = arith.constant 4 : index
    %c0_298 = arith.constant 0 : index
    %186 = vector.load %arg17[%c0_295, %c1_296, %c4_297, %c0_298] : memref<1x4x9x128xbf16, #tpu.memory_space<vmem>>, vector<1x1x5x128xbf16>
    %187 = vector.shape_cast %186 : vector<1x1x5x128xbf16> to vector<5x128xbf16>
    %c24_299 = arith.constant 24 : index
    %c640_300 = arith.constant 640 : index
    %188 = vector.load %arg18[%c24_299, %c640_300] : memref<32x1152xbf16, #tpu.memory_space<vmem>>, vector<5x128xbf16>
    tpu.vector_store %arg18[%c24_299, %c640_300], %187 {strides = array<i32>} : memref<32x1152xbf16, #tpu.memory_space<vmem>>, vector<5x128xbf16>,
    %c0_301 = arith.constant 0 : index
    %c3_302 = arith.constant 3 : index
    %c3_303 = arith.constant 3 : index
    %c0_304 = arith.constant 0 : index
    %189 = vector.load %arg17[%c0_301, %c3_302, %c3_303, %c0_304] : memref<1x4x9x128xbf16, #tpu.memory_space<vmem>>, vector<1x1x5x128xbf16>
    %190 = vector.shape_cast %189 : vector<1x1x5x128xbf16> to vector<5x128xbf16>
    %c24_305 = arith.constant 24 : index
    %c768_306 = arith.constant 768 : index
    %191 = vector.load %arg18[%c24_305, %c768_306] : memref<32x1152xbf16, #tpu.memory_space<vmem>>, vector<5x128xbf16>
    tpu.vector_store %arg18[%c24_305, %c768_306], %190 {strides = array<i32>} : memref<32x1152xbf16, #tpu.memory_space<vmem>>, vector<5x128xbf16>,
    %c0_307 = arith.constant 0 : index
    %c2_308 = arith.constant 2 : index
    %c4_309 = arith.constant 4 : index
    %c0_310 = arith.constant 0 : index
    %192 = vector.load %arg17[%c0_307, %c2_308, %c4_309, %c0_310] : memref<1x4x9x128xbf16, #tpu.memory_space<vmem>>, vector<1x1x5x128xbf16>
    %193 = vector.shape_cast %192 : vector<1x1x5x128xbf16> to vector<5x128xbf16>
    %c24_311 = arith.constant 24 : index
    %c896_312 = arith.constant 896 : index
    %194 = vector.load %arg18[%c24_311, %c896_312] : memref<32x1152xbf16, #tpu.memory_space<vmem>>, vector<5x128xbf16>
    tpu.vector_store %arg18[%c24_311, %c896_312], %193 {strides = array<i32>} : memref<32x1152xbf16, #tpu.memory_space<vmem>>, vector<5x128xbf16>,
    %c0_313 = arith.constant 0 : index
    %c3_314 = arith.constant 3 : index
    %c4_315 = arith.constant 4 : index
    %c0_316 = arith.constant 0 : index
    %195 = vector.load %arg17[%c0_313, %c3_314, %c4_315, %c0_316] : memref<1x4x9x128xbf16, #tpu.memory_space<vmem>>, vector<1x1x5x128xbf16>
    %196 = vector.shape_cast %195 : vector<1x1x5x128xbf16> to vector<5x128xbf16>
    %c24_317 = arith.constant 24 : index
    %c1024_318 = arith.constant 1024 : index
    %197 = vector.load %arg18[%c24_317, %c1024_318] : memref<32x1152xbf16, #tpu.memory_space<vmem>>, vector<5x128xbf16>
    tpu.vector_store %arg18[%c24_317, %c1024_318], %196 {strides = array<i32>} : memref<32x1152xbf16, #tpu.memory_space<vmem>>, vector<5x128xbf16>,
    %c0_319 = arith.constant 0 : index
    %c0_320 = arith.constant 0 : index
    %198 = vector.load %arg18[%c0_319, %c0_320] : memref<32x1152xbf16, #tpu.memory_space<vmem>>, vector<32x1152xbf16>
    %c0_321 = arith.constant 0 : index
    %c0_322 = arith.constant 0 : index
    %199 = vector.load %arg4[%c0_321, %c0_322] : memref<1152x256xbf16, #tpu.memory_space<vmem>>, vector<1152x256xbf16>
    %cst_323 = arith.constant dense<0.000000e+00> : vector<32x256xf32>
    %200 = tpu.matmul %198, %199, %cst_323 {dimension_numbers = #tpu.dot_dimension_numbers<[1], [0], [0], [1], [0, 0, 1, 1], [], []>} : vector<32x1152xbf16>, vector<1152x256xbf16>, vector<32x256xf32> -> vector<32x256xf32>
    %c0_324 = arith.constant 0 : index
    %c0_325 = arith.constant 0 : index
    %201 = vector.load %arg19[%c0_324, %c0_325] : memref<32x256xf32, #tpu.memory_space<vmem>>, vector<32x256xf32>
    tpu.vector_store %arg19[%c0_324, %c0_325], %200 {strides = array<i32>} : memref<32x256xf32, #tpu.memory_space<vmem>>, vector<32x256xf32>,
    %c0_326 = arith.constant 0 : index
    %c0_327 = arith.constant 0 : index
    %202 = vector.load %arg19[%c0_326, %c0_327] : memref<32x256xf32, #tpu.memory_space<vmem>>, vector<8x256xf32>
    %c8_328 = arith.constant 8 : index
    %c0_329 = arith.constant 0 : index
    %203 = vector.load %arg19[%c8_328, %c0_329] : memref<32x256xf32, #tpu.memory_space<vmem>>, vector<8x256xf32>
    %204 = arith.maximumf %202, %203 : vector<8x256xf32>
    %c16_330 = arith.constant 16 : index
    %c0_331 = arith.constant 0 : index
    %205 = vector.load %arg19[%c16_330, %c0_331] : memref<32x256xf32, #tpu.memory_space<vmem>>, vector<8x256xf32>
    %c24_332 = arith.constant 24 : index
    %c0_333 = arith.constant 0 : index
    %206 = vector.load %arg19[%c24_332, %c0_333] : memref<32x256xf32, #tpu.memory_space<vmem>>, vector<8x256xf32>
    %207 = arith.maximumf %205, %206 : vector<8x256xf32>
    %208 = arith.maximumf %204, %207 : vector<8x256xf32>
    %c0_334 = arith.constant 0 : index
    %c0_335 = arith.constant 0 : index
    %209 = vector.load %arg5[%c0_334, %c0_335] : memref<1x256xf32, #tpu.memory_space<vmem>>, vector<1x256xf32>
    %210 = vector.broadcast %209 : vector<1x256xf32> to vector<8x256xf32>
    %211 = arith.addf %208, %210 : vector<8x256xf32>
    %cst_336 = arith.constant 0.000000e+00 : f32
    %212 = vector.broadcast %cst_336 : f32 to vector<8x256xf32>
    %213 = arith.maximumf %211, %212 : vector<8x256xf32>
    %214 = arith.truncf %213 : vector<8x256xf32> to vector<8x256xbf16>
    %c0_337 = arith.constant 0 : index
    %c0_338 = arith.constant 0 : index
    %215 = vector.load %arg20[%c0_337, %c0_338] : memref<8x256xbf16, #tpu.memory_space<vmem>>, vector<8x256xbf16>
    tpu.vector_store %arg20[%c0_337, %c0_338], %214 {strides = array<i32>} : memref<8x256xbf16, #tpu.memory_space<vmem>>, vector<8x256xbf16>,
    %c0_339 = arith.constant 0 : index
    %c0_340 = arith.constant 0 : index
    %216 = vector.load %arg20[%c0_339, %c0_340] : memref<8x256xbf16, #tpu.memory_space<vmem>>, vector<1x256xbf16>
    %c0_341 = arith.constant 0 : index
    %c3_342 = arith.constant 3 : index
    %c0_343 = arith.constant 0 : index
    %c0_344 = arith.constant 0 : index
    %217 = vector.load %arg21[%c0_341, %c3_342, %c0_343, %c0_344] : memref<1x4x4x256xbf16, #tpu.memory_space<vmem>>, vector<1x1x1x256xbf16>
    %218 = vector.shape_cast %217 : vector<1x1x1x256xbf16> to vector<1x256xbf16>
    %219 = vector.shape_cast %216 : vector<1x256xbf16> to vector<1x1x1x256xbf16>
    tpu.vector_store %arg21[%c0_341, %c3_342, %c0_343, %c0_344], %219 {strides = array<i32>} : memref<1x4x4x256xbf16, #tpu.memory_space<vmem>>, vector<1x1x1x256xbf16>,
    %c1_345 = arith.constant 1 : index
    %c0_346 = arith.constant 0 : index
    %220 = vector.load %arg20[%c1_345, %c0_346] : memref<8x256xbf16, #tpu.memory_space<vmem>>, vector<1x256xbf16>
    %c0_347 = arith.constant 0 : index
    %c2_348 = arith.constant 2 : index
    %c1_349 = arith.constant 1 : index
    %c0_350 = arith.constant 0 : index
    %221 = vector.load %arg21[%c0_347, %c2_348, %c1_349, %c0_350] : memref<1x4x4x256xbf16, #tpu.memory_space<vmem>>, vector<1x1x1x256xbf16>
    %222 = vector.shape_cast %221 : vector<1x1x1x256xbf16> to vector<1x256xbf16>
    %223 = vector.shape_cast %220 : vector<1x256xbf16> to vector<1x1x1x256xbf16>
    tpu.vector_store %arg21[%c0_347, %c2_348, %c1_349, %c0_350], %223 {strides = array<i32>} : memref<1x4x4x256xbf16, #tpu.memory_space<vmem>>, vector<1x1x1x256xbf16>,
    %c3_351 = arith.constant 3 : index
    %c0_352 = arith.constant 0 : index
    %224 = vector.load %arg20[%c3_351, %c0_352] : memref<8x256xbf16, #tpu.memory_space<vmem>>, vector<1x256xbf16>
    %c0_353 = arith.constant 0 : index
    %c1_354 = arith.constant 1 : index
    %c2_355 = arith.constant 2 : index
    %c0_356 = arith.constant 0 : index
    %225 = vector.load %arg21[%c0_353, %c1_354, %c2_355, %c0_356] : memref<1x4x4x256xbf16, #tpu.memory_space<vmem>>, vector<1x1x1x256xbf16>
    %226 = vector.shape_cast %225 : vector<1x1x1x256xbf16> to vector<1x256xbf16>
    %227 = vector.shape_cast %224 : vector<1x256xbf16> to vector<1x1x1x256xbf16>
    tpu.vector_store %arg21[%c0_353, %c1_354, %c2_355, %c0_356], %227 {strides = array<i32>} : memref<1x4x4x256xbf16, #tpu.memory_space<vmem>>, vector<1x1x1x256xbf16>,
    %c4_357 = arith.constant 4 : index
    %c0_358 = arith.constant 0 : index
    %228 = vector.load %arg20[%c4_357, %c0_358] : memref<8x256xbf16, #tpu.memory_space<vmem>>, vector<1x256xbf16>
    %c0_359 = arith.constant 0 : index
    %c0_360 = arith.constant 0 : index
    %c3_361 = arith.constant 3 : index
    %c0_362 = arith.constant 0 : index
    %229 = vector.load %arg21[%c0_359, %c0_360, %c3_361, %c0_362] : memref<1x4x4x256xbf16, #tpu.memory_space<vmem>>, vector<1x1x1x256xbf16>
    %230 = vector.shape_cast %229 : vector<1x1x1x256xbf16> to vector<1x256xbf16>
    %231 = vector.shape_cast %228 : vector<1x256xbf16> to vector<1x1x1x256xbf16>
    tpu.vector_store %arg21[%c0_359, %c0_360, %c3_361, %c0_362], %231 {strides = array<i32>} : memref<1x4x4x256xbf16, #tpu.memory_space<vmem>>, vector<1x1x1x256xbf16>,
    %c0_363 = arith.constant 0 : index
    %c0_364 = arith.constant 0 : index
    %c0_365 = arith.constant 0 : index
    %c0_366 = arith.constant 0 : index
    %232 = vector.load %arg21[%c0_363, %c0_364, %c0_365, %c0_366] : memref<1x4x4x256xbf16, #tpu.memory_space<vmem>>, vector<1x1x1x256xbf16>
    %233 = vector.shape_cast %232 : vector<1x1x1x256xbf16> to vector<1x256xbf16>
    %c0_367 = arith.constant 0 : index
    %c0_368 = arith.constant 0 : index
    %234 = vector.load %arg22[%c0_367, %c0_368] : memref<32x2304xbf16, #tpu.memory_space<vmem>>, vector<1x256xbf16>
    tpu.vector_store %arg22[%c0_367, %c0_368], %233 {strides = array<i32>} : memref<32x2304xbf16, #tpu.memory_space<vmem>>, vector<1x256xbf16>,
    %c0_369 = arith.constant 0 : index
    %c1_370 = arith.constant 1 : index
    %c0_371 = arith.constant 0 : index
    %c0_372 = arith.constant 0 : index
    %235 = vector.load %arg21[%c0_369, %c1_370, %c0_371, %c0_372] : memref<1x4x4x256xbf16, #tpu.memory_space<vmem>>, vector<1x1x1x256xbf16>
    %236 = vector.shape_cast %235 : vector<1x1x1x256xbf16> to vector<1x256xbf16>
    %c0_373 = arith.constant 0 : index
    %c256_374 = arith.constant 256 : index
    %237 = vector.load %arg22[%c0_373, %c256_374] : memref<32x2304xbf16, #tpu.memory_space<vmem>>, vector<1x256xbf16>
    tpu.vector_store %arg22[%c0_373, %c256_374], %236 {strides = array<i32>} : memref<32x2304xbf16, #tpu.memory_space<vmem>>, vector<1x256xbf16>,
    %c0_375 = arith.constant 0 : index
    %c0_376 = arith.constant 0 : index
    %c1_377 = arith.constant 1 : index
    %c0_378 = arith.constant 0 : index
    %238 = vector.load %arg21[%c0_375, %c0_376, %c1_377, %c0_378] : memref<1x4x4x256xbf16, #tpu.memory_space<vmem>>, vector<1x1x1x256xbf16>
    %239 = vector.shape_cast %238 : vector<1x1x1x256xbf16> to vector<1x256xbf16>
    %c0_379 = arith.constant 0 : index
    %c512_380 = arith.constant 512 : index
    %240 = vector.load %arg22[%c0_379, %c512_380] : memref<32x2304xbf16, #tpu.memory_space<vmem>>, vector<1x256xbf16>
    tpu.vector_store %arg22[%c0_379, %c512_380], %239 {strides = array<i32>} : memref<32x2304xbf16, #tpu.memory_space<vmem>>, vector<1x256xbf16>,
    %c0_381 = arith.constant 0 : index
    %c2_382 = arith.constant 2 : index
    %c0_383 = arith.constant 0 : index
    %c0_384 = arith.constant 0 : index
    %241 = vector.load %arg21[%c0_381, %c2_382, %c0_383, %c0_384] : memref<1x4x4x256xbf16, #tpu.memory_space<vmem>>, vector<1x1x1x256xbf16>
    %242 = vector.shape_cast %241 : vector<1x1x1x256xbf16> to vector<1x256xbf16>
    %c0_385 = arith.constant 0 : index
    %c768_386 = arith.constant 768 : index
    %243 = vector.load %arg22[%c0_385, %c768_386] : memref<32x2304xbf16, #tpu.memory_space<vmem>>, vector<1x256xbf16>
    tpu.vector_store %arg22[%c0_385, %c768_386], %242 {strides = array<i32>} : memref<32x2304xbf16, #tpu.memory_space<vmem>>, vector<1x256xbf16>,
    %c0_387 = arith.constant 0 : index
    %c3_388 = arith.constant 3 : index
    %c0_389 = arith.constant 0 : index
    %c0_390 = arith.constant 0 : index
    %244 = vector.load %arg21[%c0_387, %c3_388, %c0_389, %c0_390] : memref<1x4x4x256xbf16, #tpu.memory_space<vmem>>, vector<1x1x1x256xbf16>
    %245 = vector.shape_cast %244 : vector<1x1x1x256xbf16> to vector<1x256xbf16>
    %c0_391 = arith.constant 0 : index
    %c1024_392 = arith.constant 1024 : index
    %246 = vector.load %arg22[%c0_391, %c1024_392] : memref<32x2304xbf16, #tpu.memory_space<vmem>>, vector<1x256xbf16>
    tpu.vector_store %arg22[%c0_391, %c1024_392], %245 {strides = array<i32>} : memref<32x2304xbf16, #tpu.memory_space<vmem>>, vector<1x256xbf16>,
    %c0_393 = arith.constant 0 : index
    %c2_394 = arith.constant 2 : index
    %c1_395 = arith.constant 1 : index
    %c0_396 = arith.constant 0 : index
    %247 = vector.load %arg21[%c0_393, %c2_394, %c1_395, %c0_396] : memref<1x4x4x256xbf16, #tpu.memory_space<vmem>>, vector<1x1x1x256xbf16>
    %248 = vector.shape_cast %247 : vector<1x1x1x256xbf16> to vector<1x256xbf16>
    %c0_397 = arith.constant 0 : index
    %c1280 = arith.constant 1280 : index
    %249 = vector.load %arg22[%c0_397, %c1280] : memref<32x2304xbf16, #tpu.memory_space<vmem>>, vector<1x256xbf16>
    tpu.vector_store %arg22[%c0_397, %c1280], %248 {strides = array<i32>} : memref<32x2304xbf16, #tpu.memory_space<vmem>>, vector<1x256xbf16>,
    %c0_398 = arith.constant 0 : index
    %c0_399 = arith.constant 0 : index
    %c2_400 = arith.constant 2 : index
    %c0_401 = arith.constant 0 : index
    %250 = vector.load %arg21[%c0_398, %c0_399, %c2_400, %c0_401] : memref<1x4x4x256xbf16, #tpu.memory_space<vmem>>, vector<1x1x1x256xbf16>
    %251 = vector.shape_cast %250 : vector<1x1x1x256xbf16> to vector<1x256xbf16>
    %c0_402 = arith.constant 0 : index
    %c1536 = arith.constant 1536 : index
    %252 = vector.load %arg22[%c0_402, %c1536] : memref<32x2304xbf16, #tpu.memory_space<vmem>>, vector<1x256xbf16>
    tpu.vector_store %arg22[%c0_402, %c1536], %251 {strides = array<i32>} : memref<32x2304xbf16, #tpu.memory_space<vmem>>, vector<1x256xbf16>,
    %c0_403 = arith.constant 0 : index
    %c1_404 = arith.constant 1 : index
    %c2_405 = arith.constant 2 : index
    %c0_406 = arith.constant 0 : index
    %253 = vector.load %arg21[%c0_403, %c1_404, %c2_405, %c0_406] : memref<1x4x4x256xbf16, #tpu.memory_space<vmem>>, vector<1x1x1x256xbf16>
    %254 = vector.shape_cast %253 : vector<1x1x1x256xbf16> to vector<1x256xbf16>
    %c0_407 = arith.constant 0 : index
    %c1792 = arith.constant 1792 : index
    %255 = vector.load %arg22[%c0_407, %c1792] : memref<32x2304xbf16, #tpu.memory_space<vmem>>, vector<1x256xbf16>
    tpu.vector_store %arg22[%c0_407, %c1792], %254 {strides = array<i32>} : memref<32x2304xbf16, #tpu.memory_space<vmem>>, vector<1x256xbf16>,
    %c0_408 = arith.constant 0 : index
    %c0_409 = arith.constant 0 : index
    %c3_410 = arith.constant 3 : index
    %c0_411 = arith.constant 0 : index
    %256 = vector.load %arg21[%c0_408, %c0_409, %c3_410, %c0_411] : memref<1x4x4x256xbf16, #tpu.memory_space<vmem>>, vector<1x1x1x256xbf16>
    %257 = vector.shape_cast %256 : vector<1x1x1x256xbf16> to vector<1x256xbf16>
    %c0_412 = arith.constant 0 : index
    %c2048 = arith.constant 2048 : index
    %258 = vector.load %arg22[%c0_412, %c2048] : memref<32x2304xbf16, #tpu.memory_space<vmem>>, vector<1x256xbf16>
    tpu.vector_store %arg22[%c0_412, %c2048], %257 {strides = array<i32>} : memref<32x2304xbf16, #tpu.memory_space<vmem>>, vector<1x256xbf16>,
    %c0_413 = arith.constant 0 : index
    %c1_414 = arith.constant 1 : index
    %c0_415 = arith.constant 0 : index
    %c0_416 = arith.constant 0 : index
    %259 = vector.load %arg21[%c0_413, %c1_414, %c0_415, %c0_416] : memref<1x4x4x256xbf16, #tpu.memory_space<vmem>>, vector<1x1x1x256xbf16>
    %260 = vector.shape_cast %259 : vector<1x1x1x256xbf16> to vector<1x256xbf16>
    %c8_417 = arith.constant 8 : index
    %c0_418 = arith.constant 0 : index
    %261 = vector.load %arg22[%c8_417, %c0_418] : memref<32x2304xbf16, #tpu.memory_space<vmem>>, vector<1x256xbf16>
    tpu.vector_store %arg22[%c8_417, %c0_418], %260 {strides = array<i32>} : memref<32x2304xbf16, #tpu.memory_space<vmem>>, vector<1x256xbf16>,
    %c0_419 = arith.constant 0 : index
    %c0_420 = arith.constant 0 : index
    %c1_421 = arith.constant 1 : index
    %c0_422 = arith.constant 0 : index
    %262 = vector.load %arg21[%c0_419, %c0_420, %c1_421, %c0_422] : memref<1x4x4x256xbf16, #tpu.memory_space<vmem>>, vector<1x1x1x256xbf16>
    %263 = vector.shape_cast %262 : vector<1x1x1x256xbf16> to vector<1x256xbf16>
    %c8_423 = arith.constant 8 : index
    %c256_424 = arith.constant 256 : index
    %264 = vector.load %arg22[%c8_423, %c256_424] : memref<32x2304xbf16, #tpu.memory_space<vmem>>, vector<1x256xbf16>
    tpu.vector_store %arg22[%c8_423, %c256_424], %263 {strides = array<i32>} : memref<32x2304xbf16, #tpu.memory_space<vmem>>, vector<1x256xbf16>,
    %c0_425 = arith.constant 0 : index
    %c1_426 = arith.constant 1 : index
    %c1_427 = arith.constant 1 : index
    %c0_428 = arith.constant 0 : index
    %265 = vector.load %arg21[%c0_425, %c1_426, %c1_427, %c0_428] : memref<1x4x4x256xbf16, #tpu.memory_space<vmem>>, vector<1x1x1x256xbf16>
    %266 = vector.shape_cast %265 : vector<1x1x1x256xbf16> to vector<1x256xbf16>
    %c8_429 = arith.constant 8 : index
    %c512_430 = arith.constant 512 : index
    %267 = vector.load %arg22[%c8_429, %c512_430] : memref<32x2304xbf16, #tpu.memory_space<vmem>>, vector<1x256xbf16>
    tpu.vector_store %arg22[%c8_429, %c512_430], %266 {strides = array<i32>} : memref<32x2304xbf16, #tpu.memory_space<vmem>>, vector<1x256xbf16>,
    %c0_431 = arith.constant 0 : index
    %c3_432 = arith.constant 3 : index
    %c0_433 = arith.constant 0 : index
    %c0_434 = arith.constant 0 : index
    %268 = vector.load %arg21[%c0_431, %c3_432, %c0_433, %c0_434] : memref<1x4x4x256xbf16, #tpu.memory_space<vmem>>, vector<1x1x1x256xbf16>
    %269 = vector.shape_cast %268 : vector<1x1x1x256xbf16> to vector<1x256xbf16>
    %c8_435 = arith.constant 8 : index
    %c768_436 = arith.constant 768 : index
    %270 = vector.load %arg22[%c8_435, %c768_436] : memref<32x2304xbf16, #tpu.memory_space<vmem>>, vector<1x256xbf16>
    tpu.vector_store %arg22[%c8_435, %c768_436], %269 {strides = array<i32>} : memref<32x2304xbf16, #tpu.memory_space<vmem>>, vector<1x256xbf16>,
    %c0_437 = arith.constant 0 : index
    %c2_438 = arith.constant 2 : index
    %c1_439 = arith.constant 1 : index
    %c0_440 = arith.constant 0 : index
    %271 = vector.load %arg21[%c0_437, %c2_438, %c1_439, %c0_440] : memref<1x4x4x256xbf16, #tpu.memory_space<vmem>>, vector<1x1x1x256xbf16>
    %272 = vector.shape_cast %271 : vector<1x1x1x256xbf16> to vector<1x256xbf16>
    %c8_441 = arith.constant 8 : index
    %c1024_442 = arith.constant 1024 : index
    %273 = vector.load %arg22[%c8_441, %c1024_442] : memref<32x2304xbf16, #tpu.memory_space<vmem>>, vector<1x256xbf16>
    tpu.vector_store %arg22[%c8_441, %c1024_442], %272 {strides = array<i32>} : memref<32x2304xbf16, #tpu.memory_space<vmem>>, vector<1x256xbf16>,
    %c0_443 = arith.constant 0 : index
    %c3_444 = arith.constant 3 : index
    %c1_445 = arith.constant 1 : index
    %c0_446 = arith.constant 0 : index
    %274 = vector.load %arg21[%c0_443, %c3_444, %c1_445, %c0_446] : memref<1x4x4x256xbf16, #tpu.memory_space<vmem>>, vector<1x1x1x256xbf16>
    %275 = vector.shape_cast %274 : vector<1x1x1x256xbf16> to vector<1x256xbf16>
    %c8_447 = arith.constant 8 : index
    %c1280_448 = arith.constant 1280 : index
    %276 = vector.load %arg22[%c8_447, %c1280_448] : memref<32x2304xbf16, #tpu.memory_space<vmem>>, vector<1x256xbf16>
    tpu.vector_store %arg22[%c8_447, %c1280_448], %275 {strides = array<i32>} : memref<32x2304xbf16, #tpu.memory_space<vmem>>, vector<1x256xbf16>,
    %c0_449 = arith.constant 0 : index
    %c1_450 = arith.constant 1 : index
    %c2_451 = arith.constant 2 : index
    %c0_452 = arith.constant 0 : index
    %277 = vector.load %arg21[%c0_449, %c1_450, %c2_451, %c0_452] : memref<1x4x4x256xbf16, #tpu.memory_space<vmem>>, vector<1x1x1x256xbf16>
    %278 = vector.shape_cast %277 : vector<1x1x1x256xbf16> to vector<1x256xbf16>
    %c8_453 = arith.constant 8 : index
    %c1536_454 = arith.constant 1536 : index
    %279 = vector.load %arg22[%c8_453, %c1536_454] : memref<32x2304xbf16, #tpu.memory_space<vmem>>, vector<1x256xbf16>
    tpu.vector_store %arg22[%c8_453, %c1536_454], %278 {strides = array<i32>} : memref<32x2304xbf16, #tpu.memory_space<vmem>>, vector<1x256xbf16>,
    %c0_455 = arith.constant 0 : index
    %c0_456 = arith.constant 0 : index
    %c3_457 = arith.constant 3 : index
    %c0_458 = arith.constant 0 : index
    %280 = vector.load %arg21[%c0_455, %c0_456, %c3_457, %c0_458] : memref<1x4x4x256xbf16, #tpu.memory_space<vmem>>, vector<1x1x1x256xbf16>
    %281 = vector.shape_cast %280 : vector<1x1x1x256xbf16> to vector<1x256xbf16>
    %c8_459 = arith.constant 8 : index
    %c1792_460 = arith.constant 1792 : index
    %282 = vector.load %arg22[%c8_459, %c1792_460] : memref<32x2304xbf16, #tpu.memory_space<vmem>>, vector<1x256xbf16>
    tpu.vector_store %arg22[%c8_459, %c1792_460], %281 {strides = array<i32>} : memref<32x2304xbf16, #tpu.memory_space<vmem>>, vector<1x256xbf16>,
    %c0_461 = arith.constant 0 : index
    %c1_462 = arith.constant 1 : index
    %c3_463 = arith.constant 3 : index
    %c0_464 = arith.constant 0 : index
    %283 = vector.load %arg21[%c0_461, %c1_462, %c3_463, %c0_464] : memref<1x4x4x256xbf16, #tpu.memory_space<vmem>>, vector<1x1x1x256xbf16>
    %284 = vector.shape_cast %283 : vector<1x1x1x256xbf16> to vector<1x256xbf16>
    %c8_465 = arith.constant 8 : index
    %c2048_466 = arith.constant 2048 : index
    %285 = vector.load %arg22[%c8_465, %c2048_466] : memref<32x2304xbf16, #tpu.memory_space<vmem>>, vector<1x256xbf16>
    tpu.vector_store %arg22[%c8_465, %c2048_466], %284 {strides = array<i32>} : memref<32x2304xbf16, #tpu.memory_space<vmem>>, vector<1x256xbf16>,
    %c0_467 = arith.constant 0 : index
    %c2_468 = arith.constant 2 : index
    %c0_469 = arith.constant 0 : index
    %c0_470 = arith.constant 0 : index
    %286 = vector.load %arg21[%c0_467, %c2_468, %c0_469, %c0_470] : memref<1x4x4x256xbf16, #tpu.memory_space<vmem>>, vector<1x1x1x256xbf16>
    %287 = vector.shape_cast %286 : vector<1x1x1x256xbf16> to vector<1x256xbf16>
    %c16_471 = arith.constant 16 : index
    %c0_472 = arith.constant 0 : index
    %288 = vector.load %arg22[%c16_471, %c0_472] : memref<32x2304xbf16, #tpu.memory_space<vmem>>, vector<1x256xbf16>
    tpu.vector_store %arg22[%c16_471, %c0_472], %287 {strides = array<i32>} : memref<32x2304xbf16, #tpu.memory_space<vmem>>, vector<1x256xbf16>,
    %c0_473 = arith.constant 0 : index
    %c3_474 = arith.constant 3 : index
    %c0_475 = arith.constant 0 : index
    %c0_476 = arith.constant 0 : index
    %289 = vector.load %arg21[%c0_473, %c3_474, %c0_475, %c0_476] : memref<1x4x4x256xbf16, #tpu.memory_space<vmem>>, vector<1x1x1x256xbf16>
    %290 = vector.shape_cast %289 : vector<1x1x1x256xbf16> to vector<1x256xbf16>
    %c16_477 = arith.constant 16 : index
    %c256_478 = arith.constant 256 : index
    %291 = vector.load %arg22[%c16_477, %c256_478] : memref<32x2304xbf16, #tpu.memory_space<vmem>>, vector<1x256xbf16>
    tpu.vector_store %arg22[%c16_477, %c256_478], %290 {strides = array<i32>} : memref<32x2304xbf16, #tpu.memory_space<vmem>>, vector<1x256xbf16>,
    %c0_479 = arith.constant 0 : index
    %c2_480 = arith.constant 2 : index
    %c1_481 = arith.constant 1 : index
    %c0_482 = arith.constant 0 : index
    %292 = vector.load %arg21[%c0_479, %c2_480, %c1_481, %c0_482] : memref<1x4x4x256xbf16, #tpu.memory_space<vmem>>, vector<1x1x1x256xbf16>
    %293 = vector.shape_cast %292 : vector<1x1x1x256xbf16> to vector<1x256xbf16>
    %c16_483 = arith.constant 16 : index
    %c512_484 = arith.constant 512 : index
    %294 = vector.load %arg22[%c16_483, %c512_484] : memref<32x2304xbf16, #tpu.memory_space<vmem>>, vector<1x256xbf16>
    tpu.vector_store %arg22[%c16_483, %c512_484], %293 {strides = array<i32>} : memref<32x2304xbf16, #tpu.memory_space<vmem>>, vector<1x256xbf16>,
    %c0_485 = arith.constant 0 : index
    %c0_486 = arith.constant 0 : index
    %c2_487 = arith.constant 2 : index
    %c0_488 = arith.constant 0 : index
    %295 = vector.load %arg21[%c0_485, %c0_486, %c2_487, %c0_488] : memref<1x4x4x256xbf16, #tpu.memory_space<vmem>>, vector<1x1x1x256xbf16>
    %296 = vector.shape_cast %295 : vector<1x1x1x256xbf16> to vector<1x256xbf16>
    %c16_489 = arith.constant 16 : index
    %c768_490 = arith.constant 768 : index
    %297 = vector.load %arg22[%c16_489, %c768_490] : memref<32x2304xbf16, #tpu.memory_space<vmem>>, vector<1x256xbf16>
    tpu.vector_store %arg22[%c16_489, %c768_490], %296 {strides = array<i32>} : memref<32x2304xbf16, #tpu.memory_space<vmem>>, vector<1x256xbf16>,
    %c0_491 = arith.constant 0 : index
    %c1_492 = arith.constant 1 : index
    %c2_493 = arith.constant 2 : index
    %c0_494 = arith.constant 0 : index
    %298 = vector.load %arg21[%c0_491, %c1_492, %c2_493, %c0_494] : memref<1x4x4x256xbf16, #tpu.memory_space<vmem>>, vector<1x1x1x256xbf16>
    %299 = vector.shape_cast %298 : vector<1x1x1x256xbf16> to vector<1x256xbf16>
    %c16_495 = arith.constant 16 : index
    %c1024_496 = arith.constant 1024 : index
    %300 = vector.load %arg22[%c16_495, %c1024_496] : memref<32x2304xbf16, #tpu.memory_space<vmem>>, vector<1x256xbf16>
    tpu.vector_store %arg22[%c16_495, %c1024_496], %299 {strides = array<i32>} : memref<32x2304xbf16, #tpu.memory_space<vmem>>, vector<1x256xbf16>,
    %c0_497 = arith.constant 0 : index
    %c0_498 = arith.constant 0 : index
    %c3_499 = arith.constant 3 : index
    %c0_500 = arith.constant 0 : index
    %301 = vector.load %arg21[%c0_497, %c0_498, %c3_499, %c0_500] : memref<1x4x4x256xbf16, #tpu.memory_space<vmem>>, vector<1x1x1x256xbf16>
    %302 = vector.shape_cast %301 : vector<1x1x1x256xbf16> to vector<1x256xbf16>
    %c16_501 = arith.constant 16 : index
    %c1280_502 = arith.constant 1280 : index
    %303 = vector.load %arg22[%c16_501, %c1280_502] : memref<32x2304xbf16, #tpu.memory_space<vmem>>, vector<1x256xbf16>
    tpu.vector_store %arg22[%c16_501, %c1280_502], %302 {strides = array<i32>} : memref<32x2304xbf16, #tpu.memory_space<vmem>>, vector<1x256xbf16>,
    %c0_503 = arith.constant 0 : index
    %c2_504 = arith.constant 2 : index
    %c2_505 = arith.constant 2 : index
    %c0_506 = arith.constant 0 : index
    %304 = vector.load %arg21[%c0_503, %c2_504, %c2_505, %c0_506] : memref<1x4x4x256xbf16, #tpu.memory_space<vmem>>, vector<1x1x1x256xbf16>
    %305 = vector.shape_cast %304 : vector<1x1x1x256xbf16> to vector<1x256xbf16>
    %c16_507 = arith.constant 16 : index
    %c1536_508 = arith.constant 1536 : index
    %306 = vector.load %arg22[%c16_507, %c1536_508] : memref<32x2304xbf16, #tpu.memory_space<vmem>>, vector<1x256xbf16>
    tpu.vector_store %arg22[%c16_507, %c1536_508], %305 {strides = array<i32>} : memref<32x2304xbf16, #tpu.memory_space<vmem>>, vector<1x256xbf16>,
    %c0_509 = arith.constant 0 : index
    %c3_510 = arith.constant 3 : index
    %c2_511 = arith.constant 2 : index
    %c0_512 = arith.constant 0 : index
    %307 = vector.load %arg21[%c0_509, %c3_510, %c2_511, %c0_512] : memref<1x4x4x256xbf16, #tpu.memory_space<vmem>>, vector<1x1x1x256xbf16>
    %308 = vector.shape_cast %307 : vector<1x1x1x256xbf16> to vector<1x256xbf16>
    %c16_513 = arith.constant 16 : index
    %c1792_514 = arith.constant 1792 : index
    %309 = vector.load %arg22[%c16_513, %c1792_514] : memref<32x2304xbf16, #tpu.memory_space<vmem>>, vector<1x256xbf16>
    tpu.vector_store %arg22[%c16_513, %c1792_514], %308 {strides = array<i32>} : memref<32x2304xbf16, #tpu.memory_space<vmem>>, vector<1x256xbf16>,
    %c0_515 = arith.constant 0 : index
    %c2_516 = arith.constant 2 : index
    %c3_517 = arith.constant 3 : index
    %c0_518 = arith.constant 0 : index
    %310 = vector.load %arg21[%c0_515, %c2_516, %c3_517, %c0_518] : memref<1x4x4x256xbf16, #tpu.memory_space<vmem>>, vector<1x1x1x256xbf16>
    %311 = vector.shape_cast %310 : vector<1x1x1x256xbf16> to vector<1x256xbf16>
    %c16_519 = arith.constant 16 : index
    %c2048_520 = arith.constant 2048 : index
    %312 = vector.load %arg22[%c16_519, %c2048_520] : memref<32x2304xbf16, #tpu.memory_space<vmem>>, vector<1x256xbf16>
    tpu.vector_store %arg22[%c16_519, %c2048_520], %311 {strides = array<i32>} : memref<32x2304xbf16, #tpu.memory_space<vmem>>, vector<1x256xbf16>,
    %c0_521 = arith.constant 0 : index
    %c3_522 = arith.constant 3 : index
    %c0_523 = arith.constant 0 : index
    %c0_524 = arith.constant 0 : index
    %313 = vector.load %arg21[%c0_521, %c3_522, %c0_523, %c0_524] : memref<1x4x4x256xbf16, #tpu.memory_space<vmem>>, vector<1x1x1x256xbf16>
    %314 = vector.shape_cast %313 : vector<1x1x1x256xbf16> to vector<1x256xbf16>
    %c24_525 = arith.constant 24 : index
    %c0_526 = arith.constant 0 : index
    %315 = vector.load %arg22[%c24_525, %c0_526] : memref<32x2304xbf16, #tpu.memory_space<vmem>>, vector<1x256xbf16>
    tpu.vector_store %arg22[%c24_525, %c0_526], %314 {strides = array<i32>} : memref<32x2304xbf16, #tpu.memory_space<vmem>>, vector<1x256xbf16>,
    %c0_527 = arith.constant 0 : index
    %c2_528 = arith.constant 2 : index
    %c1_529 = arith.constant 1 : index
    %c0_530 = arith.constant 0 : index
    %316 = vector.load %arg21[%c0_527, %c2_528, %c1_529, %c0_530] : memref<1x4x4x256xbf16, #tpu.memory_space<vmem>>, vector<1x1x1x256xbf16>
    %317 = vector.shape_cast %316 : vector<1x1x1x256xbf16> to vector<1x256xbf16>
    %c24_531 = arith.constant 24 : index
    %c256_532 = arith.constant 256 : index
    %318 = vector.load %arg22[%c24_531, %c256_532] : memref<32x2304xbf16, #tpu.memory_space<vmem>>, vector<1x256xbf16>
    tpu.vector_store %arg22[%c24_531, %c256_532], %317 {strides = array<i32>} : memref<32x2304xbf16, #tpu.memory_space<vmem>>, vector<1x256xbf16>,
    %c0_533 = arith.constant 0 : index
    %c3_534 = arith.constant 3 : index
    %c1_535 = arith.constant 1 : index
    %c0_536 = arith.constant 0 : index
    %319 = vector.load %arg21[%c0_533, %c3_534, %c1_535, %c0_536] : memref<1x4x4x256xbf16, #tpu.memory_space<vmem>>, vector<1x1x1x256xbf16>
    %320 = vector.shape_cast %319 : vector<1x1x1x256xbf16> to vector<1x256xbf16>
    %c24_537 = arith.constant 24 : index
    %c512_538 = arith.constant 512 : index
    %321 = vector.load %arg22[%c24_537, %c512_538] : memref<32x2304xbf16, #tpu.memory_space<vmem>>, vector<1x256xbf16>
    tpu.vector_store %arg22[%c24_537, %c512_538], %320 {strides = array<i32>} : memref<32x2304xbf16, #tpu.memory_space<vmem>>, vector<1x256xbf16>,
    %c0_539 = arith.constant 0 : index
    %c1_540 = arith.constant 1 : index
    %c2_541 = arith.constant 2 : index
    %c0_542 = arith.constant 0 : index
    %322 = vector.load %arg21[%c0_539, %c1_540, %c2_541, %c0_542] : memref<1x4x4x256xbf16, #tpu.memory_space<vmem>>, vector<1x1x1x256xbf16>
    %323 = vector.shape_cast %322 : vector<1x1x1x256xbf16> to vector<1x256xbf16>
    %c24_543 = arith.constant 24 : index
    %c768_544 = arith.constant 768 : index
    %324 = vector.load %arg22[%c24_543, %c768_544] : memref<32x2304xbf16, #tpu.memory_space<vmem>>, vector<1x256xbf16>
    tpu.vector_store %arg22[%c24_543, %c768_544], %323 {strides = array<i32>} : memref<32x2304xbf16, #tpu.memory_space<vmem>>, vector<1x256xbf16>,
    %c0_545 = arith.constant 0 : index
    %c0_546 = arith.constant 0 : index
    %c3_547 = arith.constant 3 : index
    %c0_548 = arith.constant 0 : index
    %325 = vector.load %arg21[%c0_545, %c0_546, %c3_547, %c0_548] : memref<1x4x4x256xbf16, #tpu.memory_space<vmem>>, vector<1x1x1x256xbf16>
    %326 = vector.shape_cast %325 : vector<1x1x1x256xbf16> to vector<1x256xbf16>
    %c24_549 = arith.constant 24 : index
    %c1024_550 = arith.constant 1024 : index
    %327 = vector.load %arg22[%c24_549, %c1024_550] : memref<32x2304xbf16, #tpu.memory_space<vmem>>, vector<1x256xbf16>
    tpu.vector_store %arg22[%c24_549, %c1024_550], %326 {strides = array<i32>} : memref<32x2304xbf16, #tpu.memory_space<vmem>>, vector<1x256xbf16>,
    %c0_551 = arith.constant 0 : index
    %c1_552 = arith.constant 1 : index
    %c3_553 = arith.constant 3 : index
    %c0_554 = arith.constant 0 : index
    %328 = vector.load %arg21[%c0_551, %c1_552, %c3_553, %c0_554] : memref<1x4x4x256xbf16, #tpu.memory_space<vmem>>, vector<1x1x1x256xbf16>
    %329 = vector.shape_cast %328 : vector<1x1x1x256xbf16> to vector<1x256xbf16>
    %c24_555 = arith.constant 24 : index
    %c1280_556 = arith.constant 1280 : index
    %330 = vector.load %arg22[%c24_555, %c1280_556] : memref<32x2304xbf16, #tpu.memory_space<vmem>>, vector<1x256xbf16>
    tpu.vector_store %arg22[%c24_555, %c1280_556], %329 {strides = array<i32>} : memref<32x2304xbf16, #tpu.memory_space<vmem>>, vector<1x256xbf16>,
    %c0_557 = arith.constant 0 : index
    %c3_558 = arith.constant 3 : index
    %c2_559 = arith.constant 2 : index
    %c0_560 = arith.constant 0 : index
    %331 = vector.load %arg21[%c0_557, %c3_558, %c2_559, %c0_560] : memref<1x4x4x256xbf16, #tpu.memory_space<vmem>>, vector<1x1x1x256xbf16>
    %332 = vector.shape_cast %331 : vector<1x1x1x256xbf16> to vector<1x256xbf16>
    %c24_561 = arith.constant 24 : index
    %c1536_562 = arith.constant 1536 : index
    %333 = vector.load %arg22[%c24_561, %c1536_562] : memref<32x2304xbf16, #tpu.memory_space<vmem>>, vector<1x256xbf16>
    tpu.vector_store %arg22[%c24_561, %c1536_562], %332 {strides = array<i32>} : memref<32x2304xbf16, #tpu.memory_space<vmem>>, vector<1x256xbf16>,
    %c0_563 = arith.constant 0 : index
    %c2_564 = arith.constant 2 : index
    %c3_565 = arith.constant 3 : index
    %c0_566 = arith.constant 0 : index
    %334 = vector.load %arg21[%c0_563, %c2_564, %c3_565, %c0_566] : memref<1x4x4x256xbf16, #tpu.memory_space<vmem>>, vector<1x1x1x256xbf16>
    %335 = vector.shape_cast %334 : vector<1x1x1x256xbf16> to vector<1x256xbf16>
    %c24_567 = arith.constant 24 : index
    %c1792_568 = arith.constant 1792 : index
    %336 = vector.load %arg22[%c24_567, %c1792_568] : memref<32x2304xbf16, #tpu.memory_space<vmem>>, vector<1x256xbf16>
    tpu.vector_store %arg22[%c24_567, %c1792_568], %335 {strides = array<i32>} : memref<32x2304xbf16, #tpu.memory_space<vmem>>, vector<1x256xbf16>,
    %c0_569 = arith.constant 0 : index
    %c3_570 = arith.constant 3 : index
    %c3_571 = arith.constant 3 : index
    %c0_572 = arith.constant 0 : index
    %337 = vector.load %arg21[%c0_569, %c3_570, %c3_571, %c0_572] : memref<1x4x4x256xbf16, #tpu.memory_space<vmem>>, vector<1x1x1x256xbf16>
    %338 = vector.shape_cast %337 : vector<1x1x1x256xbf16> to vector<1x256xbf16>
    %c24_573 = arith.constant 24 : index
    %c2048_574 = arith.constant 2048 : index
    %339 = vector.load %arg22[%c24_573, %c2048_574] : memref<32x2304xbf16, #tpu.memory_space<vmem>>, vector<1x256xbf16>
    tpu.vector_store %arg22[%c24_573, %c2048_574], %338 {strides = array<i32>} : memref<32x2304xbf16, #tpu.memory_space<vmem>>, vector<1x256xbf16>,
    %c0_575 = arith.constant 0 : index
    %c0_576 = arith.constant 0 : index
    %340 = vector.load %arg22[%c0_575, %c0_576] : memref<32x2304xbf16, #tpu.memory_space<vmem>>, vector<32x2304xbf16>
    %c0_577 = arith.constant 0 : index
    %c0_578 = arith.constant 0 : index
    %341 = vector.load %arg6[%c0_577, %c0_578] : memref<2304x512xbf16, #tpu.memory_space<vmem>>, vector<2304x512xbf16>
    %cst_579 = arith.constant dense<0.000000e+00> : vector<32x512xf32>
    %342 = tpu.matmul %340, %341, %cst_579 {dimension_numbers = #tpu.dot_dimension_numbers<[1], [0], [0], [1], [0, 0, 1, 1], [], []>} : vector<32x2304xbf16>, vector<2304x512xbf16>, vector<32x512xf32> -> vector<32x512xf32>
    %c0_580 = arith.constant 0 : index
    %c0_581 = arith.constant 0 : index
    %343 = vector.load %arg23[%c0_580, %c0_581] : memref<32x512xf32, #tpu.memory_space<vmem>>, vector<32x512xf32>
    tpu.vector_store %arg23[%c0_580, %c0_581], %342 {strides = array<i32>} : memref<32x512xf32, #tpu.memory_space<vmem>>, vector<32x512xf32>,
    %c0_582 = arith.constant 0 : index
    %c0_583 = arith.constant 0 : index
    %344 = vector.load %arg23[%c0_582, %c0_583] : memref<32x512xf32, #tpu.memory_space<vmem>>, vector<8x512xf32>
    %c8_584 = arith.constant 8 : index
    %c0_585 = arith.constant 0 : index
    %345 = vector.load %arg23[%c8_584, %c0_585] : memref<32x512xf32, #tpu.memory_space<vmem>>, vector<8x512xf32>
    %346 = arith.maximumf %344, %345 : vector<8x512xf32>
    %c16_586 = arith.constant 16 : index
    %c0_587 = arith.constant 0 : index
    %347 = vector.load %arg23[%c16_586, %c0_587] : memref<32x512xf32, #tpu.memory_space<vmem>>, vector<8x512xf32>
    %c24_588 = arith.constant 24 : index
    %c0_589 = arith.constant 0 : index
    %348 = vector.load %arg23[%c24_588, %c0_589] : memref<32x512xf32, #tpu.memory_space<vmem>>, vector<8x512xf32>
    %349 = arith.maximumf %347, %348 : vector<8x512xf32>
    %350 = arith.maximumf %346, %349 : vector<8x512xf32>
    %c0_590 = arith.constant 0 : index
    %c0_591 = arith.constant 0 : index
    %351 = vector.load %arg7[%c0_590, %c0_591] : memref<1x512xf32, #tpu.memory_space<vmem>>, vector<1x512xf32>
    %352 = vector.broadcast %351 : vector<1x512xf32> to vector<8x512xf32>
    %353 = arith.addf %350, %352 : vector<8x512xf32>
    %cst_592 = arith.constant 0.000000e+00 : f32
    %354 = vector.broadcast %cst_592 : f32 to vector<8x512xf32>
    %355 = arith.maximumf %353, %354 : vector<8x512xf32>
    %356 = arith.truncf %355 : vector<8x512xf32> to vector<8x512xbf16>
    %c0_593 = arith.constant 0 : index
    %c0_594 = arith.constant 0 : index
    %357 = vector.load %arg8[%c0_593, %c0_594] : memref<512x128xbf16, #tpu.memory_space<vmem>>, vector<512x128xbf16>
    %cst_595 = arith.constant dense<0.000000e+00> : vector<8x128xf32>
    %358 = tpu.matmul %356, %357, %cst_595 {dimension_numbers = #tpu.dot_dimension_numbers<[1], [0], [0], [1], [0, 0, 1, 1], [], []>} : vector<8x512xbf16>, vector<512x128xbf16>, vector<8x128xf32> -> vector<8x128xf32>
    %c0_596 = arith.constant 0 : index
    %c0_597 = arith.constant 0 : index
    %359 = vector.load %arg9[%c0_596, %c0_597] : memref<1x128xf32, #tpu.memory_space<vmem>>, vector<1x128xf32>
    %360 = vector.broadcast %359 : vector<1x128xf32> to vector<8x128xf32>
    %361 = arith.addf %358, %360 : vector<8x128xf32>
    %cst_598 = arith.constant 0.000000e+00 : f32
    %362 = vector.broadcast %cst_598 : f32 to vector<8x128xf32>
    %363 = arith.maximumf %361, %362 : vector<8x128xf32>
    %364 = arith.truncf %363 : vector<8x128xf32> to vector<8x128xbf16>
    %c0_599 = arith.constant 0 : index
    %c0_600 = arith.constant 0 : index
    %365 = vector.load %arg10[%c0_599, %c0_600] : memref<128x128xbf16, #tpu.memory_space<vmem>>, vector<128x128xbf16>
    %cst_601 = arith.constant dense<0.000000e+00> : vector<8x128xf32>
    %366 = tpu.matmul %364, %365, %cst_601 {dimension_numbers = #tpu.dot_dimension_numbers<[1], [0], [0], [1], [0, 0, 1, 1], [], []>} : vector<8x128xbf16>, vector<128x128xbf16>, vector<8x128xf32> -> vector<8x128xf32>
    %c0_602 = arith.constant 0 : index
    %c0_603 = arith.constant 0 : index
    %367 = vector.load %arg11[%c0_602, %c0_603] : memref<1x128xf32, #tpu.memory_space<vmem>>, vector<1x128xf32>
    %368 = vector.broadcast %367 : vector<1x128xf32> to vector<8x128xf32>
    %369 = arith.addf %366, %368 : vector<8x128xf32>
    %cst_604 = arith.constant 0.000000e+00 : f32
    %370 = vector.broadcast %cst_604 : f32 to vector<8x128xf32>
    %371 = arith.maximumf %369, %370 : vector<8x128xf32>
    %372 = arith.truncf %371 : vector<8x128xf32> to vector<8x128xbf16>
    %c0_605 = arith.constant 0 : index
    %c0_606 = arith.constant 0 : index
    %373 = vector.load %arg12[%c0_605, %c0_606] : memref<128x16xbf16, #tpu.memory_space<vmem>>, vector<128x16xbf16>
    %cst_607 = arith.constant dense<0.000000e+00> : vector<8x16xf32>
    %374 = tpu.matmul %372, %373, %cst_607 {dimension_numbers = #tpu.dot_dimension_numbers<[1], [0], [0], [1], [0, 0, 1, 1], [], []>} : vector<8x128xbf16>, vector<128x16xbf16>, vector<8x16xf32> -> vector<8x16xf32>
    %c0_608 = arith.constant 0 : index
    %c0_609 = arith.constant 0 : index
    %375 = vector.load %arg13[%c0_608, %c0_609] : memref<1x16xf32, #tpu.memory_space<vmem>>, vector<1x16xf32>
    %376 = vector.broadcast %375 : vector<1x16xf32> to vector<8x16xf32>
    %377 = arith.addf %374, %376 : vector<8x16xf32>
    %c0_610 = arith.constant 0 : index
    %c0_611 = arith.constant 0 : index
    %378 = vector.load %arg14[%c0_610, %c0_611] : memref<8x16xf32, #tpu.memory_space<vmem>>, vector<8x16xf32>
    tpu.vector_store %arg14[%c0_610, %c0_611], %377 {strides = array<i32>} : memref<8x16xf32, #tpu.memory_space<vmem>>, vector<8x16xf32>,
    return
  }
  func.func @transform_0(%arg0: i32) -> (i32, i32) {
    %c0_i32 = arith.constant 0 : i32
    %c0_i32_0 = arith.constant 0 : i32
    return %arg0, %c0_i32 : i32, i32
  }
  func.func @transform_1(%arg0: i32) -> (i32, i32) {
    %c0_i32 = arith.constant 0 : i32
    %c0_i32_0 = arith.constant 0 : i32
    %c0_i32_1 = arith.constant 0 : i32
    return %c0_i32, %c0_i32_0 : i32, i32
  }
  func.func @transform_2(%arg0: i32) -> (i32, i32) {
    %c0_i32 = arith.constant 0 : i32
    %c0_i32_0 = arith.constant 0 : i32
    %c0_i32_1 = arith.constant 0 : i32
    return %c0_i32, %c0_i32_0 : i32, i32
  }
  func.func @transform_3(%arg0: i32) -> (i32, i32) {
    %c0_i32 = arith.constant 0 : i32
    %c0_i32_0 = arith.constant 0 : i32
    %c0_i32_1 = arith.constant 0 : i32
    return %c0_i32, %c0_i32_0 : i32, i32
  }
  func.func @transform_4(%arg0: i32) -> (i32, i32) {
    %c0_i32 = arith.constant 0 : i32
    %c0_i32_0 = arith.constant 0 : i32
    %c0_i32_1 = arith.constant 0 : i32
    return %c0_i32, %c0_i32_0 : i32, i32
  }
  func.func @transform_5(%arg0: i32) -> (i32, i32) {
    %c0_i32 = arith.constant 0 : i32
    %c0_i32_0 = arith.constant 0 : i32
    %c0_i32_1 = arith.constant 0 : i32
    return %c0_i32, %c0_i32_0 : i32, i32
  }
  func.func @transform_6(%arg0: i32) -> (i32, i32) {
    %c0_i32 = arith.constant 0 : i32
    %c0_i32_0 = arith.constant 0 : i32
    %c0_i32_1 = arith.constant 0 : i32
    return %c0_i32, %c0_i32_0 : i32, i32
  }
  func.func @transform_7(%arg0: i32) -> (i32, i32) {
    %c0_i32 = arith.constant 0 : i32
    %c0_i32_0 = arith.constant 0 : i32
    %c0_i32_1 = arith.constant 0 : i32
    return %c0_i32, %c0_i32_0 : i32, i32
  }
  func.func @transform_8(%arg0: i32) -> (i32, i32) {
    %c0_i32 = arith.constant 0 : i32
    %c0_i32_0 = arith.constant 0 : i32
    %c0_i32_1 = arith.constant 0 : i32
    return %c0_i32, %c0_i32_0 : i32, i32
  }
  func.func @transform_9(%arg0: i32) -> (i32, i32) {
    %c0_i32 = arith.constant 0 : i32
    %c0_i32_0 = arith.constant 0 : i32
    %c0_i32_1 = arith.constant 0 : i32
    return %c0_i32, %c0_i32_0 : i32, i32
  }
  func.func @transform_10(%arg0: i32) -> (i32, i32) {
    %c0_i32 = arith.constant 0 : i32
    %c0_i32_0 = arith.constant 0 : i32
    %c0_i32_1 = arith.constant 0 : i32
    return %c0_i32, %c0_i32_0 : i32, i32
  }
  func.func @transform_11(%arg0: i32) -> (i32, i32) {
    %c0_i32 = arith.constant 0 : i32
    %c0_i32_0 = arith.constant 0 : i32
    %c0_i32_1 = arith.constant 0 : i32
    return %c0_i32, %c0_i32_0 : i32, i32
  }
  func.func @transform_12(%arg0: i32) -> (i32, i32) {
    %c0_i32 = arith.constant 0 : i32
    %c0_i32_0 = arith.constant 0 : i32
    %c0_i32_1 = arith.constant 0 : i32
    return %c0_i32, %c0_i32_0 : i32, i32
  }
  func.func @transform_13(%arg0: i32) -> (i32, i32) {
    %c0_i32 = arith.constant 0 : i32
    %c0_i32_0 = arith.constant 0 : i32
    return %arg0, %c0_i32 : i32, i32
  }
}

</mosaic_0001>

<bundles_post_ra>
// kernel: net_forward.3
= control target key start
LH: loop header
LB: loop body
LE: loop exit
PB: predicated region body
PF: predicated region fallthrough
CT: control target
= control target key end

     0   :  { %s2527_s12 = smov 0   ;;  %s2919_s0 = inlined_call_operand.vmem [shape: bf16[2048,32], index: 0, kind: input, shape index: {}]   ;;  %s2920_s1 = inlined_call_operand.vmem [shape: bf16[32,32], index: 1, kind: input, shape index: {}]   ;;  %s2921_s2 = inlined_call_operand.vmem [shape: f32[1,32], index: 2, kind: input, shape index: {}]   ;;  %s2922_s3 = inlined_call_operand.vmem [shape: bf16[512,32], index: 3, kind: output, shape index: {}]  }
   0x1 LB: > { %s2017_s13 = sadd.s32 4294967295, %s2505_s12   ;;  %p2021_p0 = scmp.ge.s32.totalorder %s2505_s12, 1  ;;  %s2505_s12 = sphi %s2527_s12, %s13_s12  }
   0x2   : > { %p138_p1 = scmp.lt.s32.totalorder %s2505_s12, 3 }
   0x4   : > { %p139_p2 = pnand %p2021_p0, %p138_p1 }
   0x5   : > { %v2433_v0 = vld [vmem:[%s2920_s1] sm:$0xff] (!%p139_p2)   ;;  %s2022_s16 = sshll.u32 (!%p139_p2), %s2017_s13, 7  ;;  %v2434_v1 = vld [vmem:[%s2920_s1 + $0x8] sm:$0xff] (!%p139_p2)   ;;  %vm639_vm0 = vcmask (!%p139_p2), 261120   ;;  %s2024_s23 = sshll.u32 (!%p139_p2), %s2017_s13, 5  ;;  %vm1928_vm1 = vcmask (!%p139_p2), 257024  }
   0x6   : > { %142 = sbr.rel (%p139_p2) target bundleno = 376 (0x178), region = 32  ;;  %p163_p3 = scmp.lt.s32.totalorder (!%p139_p2), %s2022_s16, 255  ;;  %2289 = vmatprep.subr.bf16.mxu0 (!%p139_p2), %v2433_v0  ;;  %2421 = vmatprep.subr.bf16.mxu1 (!%p139_p2), %v2433_v0 }
   0x7   : > { %2290 = vmatpush3.bf16.msra.mxu0 (!%p139_p2), %v2433_v0  ;;  %2423 = vmatpush3.bf16.msra.mxu1 (!%p139_p2), %v2433_v0  ;;  %p169_p4 = scmp.lt.s32.totalorder (!%p139_p2), %s2024_s23, 63 }
   0x8   : > { %2291 = vmatprep.subr.bf16.mxu0 (!%p139_p2), %v2434_v1  ;;  %2422 = vmatprep.subr.bf16.mxu1 (!%p139_p2), %v2434_v1 }
   0xb   : > { %2292 = vmatpush3.bf16.msra.mxu0 (!%p139_p2), %v2434_v1  ;;  %2424 = vmatpush3.bf16.msra.mxu1 (!%p139_p2), %v2434_v1 }
   0xd   : > { %s2924_s16 = smov (!%p163_p3, %s2022_s16), 255  ;;  %s2926_s23 = smov (!%p169_p4, %s2024_s23), 63 }
   0xe   : > { %s2023_s19 = sshll.u32 %s2924_s16, 2  ;;  %s2025_s26 = sshll.u32 %s2926_s23, 2 }
   0xf   : > { %s2546_s22 = scalar_lea.vmem %s2919_s0, %s2023_s19  ;;  %s2773_s29 = scalar_lea.vmem %s2922_s3, %s2025_s26 }
  0x10   : > { %v2435_v2 = vld [vmem:[%s2546_s22] sm:$0xff]   ;;  %v2437_v4 = vld [vmem:[%s2546_s22 + $0x8] sm:$0xff]   ;;  %v2439_v6 = vld [vmem:[%s2546_s22 + $0x10] sm:$0xff]  }
  0x11   : > { %v2436_v3 = vld [vmem:[%s2546_s22 + $0x100] sm:$0xff]   ;;  %2293 = vmatprep.mubr.msk.bf16.mxu0 %vm639_vm0, %v2435_v2  ;;  %v2438_v5 = vld [vmem:[%s2546_s22 + $0x108] sm:$0xff]   ;;  %v2440_v7 = vld [vmem:[%s2546_s22 + $0x110] sm:$0xff]  }
  0x12   : > { %2357 = vmatprep.mubr.msk.bf16.mxu1 %vm639_vm0, %v2436_v3  ;;  %2294 = vmatmul.mubr.msk.bf16.vlgmr.msra.gmra.mrb[0].mxu0 %vm639_vm0, %v2437_v4  ;;  %v2441_v8 = vld [vmem:[%s2546_s22 + $0x18] sm:$0xff]   ;;  %v2443_v10 = vld [vmem:[%s2546_s22 + $0x20] sm:$0xff]   ;;  %v2445_v12 = vld [vmem:[%s2546_s22 + $0x28] sm:$0xff]  }
  0x13   : > { %2358 = vmatmul.mubr.msk.bf16.vlgmr.msra.gmra.mrb[0].mxu1 %vm639_vm0, %v2438_v5  ;;  %2297 = vmatprep.mubr.msk.bf16.mxu0 %vm639_vm0, %v2439_v6  ;;  %v2442_v9 = vld [vmem:[%s2546_s22 + $0x118] sm:$0xff]   ;;  %v2444_v11 = vld [vmem:[%s2546_s22 + $0x120] sm:$0xff]   ;;  %v2446_v13 = vld [vmem:[%s2546_s22 + $0x128] sm:$0xff]  }
  0x14   : > { %2361 = vmatprep.mubr.msk.bf16.mxu1 %vm639_vm0, %v2440_v7  ;;  %v2447_v14 = vld [vmem:[%s2546_s22 + $0x30] sm:$0xff]   ;;  %v2449_v16 = vld [vmem:[%s2546_s22 + $0x38] sm:$0xff]   ;;  %v2451_v18 = vld [vmem:[%s2546_s22 + $0x40] sm:$0xff]  }
  0x15   : > { %v2448_v15 = vld [vmem:[%s2546_s22 + $0x130] sm:$0xff]   ;;  %v2450_v17 = vld [vmem:[%s2546_s22 + $0x138] sm:$0xff]   ;;  %v2452_v19 = vld [vmem:[%s2546_s22 + $0x140] sm:$0xff]  }
  0x16   : > { %v2453_v20 = vld [vmem:[%s2546_s22 + $0x48] sm:$0xff]   ;;  %v2455_v22 = vld [vmem:[%s2546_s22 + $0x50] sm:$0xff]   ;;  %v2457_v24 = vld [vmem:[%s2546_s22 + $0x58] sm:$0xff]  }
  0x17   : > { %v2454_v21 = vld [vmem:[%s2546_s22 + $0x148] sm:$0xff]   ;;  %v2456_v23 = vld [vmem:[%s2546_s22 + $0x150] sm:$0xff]   ;;  %v2458_v25 = vld [vmem:[%s2546_s22 + $0x158] sm:$0xff]  }
  0x18   : > { %v2459_v26 = vld [vmem:[%s2546_s22 + $0x60] sm:$0xff]   ;;  %v2461_v28 = vld [vmem:[%s2546_s22 + $0x68] sm:$0xff]   ;;  %v2463_v30 = vld [vmem:[%s2546_s22 + $0x70] sm:$0xff]  }
  0x19   : > { %v2460_v27 = vld [vmem:[%s2546_s22 + $0x160] sm:$0xff]   ;;  %v2462_v29 = vld [vmem:[%s2546_s22 + $0x168] sm:$0xff]   ;;  %v2464_v31 = vld [vmem:[%s2546_s22 + $0x170] sm:$0xff]  }
  0x1a   : > { %2298 = vmatmul.mubr.msk.bf16.gmra.mrb[4].mxu0 %vm639_vm0, %v2441_v8  ;;  %v2465_v32 = vld [vmem:[%s2546_s22 + $0x78] sm:$0xff]   ;;  %v2467_v34 = vld [vmem:[%s2546_s22 + $0x80] sm:$0xff]   ;;  %v2469_v36 = vld [vmem:[%s2546_s22 + $0x88] sm:$0xff]  }
  0x1b   : > { %2362 = vmatmul.mubr.msk.bf16.gmra.mrb[4].mxu1 %vm639_vm0, %v2442_v9  ;;  %2301 = vmatprep.mubr.msk.bf16.mxu0 %vm639_vm0, %v2443_v10  ;;  %v2466_v33 = vld [vmem:[%s2546_s22 + $0x178] sm:$0xff]   ;;  %v2468_v35 = vld [vmem:[%s2546_s22 + $0x180] sm:$0xff]   ;;  %v2470_v37 = vld [vmem:[%s2546_s22 + $0x188] sm:$0xff]  }
  0x1c   : > { %2365 = vmatprep.mubr.msk.bf16.mxu1 %vm639_vm0, %v2444_v11  ;;  %v2471_v38 = vld [vmem:[%s2546_s22 + $0x90] sm:$0xff]   ;;  %v2473_v40 = vld [vmem:[%s2546_s22 + $0x98] sm:$0xff]   ;;  %v2475_v42 = vld [vmem:[%s2546_s22 + $0xa0] sm:$0xff]  }
  0x1d   : > { %v2472_v39 = vld [vmem:[%s2546_s22 + $0x190] sm:$0xff]   ;;  %v2474_v41 = vld [vmem:[%s2546_s22 + $0x198] sm:$0xff]   ;;  %v2476_v43 = vld [vmem:[%s2546_s22 + $0x1a0] sm:$0xff]  }
  0x1e   : > { %v2477_v44 = vld [vmem:[%s2546_s22 + $0xa8] sm:$0xff]   ;;  %v2479_v46 = vld [vmem:[%s2546_s22 + $0xb0] sm:$0xff]   ;;  %v2481_v48 = vld [vmem:[%s2546_s22 + $0xb8] sm:$0xff]  }
  0x1f   : > { %v2478_v45 = vld [vmem:[%s2546_s22 + $0x1a8] sm:$0xff]   ;;  %v2480_v47 = vld [vmem:[%s2546_s22 + $0x1b0] sm:$0xff]   ;;  %v2482_v49 = vld [vmem:[%s2546_s22 + $0x1b8] sm:$0xff]  }
  0x20   : > { %v2483_v50 = vld [vmem:[%s2546_s22 + $0xc0] sm:$0xff]   ;;  %v2485_v52 = vld [vmem:[%s2546_s22 + $0xc8] sm:$0xff]   ;;  %v2487_v54 = vld [vmem:[%s2546_s22 + $0xd0] sm:$0xff]  }
  0x21   : > { %v2484_v51 = vld [vmem:[%s2546_s22 + $0x1c0] sm:$0xff]   ;;  %v2486_v53 = vld [vmem:[%s2546_s22 + $0x1c8] sm:$0xff]   ;;  %v2488_v55 = vld [vmem:[%s2546_s22 + $0x1d0] sm:$0xff]  }
  0x22   : > { %2302 = vmatmul.mubr.msk.bf16.gmra.mrb[8].mxu0 %vm639_vm0, %v2445_v12  ;;  %v2489_v56 = vld [vmem:[%s2546_s22 + $0xd8] sm:$0xff]   ;;  %v2491_v58 = vld [vmem:[%s2546_s22 + $0xe0] sm:$0xff]   ;;  %v2493_v60 = vld [vmem:[%s2546_s22 + $0xe8] sm:$0xff]  }
  0x23   : > { %2366 = vmatmul.mubr.msk.bf16.gmra.mrb[8].mxu1 %vm639_vm0, %v2446_v13  ;;  %2305 = vmatprep.mubr.msk.bf16.mxu0 %vm639_vm0, %v2447_v14  ;;  %v2490_v57 = vld [vmem:[%s2546_s22 + $0x1d8] sm:$0xff]   ;;  %v2492_v59 = vld [vmem:[%s2546_s22 + $0x1e0] sm:$0xff]   ;;  %v2494_v61 = vld [vmem:[%s2546_s22 + $0x1e8] sm:$0xff]  }
  0x24   : > { %2369 = vmatprep.mubr.msk.bf16.mxu1 %vm639_vm0, %v2448_v15  ;;  %v2495_v62 = vld [vmem:[%s2546_s22 + $0xf0] sm:$0xff]   ;;  %v2497_v0 = vld [vmem:[%s2546_s22 + $0xf8] sm:$0xff]  }
  0x25   : > { %v2496_v63 = vld [vmem:[%s2546_s22 + $0x1f0] sm:$0xff]   ;;  %v2498_v1 = vld [vmem:[%s2546_s22 + $0x1f8] sm:$0xff]  }
  0x2a   : > { %2306 = vmatmul.mubr.msk.bf16.gmra.mrb[12].mxu0 %vm639_vm0, %v2449_v16 }
  0x2b   : > { %2370 = vmatmul.mubr.msk.bf16.gmra.mrb[12].mxu1 %vm639_vm0, %v2450_v17  ;;  %2309 = vmatprep.mubr.msk.bf16.mxu0 %vm639_vm0, %v2451_v18 }
  0x2c   : > { %2373 = vmatprep.mubr.msk.bf16.mxu1 %vm639_vm0, %v2452_v19 }
  0x32   : > { %2310 = vmatmul.mubr.msk.bf16.gmra.mrb[16].mxu0 %vm639_vm0, %v2453_v20 }
  0x33   : > { %2374 = vmatmul.mubr.msk.bf16.gmra.mrb[16].mxu1 %vm639_vm0, %v2454_v21  ;;  %2313 = vmatprep.mubr.msk.bf16.mxu0 %vm639_vm0, %v2455_v22 }
  0x34   : > { %2377 = vmatprep.mubr.msk.bf16.mxu1 %vm639_vm0, %v2456_v23 }
  0x3a   : > { %2314 = vmatmul.mubr.msk.bf16.gmra.mrb[20].mxu0 %vm639_vm0, %v2457_v24 }
  0x3b   : > { %2378 = vmatmul.mubr.msk.bf16.gmra.mrb[20].mxu1 %vm639_vm0, %v2458_v25  ;;  %2317 = vmatprep.mubr.msk.bf16.mxu0 %vm639_vm0, %v2459_v26 }
  0x3c   : > { %2381 = vmatprep.mubr.msk.bf16.mxu1 %vm639_vm0, %v2460_v27 }
  0x42   : > { %2318 = vmatmul.mubr.msk.bf16.gmra.mrb[24].mxu0 %vm639_vm0, %v2461_v28 }
  0x43   : > { %2382 = vmatmul.mubr.msk.bf16.gmra.mrb[24].mxu1 %vm639_vm0, %v2462_v29  ;;  %2321 = vmatprep.mubr.msk.bf16.mxu0 %vm639_vm0, %v2463_v30 }
  0x44   : > { %2385 = vmatprep.mubr.msk.bf16.mxu1 %vm639_vm0, %v2464_v31 }
  0x4a   : > { %2322 = vmatmul.mubr.msk.bf16.gmra.mrb[28].mxu0 %vm639_vm0, %v2465_v32 }
  0x4b   : > { %2386 = vmatmul.mubr.msk.bf16.gmra.mrb[28].mxu1 %vm639_vm0, %v2466_v33  ;;  %2325 = vmatprep.mubr.msk.bf16.mxu0 %vm639_vm0, %v2467_v34 }
  0x4c   : > { %2389 = vmatprep.mubr.msk.bf16.mxu1 %vm639_vm0, %v2468_v35 }
  0x52   : > { %2326 = vmatmul.mubr.msk.bf16.gmra.mrb[32].mxu0 %vm639_vm0, %v2469_v36 }
  0x53   : > { %2390 = vmatmul.mubr.msk.bf16.gmra.mrb[32].mxu1 %vm639_vm0, %v2470_v37  ;;  %2329 = vmatprep.mubr.msk.bf16.mxu0 %vm639_vm0, %v2471_v38 }
  0x54   : > { %2393 = vmatprep.mubr.msk.bf16.mxu1 %vm639_vm0, %v2472_v39 }
  0x5a   : > { %2330 = vmatmul.mubr.msk.bf16.gmra.mrb[36].mxu0 %vm639_vm0, %v2473_v40 }
  0x5b   : > { %2394 = vmatmul.mubr.msk.bf16.gmra.mrb[36].mxu1 %vm639_vm0, %v2474_v41  ;;  %2333 = vmatprep.mubr.msk.bf16.mxu0 %vm639_vm0, %v2475_v42 }
  0x5c   : > { %2397 = vmatprep.mubr.msk.bf16.mxu1 %vm639_vm0, %v2476_v43 }
  0x62   : > { %2334 = vmatmul.mubr.msk.bf16.gmra.mrb[40].mxu0 %vm639_vm0, %v2477_v44 }
  0x63   : > { %2398 = vmatmul.mubr.msk.bf16.gmra.mrb[40].mxu1 %vm639_vm0, %v2478_v45  ;;  %2337 = vmatprep.mubr.msk.bf16.mxu0 %vm639_vm0, %v2479_v46 }
  0x64   : > { %2401 = vmatprep.mubr.msk.bf16.mxu1 %vm639_vm0, %v2480_v47 }
  0x6a   : > { %2338 = vmatmul.mubr.msk.bf16.gmra.mrb[44].mxu0 %vm639_vm0, %v2481_v48 }
  0x6b   : > { %2402 = vmatmul.mubr.msk.bf16.gmra.mrb[44].mxu1 %vm639_vm0, %v2482_v49  ;;  %2341 = vmatprep.mubr.msk.bf16.mxu0 %vm639_vm0, %v2483_v50 }
  0x6c   : > { %2405 = vmatprep.mubr.msk.bf16.mxu1 %vm639_vm0, %v2484_v51 }
  0x72   : > { %2342 = vmatmul.mubr.msk.bf16.gmra.mrb[48].mxu0 %vm639_vm0, %v2485_v52 }
  0x73   : > { %2406 = vmatmul.mubr.msk.bf16.gmra.mrb[48].mxu1 %vm639_vm0, %v2486_v53  ;;  %2345 = vmatprep.mubr.msk.bf16.mxu0 %vm639_vm0, %v2487_v54 }
  0x74   : > { %2409 = vmatprep.mubr.msk.bf16.mxu1 %vm639_vm0, %v2488_v55 }
  0x7a   : > { %2346 = vmatmul.mubr.msk.bf16.gmra.mrb[52].mxu0 %vm639_vm0, %v2489_v56 }
  0x7b   : > { %2410 = vmatmul.mubr.msk.bf16.gmra.mrb[52].mxu1 %vm639_vm0, %v2490_v57  ;;  %2349 = vmatprep.mubr.msk.bf16.mxu0 %vm639_vm0, %v2491_v58 }
  0x7c   : > { %2413 = vmatprep.mubr.msk.bf16.mxu1 %vm639_vm0, %v2492_v59 }
  0x82   : > { %2350 = vmatmul.mubr.msk.bf16.gmra.mrb[56].mxu0 %vm639_vm0, %v2493_v60 }
  0x83   : > { %2414 = vmatmul.mubr.msk.bf16.gmra.mrb[56].mxu1 %vm639_vm0, %v2494_v61  ;;  %2353 = vmatprep.mubr.msk.bf16.mxu0 %vm639_vm0, %v2495_v62 }
  0x84   : > { %2417 = vmatprep.mubr.msk.bf16.mxu1 %vm639_vm0, %v2496_v63 }
  0x8a   : > { %2354 = vmatmul.mubr.msk.bf16.gmra.mrb[60].mxu0 %vm639_vm0, %v2497_v0 }
  0x8b   : > { %2418 = vmatmul.mubr.msk.bf16.gmra.mrb[60].mxu1 %vm639_vm0, %v2498_v1 }
  0xe5   : > { %v2295_v2 = vpop.f32.mrb[0].mxu0 }
  0xe6   : > { %1379 = vst.msk [vmem:[#allocation2 + $0x10] sm:$0xff] %vm639_vm0, %v2295_v2  ;;  %v2359_v3 = vpop.f32.mrb[0].mxu1  ;;  %v866_v4 = vpop.f32.mrb[1].mxu0 }
  0xe7   : > { %1443 = vst.msk [vmem:[#allocation2 + $0x210] sm:$0xff] %vm639_vm0, %v2359_v3  ;;  %1377 = vst.msk [vmem:[#allocation2] sm:$0xff] %vm639_vm0, %v866_v4  ;;  %v1122_v5 = vpop.f32.mrb[1].mxu1  ;;  %v2296_v6 = vpop.f32.mrb[2].mxu0 }
  0xe8   : > { %1441 = vst.msk [vmem:[#allocation2 + $0x200] sm:$0xff] %vm639_vm0, %v1122_v5  ;;  %1380 = vst.msk [vmem:[#allocation2 + $0x18] sm:$0xff] %vm639_vm0, %v2296_v6  ;;  %v2360_v7 = vpop.f32.mrb[2].mxu1  ;;  %v869_v8 = vpop.f32.mrb[3].mxu0 }
  0xe9   : > { %1444 = vst.msk [vmem:[#allocation2 + $0x218] sm:$0xff] %vm639_vm0, %v2360_v7  ;;  %1378 = vst.msk [vmem:[#allocation2 + $0x8] sm:$0xff] %vm639_vm0, %v869_v8  ;;  %v1125_v9 = vpop.f32.mrb[3].mxu1 }
  0xea   : > { %1442 = vst.msk [vmem:[#allocation2 + $0x208] sm:$0xff] %vm639_vm0, %v1125_v9 }
  0xed   : > { %v2299_v10 = vpop.f32.mrb[4].mxu0 }
  0xee   : > { %1383 = vst.msk [vmem:[#allocation2 + $0x30] sm:$0xff] %vm639_vm0, %v2299_v10  ;;  %v2363_v11 = vpop.f32.mrb[4].mxu1  ;;  %v882_v12 = vpop.f32.mrb[5].mxu0  ;;  %v1507_v10 = vld [vmem:[#allocation2 + $0x10] sm:$0xff] }
  0xef   : > { %1447 = vst.msk [vmem:[#allocation2 + $0x230] sm:$0xff] %vm639_vm0, %v2363_v11  ;;  %1381 = vst.msk [vmem:[#allocation2 + $0x20] sm:$0xff] %vm639_vm0, %v882_v12  ;;  %v1138_v13 = vpop.f32.mrb[5].mxu1  ;;  %v2300_v14 = vpop.f32.mrb[6].mxu0  ;;  %v1603_v11 = vld [vmem:[#allocation2 + $0x210] sm:$0xff]  ;;  %v1505_v12 = vld [vmem:[#allocation2] sm:$0xff] }
  0xf0   : > { %1445 = vst.msk [vmem:[#allocation2 + $0x220] sm:$0xff] %vm639_vm0, %v1138_v13  ;;  %1384 = vst.msk [vmem:[#allocation2 + $0x38] sm:$0xff] %vm639_vm0, %v2300_v14  ;;  %v2364_v15 = vpop.f32.mrb[6].mxu1  ;;  %v885_v16 = vpop.f32.mrb[7].mxu0  ;;  %v1601_v13 = vld [vmem:[#allocation2 + $0x200] sm:$0xff] }
  0xf1   : > { %1448 = vst.msk [vmem:[#allocation2 + $0x238] sm:$0xff] %vm639_vm0, %v2364_v15  ;;  %1382 = vst.msk [vmem:[#allocation2 + $0x28] sm:$0xff] %vm639_vm0, %v885_v16  ;;  %v1141_v17 = vpop.f32.mrb[7].mxu1  ;;  %v1508_v16 = vld [vmem:[#allocation2 + $0x18] sm:$0xff] }
  0xf2   : > { %1446 = vst.msk [vmem:[#allocation2 + $0x228] sm:$0xff] %vm639_vm0, %v1141_v17 }
  0xf5   : > { %v2303_v18 = vpop.f32.mrb[8].mxu0 }
  0xf6   : > { %1387 = vst.msk [vmem:[#allocation2 + $0x50] sm:$0xff] %vm639_vm0, %v2303_v18  ;;  %v2367_v19 = vpop.f32.mrb[8].mxu1  ;;  %v898_v20 = vpop.f32.mrb[9].mxu0 }
  0xf7   : > { %1451 = vst.msk [vmem:[#allocation2 + $0x250] sm:$0xff] %vm639_vm0, %v2367_v19  ;;  %1385 = vst.msk [vmem:[#allocation2 + $0x40] sm:$0xff] %vm639_vm0, %v898_v20  ;;  %v1154_v21 = vpop.f32.mrb[9].mxu1  ;;  %v2304_v22 = vpop.f32.mrb[10].mxu0  ;;  %v2753_v19 = vld [vmem:[%s2921_s2] ss:$0 sm:$0xff] }
  0xf8   : > { %1449 = vst.msk [vmem:[#allocation2 + $0x240] sm:$0xff] %vm639_vm0, %v1154_v21  ;;  %1388 = vst.msk [vmem:[#allocation2 + $0x58] sm:$0xff] %vm639_vm0, %v2304_v22  ;;  %v2368_v23 = vpop.f32.mrb[10].mxu1  ;;  %v901_v24 = vpop.f32.mrb[11].mxu0 }
  0xf9   : > { %1452 = vst.msk [vmem:[#allocation2 + $0x258] sm:$0xff] %vm639_vm0, %v2368_v23  ;;  %1386 = vst.msk [vmem:[#allocation2 + $0x48] sm:$0xff] %vm639_vm0, %v901_v24  ;;  %v1157_v25 = vpop.f32.mrb[11].mxu1  ;;  %v1604_v23 = vld [vmem:[#allocation2 + $0x218] sm:$0xff] }
  0xfa   : > { %1450 = vst.msk [vmem:[#allocation2 + $0x248] sm:$0xff] %vm639_vm0, %v1157_v25 }
  0xfd   : > { %v2307_v26 = vpop.f32.mrb[12].mxu0 }
  0xfe   : > { %1391 = vst.msk [vmem:[#allocation2 + $0x70] sm:$0xff] %vm639_vm0, %v2307_v26  ;;  %v2371_v27 = vpop.f32.mrb[12].mxu1  ;;  %v914_v28 = vpop.f32.mrb[13].mxu0 }
  0xff   : > { %1455 = vst.msk [vmem:[#allocation2 + $0x270] sm:$0xff] %vm639_vm0, %v2371_v27  ;;  %1389 = vst.msk [vmem:[#allocation2 + $0x60] sm:$0xff] %vm639_vm0, %v914_v28  ;;  %v1170_v29 = vpop.f32.mrb[13].mxu1  ;;  %v2308_v30 = vpop.f32.mrb[14].mxu0 }
 0x100   : > { %1453 = vst.msk [vmem:[#allocation2 + $0x260] sm:$0xff] %vm639_vm0, %v1170_v29  ;;  %1392 = vst.msk [vmem:[#allocation2 + $0x78] sm:$0xff] %vm639_vm0, %v2308_v30  ;;  %v2372_v31 = vpop.f32.mrb[14].mxu1  ;;  %v917_v32 = vpop.f32.mrb[15].mxu0  ;;  %v1506_v30 = vld [vmem:[#allocation2 + $0x8] sm:$0xff] }
 0x101   : > { %1456 = vst.msk [vmem:[#allocation2 + $0x278] sm:$0xff] %vm639_vm0, %v2372_v31  ;;  %1390 = vst.msk [vmem:[#allocation2 + $0x68] sm:$0xff] %vm639_vm0, %v917_v32  ;;  %v1173_v33 = vpop.f32.mrb[15].mxu1 }
 0x102   : > { %1454 = vst.msk [vmem:[#allocation2 + $0x268] sm:$0xff] %vm639_vm0, %v1173_v33 }
 0x105   : > { %v2311_v34 = vpop.f32.mrb[16].mxu0 }
 0x106   : > { %1395 = vst.msk [vmem:[#allocation2 + $0x90] sm:$0xff] %vm639_vm0, %v2311_v34  ;;  %v2375_v35 = vpop.f32.mrb[16].mxu1  ;;  %v930_v36 = vpop.f32.mrb[17].mxu0 }
 0x107   : > { %1459 = vst.msk [vmem:[#allocation2 + $0x290] sm:$0xff] %vm639_vm0, %v2375_v35  ;;  %1393 = vst.msk [vmem:[#allocation2 + $0x80] sm:$0xff] %vm639_vm0, %v930_v36  ;;  %v1186_v37 = vpop.f32.mrb[17].mxu1  ;;  %v2312_v38 = vpop.f32.mrb[18].mxu0 }
 0x108   : > { %1457 = vst.msk [vmem:[#allocation2 + $0x280] sm:$0xff] %vm639_vm0, %v1186_v37  ;;  %1396 = vst.msk [vmem:[#allocation2 + $0x98] sm:$0xff] %vm639_vm0, %v2312_v38  ;;  %v2376_v39 = vpop.f32.mrb[18].mxu1  ;;  %v933_v40 = vpop.f32.mrb[19].mxu0  ;;  %v1602_v37 = vld [vmem:[#allocation2 + $0x208] sm:$0xff] }
 0x109   : > { %1460 = vst.msk [vmem:[#allocation2 + $0x298] sm:$0xff] %vm639_vm0, %v2376_v39  ;;  %1394 = vst.msk [vmem:[#allocation2 + $0x88] sm:$0xff] %vm639_vm0, %v933_v40  ;;  %v1189_v41 = vpop.f32.mrb[19].mxu1 }
 0x10a   : > { %1458 = vst.msk [vmem:[#allocation2 + $0x288] sm:$0xff] %vm639_vm0, %v1189_v41 }
 0x10d   : > { %v2315_v42 = vpop.f32.mrb[20].mxu0 }
 0x10e   : > { %1399 = vst.msk [vmem:[#allocation2 + $0xb0] sm:$0xff] %vm639_vm0, %v2315_v42  ;;  %v2379_v43 = vpop.f32.mrb[20].mxu1  ;;  %v946_v44 = vpop.f32.mrb[21].mxu0 }
 0x10f   : > { %1463 = vst.msk [vmem:[#allocation2 + $0x2b0] sm:$0xff] %vm639_vm0, %v2379_v43  ;;  %1397 = vst.msk [vmem:[#allocation2 + $0xa0] sm:$0xff] %vm639_vm0, %v946_v44  ;;  %v1202_v45 = vpop.f32.mrb[21].mxu1  ;;  %v2316_v46 = vpop.f32.mrb[22].mxu0 }
 0x110   : > { %1461 = vst.msk [vmem:[#allocation2 + $0x2a0] sm:$0xff] %vm639_vm0, %v1202_v45  ;;  %1400 = vst.msk [vmem:[#allocation2 + $0xb8] sm:$0xff] %vm639_vm0, %v2316_v46  ;;  %v2380_v47 = vpop.f32.mrb[22].mxu1  ;;  %v949_v48 = vpop.f32.mrb[23].mxu0 }
 0x111   : > { %1464 = vst.msk [vmem:[#allocation2 + $0x2b8] sm:$0xff] %vm639_vm0, %v2380_v47  ;;  %1398 = vst.msk [vmem:[#allocation2 + $0xa8] sm:$0xff] %vm639_vm0, %v949_v48  ;;  %v1205_v49 = vpop.f32.mrb[23].mxu1  ;;  %v1511_v47 = vld [vmem:[#allocation2 + $0x30] sm:$0xff] }
 0x112   : > { %1462 = vst.msk [vmem:[#allocation2 + $0x2a8] sm:$0xff] %vm639_vm0, %v1205_v49  ;;  %v1607_v48 = vld [vmem:[#allocation2 + $0x230] sm:$0xff] }
 0x115   : > { %v2319_v50 = vpop.f32.mrb[24].mxu0 }
 0x116   : > { %1403 = vst.msk [vmem:[#allocation2 + $0xd0] sm:$0xff] %vm639_vm0, %v2319_v50  ;;  %v2383_v51 = vpop.f32.mrb[24].mxu1  ;;  %v962_v52 = vpop.f32.mrb[25].mxu0 }
 0x117   : > { %1467 = vst.msk [vmem:[#allocation2 + $0x2d0] sm:$0xff] %vm639_vm0, %v2383_v51  ;;  %1401 = vst.msk [vmem:[#allocation2 + $0xc0] sm:$0xff] %vm639_vm0, %v962_v52  ;;  %v1218_v53 = vpop.f32.mrb[25].mxu1  ;;  %v2320_v54 = vpop.f32.mrb[26].mxu0  ;;  %v1509_v51 = vld [vmem:[#allocation2 + $0x20] sm:$0xff] }
 0x118   : > { %1465 = vst.msk [vmem:[#allocation2 + $0x2c0] sm:$0xff] %vm639_vm0, %v1218_v53  ;;  %1404 = vst.msk [vmem:[#allocation2 + $0xd8] sm:$0xff] %vm639_vm0, %v2320_v54  ;;  %v2384_v55 = vpop.f32.mrb[26].mxu1  ;;  %v965_v56 = vpop.f32.mrb[27].mxu0  ;;  %v1605_v52 = vld [vmem:[#allocation2 + $0x220] sm:$0xff] }
 0x119   : > { %1468 = vst.msk [vmem:[#allocation2 + $0x2d8] sm:$0xff] %vm639_vm0, %v2384_v55  ;;  %1402 = vst.msk [vmem:[#allocation2 + $0xc8] sm:$0xff] %vm639_vm0, %v965_v56  ;;  %v1221_v57 = vpop.f32.mrb[27].mxu1 }
 0x11a   : > { %1466 = vst.msk [vmem:[#allocation2 + $0x2c8] sm:$0xff] %vm639_vm0, %v1221_v57  ;;  %v1512_v57 = vld [vmem:[#allocation2 + $0x38] sm:$0xff] }
 0x11d   : > { %v2323_v58 = vpop.f32.mrb[28].mxu0 }
 0x11e   : > { %1407 = vst.msk [vmem:[#allocation2 + $0xf0] sm:$0xff] %vm639_vm0, %v2323_v58  ;;  %v2387_v59 = vpop.f32.mrb[28].mxu1  ;;  %v978_v60 = vpop.f32.mrb[29].mxu0 }
 0x11f   : > { %1471 = vst.msk [vmem:[#allocation2 + $0x2f0] sm:$0xff] %vm639_vm0, %v2387_v59  ;;  %1405 = vst.msk [vmem:[#allocation2 + $0xe0] sm:$0xff] %vm639_vm0, %v978_v60  ;;  %v1234_v61 = vpop.f32.mrb[29].mxu1  ;;  %v2324_v62 = vpop.f32.mrb[30].mxu0 }
 0x120   : > { %1469 = vst.msk [vmem:[#allocation2 + $0x2e0] sm:$0xff] %vm639_vm0, %v1234_v61  ;;  %1408 = vst.msk [vmem:[#allocation2 + $0xf8] sm:$0xff] %vm639_vm0, %v2324_v62  ;;  %v2388_v63 = vpop.f32.mrb[30].mxu1  ;;  %v981_v0 = vpop.f32.mrb[31].mxu0 }
 0x121   : > { %1472 = vst.msk [vmem:[#allocation2 + $0x2f8] sm:$0xff] %vm639_vm0, %v2388_v63  ;;  %1406 = vst.msk [vmem:[#allocation2 + $0xe8] sm:$0xff] %vm639_vm0, %v981_v0  ;;  %v1237_v1 = vpop.f32.mrb[31].mxu1 }
 0x122   : > { %1470 = vst.msk [vmem:[#allocation2 + $0x2e8] sm:$0xff] %vm639_vm0, %v1237_v1  ;;  %v1608_v1 = vld [vmem:[#allocation2 + $0x238] sm:$0xff] }
 0x125   : > { %v2327_v2 = vpop.f32.mrb[32].mxu0 }
 0x126   : > { %1411 = vst.msk [vmem:[#allocation2 + $0x110] sm:$0xff] %vm639_vm0, %v2327_v2  ;;  %v2391_v3 = vpop.f32.mrb[32].mxu1  ;;  %v994_v4 = vpop.f32.mrb[33].mxu0 }
 0x127   : > { %1475 = vst.msk [vmem:[#allocation2 + $0x310] sm:$0xff] %vm639_vm0, %v2391_v3  ;;  %1409 = vst.msk [vmem:[#allocation2 + $0x100] sm:$0xff] %vm639_vm0, %v994_v4  ;;  %v1250_v5 = vpop.f32.mrb[33].mxu1  ;;  %v2328_v6 = vpop.f32.mrb[34].mxu0 }
 0x128   : > { %1473 = vst.msk [vmem:[#allocation2 + $0x300] sm:$0xff] %vm639_vm0, %v1250_v5  ;;  %1412 = vst.msk [vmem:[#allocation2 + $0x118] sm:$0xff] %vm639_vm0, %v2328_v6  ;;  %v2392_v7 = vpop.f32.mrb[34].mxu1  ;;  %v997_v8 = vpop.f32.mrb[35].mxu0 }
 0x129   : > { %1476 = vst.msk [vmem:[#allocation2 + $0x318] sm:$0xff] %vm639_vm0, %v2392_v7  ;;  %1410 = vst.msk [vmem:[#allocation2 + $0x108] sm:$0xff] %vm639_vm0, %v997_v8  ;;  %v1253_v9 = vpop.f32.mrb[35].mxu1 }
 0x12a   : > { %1474 = vst.msk [vmem:[#allocation2 + $0x308] sm:$0xff] %vm639_vm0, %v1253_v9 }
 0x12d   : > { %v1539_v14 = vld [vmem:[#allocation2 + $0x110] sm:$0xff]  ;;  %v2331_v15 = vpop.f32.mrb[36].mxu0 }
 0x12e   : > { %v1571_v17 = vmax.f32 %v1507_v10, %v1539_v14  ;;  %v1635_v18 = vld [vmem:[#allocation2 + $0x310] sm:$0xff]  ;;  %v1537_v20 = vld [vmem:[#allocation2 + $0x100] sm:$0xff]  ;;  %1415 = vst.msk [vmem:[#allocation2 + $0x130] sm:$0xff] %vm639_vm0, %v2331_v15  ;;  %v2395_v21 = vpop.f32.mrb[36].mxu1  ;;  %v1010_v22 = vpop.f32.mrb[37].mxu0  ;;  %v1510_v10 = vld [vmem:[#allocation2 + $0x28] sm:$0xff] }
 0x12f   : > { %v1667_v24 = vmax.f32 %v1603_v11, %v1635_v18  ;;  %v1569_v25 = vmax.f32 %v1505_v12, %v1537_v20  ;;  %v1633_v26 = vld [vmem:[#allocation2 + $0x300] sm:$0xff]  ;;  %v1540_v27 = vld [vmem:[#allocation2 + $0x118] sm:$0xff]  ;;  %1479 = vst.msk [vmem:[#allocation2 + $0x330] sm:$0xff] %vm639_vm0, %v2395_v21  ;;  %1413 = vst.msk [vmem:[#allocation2 + $0x120] sm:$0xff] %vm639_vm0, %v1010_v22  ;;  %v1266_v28 = vpop.f32.mrb[37].mxu1  ;;  %v2332_v29 = vpop.f32.mrb[38].mxu0 }
 0x130   : > { %v1665_v31 = vmax.f32 %v1601_v13, %v1633_v26  ;;  %v1572_v32 = vmax.f32 %v1508_v16, %v1540_v27  ;;  %v1636_v33 = vld [vmem:[#allocation2 + $0x318] sm:$0xff]  ;;  %v1538_v34 = vld [vmem:[#allocation2 + $0x108] sm:$0xff]  ;;  %1477 = vst.msk [vmem:[#allocation2 + $0x320] sm:$0xff] %vm639_vm0, %v1266_v28  ;;  %1416 = vst.msk [vmem:[#allocation2 + $0x138] sm:$0xff] %vm639_vm0, %v2332_v29  ;;  %v2396_v35 = vpop.f32.mrb[38].mxu1  ;;  %v1013_v36 = vpop.f32.mrb[39].mxu0 }
 0x131   : > { %v1699_v38 = vmax.f32 %v1571_v17, %v1667_v24  ;;  %v1668_v39 = vmax.f32 %v1604_v23, %v1636_v33  ;;  %v1570_v40 = vmax.f32 %v1506_v30, %v1538_v34  ;;  %v1634_v41 = vld [vmem:[#allocation2 + $0x308] sm:$0xff]  ;;  %1480 = vst.msk [vmem:[#allocation2 + $0x338] sm:$0xff] %vm639_vm0, %v2396_v35  ;;  %1414 = vst.msk [vmem:[#allocation2 + $0x128] sm:$0xff] %vm639_vm0, %v1013_v36  ;;  %v1269_v42 = vpop.f32.mrb[39].mxu1  ;;  %v1611_v33 = vld [vmem:[#allocation2 + $0x250] sm:$0xff] }
 0x132   : > { %v1697_v43 = vmax.f32 %v1569_v25, %v1665_v31  ;;  %v1666_v44 = vmax.f32 %v1602_v37, %v1634_v41  ;;  %1478 = vst.msk [vmem:[#allocation2 + $0x328] sm:$0xff] %vm639_vm0, %v1269_v42  ;;  %v1606_v20 = vld [vmem:[#allocation2 + $0x228] sm:$0xff]  ;;  %v1513_v36 = vld [vmem:[#allocation2 + $0x40] sm:$0xff]  ;;  %v1516_v42 = vld [vmem:[#allocation2 + $0x58] sm:$0xff] }
 0x133   : > { %v1738_v45 = vadd.f32 %v2753_v19, %v1699_v38  ;;  %v1700_v46 = vmax.f32 %v1572_v32, %v1668_v39  ;;  %v1515_v32 = vld [vmem:[#allocation2 + $0x50] sm:$0xff]  ;;  %v1609_v37 = vld [vmem:[#allocation2 + $0x240] sm:$0xff] }
 0x134   : > { %v1736_v49 = vadd.f32 %v2753_v19, %v1697_v43  ;;  %v1698_v50 = vmax.f32 %v1570_v40, %v1666_v44 }
 0x135   : > { %v1770_v53 = vmax.f32 %v1738_v45, 0.0  ;;  %v1739_v54 = vadd.f32 %v2753_v19, %v1700_v46  ;;  %v1543_v55 = vld [vmem:[#allocation2 + $0x130] sm:$0xff]  ;;  %v2335_v56 = vpop.f32.mrb[40].mxu0 }
 0x136   : > { %v1768_v58 = vmax.f32 %v1736_v49, 0.0  ;;  %v1737_v59 = vadd.f32 %v2753_v19, %v1698_v50  ;;  %v1575_v60 = vmax.f32 %v1511_v47, %v1543_v55  ;;  %v1639_v61 = vld [vmem:[#allocation2 + $0x330] sm:$0xff]  ;;  %v1541_v62 = vld [vmem:[#allocation2 + $0x120] sm:$0xff]  ;;  %1419 = vst.msk [vmem:[#allocation2 + $0x150] sm:$0xff] %vm639_vm0, %v2335_v56  ;;  %v2399_v63 = vpop.f32.mrb[40].mxu1  ;;  %v1026_v0 = vpop.f32.mrb[41].mxu0 }
 0x137   : > { %v2193_v2 = vpack.c.bf16 %v1770_v53, %v1770_v53  ;;  %v1771_v3 = vmax.f32 %v1739_v54, 0.0  ;;  %v1671_v4 = vmax.f32 %v1607_v48, %v1639_v61  ;;  %v1573_v5 = vmax.f32 %v1509_v51, %v1541_v62  ;;  %v1637_v6 = vld [vmem:[#allocation2 + $0x320] sm:$0xff]  ;;  %v1544_v7 = vld [vmem:[#allocation2 + $0x138] sm:$0xff]  ;;  %1483 = vst.msk [vmem:[#allocation2 + $0x350] sm:$0xff] %vm639_vm0, %v2399_v63  ;;  %1417 = vst.msk [vmem:[#allocation2 + $0x140] sm:$0xff] %vm639_vm0, %v1026_v0  ;;  %v1282_v8 = vpop.f32.mrb[41].mxu1 }
 0x138   : > { %v2336_v9 = vpop.f32.mrb[42].mxu0  ;;  %v2191_v11 = vpack.c.bf16 %v1768_v58, %v1768_v58  ;;  %v1769_v12 = vmax.f32 %v1737_v59, 0.0  ;;  %v1669_v13 = vmax.f32 %v1605_v52, %v1637_v6  ;;  %v1576_v14 = vmax.f32 %v1512_v57, %v1544_v7  ;;  %v1640_v15 = vld [vmem:[#allocation2 + $0x338] sm:$0xff]  ;;  %v1542_v16 = vld [vmem:[#allocation2 + $0x128] sm:$0xff]  ;;  %1481 = vst.msk [vmem:[#allocation2 + $0x340] sm:$0xff] %vm639_vm0, %v1282_v8  ;;  %v2400_v17 = vpop.f32.mrb[42].mxu1 }
 0x139   : > { %1420 = vst.msk [vmem:[#allocation2 + $0x158] sm:$0xff] %vm639_vm0, %v2336_v9  ;;  %v1029_v18 = vpop.f32.mrb[43].mxu0  ;;  %v2194_v21 = vpack.c.bf16 %v1771_v3, %v1771_v3  ;;  %v1703_v22 = vmax.f32 %v1575_v60, %v1671_v4  ;;  %v1672_v23 = vmax.f32 %v1608_v1, %v1640_v15  ;;  %v1574_v24 = vmax.f32 %v1510_v10, %v1542_v16  ;;  %v1638_v25 = vld [vmem:[#allocation2 + $0x328] sm:$0xff]  ;;  %v1285_v26 = vpop.f32.mrb[43].mxu1  ;;  %v1612_v50 = vld [vmem:[#allocation2 + $0x258] sm:$0xff]  ;;  %v1519_v16 = vld [vmem:[#allocation2 + $0x70] sm:$0xff] }
 0x13a   : > { %1931 = vst.msk [vmem:[%s2773_s29 + $0x8] sm:$0xf] %vm1928_vm1, %v2193_v2  ;;  %1929 = vst.msk [vmem:[%s2773_s29] sm:$0xf] %vm1928_vm1, %v2191_v11  ;;  %v2192_v27 = vpack.c.bf16 %v1769_v12, %v1769_v12  ;;  %v1701_v28 = vmax.f32 %v1573_v5, %v1669_v13  ;;  %v1670_v29 = vmax.f32 %v1606_v20, %v1638_v25  ;;  %v1514_v59 = vld [vmem:[#allocation2 + $0x48] sm:$0xff] }
 0x13b   : > { %1484 = vst.msk [vmem:[#allocation2 + $0x358] sm:$0xff] %vm639_vm0, %v2400_v17  ;;  %1418 = vst.msk [vmem:[#allocation2 + $0x148] sm:$0xff] %vm639_vm0, %v1029_v18  ;;  %v1742_v30 = vadd.f32 %v2753_v19, %v1703_v22  ;;  %v1704_v31 = vmax.f32 %v1576_v14, %v1672_v23  ;;  %v1610_v4 = vld [vmem:[#allocation2 + $0x248] sm:$0xff]  ;;  %v1615_v17 = vld [vmem:[#allocation2 + $0x270] sm:$0xff] }
 0x13c   : > { %1482 = vst.msk [vmem:[#allocation2 + $0x348] sm:$0xff] %vm639_vm0, %v1285_v26  ;;  %v1740_v34 = vadd.f32 %v2753_v19, %v1701_v28  ;;  %v1702_v35 = vmax.f32 %v1574_v24, %v1670_v29  ;;  %v1613_v22 = vld [vmem:[#allocation2 + $0x260] sm:$0xff] }
 0x13d   : > { %1932 = vst.msk [vmem:[%s2773_s29 + $0xc] sm:$0xf] %vm1928_vm1, %v2194_v21  ;;  %1930 = vst.msk [vmem:[%s2773_s29 + $0x4] sm:$0xf] %vm1928_vm1, %v2192_v27  ;;  %v1774_v38 = vmax.f32 %v1742_v30, 0.0  ;;  %v1743_v39 = vadd.f32 %v2753_v19, %v1704_v31  ;;  %v1547_v40 = vld [vmem:[#allocation2 + $0x150] sm:$0xff] }
 0x13e   : > { %v2339_v41 = vpop.f32.mrb[44].mxu0  ;;  %v1772_v43 = vmax.f32 %v1740_v34, 0.0  ;;  %v1741_v44 = vadd.f32 %v2753_v19, %v1702_v35  ;;  %v1579_v45 = vmax.f32 %v1515_v32, %v1547_v40  ;;  %v1643_v46 = vld [vmem:[#allocation2 + $0x350] sm:$0xff]  ;;  %v1545_v47 = vld [vmem:[#allocation2 + $0x140] sm:$0xff]  ;;  %v2403_v48 = vpop.f32.mrb[44].mxu1  ;;  %v1520_v27 = vld [vmem:[#allocation2 + $0x78] sm:$0xff] }
 0x13f   : > { %1423 = vst.msk [vmem:[#allocation2 + $0x170] sm:$0xff] %vm639_vm0, %v2339_v41  ;;  %v1042_v49 = vpop.f32.mrb[45].mxu0  ;;  %v2197_v51 = vpack.c.bf16 %v1774_v38, %v1774_v38  ;;  %v1775_v52 = vmax.f32 %v1743_v39, 0.0  ;;  %v1675_v53 = vmax.f32 %v1611_v33, %v1643_v46  ;;  %v1577_v54 = vmax.f32 %v1513_v36, %v1545_v47  ;;  %v1641_v55 = vld [vmem:[#allocation2 + $0x340] sm:$0xff]  ;;  %1487 = vst.msk [vmem:[#allocation2 + $0x370] sm:$0xff] %vm639_vm0, %v2403_v48  ;;  %v1298_v57 = vpop.f32.mrb[45].mxu1 }
 0x140   : > { %v1548_v56 = vld [vmem:[#allocation2 + $0x158] sm:$0xff]  ;;  %1421 = vst.msk [vmem:[#allocation2 + $0x160] sm:$0xff] %vm639_vm0, %v1042_v49  ;;  %v2340_v58 = vpop.f32.mrb[46].mxu0  ;;  %v2195_v60 = vpack.c.bf16 %v1772_v43, %v1772_v43  ;;  %v1773_v61 = vmax.f32 %v1741_v44, 0.0  ;;  %v1673_v62 = vmax.f32 %v1609_v37, %v1641_v55  ;;  %1485 = vst.msk [vmem:[#allocation2 + $0x360] sm:$0xff] %vm639_vm0, %v1298_v57  ;;  %v2404_v2 = vpop.f32.mrb[46].mxu1 }
 0x141   : > { %v1580_v63 = vmax.f32 %v1516_v42, %v1548_v56  ;;  %1424 = vst.msk [vmem:[#allocation2 + $0x178] sm:$0xff] %vm639_vm0, %v2340_v58  ;;  %v1045_v3 = vpop.f32.mrb[47].mxu0  ;;  %v2198_v5 = vpack.c.bf16 %v1775_v52, %v1775_v52  ;;  %v1707_v6 = vmax.f32 %v1579_v45, %v1675_v53  ;;  %1488 = vst.msk [vmem:[#allocation2 + $0x378] sm:$0xff] %vm639_vm0, %v2404_v2  ;;  %v1301_v10 = vpop.f32.mrb[47].mxu1  ;;  %v1517_v21 = vld [vmem:[#allocation2 + $0x60] sm:$0xff]  ;;  %v1616_v35 = vld [vmem:[#allocation2 + $0x278] sm:$0xff] }
 0x142   : > { %v1644_v0 = vld [vmem:[#allocation2 + $0x358] sm:$0xff]  ;;  %v1546_v1 = vld [vmem:[#allocation2 + $0x148] sm:$0xff]  ;;  %1935 = vst.msk [vmem:[%s2773_s29 + $0x18] sm:$0xf] %vm1928_vm1, %v2197_v51  ;;  %1933 = vst.msk [vmem:[%s2773_s29 + $0x10] sm:$0xf] %vm1928_vm1, %v2195_v60  ;;  %v2196_v11 = vpack.c.bf16 %v1773_v61, %v1773_v61  ;;  %v1705_v12 = vmax.f32 %v1577_v54, %v1673_v62 }
 0x143   : > { %v1676_v7 = vmax.f32 %v1612_v50, %v1644_v0  ;;  %v1578_v8 = vmax.f32 %v1514_v59, %v1546_v1  ;;  %v1642_v9 = vld [vmem:[#allocation2 + $0x348] sm:$0xff]  ;;  %1422 = vst.msk [vmem:[#allocation2 + $0x168] sm:$0xff] %vm639_vm0, %v1045_v3  ;;  %1486 = vst.msk [vmem:[#allocation2 + $0x368] sm:$0xff] %vm639_vm0, %v1301_v10  ;;  %v1746_v14 = vadd.f32 %v2753_v19, %v1707_v6  ;;  %v1523_v1 = vld [vmem:[#allocation2 + $0x90] sm:$0xff] }
 0x144   : > { %v1674_v13 = vmax.f32 %v1610_v4, %v1642_v9  ;;  %1936 = vst.msk [vmem:[%s2773_s29 + $0x1c] sm:$0xf] %vm1928_vm1, %v2198_v5  ;;  %1934 = vst.msk [vmem:[%s2773_s29 + $0x14] sm:$0xf] %vm1928_vm1, %v2196_v11  ;;  %v1744_v18 = vadd.f32 %v2753_v19, %v1705_v12  ;;  %v1518_v44 = vld [vmem:[#allocation2 + $0x68] sm:$0xff]  ;;  %v1619_v2 = vld [vmem:[#allocation2 + $0x290] sm:$0xff] }
 0x145   : > { %v1708_v15 = vmax.f32 %v1580_v63, %v1676_v7  ;;  %v1778_v23 = vmax.f32 %v1746_v14, 0.0  ;;  %v2343_v26 = vpop.f32.mrb[48].mxu0  ;;  %v1614_v53 = vld [vmem:[#allocation2 + $0x268] sm:$0xff]  ;;  %v1521_v5 = vld [vmem:[#allocation2 + $0x80] sm:$0xff]  ;;  %v1524_v11 = vld [vmem:[#allocation2 + $0x98] sm:$0xff] }
 0x146   : > { %v1706_v20 = vmax.f32 %v1578_v8, %v1674_v13  ;;  %v1551_v25 = vld [vmem:[#allocation2 + $0x170] sm:$0xff]  ;;  %v1776_v28 = vmax.f32 %v1744_v18, 0.0  ;;  %1427 = vst.msk [vmem:[#allocation2 + $0x190] sm:$0xff] %vm639_vm0, %v2343_v26  ;;  %v2407_v33 = vpop.f32.mrb[48].mxu1  ;;  %v1058_v34 = vpop.f32.mrb[49].mxu0  ;;  %v1617_v6 = vld [vmem:[#allocation2 + $0x280] sm:$0xff] }
 0x147   : > { %v1747_v24 = vadd.f32 %v2753_v19, %v1708_v15  ;;  %v1583_v30 = vmax.f32 %v1519_v16, %v1551_v25  ;;  %v1647_v31 = vld [vmem:[#allocation2 + $0x370] sm:$0xff]  ;;  %v1549_v32 = vld [vmem:[#allocation2 + $0x160] sm:$0xff]  ;;  %v2201_v36 = vpack.c.bf16 %v1778_v23, %v1778_v23  ;;  %1491 = vst.msk [vmem:[#allocation2 + $0x390] sm:$0xff] %vm639_vm0, %v2407_v33  ;;  %1425 = vst.msk [vmem:[#allocation2 + $0x180] sm:$0xff] %vm639_vm0, %v1058_v34  ;;  %v1314_v42 = vpop.f32.mrb[49].mxu1  ;;  %v2344_v43 = vpop.f32.mrb[50].mxu0 }
 0x148   : > { %v1745_v29 = vadd.f32 %v2753_v19, %v1706_v20  ;;  %v1679_v38 = vmax.f32 %v1615_v17, %v1647_v31  ;;  %v1581_v39 = vmax.f32 %v1517_v21, %v1549_v32  ;;  %v1645_v40 = vld [vmem:[#allocation2 + $0x360] sm:$0xff]  ;;  %v1552_v41 = vld [vmem:[#allocation2 + $0x178] sm:$0xff]  ;;  %v2199_v45 = vpack.c.bf16 %v1776_v28, %v1776_v28  ;;  %1489 = vst.msk [vmem:[#allocation2 + $0x380] sm:$0xff] %vm639_vm0, %v1314_v42  ;;  %v2408_v51 = vpop.f32.mrb[50].mxu1  ;;  %v1061_v52 = vpop.f32.mrb[51].mxu0 }
 0x149   : > { %v1779_v37 = vmax.f32 %v1747_v24, 0.0  ;;  %v1677_v47 = vmax.f32 %v1613_v22, %v1645_v40  ;;  %v1584_v48 = vmax.f32 %v1520_v27, %v1552_v41  ;;  %v1648_v49 = vld [vmem:[#allocation2 + $0x378] sm:$0xff]  ;;  %1428 = vst.msk [vmem:[#allocation2 + $0x198] sm:$0xff] %vm639_vm0, %v2344_v43  ;;  %1492 = vst.msk [vmem:[#allocation2 + $0x398] sm:$0xff] %vm639_vm0, %v2408_v51  ;;  %v1317_v59 = vpop.f32.mrb[51].mxu1  ;;  %v1623_v51 = vld [vmem:[#allocation2 + $0x2b0] sm:$0xff] }
 0x14a   : > { %v1777_v46 = vmax.f32 %v1745_v29, 0.0  ;;  %v1550_v50 = vld [vmem:[#allocation2 + $0x168] sm:$0xff]  ;;  %1939 = vst.msk [vmem:[%s2773_s29 + $0x28] sm:$0xf] %vm1928_vm1, %v2201_v36  ;;  %v1711_v55 = vmax.f32 %v1583_v30, %v1679_v38  ;;  %v1680_v56 = vmax.f32 %v1616_v35, %v1648_v49  ;;  %1937 = vst.msk [vmem:[%s2773_s29 + $0x20] sm:$0xf] %vm1928_vm1, %v2199_v45 }
 0x14b   : > { %v2202_v54 = vpack.c.bf16 %v1779_v37, %v1779_v37  ;;  %v1582_v57 = vmax.f32 %v1518_v44, %v1550_v50  ;;  %v1646_v58 = vld [vmem:[#allocation2 + $0x368] sm:$0xff]  ;;  %1426 = vst.msk [vmem:[#allocation2 + $0x188] sm:$0xff] %vm639_vm0, %v1061_v52  ;;  %v1709_v61 = vmax.f32 %v1581_v39, %v1677_v47  ;;  %1490 = vst.msk [vmem:[#allocation2 + $0x388] sm:$0xff] %vm639_vm0, %v1317_v59  ;;  %v1620_v20 = vld [vmem:[#allocation2 + $0x298] sm:$0xff] }
 0x14c   : > { %v2200_v60 = vpack.c.bf16 %v1777_v46, %v1777_v46  ;;  %v1678_v62 = vmax.f32 %v1614_v53, %v1646_v58  ;;  %v1750_v63 = vadd.f32 %v2753_v19, %v1711_v55  ;;  %v1712_v0 = vmax.f32 %v1584_v48, %v1680_v56  ;;  %v1522_v29 = vld [vmem:[#allocation2 + $0x88] sm:$0xff]  ;;  %v1527_v50 = vld [vmem:[#allocation2 + $0xb0] sm:$0xff]  ;;  %v1621_v55 = vld [vmem:[#allocation2 + $0x2a0] sm:$0xff] }
 0x14d   : > { %1940 = vst.msk [vmem:[%s2773_s29 + $0x2c] sm:$0xf] %vm1928_vm1, %v2202_v54  ;;  %v1748_v3 = vadd.f32 %v2753_v19, %v1709_v61  ;;  %v1555_v9 = vld [vmem:[#allocation2 + $0x190] sm:$0xff]  ;;  %v2347_v10 = vpop.f32.mrb[52].mxu0  ;;  %v1618_v38 = vld [vmem:[#allocation2 + $0x288] sm:$0xff]  ;;  %v1525_v54 = vld [vmem:[#allocation2 + $0xa0] sm:$0xff] }
 0x14e   : > { %1938 = vst.msk [vmem:[%s2773_s29 + $0x24] sm:$0xf] %vm1928_vm1, %v2200_v60  ;;  %v1710_v4 = vmax.f32 %v1582_v57, %v1678_v62  ;;  %v1782_v7 = vmax.f32 %v1750_v63, 0.0  ;;  %v1751_v8 = vadd.f32 %v2753_v19, %v1712_v0  ;;  %v1587_v14 = vmax.f32 %v1523_v1, %v1555_v9  ;;  %v1651_v15 = vld [vmem:[#allocation2 + $0x390] sm:$0xff]  ;;  %v1553_v16 = vld [vmem:[#allocation2 + $0x180] sm:$0xff]  ;;  %v2411_v17 = vpop.f32.mrb[52].mxu1 }
 0x14f   : > { %v1780_v12 = vmax.f32 %v1748_v3, 0.0  ;;  %1431 = vst.msk [vmem:[#allocation2 + $0x1b0] sm:$0xff] %vm639_vm0, %v2347_v10  ;;  %v1074_v18 = vpop.f32.mrb[53].mxu0  ;;  %v1683_v23 = vmax.f32 %v1619_v2, %v1651_v15  ;;  %v1585_v24 = vmax.f32 %v1521_v5, %v1553_v16  ;;  %v1649_v25 = vld [vmem:[#allocation2 + $0x380] sm:$0xff]  ;;  %1495 = vst.msk [vmem:[#allocation2 + $0x3b0] sm:$0xff] %vm639_vm0, %v2411_v17  ;;  %v1330_v27 = vpop.f32.mrb[53].mxu1 }
 0x150   : > { %v1749_v13 = vadd.f32 %v2753_v19, %v1710_v4  ;;  %v2205_v21 = vpack.c.bf16 %v1782_v7, %v1782_v7  ;;  %v1783_v22 = vmax.f32 %v1751_v8, 0.0  ;;  %v1556_v26 = vld [vmem:[#allocation2 + $0x198] sm:$0xff]  ;;  %1429 = vst.msk [vmem:[#allocation2 + $0x1a0] sm:$0xff] %vm639_vm0, %v1074_v18  ;;  %v2348_v28 = vpop.f32.mrb[54].mxu0  ;;  %v1681_v32 = vmax.f32 %v1617_v6, %v1649_v25  ;;  %1493 = vst.msk [vmem:[#allocation2 + $0x3a0] sm:$0xff] %vm639_vm0, %v1330_v27  ;;  %v2412_v36 = vpop.f32.mrb[54].mxu1 }
 0x151   : > { %v2203_v30 = vpack.c.bf16 %v1780_v12, %v1780_v12  ;;  %v1588_v33 = vmax.f32 %v1524_v11, %v1556_v26  ;;  %v1652_v34 = vld [vmem:[#allocation2 + $0x398] sm:$0xff]  ;;  %1432 = vst.msk [vmem:[#allocation2 + $0x1b8] sm:$0xff] %vm639_vm0, %v2348_v28  ;;  %v1077_v37 = vpop.f32.mrb[55].mxu0  ;;  %v1715_v40 = vmax.f32 %v1587_v14, %v1683_v23  ;;  %1496 = vst.msk [vmem:[#allocation2 + $0x3b8] sm:$0xff] %vm639_vm0, %v2412_v36  ;;  %v1333_v44 = vpop.f32.mrb[55].mxu1  ;;  %v1622_v23 = vld [vmem:[#allocation2 + $0x2a8] sm:$0xff] }
 0x152   : > { %v1781_v31 = vmax.f32 %v1749_v13, 0.0  ;;  %v1554_v35 = vld [vmem:[#allocation2 + $0x188] sm:$0xff]  ;;  %1943 = vst.msk [vmem:[%s2773_s29 + $0x38] sm:$0xf] %vm1928_vm1, %v2205_v21  ;;  %v2206_v39 = vpack.c.bf16 %v1783_v22, %v1783_v22  ;;  %v1684_v41 = vmax.f32 %v1620_v20, %v1652_v34  ;;  %v1713_v46 = vmax.f32 %v1585_v24, %v1681_v32  ;;  %v1528_v60 = vld [vmem:[#allocation2 + $0xb8] sm:$0xff]  ;;  %v1627_v36 = vld [vmem:[#allocation2 + $0x2d0] sm:$0xff] }
 0x153   : > { %v1586_v42 = vmax.f32 %v1522_v29, %v1554_v35  ;;  %v1650_v43 = vld [vmem:[#allocation2 + $0x388] sm:$0xff]  ;;  %1430 = vst.msk [vmem:[#allocation2 + $0x1a8] sm:$0xff] %vm639_vm0, %v1077_v37  ;;  %1494 = vst.msk [vmem:[#allocation2 + $0x3a8] sm:$0xff] %vm639_vm0, %v1333_v44  ;;  %v1754_v48 = vadd.f32 %v2753_v19, %v1715_v40  ;;  %v1624_v4 = vld [vmem:[#allocation2 + $0x2b8] sm:$0xff] }
 0x154   : > { %1941 = vst.msk [vmem:[%s2773_s29 + $0x30] sm:$0xf] %vm1928_vm1, %v2203_v30  ;;  %v2204_v45 = vpack.c.bf16 %v1781_v31, %v1781_v31  ;;  %v1682_v47 = vmax.f32 %v1618_v38, %v1650_v43  ;;  %1944 = vst.msk [vmem:[%s2773_s29 + $0x3c] sm:$0xf] %vm1928_vm1, %v2206_v39  ;;  %v1716_v49 = vmax.f32 %v1588_v33, %v1684_v41  ;;  %v1526_v13 = vld [vmem:[#allocation2 + $0xa8] sm:$0xff]  ;;  %v1531_v35 = vld [vmem:[#allocation2 + $0xd0] sm:$0xff] }
 0x155   : > { %v1752_v52 = vadd.f32 %v2753_v19, %v1713_v46  ;;  %v1786_v56 = vmax.f32 %v1754_v48, 0.0  ;;  %v2351_v59 = vpop.f32.mrb[56].mxu0  ;;  %v1529_v39 = vld [vmem:[#allocation2 + $0xc0] sm:$0xff] }
 0x156   : > { %1942 = vst.msk [vmem:[%s2773_s29 + $0x34] sm:$0xf] %vm1928_vm1, %v2204_v45  ;;  %v1714_v53 = vmax.f32 %v1586_v42, %v1682_v47  ;;  %v1755_v57 = vadd.f32 %v2753_v19, %v1716_v49  ;;  %v1559_v58 = vld [vmem:[#allocation2 + $0x1b0] sm:$0xff]  ;;  %v2415_v2 = vpop.f32.mrb[56].mxu1  ;;  %v1090_v3 = vpop.f32.mrb[57].mxu0  ;;  %v1625_v40 = vld [vmem:[#allocation2 + $0x2c0] sm:$0xff] }
 0x157   : > { %v1784_v61 = vmax.f32 %v1752_v52, 0.0  ;;  %v1591_v63 = vmax.f32 %v1527_v50, %v1559_v58  ;;  %v1655_v0 = vld [vmem:[#allocation2 + $0x3b0] sm:$0xff]  ;;  %v1557_v1 = vld [vmem:[#allocation2 + $0x1a0] sm:$0xff]  ;;  %1435 = vst.msk [vmem:[#allocation2 + $0x1d0] sm:$0xff] %vm639_vm0, %v2351_v59  ;;  %v2209_v5 = vpack.c.bf16 %v1786_v56, %v1786_v56  ;;  %1499 = vst.msk [vmem:[#allocation2 + $0x3d0] sm:$0xff] %vm639_vm0, %v2415_v2  ;;  %v1346_v11 = vpop.f32.mrb[57].mxu1 }
 0x158   : > { %v1753_v62 = vadd.f32 %v2753_v19, %v1714_v53  ;;  %v1787_v6 = vmax.f32 %v1755_v57, 0.0  ;;  %v1687_v7 = vmax.f32 %v1623_v51, %v1655_v0  ;;  %v1589_v8 = vmax.f32 %v1525_v54, %v1557_v1  ;;  %v1653_v9 = vld [vmem:[#allocation2 + $0x3a0] sm:$0xff]  ;;  %v1560_v10 = vld [vmem:[#allocation2 + $0x1b8] sm:$0xff]  ;;  %1433 = vst.msk [vmem:[#allocation2 + $0x1c0] sm:$0xff] %vm639_vm0, %v1090_v3  ;;  %v2352_v12 = vpop.f32.mrb[58].mxu0  ;;  %1497 = vst.msk [vmem:[#allocation2 + $0x3c0] sm:$0xff] %vm639_vm0, %v1346_v11 }
 0x159   : > { %v2207_v14 = vpack.c.bf16 %v1784_v61, %v1784_v61  ;;  %v1685_v16 = vmax.f32 %v1621_v55, %v1653_v9  ;;  %v1592_v17 = vmax.f32 %v1528_v60, %v1560_v10  ;;  %v1656_v18 = vld [vmem:[#allocation2 + $0x3b8] sm:$0xff]  ;;  %1436 = vst.msk [vmem:[#allocation2 + $0x1d8] sm:$0xff] %vm639_vm0, %v2352_v12  ;;  %v2416_v21 = vpop.f32.mrb[58].mxu1  ;;  %v1093_v22 = vpop.f32.mrb[59].mxu0 }
 0x15a   : > { %v1785_v15 = vmax.f32 %v1753_v62, 0.0  ;;  %v1558_v20 = vld [vmem:[#allocation2 + $0x1a8] sm:$0xff]  ;;  %1947 = vst.msk [vmem:[%s2773_s29 + $0x48] sm:$0xf] %vm1928_vm1, %v2209_v5  ;;  %v2210_v24 = vpack.c.bf16 %v1787_v6, %v1787_v6  ;;  %v1719_v25 = vmax.f32 %v1591_v63, %v1687_v7  ;;  %v1688_v26 = vmax.f32 %v1624_v4, %v1656_v18  ;;  %v1349_v29 = vpop.f32.mrb[59].mxu1  ;;  %v1532_v45 = vld [vmem:[#allocation2 + $0xd8] sm:$0xff] }
 0x15b   : > { %v1590_v27 = vmax.f32 %v1526_v13, %v1558_v20  ;;  %v1654_v28 = vld [vmem:[#allocation2 + $0x3a8] sm:$0xff]  ;;  %1500 = vst.msk [vmem:[#allocation2 + $0x3d8] sm:$0xff] %vm639_vm0, %v2416_v21  ;;  %1434 = vst.msk [vmem:[#allocation2 + $0x1c8] sm:$0xff] %vm639_vm0, %v1093_v22  ;;  %v1717_v31 = vmax.f32 %v1589_v8, %v1685_v16  ;;  %v1628_v53 = vld [vmem:[#allocation2 + $0x2d8] sm:$0xff] }
 0x15c   : > { %1945 = vst.msk [vmem:[%s2773_s29 + $0x40] sm:$0xf] %vm1928_vm1, %v2207_v14  ;;  %v2208_v30 = vpack.c.bf16 %v1785_v15, %v1785_v15  ;;  %v1686_v32 = vmax.f32 %v1622_v23, %v1654_v28  ;;  %1948 = vst.msk [vmem:[%s2773_s29 + $0x4c] sm:$0xf] %vm1928_vm1, %v2210_v24  ;;  %v1758_v33 = vadd.f32 %v2753_v19, %v1719_v25  ;;  %v1530_v62 = vld [vmem:[#allocation2 + $0xc8] sm:$0xff]  ;;  %v1535_v20 = vld [vmem:[#allocation2 + $0xf0] sm:$0xff] }
 0x15d   : > { %1498 = vst.msk [vmem:[#allocation2 + $0x3c8] sm:$0xff] %vm639_vm0, %v1349_v29  ;;  %v1720_v34 = vmax.f32 %v1592_v17, %v1688_v26  ;;  %v1756_v37 = vadd.f32 %v2753_v19, %v1717_v31  ;;  %v2355_v44 = vpop.f32.mrb[60].mxu0  ;;  %v1626_v7 = vld [vmem:[#allocation2 + $0x2c8] sm:$0xff]  ;;  %v1631_v21 = vld [vmem:[#allocation2 + $0x2f0] sm:$0xff]  ;;  %v1533_v24 = vld [vmem:[#allocation2 + $0xe0] sm:$0xff] }
 0x15e   : > { %1946 = vst.msk [vmem:[%s2773_s29 + $0x44] sm:$0xf] %vm1928_vm1, %v2208_v30  ;;  %v1718_v38 = vmax.f32 %v1590_v27, %v1686_v32  ;;  %v1790_v41 = vmax.f32 %v1758_v33, 0.0  ;;  %v1563_v43 = vld [vmem:[#allocation2 + $0x1d0] sm:$0xff]  ;;  %v2419_v51 = vpop.f32.mrb[60].mxu1  ;;  %v1106_v52 = vpop.f32.mrb[61].mxu0 }
 0x15f   : > { %v1759_v42 = vadd.f32 %v2753_v19, %v1720_v34  ;;  %v1788_v46 = vmax.f32 %v1756_v37, 0.0  ;;  %v1595_v48 = vmax.f32 %v1531_v35, %v1563_v43  ;;  %v1659_v49 = vld [vmem:[#allocation2 + $0x3d0] sm:$0xff]  ;;  %v1561_v50 = vld [vmem:[#allocation2 + $0x1c0] sm:$0xff]  ;;  %1439 = vst.msk [vmem:[#allocation2 + $0x1f0] sm:$0xff] %vm639_vm0, %v2355_v44  ;;  %1503 = vst.msk [vmem:[#allocation2 + $0x3f0] sm:$0xff] %vm639_vm0, %v2419_v51  ;;  %v1362_v60 = vpop.f32.mrb[61].mxu1 }
 0x160   : > { %v1757_v47 = vadd.f32 %v2753_v19, %v1718_v38  ;;  %v2213_v54 = vpack.c.bf16 %v1790_v41, %v1790_v41  ;;  %v1691_v56 = vmax.f32 %v1627_v36, %v1659_v49  ;;  %v1593_v57 = vmax.f32 %v1529_v39, %v1561_v50  ;;  %v1657_v58 = vld [vmem:[#allocation2 + $0x3c0] sm:$0xff]  ;;  %v1564_v59 = vld [vmem:[#allocation2 + $0x1d8] sm:$0xff]  ;;  %1437 = vst.msk [vmem:[#allocation2 + $0x1e0] sm:$0xff] %vm639_vm0, %v1106_v52  ;;  %v2356_v61 = vpop.f32.mrb[62].mxu0  ;;  %v2420_v5 = vpop.f32.mrb[62].mxu1  ;;  %v1630_v49 = vld [vmem:[#allocation2 + $0x2e8] sm:$0xff] }
 0x161   : > { %v1791_v55 = vmax.f32 %v1759_v42, 0.0  ;;  %v2211_v63 = vpack.c.bf16 %v1788_v46, %v1788_v46  ;;  %v1689_v1 = vmax.f32 %v1625_v40, %v1657_v58  ;;  %v1596_v2 = vmax.f32 %v1532_v45, %v1564_v59  ;;  %1501 = vst.msk [vmem:[#allocation2 + $0x3e0] sm:$0xff] %vm639_vm0, %v1362_v60  ;;  %1440 = vst.msk [vmem:[#allocation2 + $0x1f8] sm:$0xff] %vm639_vm0, %v2356_v61  ;;  %v1109_v6 = vpop.f32.mrb[63].mxu0  ;;  %v1365_v13 = vpop.f32.mrb[63].mxu1  ;;  %v1629_v25 = vld [vmem:[#allocation2 + $0x2e0] sm:$0xff] }
 0x162   : > { %v1789_v0 = vmax.f32 %v1757_v47, 0.0  ;;  %v1660_v3 = vld [vmem:[#allocation2 + $0x3d8] sm:$0xff]  ;;  %v1562_v4 = vld [vmem:[#allocation2 + $0x1c8] sm:$0xff]  ;;  %1951 = vst.msk [vmem:[%s2773_s29 + $0x58] sm:$0xf] %vm1928_vm1, %v2213_v54  ;;  %v1723_v9 = vmax.f32 %v1595_v48, %v1691_v56 }
 0x163   : > { %v2214_v8 = vpack.c.bf16 %v1791_v55, %v1791_v55  ;;  %v1692_v10 = vmax.f32 %v1628_v53, %v1660_v3  ;;  %v1594_v11 = vmax.f32 %v1530_v62, %v1562_v4  ;;  %1504 = vst.msk [vmem:[#allocation2 + $0x3f8] sm:$0xff] %vm639_vm0, %v2420_v5  ;;  %1438 = vst.msk [vmem:[#allocation2 + $0x1e8] sm:$0xff] %vm639_vm0, %v1109_v6  ;;  %v1536_v29 = vld [vmem:[#allocation2 + $0xf8] sm:$0xff]  ;;  %v1534_v42 = vld [vmem:[#allocation2 + $0xe8] sm:$0xff] }
 0x164   : > { %v1658_v12 = vld [vmem:[#allocation2 + $0x3c8] sm:$0xff]  ;;  %1949 = vst.msk [vmem:[%s2773_s29 + $0x50] sm:$0xf] %vm1928_vm1, %v2211_v63  ;;  %v2212_v14 = vpack.c.bf16 %v1789_v0, %v1789_v0  ;;  %v1721_v15 = vmax.f32 %v1593_v57, %v1689_v1  ;;  %v1762_v17 = vadd.f32 %v2753_v19, %v1723_v9  ;;  %v1632_v35 = vld [vmem:[#allocation2 + $0x2f8] sm:$0xff] }
 0x165   : > { %v1690_v16 = vmax.f32 %v1626_v7, %v1658_v12  ;;  %1502 = vst.msk [vmem:[#allocation2 + $0x3e8] sm:$0xff] %vm639_vm0, %v1365_v13  ;;  %v1724_v18 = vmax.f32 %v1596_v2, %v1692_v10 }
 0x166   : > { %1952 = vst.msk [vmem:[%s2773_s29 + $0x5c] sm:$0xf] %vm1928_vm1, %v2214_v8  ;;  %1950 = vst.msk [vmem:[%s2773_s29 + $0x54] sm:$0xf] %vm1928_vm1, %v2212_v14  ;;  %v1760_v22 = vadd.f32 %v2753_v19, %v1721_v15  ;;  %v1794_v26 = vmax.f32 %v1762_v17, 0.0  ;;  %v1567_v28 = vld [vmem:[#allocation2 + $0x1f0] sm:$0xff] }
 0x167   : > { %v1722_v23 = vmax.f32 %v1594_v11, %v1690_v16  ;;  %v1763_v27 = vadd.f32 %v2753_v19, %v1724_v18  ;;  %v1599_v32 = vmax.f32 %v1535_v20, %v1567_v28  ;;  %v1663_v33 = vld [vmem:[#allocation2 + $0x3f0] sm:$0xff]  ;;  %v1565_v34 = vld [vmem:[#allocation2 + $0x1e0] sm:$0xff] }
 0x168   : > { %v1792_v30 = vmax.f32 %v1760_v22, 0.0  ;;  %v2217_v36 = vpack.c.bf16 %v1794_v26, %v1794_v26  ;;  %v1695_v38 = vmax.f32 %v1631_v21, %v1663_v33  ;;  %v1597_v39 = vmax.f32 %v1533_v24, %v1565_v34  ;;  %v1661_v40 = vld [vmem:[#allocation2 + $0x3e0] sm:$0xff]  ;;  %v1568_v41 = vld [vmem:[#allocation2 + $0x1f8] sm:$0xff] }
 0x169   : > { %v1761_v31 = vadd.f32 %v2753_v19, %v1722_v23  ;;  %v1795_v37 = vmax.f32 %v1763_v27, 0.0  ;;  %v1693_v45 = vmax.f32 %v1629_v25, %v1661_v40  ;;  %v1600_v46 = vmax.f32 %v1536_v29, %v1568_v41 }
 0x16a   : > { %v2215_v43 = vpack.c.bf16 %v1792_v30, %v1792_v30  ;;  %v1664_v47 = vld [vmem:[#allocation2 + $0x3f8] sm:$0xff]  ;;  %v1566_v48 = vld [vmem:[#allocation2 + $0x1e8] sm:$0xff]  ;;  %1955 = vst.msk [vmem:[%s2773_s29 + $0x68] sm:$0xf] %vm1928_vm1, %v2217_v36  ;;  %v1727_v51 = vmax.f32 %v1599_v32, %v1695_v38 }
 0x16b   : > { %v1793_v44 = vmax.f32 %v1761_v31, 0.0  ;;  %v2218_v50 = vpack.c.bf16 %v1795_v37, %v1795_v37  ;;  %v1696_v52 = vmax.f32 %v1632_v35, %v1664_v47  ;;  %v1598_v53 = vmax.f32 %v1534_v42, %v1566_v48 }
 0x16c   : > { %v1662_v54 = vld [vmem:[#allocation2 + $0x3e8] sm:$0xff]  ;;  %1953 = vst.msk [vmem:[%s2773_s29 + $0x60] sm:$0xf] %vm1928_vm1, %v2215_v43  ;;  %v1725_v56 = vmax.f32 %v1597_v39, %v1693_v45  ;;  %v1766_v58 = vadd.f32 %v2753_v19, %v1727_v51 }
 0x16d   : > { %v2216_v55 = vpack.c.bf16 %v1793_v44, %v1793_v44  ;;  %v1694_v57 = vmax.f32 %v1630_v49, %v1662_v54  ;;  %1956 = vst.msk [vmem:[%s2773_s29 + $0x6c] sm:$0xf] %vm1928_vm1, %v2218_v50  ;;  %v1728_v59 = vmax.f32 %v1600_v46, %v1696_v52 }
 0x16e   : > { %v1764_v60 = vadd.f32 %v2753_v19, %v1725_v56  ;;  %v1798_v62 = vmax.f32 %v1766_v58, 0.0 }
 0x16f   : > { %1954 = vst.msk [vmem:[%s2773_s29 + $0x64] sm:$0xf] %vm1928_vm1, %v2216_v55  ;;  %v1726_v61 = vmax.f32 %v1598_v53, %v1694_v57  ;;  %v1767_v63 = vadd.f32 %v2753_v19, %v1728_v59 }
 0x170   : > { %v1796_v0 = vmax.f32 %v1764_v60, 0.0  ;;  %v2221_v2 = vpack.c.bf16 %v1798_v62, %v1798_v62 }
 0x171   : > { %v1765_v1 = vadd.f32 %v2753_v19, %v1726_v61  ;;  %v1799_v3 = vmax.f32 %v1767_v63, 0.0 }
 0x172   : > { %v2219_v4 = vpack.c.bf16 %v1796_v0, %v1796_v0  ;;  %1959 = vst.msk [vmem:[%s2773_s29 + $0x78] sm:$0xf] %vm1928_vm1, %v2221_v2 }
 0x173   : > { %v1797_v5 = vmax.f32 %v1765_v1, 0.0  ;;  %v2222_v6 = vpack.c.bf16 %v1799_v3, %v1799_v3 }
 0x174   : > { %1957 = vst.msk [vmem:[%s2773_s29 + $0x70] sm:$0xf] %vm1928_vm1, %v2219_v4 }
 0x175   : > { %v2220_v7 = vpack.c.bf16 %v1797_v5, %v1797_v5  ;;  %1960 = vst.msk [vmem:[%s2773_s29 + $0x7c] sm:$0xf] %vm1928_vm1, %v2222_v6 }
 0x177   : > { %1958 = vst.msk [vmem:[%s2773_s29 + $0x74] sm:$0xf] %vm1928_vm1, %v2220_v7 }
 0x178 PF: > { %s13_s12 = sadd.s32 1, %s2505_s12  }
 0x179   : > { %p10_p5 = scmp.ge.s32.totalorder %s13_s12, 4  }
 0x17b   :  { %12 = sbr.rel (!%p10_p5) target bundleno = 1 (0x1), region = 62 }

// kernel: net_forward.4
= control target key start
LH: loop header
LB: loop body
LE: loop exit
PB: predicated region body
PF: predicated region fallthrough
CT: control target
= control target key end

     0   :  { %s1617_s12 = smov 0   ;;  %s1860_s0 = inlined_call_operand.vmem [shape: bf16[512,288], index: 0, kind: input, shape index: {}]   ;;  %s1861_s1 = inlined_call_operand.vmem [shape: bf16[288,64], index: 1, kind: input, shape index: {}]   ;;  %s1862_s2 = inlined_call_operand.vmem [shape: f32[1,64], index: 2, kind: input, shape index: {}]   ;;  %s1863_s3 = inlined_call_operand.vmem [shape: bf16[128,64], index: 3, kind: output, shape index: {}]  }
   0x1 LB: > { %s1206_s13 = sadd.s32 4294967295, %s1595_s12   ;;  %p1210_p0 = scmp.ge.s32.totalorder %s1595_s12, 1  ;;  %s1595_s12 = sphi %s1617_s12, %s13_s12  }
   0x2   : > { %p139_p1 = scmp.lt.s32.totalorder %s1595_s12, 3 }
   0x4   : > { %p140_p2 = pnand %p1210_p0, %p139_p1 }
   0x5   : > { %v1507_v0 = vld [vmem:[%s1861_s1 + $0x40] sm:$0xff] (!%p140_p2)   ;;  %s1211_s16 = sshll.u32 (!%p140_p2), %s1206_s13, 5  ;;  %v1509_v2 = vld [vmem:[%s1861_s1 + $0x48] sm:$0xff] (!%p140_p2)   ;;  %v1511_v4 = vld [vmem:[%s1861_s1 + $0x50] sm:$0xff] (!%p140_p2)   ;;  %vm626_vm0 = vcmask (!%p140_p2), 261120   ;;  %vm997_vm1 = vcmask (!%p140_p2), 523264  }
   0x6   : > { %143 = sbr.rel (%p140_p2) target bundleno = 364 (0x16c), region = 32  ;;  %v1508_v1 = vld [vmem:[%s1861_s1] sm:$0xff] (!%p140_p2)   ;;  %1316 = vmatprep.subr.bf16.mxu0 (!%p140_p2), %v1507_v0  ;;  %1482 = vmatprep.subr.bf16.mxu1 (!%p140_p2), %v1507_v0  ;;  %p165_p3 = scmp.lt.s32.totalorder (!%p140_p2), %s1211_s16, 63  ;;  %v1510_v3 = vld [vmem:[%s1861_s1 + $0x8] sm:$0xff] (!%p140_p2)   ;;  %v1512_v5 = vld [vmem:[%s1861_s1 + $0x10] sm:$0xff] (!%p140_p2)   ;;  %vm1141_vm2 = vcmask (!%p140_p2), 519168  }
   0x7   : > { %1317 = vmatpush3.bf16.msra.mxu0 (!%p140_p2), %v1508_v1  ;;  %1490 = vmatpush3.bf16.msra.mxu1 (!%p140_p2), %v1508_v1  ;;  %v1513_v6 = vld [vmem:[%s1861_s1 + $0x58] sm:$0xff] (!%p140_p2)   ;;  %v1515_v8 = vld [vmem:[%s1861_s1 + $0x60] sm:$0xff] (!%p140_p2)   ;;  %v1517_v10 = vld [vmem:[%s1861_s1 + $0x68] sm:$0xff] (!%p140_p2)   ;;  %s1796_s30 = sshll.u32 (!%p140_p2), %s1206_s13, 3 }
   0x8   : > { %1318 = vmatprep.subr.bf16.mxu0 (!%p140_p2), %v1509_v2  ;;  %1483 = vmatprep.subr.bf16.mxu1 (!%p140_p2), %v1509_v2  ;;  %v1514_v7 = vld [vmem:[%s1861_s1 + $0x18] sm:$0xff] (!%p140_p2)   ;;  %v1516_v9 = vld [vmem:[%s1861_s1 + $0x20] sm:$0xff] (!%p140_p2)   ;;  %v1518_v13 = vld [vmem:[%s1861_s1 + $0x28] sm:$0xff] (!%p140_p2)   ;;  %p172_p4 = scmp.lt.s32.totalorder (!%p140_p2), %s1796_s30, 15 }
   0x9   : > { %v1519_v14 = vld [vmem:[%s1861_s1 + $0x70] sm:$0xff] (!%p140_p2)   ;;  %v1521_v16 = vld [vmem:[%s1861_s1 + $0x78] sm:$0xff] (!%p140_p2)   ;;  %v1529_v18 = vld [vmem:[%s1861_s1 + $0x80] sm:$0xff] (!%p140_p2)  }
   0xa   : > { %v1520_v15 = vld [vmem:[%s1861_s1 + $0x30] sm:$0xff] (!%p140_p2)   ;;  %v1522_v17 = vld [vmem:[%s1861_s1 + $0x38] sm:$0xff] (!%p140_p2)   ;;  %v1542_v23 = vld [vmem:[%s1861_s1 + $0x88] sm:$0xff] (!%p140_p2)  }
   0xb   : > { %1319 = vmatpush3.bf16.msra.mxu0 (!%p140_p2), %v1510_v3  ;;  %1491 = vmatpush3.bf16.msra.mxu1 (!%p140_p2), %v1510_v3 }
   0xc   : > { %1320 = vmatprep.subr.bf16.mxu0 (!%p140_p2), %v1511_v4  ;;  %1484 = vmatprep.subr.bf16.mxu1 (!%p140_p2), %v1511_v4 }
   0xd   : > { %s1865_s16 = smov (!%p165_p3, %s1211_s16), 63  ;;  %s1867_s30 = smov (!%p172_p4, %s1796_s30), 15 }
   0xe   : > { %s1498_s29 = smul.u32 12, %s1865_s16  ;;  %s1214_s5 = sshll.u32 %s1867_s30, 2 }
   0xf   : > { %1321 = vmatpush3.bf16.msra.mxu0 %v1512_v5  ;;  %1492 = vmatpush3.bf16.msra.mxu1 %v1512_v5  ;;  %s1834_s8 = scalar_lea.vmem %s1863_s3, %s1214_s5 }
  0x10   : > { %1322 = vmatprep.subr.bf16.mxu0 %v1513_v6  ;;  %1485 = vmatprep.subr.bf16.mxu1 %v1513_v6  ;;  %s1657_s9 = scalar_lea.vmem %s1860_s0, %s1498_s29 }
  0x11   : > { %v1525_v11 = vld [vmem:[%s1657_s9 + $0x4] ss:$12 sps:$4 sm:$0xff]   ;;  %v1523_v19 = vld [vmem:[%s1657_s9] ss:$12 sps:$4 sm:$0xff]   ;;  %v1530_v21 = vld [vmem:[%s1657_s9 + $0x1c] ss:$12 sps:$4 sm:$0xff]  }
  0x12   : > { %v1528_v12 = vld [vmem:[%s1657_s9 + $0x124] ss:$12 sps:$4 sm:$0xff]   ;;  %707 = vmatprep.mubr.bf16.mxu0 %v1525_v11  ;;  %v1526_v20 = vld [vmem:[%s1657_s9 + $0x120] ss:$12 sps:$4 sm:$0xff]   ;;  %v1532_v22 = vld [vmem:[%s1657_s9 + $0x13c] ss:$12 sps:$4 sm:$0xff]  }
  0x13   : > { %1323 = vmatpush3.bf16.msra.mxu0 %v1514_v7  ;;  %1493 = vmatpush3.bf16.msra.mxu1 %v1514_v7  ;;  %v1534_v24 = vld [vmem:[%s1657_s9 + $0x18] ss:$12 sps:$4 sm:$0xff]   ;;  %v1536_v26 = vld [vmem:[%s1657_s9 + $0x34] ss:$12 sps:$4 sm:$0xff]   ;;  %v1540_v28 = vld [vmem:[%s1657_s9 + $0x30] ss:$12 sps:$4 sm:$0xff]  }
  0x14   : > { %1324 = vmatprep.subr.bf16.mxu0 %v1515_v8  ;;  %1486 = vmatprep.subr.bf16.mxu1 %v1515_v8  ;;  %v1535_v25 = vld [vmem:[%s1657_s9 + $0x138] ss:$12 sps:$4 sm:$0xff]   ;;  %v1538_v27 = vld [vmem:[%s1657_s9 + $0x154] ss:$12 sps:$4 sm:$0xff]   ;;  %v1541_v29 = vld [vmem:[%s1657_s9 + $0x150] ss:$12 sps:$4 sm:$0xff]  }
  0x15   : > { %803 = vmatprep.mubr.bf16.mxu1 %v1528_v12  ;;  %v1543_v30 = vld [vmem:[%s1657_s9 + $0x4c] ss:$12 sps:$4 sm:$0xff]   ;;  %v1547_v32 = vld [vmem:[%s1657_s9 + $0x48] ss:$12 sps:$4 sm:$0xff]   ;;  %v1549_v34 = vld [vmem:[%s1657_s9 + $0x64] ss:$12 sps:$4 sm:$0xff]  }
  0x16   : > { %v1545_v31 = vld [vmem:[%s1657_s9 + $0x16c] ss:$12 sps:$4 sm:$0xff]   ;;  %v1548_v33 = vld [vmem:[%s1657_s9 + $0x168] ss:$12 sps:$4 sm:$0xff]   ;;  %v1558_v41 = vld [vmem:[%s1657_s9 + $0x50] ss:$12 sps:$4 sm:$0xff]  }
  0x17   : > { %1325 = vmatpush3.bf16.msra.mxu0 %v1516_v9  ;;  %1494 = vmatpush3.bf16.msra.mxu1 %v1516_v9  ;;  %v1551_v35 = vld [vmem:[%s1657_s9 + $0x8] ss:$12 sps:$4 sm:$0xff]   ;;  %v1552_v36 = vld [vmem:[%s1657_s9 + $0x60] ss:$12 sps:$4 sm:$0xff]   ;;  %v1556_v39 = vld [vmem:[%s1657_s9 + $0x38] ss:$12 sps:$4 sm:$0xff]  }
  0x18   : > { %1326 = vmatprep.subr.bf16.mxu0 %v1517_v10  ;;  %1487 = vmatprep.subr.bf16.mxu1 %v1517_v10  ;;  %v1553_v37 = vld [vmem:[%s1657_s9 + $0x20] ss:$12 sps:$4 sm:$0xff]   ;;  %v1554_v38 = vld [vmem:[%s1657_s9 + $0x7c] ss:$12 sps:$4 sm:$0xff]   ;;  %v1557_v40 = vld [vmem:[%s1657_s9 + $0x78] ss:$12 sps:$4 sm:$0xff]  }
  0x19   : > { %v1559_v42 = vld [vmem:[%s1657_s9 + $0x94] ss:$12 sps:$4 sm:$0xff]   ;;  %v1562_v44 = vld [vmem:[%s1657_s9 + $0x90] ss:$12 sps:$4 sm:$0xff]   ;;  %v1564_v46 = vld [vmem:[%s1657_s9 + $0xac] ss:$12 sps:$4 sm:$0xff]  }
  0x1a   : > { %v1561_v43 = vld [vmem:[%s1657_s9 + $0x68] ss:$12 sps:$4 sm:$0xff]   ;;  %v1563_v45 = vld [vmem:[%s1657_s9 + $0x80] ss:$12 sps:$4 sm:$0xff]   ;;  %v1566_v47 = vld [vmem:[%s1657_s9 + $0x98] ss:$12 sps:$4 sm:$0xff]  }
  0x1b   : > { %1327 = vmatpush3.bf16.msra.mxu0 %v1518_v13  ;;  %1495 = vmatpush3.bf16.msra.mxu1 %v1518_v13  ;;  %v1567_v48 = vld [vmem:[%s1657_s9 + $0xa8] ss:$12 sps:$4 sm:$0xff]   ;;  %v1568_v49 = vld [vmem:[%s1657_s9 + $0xb0] ss:$12 sps:$4 sm:$0xff]   ;;  %v1572_v52 = vld [vmem:[%s1657_s9 + $0xc0] ss:$12 sps:$4 sm:$0xff]  }
  0x1c   : > { %1328 = vmatprep.subr.bf16.mxu0 %v1519_v14  ;;  %1488 = vmatprep.subr.bf16.mxu1 %v1519_v14  ;;  %v1569_v50 = vld [vmem:[%s1657_s9 + $0xc4] ss:$12 sps:$4 sm:$0xff]   ;;  %v1571_v51 = vld [vmem:[%s1657_s9 + $0xc8] ss:$12 sps:$4 sm:$0xff]   ;;  %v1573_v53 = vld [vmem:[%s1657_s9 + $0xe0] ss:$12 sps:$4 sm:$0xff]  }
  0x1d   : > { %v1574_v54 = vld [vmem:[%s1657_s9 + $0xdc] ss:$12 sps:$4 sm:$0xff]   ;;  %v1576_v55 = vld [vmem:[%s1657_s9 + $0xf8] ss:$12 sps:$4 sm:$0xff]   ;;  %v1579_v58 = vld [vmem:[%s1657_s9 + $0xf4] ss:$12 sps:$4 sm:$0xff]  }
  0x1e   : > { %v1577_v56 = vld [vmem:[%s1657_s9 + $0xd8] ss:$12 sps:$4 sm:$0xff]   ;;  %v1578_v57 = vld [vmem:[%s1657_s9 + $0x110] ss:$12 sps:$4 sm:$0xff]   ;;  %v1581_v59 = vld [vmem:[%s1657_s9 + $0x128] ss:$12 sps:$4 sm:$0xff]  }
  0x1f   : > { %1329 = vmatpush3.bf16.msra.mxu0 %v1520_v15  ;;  %1496 = vmatpush3.bf16.msra.mxu1 %v1520_v15  ;;  %v1582_v60 = vld [vmem:[%s1657_s9 + $0xf0] ss:$12 sps:$4 sm:$0xff]   ;;  %v1583_v61 = vld [vmem:[%s1657_s9 + $0x140] ss:$12 sps:$4 sm:$0xff]   ;;  %v1586_v63 = vld [vmem:[%s1657_s9 + $0x158] ss:$12 sps:$4 sm:$0xff]  }
  0x20   : > { %1330 = vmatprep.subr.bf16.mxu0 %v1521_v16  ;;  %1489 = vmatprep.subr.bf16.mxu1 %v1521_v16  ;;  %v1584_v62 = vld [vmem:[%s1657_s9 + $0x10c] ss:$12 sps:$4 sm:$0xff]   ;;  %v1587_v0 = vld [vmem:[%s1657_s9 + $0x108] ss:$12 sps:$4 sm:$0xff]   ;;  %v1588_v1 = vld [vmem:[%s1657_s9 + $0x170] ss:$12 sps:$4 sm:$0xff]  }
  0x23   : > { %1331 = vmatpush3.bf16.msra.mxu0 %v1522_v17  ;;  %1497 = vmatpush3.bf16.msra.mxu1 %v1522_v17 }
  0x24   : > { %1446 = vmatprep.subr.bf16.mxu1 %v1529_v18 }
  0x26   : > { %708 = vmatmul.mubr.bf16.vlgmr.msra.gmra.mrb[0].mxu0 %v1523_v19  ;;  %804 = vmatmul.mubr.bf16.vlgmr.msra.gmra.mrb[0].mxu1 %v1526_v20 }
  0x27   : > { %1447 = vmatpush3.bf16.msra.mxu1 %v1529_v18  ;;  %715 = vmatprep.mubr.bf16.mxu0 %v1530_v21 }
  0x28   : > { %811 = vmatprep.mubr.bf16.mxu1 %v1532_v22  ;;  %1448 = vmatprep.subr.bf16.mxu1 %v1542_v23 }
  0x2b   : > { %1449 = vmatpush3.bf16.msra.mxu1 %v1542_v23 }
  0x2e   : > { %716 = vmatmul.mubr.bf16.gmra.mrb[4].mxu0 %v1534_v24  ;;  %812 = vmatmul.mubr.bf16.gmra.mrb[4].mxu1 %v1535_v25 }
  0x2f   : > { %723 = vmatprep.mubr.bf16.mxu0 %v1536_v26  ;;  %819 = vmatprep.mubr.bf16.mxu1 %v1538_v27 }
  0x36   : > { %724 = vmatmul.mubr.bf16.gmra.mrb[8].mxu0 %v1540_v28  ;;  %820 = vmatmul.mubr.bf16.gmra.mrb[8].mxu1 %v1541_v29 }
  0x37   : > { %731 = vmatprep.mubr.bf16.mxu0 %v1543_v30  ;;  %827 = vmatprep.mubr.bf16.mxu1 %v1545_v31 }
  0x3e   : > { %732 = vmatmul.mubr.bf16.gmra.mrb[12].mxu0 %v1547_v32  ;;  %828 = vmatmul.mubr.bf16.gmra.mrb[12].mxu1 %v1548_v33 }
  0x3f   : > { %739 = vmatprep.mubr.bf16.mxu0 %v1549_v34  ;;  %1450 = vmatprep.mubr.msk.bf16.mxu1 %vm626_vm0, %v1551_v35 }
  0x46   : > { %740 = vmatmul.mubr.bf16.gmra.mrb[16].mxu0 %v1552_v36  ;;  %1451 = vmatmul.mubr.msk.bf16.vlgmr.msra.gmra.mrb[16].mxu1 %vm626_vm0, %v1553_v37 }
  0x47   : > { %747 = vmatprep.mubr.bf16.mxu0 %v1554_v38  ;;  %1454 = vmatprep.mubr.msk.bf16.mxu1 %vm626_vm0, %v1556_v39 }
  0x4e   : > { %748 = vmatmul.mubr.bf16.gmra.mrb[20].mxu0 %v1557_v40  ;;  %1455 = vmatmul.mubr.msk.bf16.gmra.mrb[20].mxu1 %vm626_vm0, %v1558_v41 }
  0x4f   : > { %755 = vmatprep.mubr.bf16.mxu0 %v1559_v42  ;;  %1458 = vmatprep.mubr.msk.bf16.mxu1 %vm626_vm0, %v1561_v43 }
  0x56   : > { %756 = vmatmul.mubr.bf16.gmra.mrb[24].mxu0 %v1562_v44  ;;  %1459 = vmatmul.mubr.msk.bf16.gmra.mrb[24].mxu1 %vm626_vm0, %v1563_v45 }
  0x57   : > { %763 = vmatprep.mubr.bf16.mxu0 %v1564_v46  ;;  %1462 = vmatprep.mubr.msk.bf16.mxu1 %vm626_vm0, %v1566_v47 }
  0x5e   : > { %764 = vmatmul.mubr.bf16.gmra.mrb[28].mxu0 %v1567_v48  ;;  %1463 = vmatmul.mubr.msk.bf16.gmra.mrb[28].mxu1 %vm626_vm0, %v1568_v49 }
  0x5f   : > { %771 = vmatprep.mubr.bf16.mxu0 %v1569_v50  ;;  %1466 = vmatprep.mubr.msk.bf16.mxu1 %vm626_vm0, %v1571_v51 }
  0x66   : > { %772 = vmatmul.mubr.bf16.gmra.mrb[32].mxu0 %v1572_v52  ;;  %1467 = vmatmul.mubr.msk.bf16.gmra.mrb[32].mxu1 %vm626_vm0, %v1573_v53 }
  0x67   : > { %779 = vmatprep.mubr.bf16.mxu0 %v1574_v54  ;;  %1470 = vmatprep.mubr.msk.bf16.mxu1 %vm626_vm0, %v1576_v55 }
  0x6e   : > { %780 = vmatmul.mubr.bf16.gmra.mrb[36].mxu0 %v1577_v56  ;;  %1471 = vmatmul.mubr.msk.bf16.gmra.mrb[36].mxu1 %vm626_vm0, %v1578_v57 }
  0x6f   : > { %787 = vmatprep.mubr.bf16.mxu0 %v1579_v58  ;;  %1474 = vmatprep.mubr.msk.bf16.mxu1 %vm626_vm0, %v1581_v59 }
  0x76   : > { %788 = vmatmul.mubr.bf16.gmra.mrb[40].mxu0 %v1582_v60  ;;  %1475 = vmatmul.mubr.msk.bf16.gmra.mrb[40].mxu1 %vm626_vm0, %v1583_v61 }
  0x77   : > { %795 = vmatprep.mubr.bf16.mxu0 %v1584_v62  ;;  %1478 = vmatprep.mubr.msk.bf16.mxu1 %vm626_vm0, %v1586_v63 }
  0x7e   : > { %796 = vmatmul.mubr.bf16.gmra.mrb[44].mxu0 %v1587_v0  ;;  %1479 = vmatmul.mubr.msk.bf16.gmra.mrb[44].mxu1 %vm626_vm0, %v1588_v1 }
  0xf9   : > { %v1332_v2 = vpop.f32.mrb[0].mxu0  ;;  %v1404_v3 = vpop.f32.mrb[0].mxu1 }
  0xfa   : > { %v1333_v4 = vpop.f32.mrb[1].mxu0  ;;  %v1405_v5 = vpop.f32.mrb[1].mxu1 }
  0xfb   : > { %v1334_v6 = vadd.f32 %v1333_v4, %v1332_v2  ;;  %v1750_v7 = vadd.f32 %v1405_v5, %v1404_v3  ;;  %v1335_v8 = vpop.f32.mrb[2].mxu0  ;;  %v1407_v9 = vpop.f32.mrb[2].mxu1 }
  0xfc   : > { %v1336_v10 = vpop.f32.mrb[3].mxu0  ;;  %v1408_v11 = vpop.f32.mrb[3].mxu1 }
  0xfd   : > { %v1337_v12 = vadd.f32 %v1336_v10, %v1335_v8  ;;  %v1752_v13 = vadd.f32 %v1408_v11, %v1407_v9 }
 0x101   : > { %v1338_v14 = vpop.f32.mrb[4].mxu0  ;;  %v1410_v15 = vpop.f32.mrb[4].mxu1 }
 0x102   : > { %v1339_v16 = vpop.f32.mrb[5].mxu0  ;;  %v1411_v17 = vpop.f32.mrb[5].mxu1 }
 0x103   : > { %v1340_v18 = vadd.f32 %v1339_v16, %v1338_v14  ;;  %v1754_v19 = vadd.f32 %v1411_v17, %v1410_v15  ;;  %v1341_v20 = vpop.f32.mrb[6].mxu0  ;;  %v1413_v21 = vpop.f32.mrb[6].mxu1 }
 0x104   : > { %v1342_v22 = vpop.f32.mrb[7].mxu0  ;;  %v1414_v23 = vpop.f32.mrb[7].mxu1 }
 0x105   : > { %v1343_v24 = vadd.f32 %v1342_v22, %v1341_v20  ;;  %v1756_v25 = vadd.f32 %v1414_v23, %v1413_v21 }
 0x109   : > { %v1344_v26 = vpop.f32.mrb[8].mxu0  ;;  %v1416_v27 = vpop.f32.mrb[8].mxu1 }
 0x10a   : > { %v1345_v28 = vpop.f32.mrb[9].mxu0  ;;  %v1417_v29 = vpop.f32.mrb[9].mxu1 }
 0x10b   : > { %v1346_v30 = vadd.f32 %v1345_v28, %v1344_v26  ;;  %v1758_v31 = vadd.f32 %v1417_v29, %v1416_v27  ;;  %v1347_v32 = vpop.f32.mrb[10].mxu0  ;;  %v1419_v33 = vpop.f32.mrb[10].mxu1 }
 0x10c   : > { %v1348_v34 = vpop.f32.mrb[11].mxu0  ;;  %v1420_v35 = vpop.f32.mrb[11].mxu1 }
 0x10d   : > { %v1349_v36 = vadd.f32 %v1348_v34, %v1347_v32  ;;  %v1760_v37 = vadd.f32 %v1420_v35, %v1419_v33 }
 0x111   : > { %v1350_v38 = vpop.f32.mrb[12].mxu0  ;;  %v1422_v39 = vpop.f32.mrb[12].mxu1 }
 0x112   : > { %v1351_v40 = vpop.f32.mrb[13].mxu0  ;;  %v1423_v41 = vpop.f32.mrb[13].mxu1 }
 0x113   : > { %v1352_v42 = vadd.f32 %v1351_v40, %v1350_v38  ;;  %v1762_v43 = vadd.f32 %v1423_v41, %v1422_v39  ;;  %v1353_v44 = vpop.f32.mrb[14].mxu0  ;;  %v1425_v45 = vpop.f32.mrb[14].mxu1 }
 0x114   : > { %v1354_v46 = vpop.f32.mrb[15].mxu0  ;;  %v1426_v47 = vpop.f32.mrb[15].mxu1 }
 0x115   : > { %v1355_v48 = vadd.f32 %v1354_v46, %v1353_v44  ;;  %v1764_v49 = vadd.f32 %v1426_v47, %v1425_v45 }
 0x119   : > { %v1356_v50 = vpop.f32.mrb[16].mxu0  ;;  %v1452_v51 = vpop.f32.mrb[16].mxu1 }
 0x11a   : > { %v879_v52 = vadd.f32 %v1452_v51, %v1340_v18  ;;  %v1357_v53 = vpop.f32.mrb[17].mxu0  ;;  %v870_v54 = vpop.f32.mrb[17].mxu1 }
 0x11b   : > { %v1358_v55 = vadd.f32 %v1357_v53, %v1356_v50  ;;  %v871_v56 = vadd.f32 %v1334_v6, %v870_v54  ;;  %v1359_v57 = vpop.f32.mrb[18].mxu0  ;;  %v1453_v58 = vpop.f32.mrb[18].mxu1 }
 0x11c   : > { %1000 = vst.msk [vmem:[#allocation2 + $0x10] sm:$0xff] %vm997_vm1, %v879_v52  ;;  %v882_v59 = vadd.f32 %v1453_v58, %v1343_v24  ;;  %v1360_v60 = vpop.f32.mrb[19].mxu0  ;;  %v873_v61 = vpop.f32.mrb[19].mxu1 }
 0x11d   : > { %998 = vst.msk [vmem:[#allocation2] sm:$0xff] %vm997_vm1, %v871_v56  ;;  %v1361_v62 = vadd.f32 %v1360_v60, %v1359_v57  ;;  %v874_v63 = vadd.f32 %v1337_v12, %v873_v61 }
 0x11e   : > { %1001 = vst.msk [vmem:[#allocation2 + $0x18] sm:$0xff] %vm997_vm1, %v882_v59 }
 0x11f   : > { %999 = vst.msk [vmem:[#allocation2 + $0x8] sm:$0xff] %vm997_vm1, %v874_v63 }
 0x121   : > { %v1362_v0 = vpop.f32.mrb[20].mxu0  ;;  %v1456_v1 = vpop.f32.mrb[20].mxu1 }
 0x122   : > { %v895_v2 = vadd.f32 %v1456_v1, %v1352_v42  ;;  %v1363_v3 = vpop.f32.mrb[21].mxu0  ;;  %v886_v4 = vpop.f32.mrb[21].mxu1 }
 0x123   : > { %v1364_v5 = vadd.f32 %v1363_v3, %v1362_v0  ;;  %v887_v6 = vadd.f32 %v1346_v30, %v886_v4  ;;  %v1365_v8 = vpop.f32.mrb[22].mxu0  ;;  %v1457_v9 = vpop.f32.mrb[22].mxu1 }
 0x124   : > { %1004 = vst.msk [vmem:[#allocation2 + $0x30] sm:$0xff] %vm997_vm1, %v895_v2  ;;  %v898_v10 = vadd.f32 %v1457_v9, %v1355_v48  ;;  %v1366_v11 = vpop.f32.mrb[23].mxu0  ;;  %v889_v14 = vpop.f32.mrb[23].mxu1 }
 0x125   : > { %1002 = vst.msk [vmem:[#allocation2 + $0x20] sm:$0xff] %vm997_vm1, %v887_v6  ;;  %v1367_v12 = vadd.f32 %v1366_v11, %v1365_v8  ;;  %v890_v15 = vadd.f32 %v1349_v36, %v889_v14 }
 0x126   : > { %1005 = vst.msk [vmem:[#allocation2 + $0x38] sm:$0xff] %vm997_vm1, %v898_v10 }
 0x127   : > { %1003 = vst.msk [vmem:[#allocation2 + $0x28] sm:$0xff] %vm997_vm1, %v890_v15 }
 0x129   : > { %v1368_v16 = vpop.f32.mrb[24].mxu0  ;;  %v1460_v17 = vpop.f32.mrb[24].mxu1 }
 0x12a   : > { %v911_v18 = vadd.f32 %v1460_v17, %v1364_v5  ;;  %v1369_v20 = vpop.f32.mrb[25].mxu0  ;;  %v902_v21 = vpop.f32.mrb[25].mxu1 }
 0x12b   : > { %v1370_v22 = vadd.f32 %v1369_v20, %v1368_v16  ;;  %v903_v23 = vadd.f32 %v1358_v55, %v902_v21  ;;  %v1371_v24 = vpop.f32.mrb[26].mxu0  ;;  %v1461_v26 = vpop.f32.mrb[26].mxu1 }
 0x12c   : > { %1008 = vst.msk [vmem:[#allocation2 + $0x50] sm:$0xff] %vm997_vm1, %v911_v18  ;;  %v914_v27 = vadd.f32 %v1461_v26, %v1367_v12  ;;  %v1372_v28 = vpop.f32.mrb[27].mxu0  ;;  %v905_v29 = vpop.f32.mrb[27].mxu1 }
 0x12d   : > { %1006 = vst.msk [vmem:[#allocation2 + $0x40] sm:$0xff] %vm997_vm1, %v903_v23  ;;  %v1373_v30 = vadd.f32 %v1372_v28, %v1371_v24  ;;  %v906_v32 = vadd.f32 %v1361_v62, %v905_v29 }
 0x12e   : > { %1009 = vst.msk [vmem:[#allocation2 + $0x58] sm:$0xff] %vm997_vm1, %v914_v27 }
 0x12f   : > { %1007 = vst.msk [vmem:[#allocation2 + $0x48] sm:$0xff] %vm997_vm1, %v906_v32  ;;  %v1032_v32 = vld [vmem:[#allocation2 + $0x10] sm:$0xff] }
 0x131   : > { %v1374_v33 = vpop.f32.mrb[28].mxu0  ;;  %v1464_v34 = vpop.f32.mrb[28].mxu1 }
 0x132   : > { %v1375_v35 = vpop.f32.mrb[29].mxu0  ;;  %v918_v36 = vpop.f32.mrb[29].mxu1 }
 0x133   : > { %v1376_v38 = vadd.f32 %v1375_v35, %v1374_v33  ;;  %v919_v39 = vadd.f32 %v1370_v22, %v918_v36  ;;  %v1377_v40 = vpop.f32.mrb[30].mxu0  ;;  %v1465_v41 = vpop.f32.mrb[30].mxu1  ;;  %v1030_v33 = vld [vmem:[#allocation2] sm:$0xff] }
 0x134   : > { %v1378_v42 = vpop.f32.mrb[31].mxu0  ;;  %v921_v44 = vpop.f32.mrb[31].mxu1  ;;  %v1038_v28 = vld [vmem:[#allocation2 + $0x40] sm:$0xff] }
 0x135   : > { %v927_v45 = vadd.f32 %v1464_v34, %v1376_v38  ;;  %1010 = vst.msk [vmem:[#allocation2 + $0x60] sm:$0xff] %vm997_vm1, %v919_v39  ;;  %v1379_v46 = vadd.f32 %v1378_v42, %v1377_v40  ;;  %v922_v47 = vadd.f32 %v1373_v30, %v921_v44  ;;  %v1041_v36 = vld [vmem:[#allocation2 + $0x58] sm:$0xff]  ;;  %v1809_v40 = vld [vmem:[%s1862_s2] ss:$0 sm:$0xff] }
 0x137   : > { %1012 = vst.msk [vmem:[#allocation2 + $0x70] sm:$0xff] %vm997_vm1, %v927_v45  ;;  %v930_v48 = vadd.f32 %v1465_v41, %v1379_v46  ;;  %1011 = vst.msk [vmem:[#allocation2 + $0x68] sm:$0xff] %vm997_vm1, %v922_v47  ;;  %v1046_v47 = vmax.f32 %v1030_v33, %v1038_v28 }
 0x139   : > { %1013 = vst.msk [vmem:[#allocation2 + $0x78] sm:$0xff] %vm997_vm1, %v930_v48  ;;  %v1380_v50 = vpop.f32.mrb[32].mxu0  ;;  %v1468_v51 = vpop.f32.mrb[32].mxu1  ;;  %v1039_v48 = vld [vmem:[#allocation2 + $0x48] sm:$0xff] }
 0x13a   : > { %v1381_v52 = vpop.f32.mrb[33].mxu0  ;;  %v934_v53 = vpop.f32.mrb[33].mxu1 }
 0x13b   : > { %v1382_v54 = vadd.f32 %v1381_v52, %v1380_v50  ;;  %v1383_v55 = vpop.f32.mrb[34].mxu0  ;;  %v1469_v56 = vpop.f32.mrb[34].mxu1 }
 0x13c   : > { %v1384_v57 = vpop.f32.mrb[35].mxu0  ;;  %v937_v58 = vpop.f32.mrb[35].mxu1 }
 0x13d   : > { %v935_v59 = vadd.f32 %v1382_v54, %v934_v53  ;;  %v1385_v60 = vadd.f32 %v1384_v57, %v1383_v55  ;;  %v1033_v55 = vld [vmem:[#allocation2 + $0x18] sm:$0xff] }
 0x13f   : > { %1014 = vst.msk [vmem:[#allocation2 + $0x80] sm:$0xff] %vm997_vm1, %v935_v59  ;;  %v938_v61 = vadd.f32 %v1385_v60, %v937_v58 }
 0x141   : > { %1015 = vst.msk [vmem:[#allocation2 + $0x88] sm:$0xff] %vm997_vm1, %v938_v61  ;;  %v1386_v62 = vpop.f32.mrb[36].mxu0  ;;  %v1784_v63 = vpop.f32.mrb[36].mxu1  ;;  %v1031_v61 = vld [vmem:[#allocation2 + $0x8] sm:$0xff] }
 0x142   : > { %v1387_v0 = vpop.f32.mrb[37].mxu0  ;;  %v950_v1 = vpop.f32.mrb[37].mxu1 }
 0x143   : > { %v1388_v2 = vadd.f32 %v1387_v0, %v1386_v62  ;;  %v1389_v3 = vpop.f32.mrb[38].mxu0  ;;  %v1786_v4 = vpop.f32.mrb[38].mxu1  ;;  %v1049_v62 = vmax.f32 %v1033_v55, %v1041_v36  ;;  %v1037_v36 = vld [vmem:[#allocation2 + $0x38] sm:$0xff] }
 0x144   : > { %v1390_v5 = vpop.f32.mrb[39].mxu0  ;;  %v953_v6 = vpop.f32.mrb[39].mxu1 }
 0x145   : > { %v943_v8 = vadd.f32 %v1468_v51, %v1388_v2  ;;  %v1391_v9 = vadd.f32 %v1390_v5, %v1389_v3  ;;  %v1047_v3 = vmax.f32 %v1031_v61, %v1039_v48 }
 0x146   : > { %v1054_v50 = vld [vmem:[#allocation2 + $0x80] sm:$0xff] }
 0x147   : > { %1016 = vst.msk [vmem:[#allocation2 + $0x90] sm:$0xff] %vm997_vm1, %v943_v8  ;;  %v946_v10 = vadd.f32 %v1469_v56, %v1391_v9 }
 0x148   : > { %v1055_v0 = vld [vmem:[#allocation2 + $0x88] sm:$0xff] }
 0x149   : > { %1017 = vst.msk [vmem:[#allocation2 + $0x98] sm:$0xff] %vm997_vm1, %v946_v10  ;;  %v1392_v11 = vpop.f32.mrb[40].mxu0  ;;  %v1476_v14 = vpop.f32.mrb[40].mxu1 }
 0x14a   : > { %v975_v12 = vadd.f32 %v1476_v14, %v1754_v19  ;;  %v1393_v15 = vpop.f32.mrb[41].mxu0  ;;  %v966_v16 = vpop.f32.mrb[41].mxu1 }
 0x14b   : > { %v1394_v17 = vadd.f32 %v1393_v15, %v1392_v11  ;;  %v967_v18 = vadd.f32 %v1750_v7, %v966_v16  ;;  %v1395_v20 = vpop.f32.mrb[42].mxu0  ;;  %v1477_v21 = vpop.f32.mrb[42].mxu1  ;;  %v1042_v11 = vld [vmem:[#allocation2 + $0x60] sm:$0xff]  ;;  %v1036_v15 = vld [vmem:[#allocation2 + $0x30] sm:$0xff] }
 0x14c   : > { %1024 = vst.msk [vmem:[#allocation2 + $0xd0] sm:$0xff] %vm997_vm1, %v975_v12  ;;  %v978_v22 = vadd.f32 %v1477_v21, %v1756_v25  ;;  %v1396_v23 = vpop.f32.mrb[43].mxu0  ;;  %v969_v24 = vpop.f32.mrb[43].mxu1  ;;  %v1040_v25 = vld [vmem:[#allocation2 + $0x50] sm:$0xff] }
 0x14d   : > { %v951_v26 = vadd.f32 %v1394_v17, %v950_v1  ;;  %1022 = vst.msk [vmem:[#allocation2 + $0xc0] sm:$0xff] %vm997_vm1, %v967_v18  ;;  %v1397_v19 = vadd.f32 %v1396_v23, %v1395_v20  ;;  %v970_v27 = vadd.f32 %v1752_v13, %v969_v24  ;;  %v1048_v46 = vmax.f32 %v1032_v32, %v1040_v25  ;;  %v1044_v16 = vld [vmem:[#allocation2 + $0x70] sm:$0xff]  ;;  %v1043_v17 = vld [vmem:[#allocation2 + $0x68] sm:$0xff]  ;;  %v1034_v20 = vld [vmem:[#allocation2 + $0x20] sm:$0xff] }
 0x14e   : > { %1025 = vst.msk [vmem:[#allocation2 + $0xd8] sm:$0xff] %vm997_vm1, %v978_v22  ;;  %v1056_v38 = vld [vmem:[#allocation2 + $0x90] sm:$0xff] }
 0x14f   : > { %1018 = vst.msk [vmem:[#allocation2 + $0xa0] sm:$0xff] %vm997_vm1, %v951_v26  ;;  %v954_v7 = vadd.f32 %v1397_v19, %v953_v6  ;;  %1023 = vst.msk [vmem:[#allocation2 + $0xc8] sm:$0xff] %vm997_vm1, %v970_v27  ;;  %v1035_v26 = vld [vmem:[#allocation2 + $0x28] sm:$0xff]  ;;  %v1050_v19 = vmax.f32 %v1034_v20, %v1042_v11  ;;  %v1045_v27 = vld [vmem:[#allocation2 + $0x78] sm:$0xff] }
 0x150   : > { %v1051_v32 = vmax.f32 %v1035_v26, %v1043_v17 }
 0x151   : > { %1019 = vst.msk [vmem:[#allocation2 + $0xa8] sm:$0xff] %vm997_vm1, %v954_v7  ;;  %v1398_v29 = vpop.f32.mrb[44].mxu0  ;;  %v1480_v30 = vpop.f32.mrb[44].mxu1 }
 0x152   : > { %v991_v13 = vadd.f32 %v1480_v30, %v1762_v43  ;;  %v1399_v34 = vpop.f32.mrb[45].mxu0  ;;  %v982_v35 = vpop.f32.mrb[45].mxu1  ;;  %v1052_v30 = vmax.f32 %v1036_v15, %v1044_v16 }
 0x153   : > { %v1064_v39 = vld [vmem:[#allocation2 + $0xd0] sm:$0xff]  ;;  %v1400_v41 = vadd.f32 %v1399_v34, %v1398_v29  ;;  %v983_v42 = vadd.f32 %v1758_v31, %v982_v35  ;;  %v1401_v44 = vpop.f32.mrb[46].mxu0  ;;  %v1481_v45 = vpop.f32.mrb[46].mxu1  ;;  %v1057_v31 = vld [vmem:[#allocation2 + $0x98] sm:$0xff] }
 0x154   : > { %v1072_v43 = vmax.f32 %v1056_v38, %v1064_v39  ;;  %v1062_v51 = vld [vmem:[#allocation2 + $0xc0] sm:$0xff]  ;;  %1028 = vst.msk [vmem:[#allocation2 + $0xf0] sm:$0xff] %vm997_vm1, %v991_v13  ;;  %v994_v52 = vadd.f32 %v1481_v45, %v1764_v49  ;;  %v1402_v53 = vpop.f32.mrb[47].mxu0  ;;  %v985_v54 = vpop.f32.mrb[47].mxu1 }
 0x155   : > { %v1070_v56 = vmax.f32 %v1054_v50, %v1062_v51  ;;  %v1065_v57 = vld [vmem:[#allocation2 + $0xd8] sm:$0xff]  ;;  %v959_v58 = vadd.f32 %v1784_v63, %v1400_v41  ;;  %1026 = vst.msk [vmem:[#allocation2 + $0xe0] sm:$0xff] %vm997_vm1, %v983_v42  ;;  %v1403_v59 = vadd.f32 %v1402_v53, %v1401_v44  ;;  %v986_v60 = vadd.f32 %v1760_v37, %v985_v54 }
 0x156   : > { %v1080_v1 = vmax.f32 %v1048_v46, %v1072_v43  ;;  %v1073_v2 = vmax.f32 %v1057_v31, %v1065_v57  ;;  %v1063_v49 = vld [vmem:[#allocation2 + $0xc8] sm:$0xff]  ;;  %1029 = vst.msk [vmem:[#allocation2 + $0xf8] sm:$0xff] %vm997_vm1, %v994_v52  ;;  %v1058_v23 = vld [vmem:[#allocation2 + $0xa0] sm:$0xff]  ;;  %v1053_v44 = vmax.f32 %v1037_v36, %v1045_v27 }
 0x157   : > { %v1078_v5 = vmax.f32 %v1046_v47, %v1070_v56  ;;  %v1071_v6 = vmax.f32 %v1055_v0, %v1063_v49  ;;  %1020 = vst.msk [vmem:[#allocation2 + $0xb0] sm:$0xff] %vm997_vm1, %v959_v58  ;;  %v962_v63 = vadd.f32 %v1786_v4, %v1403_v59  ;;  %1027 = vst.msk [vmem:[#allocation2 + $0xe8] sm:$0xff] %vm997_vm1, %v986_v60 }
 0x158   : > { %v1095_v37 = vadd.f32 %v1809_v40, %v1080_v1  ;;  %v1081_v8 = vmax.f32 %v1049_v62, %v1073_v2  ;;  %v1059_v29 = vld [vmem:[#allocation2 + $0xa8] sm:$0xff] }
 0x159   : > { %v1093_v9 = vadd.f32 %v1809_v40, %v1078_v5  ;;  %v1079_v10 = vmax.f32 %v1047_v3, %v1071_v6  ;;  %1021 = vst.msk [vmem:[#allocation2 + $0xb8] sm:$0xff] %vm997_vm1, %v962_v63 }
 0x15a   : > { %v1103_v14 = vmax.f32 %v1095_v37, 0.0  ;;  %v1096_v12 = vadd.f32 %v1809_v40, %v1081_v8 }
 0x15b   : > { %v1101_v4 = vmax.f32 %v1093_v9, 0.0  ;;  %v1094_v18 = vadd.f32 %v1809_v40, %v1079_v10  ;;  %v1068_v13 = vld [vmem:[#allocation2 + $0xf0] sm:$0xff] }
 0x15c   : > { %v1310_v21 = vpack.c.bf16 %v1103_v14, %v1103_v14  ;;  %v1104_v22 = vmax.f32 %v1096_v12, 0.0  ;;  %v1066_v24 = vld [vmem:[#allocation2 + $0xe0] sm:$0xff] }
 0x15d   : > { %v1308_v7 = vpack.c.bf16 %v1101_v4, %v1101_v4  ;;  %v1102_v25 = vmax.f32 %v1094_v18, 0.0  ;;  %v1074_v28 = vmax.f32 %v1058_v23, %v1066_v24  ;;  %v1069_v45 = vld [vmem:[#allocation2 + $0xf8] sm:$0xff] }
 0x15e   : > { %1144 = vst.msk [vmem:[%s1834_s8 + $0x8] sm:$0xf] %vm1141_vm2, %v1310_v21  ;;  %v1311_v33 = vpack.c.bf16 %v1104_v22, %v1104_v22  ;;  %v1060_v34 = vld [vmem:[#allocation2 + $0xb0] sm:$0xff]  ;;  %v1067_v35 = vld [vmem:[#allocation2 + $0xe8] sm:$0xff] }
 0x15f   : > { %1142 = vst.msk [vmem:[%s1834_s8] sm:$0xf] %vm1141_vm2, %v1308_v7  ;;  %v1309_v38 = vpack.c.bf16 %v1102_v25, %v1102_v25  ;;  %v1076_v39 = vmax.f32 %v1060_v34, %v1068_v13  ;;  %v1082_v41 = vmax.f32 %v1050_v19, %v1074_v28  ;;  %v1075_v42 = vmax.f32 %v1059_v29, %v1067_v35 }
 0x160   : > { %1145 = vst.msk [vmem:[%s1834_s8 + $0xc] sm:$0xf] %vm1141_vm2, %v1311_v33  ;;  %v1061_v46 = vld [vmem:[#allocation2 + $0xb8] sm:$0xff] }
 0x161   : > { %1143 = vst.msk [vmem:[%s1834_s8 + $0x4] sm:$0xf] %vm1141_vm2, %v1309_v38  ;;  %v1084_v47 = vmax.f32 %v1052_v30, %v1076_v39  ;;  %v1097_v48 = vadd.f32 %v1809_v40, %v1082_v41  ;;  %v1077_v50 = vmax.f32 %v1061_v46, %v1069_v45  ;;  %v1083_v43 = vmax.f32 %v1051_v32, %v1075_v42 }
 0x163   : > { %v1099_v51 = vadd.f32 %v1809_v40, %v1084_v47  ;;  %v1105_v52 = vmax.f32 %v1097_v48, 0.0  ;;  %v1085_v53 = vmax.f32 %v1053_v44, %v1077_v50  ;;  %v1098_v54 = vadd.f32 %v1809_v40, %v1083_v43 }
 0x165   : > { %v1107_v55 = vmax.f32 %v1099_v51, 0.0  ;;  %v1312_v56 = vpack.c.bf16 %v1105_v52, %v1105_v52  ;;  %v1100_v31 = vadd.f32 %v1809_v40, %v1085_v53  ;;  %v1106_v57 = vmax.f32 %v1098_v54, 0.0 }
 0x167   : > { %v1314_v58 = vpack.c.bf16 %v1107_v55, %v1107_v55  ;;  %1146 = vst.msk [vmem:[%s1834_s8 + $0x10] sm:$0xf] %vm1141_vm2, %v1312_v56  ;;  %v1108_v59 = vmax.f32 %v1100_v31, 0.0  ;;  %v1313_v60 = vpack.c.bf16 %v1106_v57, %v1106_v57 }
 0x169   : > { %1148 = vst.msk [vmem:[%s1834_s8 + $0x18] sm:$0xf] %vm1141_vm2, %v1314_v58  ;;  %v1315_v61 = vpack.c.bf16 %v1108_v59, %v1108_v59  ;;  %1147 = vst.msk [vmem:[%s1834_s8 + $0x14] sm:$0xf] %vm1141_vm2, %v1313_v60 }
 0x16b   : > { %1149 = vst.msk [vmem:[%s1834_s8 + $0x1c] sm:$0xf] %vm1141_vm2, %v1315_v61 }
 0x16c PF: > { %s13_s12 = sadd.s32 1, %s1595_s12  }
 0x16d   : > { %p10_p5 = scmp.ge.s32.totalorder %s13_s12, 4  }
 0x16f   :  { %12 = sbr.rel (!%p10_p5) target bundleno = 1 (0x1), region = 62 }

// kernel: net_forward.5
= control target key start
LH: loop header
LB: loop body
LE: loop exit
PB: predicated region body
PF: predicated region fallthrough
CT: control target
= control target key end

     0   :  { %s11657_s25 = smov 0   ;;  %s14618_s0 = inlined_call_operand.vmem [shape: bf16[128,576], index: 0, kind: input, shape index: {}]   ;;  %s14619_s1 = inlined_call_operand.vmem [shape: bf16[576,128], index: 1, kind: input, shape index: {}]   ;;  %s14620_s2 = inlined_call_operand.vmem [shape: f32[1,128], index: 2, kind: input, shape index: {}]   ;;  %s14621_s3 = inlined_call_operand.vmem [shape: bf16[1152,256], index: 3, kind: input, shape index: {}]   ;;  %s14622_s4 = inlined_call_operand.vmem [shape: f32[1,256], index: 4, kind: input, shape index: {}]   ;;  %s14623_s5 = inlined_call_operand.vmem [shape: bf16[2304,512], index: 5, kind: input, shape index: {}]   ;;  %s14624_s6 = inlined_call_operand.vmem [shape: f32[1,512], index: 6, kind: input, shape index: {}]   ;;  %s14625_s7 = inlined_call_operand.vmem [shape: bf16[512,128], index: 7, kind: input, shape index: {}]   ;;  %s14626_s8 = inlined_call_operand.vmem [shape: f32[1,128], index: 8, kind: input, shape index: {}]   ;;  %s14627_s9 = inlined_call_operand.vmem [shape: bf16[128,128], index: 9, kind: input, shape index: {}]   ;;  %s14628_s10 = inlined_call_operand.vmem [shape: f32[1,128], index: 10, kind: input, shape index: {}]   ;;  %s14629_s11 = inlined_call_operand.vmem [shape: bf16[128,16], index: 11, kind: input, shape index: {}]   ;;  %s14630_s12 = inlined_call_operand.vmem [shape: f32[1,16], index: 12, kind: input, shape index: {}]   ;;  %s14631_s13 = inlined_call_operand.vmem [shape: f32[16,16], index: 13, kind: output, shape index: {}]  }
   0x1 LB: > { %s11663_s26 = sadd.s32 4294967295, %s11582_s25   ;;  %p9029_p0 = scmp.ge.s32.totalorder %s11582_s25, 1  ;;  %s11582_s25 = sphi %s11657_s25, %s23_s25  }
   0x2   : > { %p389_p1 = scmp.lt.s32.totalorder %s11582_s25, 3 }
   0x4   : > { %p390_p2 = pnand %p9029_p0, %p389_p1 }
   0x5   : > { %v10339_v0 = vld [vmem:[%s14619_s1 + $0x40] sm:$0xff] (!%p390_p2)   ;;  %v10343_v4 = vld [vmem:[%s14619_s1 + $0x48] sm:$0xff] (!%p390_p2)   ;;  %v10347_v8 = vld [vmem:[%s14619_s1 + $0x50] sm:$0xff] (!%p390_p2)   ;;  %s9030_s27 = sshll.u32 (!%p390_p2), %s11663_s26, 3  ;;  %vm857_vm0 = vcmask (!%p390_p2), 523264   ;;  %vm1074_vm1 = vcmask (!%p390_p2), 1040384  }
   0x6   : > { %393 = sbr.rel (%p390_p2) target bundleno = 2171 (0x87b), region = 72  ;;  %v10340_v1 = vld [vmem:[%s14619_s1 + $0xc0] sm:$0xff] (!%p390_p2)   ;;  %9961 = vmatprep.subr.bf16.mxu0 (!%p390_p2), %v10339_v0  ;;  %v10344_v5 = vld [vmem:[%s14619_s1 + $0xc8] sm:$0xff] (!%p390_p2)   ;;  %v10348_v9 = vld [vmem:[%s14619_s1 + $0xd0] sm:$0xff] (!%p390_p2)   ;;  %p434_p3 = scmp.lt.s32.totalorder (!%p390_p2), %s9030_s27, 15  ;;  %v11584_v63 = vmov (!%p390_p2), 0  }
   0x7   : > { %v10341_v2 = vld [vmem:[%s14619_s1] sm:$0xff] (!%p390_p2)   ;;  %10001 = vmatprep.subr.bf16.mxu1 (!%p390_p2), %v10340_v1  ;;  %v10345_v6 = vld [vmem:[%s14619_s1 + $0x8] sm:$0xff] (!%p390_p2)   ;;  %v10349_v10 = vld [vmem:[%s14619_s1 + $0x10] sm:$0xff] (!%p390_p2)   ;;  %vm1075_vm2 = vsmask.f32 (!%p390_p2), 256  ;;  %1096 = vst [vmem:[#allocation5] sm:$0xff] (!%p390_p2), %v11584_v63 }
   0x8   : > { %v10342_v3 = vld [vmem:[%s14619_s1 + $0x80] sm:$0xff] (!%p390_p2)   ;;  %9962 = vmatpush3.bf16.msra.mxu0 (!%p390_p2), %v10341_v2  ;;  %v10346_v7 = vld [vmem:[%s14619_s1 + $0x88] sm:$0xff] (!%p390_p2)   ;;  %v10350_v11 = vld [vmem:[%s14619_s1 + $0x90] sm:$0xff] (!%p390_p2)   ;;  %1073 = vst [vmem:[#allocation4] sm:$0xf] (!%p390_p2), %v11584_v63  ;;  %vm1212_vm7 = vcmask (!%p390_p2), 1041409  }
   0x9   : > { %10002 = vmatpush3.bf16.msra.mxu1 (!%p390_p2), %v10342_v3  ;;  %9963 = vmatprep.subr.bf16.mxu0 (!%p390_p2), %v10343_v4  ;;  %v10351_v12 = vld [vmem:[%s14619_s1 + $0x58] sm:$0xff] (!%p390_p2)   ;;  %v10355_v16 = vld [vmem:[%s14619_s1 + $0x60] sm:$0xff] (!%p390_p2)   ;;  %v10359_v20 = vld [vmem:[%s14619_s1 + $0x68] sm:$0xff] (!%p390_p2)   ;;  %1080 = vst [vmem:[#allocation4 + $0x8] sm:$0xf] (!%p390_p2), %v11584_v63  ;;  %vm1244_vm10 = vcmask (!%p390_p2), 1042434  }
   0xa   : > { %10003 = vmatprep.subr.bf16.mxu1 (!%p390_p2), %v10344_v5  ;;  %v10352_v13 = vld [vmem:[%s14619_s1 + $0xd8] sm:$0xff] (!%p390_p2)   ;;  %v10356_v17 = vld [vmem:[%s14619_s1 + $0xe0] sm:$0xff] (!%p390_p2)   ;;  %v10360_v21 = vld [vmem:[%s14619_s1 + $0xe8] sm:$0xff] (!%p390_p2)   ;;  %1084 = vst [vmem:[#allocation4 + $0x10] sm:$0xf] (!%p390_p2), %v11584_v63  ;;  %vm1320_vm15 = vcmask (!%p390_p2), 1043459  }
   0xb   : > { %v10353_v14 = vld [vmem:[%s14619_s1 + $0x18] sm:$0xff] (!%p390_p2)   ;;  %v10357_v18 = vld [vmem:[%s14619_s1 + $0x20] sm:$0xff] (!%p390_p2)   ;;  %v10361_v22 = vld [vmem:[%s14619_s1 + $0x28] sm:$0xff] (!%p390_p2)   ;;  %1088 = vst [vmem:[#allocation4 + $0x18] sm:$0xf] (!%p390_p2), %v11584_v63  ;;  %p440_p4 = scmp.lt.s32.totalorder (!%p390_p2), %s11663_s26, 1 }
   0xc   : > { %9964 = vmatpush3.bf16.msra.mxu0 (!%p390_p2), %v10345_v6  ;;  %v10354_v15 = vld [vmem:[%s14619_s1 + $0x98] sm:$0xff] (!%p390_p2)   ;;  %v10358_v19 = vld [vmem:[%s14619_s1 + $0xa0] sm:$0xff] (!%p390_p2)   ;;  %v10362_v23 = vld [vmem:[%s14619_s1 + $0xa8] sm:$0xff] (!%p390_p2)   ;;  %1092 = vst [vmem:[#allocation8] sm:$0xf] (!%p390_p2), %v11584_v63 }
   0xd   : > { %10004 = vmatpush3.bf16.msra.mxu1 %v10346_v7  ;;  %9965 = vmatprep.subr.bf16.mxu0 %v10347_v8  ;;  %s14655_s27 = smov (!%p434_p3, %s9030_s27), 15  ;;  %v10363_v24 = vld [vmem:[%s14619_s1 + $0x70] sm:$0xff]   ;;  %v10367_v28 = vld [vmem:[%s14619_s1 + $0x78] sm:$0xff]   ;;  %v10377_v36 = vld [vmem:[%s14619_s1 + $0x100] sm:$0xff]   ;;  %1093 = vst [vmem:[#allocation8 + $0x4] sm:$0xf] %v11584_v63 }
   0xe   : > { %10005 = vmatprep.subr.bf16.mxu1 %v10348_v9  ;;  %v10364_v25 = vld [vmem:[%s14619_s1 + $0xf0] sm:$0xff]   ;;  %s10327_s19 = smul.u32 20, %s14655_s27  ;;  %v10368_v29 = vld [vmem:[%s14619_s1 + $0xf8] sm:$0xff]   ;;  %v10384_v39 = vld [vmem:[%s14619_s1 + $0x108] sm:$0xff]   ;;  %1094 = vst [vmem:[#allocation8 + $0x8] sm:$0xf] %v11584_v63 }
   0xf   : > { %v10365_v26 = vld [vmem:[%s14619_s1 + $0x30] sm:$0xff]   ;;  %v10369_v30 = vld [vmem:[%s14619_s1 + $0x38] sm:$0xff]   ;;  %v10405_v56 = vld [vmem:[%s14621_s3 + $0x104] ss:$8 sps:$4 sm:$0xff]   ;;  %1095 = vst [vmem:[#allocation8 + $0xc] sm:$0xf] %v11584_v63 }
  0x10   : > { %9966 = vmatpush3.bf16.msra.mxu0 %v10349_v10  ;;  %v10366_v27 = vld [vmem:[%s14619_s1 + $0xb0] sm:$0xff]   ;;  %s11761_s15 = scalar_lea.vmem %s14618_s0, %s10327_s19  ;;  %v10370_v31 = vld [vmem:[%s14619_s1 + $0xb8] sm:$0xff]   ;;  %v10403_v57 = vld [vmem:[%s14621_s3 + $0x100] ss:$8 sps:$4 sm:$0xff]   ;;  %1097 = vst [vmem:[#allocation5 + $0x8] sm:$0xff] %v11584_v63  ;;  %s14657_s26 = smov (!%p440_p4, %s11663_s26), 1 }
  0x11   : > { %10006 = vmatpush3.bf16.msra.mxu1 %v10350_v11  ;;  %9967 = vmatprep.subr.bf16.mxu0 %v10351_v12  ;;  %v10371_v32 = vld [vmem:[%s11761_s15] ss:$20 sps:$4 sm:$0xff]   ;;  %v10373_v33 = vld [vmem:[%s11761_s15 + $0x4] ss:$20 sps:$4 sm:$0xff]   ;;  %v10374_v34 = vld [vmem:[%s11761_s15 + $0x8] ss:$20 sps:$4 sm:$0xff]  }
  0x12   : > { %10007 = vmatprep.subr.bf16.mxu1 %v10352_v13  ;;  %v10376_v35 = vld [vmem:[%s11761_s15 + $0xc] ss:$20 sps:$4 sm:$0xff]   ;;  %902 = vmatprep.mubr.bf16.mxu0 %v10373_v33  ;;  %v10380_v38 = vld [vmem:[%s11761_s15 + $0x34] ss:$20 sps:$4 sm:$0xff]   ;;  %v10383_v41 = vld [vmem:[%s11761_s15 + $0x30] ss:$20 sps:$4 sm:$0xff]  }
  0x13   : > { %967 = vmatprep.mubr.bf16.mxu1 %v10376_v35  ;;  %v10378_v37 = vld [vmem:[%s11761_s15 + $0x2c] ss:$20 sps:$4 sm:$0xff]   ;;  %v10382_v40 = vld [vmem:[%s11761_s15 + $0x28] ss:$20 sps:$4 sm:$0xff]   ;;  %v10391_v44 = vld [vmem:[%s14619_s1 + $0x110] sm:$0xff]   ;;  %1098 = vst [vmem:[#allocation5 + $0x10] sm:$0xff] %v11584_v63 }
  0x14   : > { %9968 = vmatpush3.bf16.msra.mxu0 %v10353_v14  ;;  %v10385_v42 = vld [vmem:[%s11761_s15 + $0x54] ss:$20 sps:$4 sm:$0xff]   ;;  %v10387_v43 = vld [vmem:[%s11761_s15 + $0x5c] ss:$20 sps:$4 sm:$0xff]   ;;  %v10390_v47 = vld [vmem:[%s11761_s15 + $0x58] ss:$20 sps:$4 sm:$0xff]  }
  0x15   : > { %10008 = vmatpush3.bf16.msra.mxu1 %v10354_v15  ;;  %9969 = vmatprep.subr.bf16.mxu0 %v10355_v16  ;;  %v10398_v45 = vld [vmem:[%s14619_s1 + $0x118] sm:$0xff]   ;;  %v10389_v46 = vld [vmem:[%s11761_s15 + $0x50] ss:$20 sps:$4 sm:$0xff]   ;;  %v10397_v51 = vld [vmem:[%s11761_s15 + $0x80] ss:$20 sps:$4 sm:$0xff]   ;;  %1099 = vst [vmem:[#allocation5 + $0x18] sm:$0xff] %v11584_v63 }
  0x16   : > { %10009 = vmatprep.subr.bf16.mxu1 %v10356_v17  ;;  %v10392_v48 = vld [vmem:[%s11761_s15 + $0x7c] ss:$20 sps:$4 sm:$0xff]   ;;  %v10394_v49 = vld [vmem:[%s11761_s15 + $0x84] ss:$20 sps:$4 sm:$0xff]   ;;  %v10401_v54 = vld [vmem:[%s11761_s15 + $0x60] ss:$20 sps:$4 sm:$0xff]  }
  0x17   : > { %v10396_v50 = vld [vmem:[%s11761_s15 + $0x78] ss:$20 sps:$4 sm:$0xff]   ;;  %v10399_v52 = vld [vmem:[%s11761_s15 + $0x10] ss:$20 sps:$4 sm:$0xff]   ;;  %v10402_v55 = vld [vmem:[%s11761_s15 + $0x88] ss:$20 sps:$4 sm:$0xff]  }
  0x18   : > { %9970 = vmatpush3.bf16.msra.mxu0 %v10357_v18  ;;  %v10400_v53 = vld [vmem:[%s11761_s15 + $0x38] ss:$20 sps:$4 sm:$0xff]   ;;  %v10406_v59 = vld [vmem:[%s14621_s3] ss:$8 sps:$4 sm:$0xff]   ;;  %v10411_v60 = vld [vmem:[%s14621_s3 + $0x114] ss:$8 sps:$4 sm:$0xff]  }
  0x19   : > { %10010 = vmatpush3.bf16.msra.mxu1 %v10358_v19  ;;  %9971 = vmatprep.subr.bf16.mxu0 %v10359_v20  ;;  %v10408_v58 = vld [vmem:[%s14621_s3 + $0x4] ss:$8 sps:$4 sm:$0xff]   ;;  %v10409_v61 = vld [vmem:[%s14621_s3 + $0x110] ss:$8 sps:$4 sm:$0xff]   ;;  %vm11822_vm3 = vmand %vm1074_vm1, %vm1075_vm2  ;;  %1100 = vst [vmem:[#allocation5 + $0x20] sm:$0xff] %v11584_v63  ;;  %vm1362_vm2 = vcmask 1042432  }
  0x1a   : > { %10011 = vmatprep.subr.bf16.mxu1 %v10360_v21  ;;  %v11819_v62 = vld [vmem:[#allocation4 + $0x4] sm:$0x1]  ;;  %1101 = vst [vmem:[#allocation5 + $0x28] sm:$0xff] %v11584_v63  ;;  %1102 = vst [vmem:[#allocation5 + $0x30] sm:$0xff] %v11584_v63  ;;  %v10428_v2 = vld [vmem:[%s14621_s3 + $0x14] ss:$8 sps:$4 sm:$0xff]  }
  0x1b   : > { %1103 = vst [vmem:[#allocation5 + $0x38] sm:$0xff] %v11584_v63  ;;  %1104 = vst [vmem:[#allocation5 + $0x40] sm:$0xff] %v11584_v63  ;;  %v1078_v1 = vsel %vm11822_vm3, 0, %v11819_v62  ;;  %v10426_v3 = vld [vmem:[%s14621_s3 + $0x10] ss:$8 sps:$4 sm:$0xff]   ;;  %s9032_s14 = sshll.u32 %s14657_s26, 3 }
  0x1c   : > { %9972 = vmatpush3.bf16.msra.mxu0 %v10361_v22  ;;  %1105 = vst [vmem:[#allocation5 + $0x48] sm:$0xff] %v11584_v63  ;;  %1106 = vst [vmem:[#allocation5 + $0x50] sm:$0xff] %v11584_v63  ;;  %v10431_v4 = vld [vmem:[%s14621_s3 + $0x124] ss:$8 sps:$4 sm:$0xff]   ;;  %v10429_v5 = vld [vmem:[%s14621_s3 + $0x120] ss:$8 sps:$4 sm:$0xff]   ;;  %s443_s19 = scalar_lea.vmem %s14631_s13, %s9032_s14 }
  0x1d   : > { %10012 = vmatpush3.bf16.msra.mxu1 %v10362_v23  ;;  %9973 = vmatprep.subr.bf16.mxu0 %v10363_v24  ;;  %1107 = vst [vmem:[#allocation5 + $0x58] sm:$0xff] %v11584_v63  ;;  %1108 = vst [vmem:[#allocation5 + $0x60] sm:$0xff] %v11584_v63  ;;  %v10434_v6 = vld [vmem:[%s14621_s3 + $0x24] ss:$8 sps:$4 sm:$0xff]   ;;  %v10432_v7 = vld [vmem:[%s14621_s3 + $0x20] ss:$8 sps:$4 sm:$0xff]  }
  0x1e   : > { %10013 = vmatprep.subr.bf16.mxu1 %v10364_v25  ;;  %1109 = vst [vmem:[#allocation5 + $0x68] sm:$0xff] %v11584_v63  ;;  %1110 = vst [vmem:[#allocation5 + $0x70] sm:$0xff] %v11584_v63  ;;  %v10437_v8 = vld [vmem:[%s14621_s3 + $0x134] ss:$8 sps:$4 sm:$0xff]   ;;  %v10435_v9 = vld [vmem:[%s14621_s3 + $0x130] ss:$8 sps:$4 sm:$0xff]  }
  0x1f   : > { %1111 = vst [vmem:[#allocation5 + $0x78] sm:$0xff] %v11584_v63  ;;  %1112 = vst [vmem:[#allocation5 + $0x80] sm:$0xff] %v11584_v63  ;;  %v10440_v10 = vld [vmem:[%s14621_s3 + $0x34] ss:$8 sps:$4 sm:$0xff]   ;;  %v10438_v11 = vld [vmem:[%s14621_s3 + $0x30] ss:$8 sps:$4 sm:$0xff]  }
  0x20   : > { %9974 = vmatpush3.bf16.msra.mxu0 %v10365_v26  ;;  %1113 = vst [vmem:[#allocation5 + $0x88] sm:$0xff] %v11584_v63  ;;  %1114 = vst [vmem:[#allocation9] sm:$0xff] %v11584_v63  ;;  %v10443_v12 = vld [vmem:[%s14621_s3 + $0x144] ss:$8 sps:$4 sm:$0xff]   ;;  %v10441_v13 = vld [vmem:[%s14621_s3 + $0x140] ss:$8 sps:$4 sm:$0xff]  }
  0x21   : > { %10014 = vmatpush3.bf16.msra.mxu1 %v10366_v27  ;;  %9975 = vmatprep.subr.bf16.mxu0 %v10367_v28  ;;  %1115 = vst [vmem:[#allocation9 + $0x8] sm:$0xff] %v11584_v63  ;;  %1116 = vst [vmem:[#allocation9 + $0x10] sm:$0xff] %v11584_v63  ;;  %v10446_v14 = vld [vmem:[%s14621_s3 + $0x44] ss:$8 sps:$4 sm:$0xff]   ;;  %v10444_v15 = vld [vmem:[%s14621_s3 + $0x40] ss:$8 sps:$4 sm:$0xff]  }
  0x22   : > { %10015 = vmatprep.subr.bf16.mxu1 %v10368_v29  ;;  %1117 = vst [vmem:[#allocation9 + $0x18] sm:$0xff] %v11584_v63  ;;  %1118 = vst [vmem:[#allocation9 + $0x20] sm:$0xff] %v11584_v63  ;;  %v10449_v16 = vld [vmem:[%s14621_s3 + $0x154] ss:$8 sps:$4 sm:$0xff]   ;;  %v10447_v17 = vld [vmem:[%s14621_s3 + $0x150] ss:$8 sps:$4 sm:$0xff]  }
  0x23   : > { %1119 = vst [vmem:[#allocation9 + $0x28] sm:$0xff] %v11584_v63  ;;  %1120 = vst [vmem:[#allocation9 + $0x30] sm:$0xff] %v11584_v63  ;;  %v10450_v18 = vld [vmem:[%s14621_s3 + $0x50] ss:$8 sps:$4 sm:$0xff]   ;;  %v10452_v19 = vld [vmem:[%s14621_s3 + $0x54] ss:$8 sps:$4 sm:$0xff]  }
  0x24   : > { %9976 = vmatpush3.bf16.msra.mxu0 %v10369_v30  ;;  %1121 = vst [vmem:[#allocation9 + $0x38] sm:$0xff] %v11584_v63  ;;  %1122 = vst [vmem:[#allocation9 + $0x40] sm:$0xff] %v11584_v63  ;;  %v10455_v20 = vld [vmem:[%s14621_s3 + $0x164] ss:$8 sps:$4 sm:$0xff]   ;;  %v10453_v21 = vld [vmem:[%s14621_s3 + $0x160] ss:$8 sps:$4 sm:$0xff]  }
  0x25   : > { %10016 = vmatpush3.bf16.msra.mxu1 %v10370_v31  ;;  %10111 = vmatprep.subr.bf16.mxu0 %v10377_v36  ;;  %1123 = vst [vmem:[#allocation9 + $0x48] sm:$0xff] %v11584_v63  ;;  %1124 = vst [vmem:[#allocation9 + $0x50] sm:$0xff] %v11584_v63  ;;  %v10458_v22 = vld [vmem:[%s14621_s3 + $0x64] ss:$8 sps:$4 sm:$0xff]   ;;  %v10456_v23 = vld [vmem:[%s14621_s3 + $0x60] ss:$8 sps:$4 sm:$0xff]  }
  0x26   : > { %2742 = vmatprep.subr.bf16.mxu1 %v10405_v56  ;;  %1125 = vst [vmem:[#allocation9 + $0x58] sm:$0xff] %v11584_v63  ;;  %1126 = vst [vmem:[#allocation9 + $0x60] sm:$0xff] %v11584_v63  ;;  %v10459_v24 = vld [vmem:[%s14621_s3 + $0x170] ss:$8 sps:$4 sm:$0xff]   ;;  %v10461_v25 = vld [vmem:[%s14621_s3 + $0x174] ss:$8 sps:$4 sm:$0xff]  }
  0x27   : > { %903 = vmatmul.mubr.bf16.vlgmr.msra.gmra.mrb[0].mxu0 %v10371_v32  ;;  %1127 = vst [vmem:[#allocation9 + $0x68] sm:$0xff] %v11584_v63  ;;  %1128 = vst [vmem:[#allocation9 + $0x70] sm:$0xff] %v11584_v63  ;;  %v10464_v26 = vld [vmem:[%s14621_s3 + $0x74] ss:$8 sps:$4 sm:$0xff]   ;;  %v10462_v27 = vld [vmem:[%s14621_s3 + $0x70] ss:$8 sps:$4 sm:$0xff]  }
  0x28   : > { %968 = vmatmul.mubr.bf16.vlgmr.msra.gmra.mrb[0].mxu1 %v10374_v34  ;;  %10112 = vmatpush3.bf16.msra.mxu0 %v10377_v36  ;;  %1129 = vst [vmem:[#allocation9 + $0x78] sm:$0xff] %v11584_v63  ;;  %1130 = vst [vmem:[#allocation9 + $0x80] sm:$0xff] %v11584_v63  ;;  %v10467_v28 = vld [vmem:[%s14621_s3 + $0x184] ss:$8 sps:$4 sm:$0xff]   ;;  %v10465_v29 = vld [vmem:[%s14621_s3 + $0x180] ss:$8 sps:$4 sm:$0xff]  }
  0x29   : > { %910 = vmatprep.mubr.bf16.mxu0 %v10378_v37  ;;  %975 = vmatprep.mubr.bf16.mxu1 %v10380_v38  ;;  %1131 = vst [vmem:[#allocation9 + $0x88] sm:$0xff] %v11584_v63  ;;  %1132 = vst [vmem:[#allocation9 + $0x90] sm:$0xff] %v11584_v63  ;;  %v10470_v30 = vld [vmem:[%s14621_s3 + $0x84] ss:$8 sps:$4 sm:$0xff]   ;;  %v10468_v31 = vld [vmem:[%s14621_s3 + $0x80] ss:$8 sps:$4 sm:$0xff]  }
  0x2a   : > { %10113 = vmatprep.subr.bf16.mxu0 %v10384_v39  ;;  %2743 = vmatpush1.bf16.msra.mxu1 %v10403_v57  ;;  %1133 = vst [vmem:[#allocation9 + $0x98] sm:$0xff] %v11584_v63  ;;  %1134 = vst [vmem:[#allocation9 + $0xa0] sm:$0xff] %v11584_v63  ;;  %v10473_v32 = vld [vmem:[%s14621_s3 + $0x194] ss:$8 sps:$4 sm:$0xff]   ;;  %v10471_v33 = vld [vmem:[%s14621_s3 + $0x190] ss:$8 sps:$4 sm:$0xff]  }
  0x2b   : > { %2744 = vmatprep.subr.bf16.mxu1 %v10411_v60  ;;  %1135 = vst [vmem:[#allocation9 + $0xa8] sm:$0xff] %v11584_v63  ;;  %1136 = vst [vmem:[#allocation9 + $0xb0] sm:$0xff] %v11584_v63  ;;  %v10476_v34 = vld [vmem:[%s14621_s3 + $0x94] ss:$8 sps:$4 sm:$0xff]   ;;  %v10474_v35 = vld [vmem:[%s14621_s3 + $0x90] ss:$8 sps:$4 sm:$0xff]  }
  0x2c   : > { %10114 = vmatpush3.bf16.msra.mxu0 %v10384_v39  ;;  %1137 = vst [vmem:[#allocation9 + $0xb8] sm:$0xff] %v11584_v63  ;;  %1138 = vst [vmem:[#allocation9 + $0xc0] sm:$0xff] %v11584_v63  ;;  %v10479_v36 = vld [vmem:[%s14621_s3 + $0x1a4] ss:$8 sps:$4 sm:$0xff]   ;;  %v10477_v37 = vld [vmem:[%s14621_s3 + $0x1a0] ss:$8 sps:$4 sm:$0xff]  }
  0x2d   : > { %10115 = vmatprep.subr.bf16.mxu0 %v10391_v44  ;;  %1139 = vst [vmem:[#allocation9 + $0xc8] sm:$0xff] %v11584_v63  ;;  %1140 = vst [vmem:[#allocation9 + $0xd0] sm:$0xff] %v11584_v63  ;;  %v10482_v38 = vld [vmem:[%s14621_s3 + $0xa4] ss:$8 sps:$4 sm:$0xff]   ;;  %v10480_v39 = vld [vmem:[%s14621_s3 + $0xa0] ss:$8 sps:$4 sm:$0xff]  }
  0x2e   : > { %2745 = vmatpush1.bf16.msra.mxu1 %v10409_v61  ;;  %1141 = vst [vmem:[#allocation9 + $0xd8] sm:$0xff] %v11584_v63  ;;  %1142 = vst [vmem:[#allocation9 + $0xe0] sm:$0xff] %v11584_v63  ;;  %v10501_v56 = vld [vmem:[%s14621_s3 + $0x1e0] ss:$8 sps:$4 sm:$0xff]   ;;  %v10513_v60 = vld [vmem:[%s14621_s3 + $0xf4] ss:$8 sps:$4 sm:$0xff]  }
  0x2f   : > { %911 = vmatmul.mubr.bf16.gmra.mrb[4].mxu0 %v10382_v40  ;;  %1143 = vst [vmem:[#allocation9 + $0xe8] sm:$0xff] %v11584_v63  ;;  %1144 = vst [vmem:[#allocation9 + $0xf0] sm:$0xff] %v11584_v63  ;;  %2746 = vmatprep.subr.bf16.mxu1 %v10431_v4  ;;  %v10485_v40 = vld [vmem:[%s14621_s3 + $0x1b4] ss:$8 sps:$4 sm:$0xff]   ;;  %v10504_v57 = vld [vmem:[%s14621_s3 + $0xe0] ss:$8 sps:$4 sm:$0xff]  }
  0x30   : > { %976 = vmatmul.mubr.bf16.gmra.mrb[4].mxu1 %v10383_v41  ;;  %918 = vmatprep.mubr.bf16.mxu0 %v10385_v42  ;;  %1145 = vst [vmem:[#allocation9 + $0xf8] sm:$0xff] %v11584_v63  ;;  %1146 = vst [vmem:[#allocation9 + $0x100] sm:$0xff] %v11584_v63  ;;  %v10488_v41 = vld [vmem:[%s14621_s3 + $0xb4] ss:$8 sps:$4 sm:$0xff]   ;;  %v10483_v42 = vld [vmem:[%s14621_s3 + $0x1b0] ss:$8 sps:$4 sm:$0xff]  }
  0x31   : > { %983 = vmatprep.mubr.bf16.mxu1 %v10387_v43  ;;  %10116 = vmatpush3.bf16.msra.mxu0 %v10391_v44  ;;  %1147 = vst [vmem:[#allocation9 + $0x108] sm:$0xff] %v11584_v63  ;;  %1148 = vst [vmem:[#allocation9 + $0x110] sm:$0xff] %v11584_v63  ;;  %v10486_v43 = vld [vmem:[%s14621_s3 + $0xb0] ss:$8 sps:$4 sm:$0xff]   ;;  %v10491_v44 = vld [vmem:[%s14621_s3 + $0x1c4] ss:$8 sps:$4 sm:$0xff]  }
  0x32   : > { %10117 = vmatprep.subr.bf16.mxu0 %v10398_v45  ;;  %1149 = vst [vmem:[#allocation9 + $0x118] sm:$0xff] %v11584_v63  ;;  %1079 = vst [vmem:[#allocation4 + $0x4] sm:$0x1] %v1078_v1  ;;  %2747 = vmatpush1.bf16.msra.mxu1 %v10429_v5  ;;  %v10511_v61 = vld [vmem:[%s14621_s3 + $0xf0] ss:$8 sps:$4 sm:$0xff]  }
  0x33   : > { %2748 = vmatprep.subr.bf16.mxu1 %v10437_v8  ;;  %v10516_v62 = vld [vmem:[%s14621_s3 + $0x204] ss:$8 sps:$4 sm:$0xff]   ;;  %v1085_v63 = vld [vmem:[#allocation4 + $0x14] sm:$0x1]  ;;  %vm1184_vm4 = vsmask.f32 7938 }
  0x34   : > { %v1086_v1 = vsel %vm11822_vm3, 0, %v1085_v63  ;;  %vm12016_vm5 = vmand %vm1074_vm1, %vm1184_vm4  ;;  %vm1213_vm6 = vsmask.f32 1280  ;;  %vm1245_vm8 = vsmask.f32 2304  ;;  %vm1458_vm4 = vcmask 1046532  }
  0x35   : > { %10118 = vmatpush3.bf16.msra.mxu0 %v10398_v45  ;;  %v10494_v45 = vld [vmem:[%s14621_s3 + $0xc4] ss:$8 sps:$4 sm:$0xff]   ;;  %1087 = vst [vmem:[#allocation4 + $0x14] sm:$0x1] %v1086_v1  ;;  %vm1229_vm9 = vsmask.f32 7942  ;;  %vm12026_vm13 = vmand %vm1212_vm7, %vm1213_vm6 }
  0x36   : > { %2689 = vmatprep.subr.bf16.mxu0 %v10408_v58  ;;  %2749 = vmatpush1.bf16.msra.mxu1 %v10435_v9  ;;  %v10510_v58 = vld [vmem:[%s14621_s3 + $0x1f4] ss:$8 sps:$4 sm:$0xff]   ;;  %vm1267_vm11 = vsmask.f32 7946  ;;  %vm1321_vm12 = vsmask.f32 3328  ;;  %vm12032_vm14 = vmand %vm1244_vm10, %vm1245_vm8 }
  0x37   : > { %919 = vmatmul.mubr.bf16.gmra.mrb[8].mxu0 %v10389_v46  ;;  %2750 = vmatprep.subr.bf16.mxu1 %v10443_v12  ;;  %v10489_v46 = vld [vmem:[%s14621_s3 + $0x1c0] ss:$8 sps:$4 sm:$0xff]   ;;  %vm1332_vm1 = vsmask.f32 7950  ;;  %vm1459_vm6 = vsmask.f32 6400 }
  0x38   : > { %984 = vmatmul.mubr.bf16.gmra.mrb[8].mxu1 %v10390_v47  ;;  %926 = vmatprep.mubr.bf16.mxu0 %v10392_v48  ;;  %v10492_v47 = vld [vmem:[%s14621_s3 + $0xc0] ss:$8 sps:$4 sm:$0xff]   ;;  %v10497_v48 = vld [vmem:[%s14621_s3 + $0x1d4] ss:$8 sps:$4 sm:$0xff]  }
  0x39   : > { %991 = vmatprep.mubr.bf16.mxu1 %v10394_v49  ;;  %v10500_v49 = vld [vmem:[%s14621_s3 + $0xd4] ss:$8 sps:$4 sm:$0xff]  }
  0x3a   : > { %2751 = vmatpush1.bf16.msra.mxu1 %v10441_v13  ;;  %v11355_v0 = vld [vmem:[%s14623_s5 + $0xe64] ss:$16 sps:$4 sm:$0xff]  }
  0x3b   : > { %2752 = vmatprep.subr.bf16.mxu1 %v10449_v16 }
  0x3e   : > { %2753 = vmatpush1.bf16.msra.mxu1 %v10447_v17 }
  0x3f   : > { %927 = vmatmul.mubr.bf16.gmra.mrb[12].mxu0 %v10396_v50  ;;  %2754 = vmatprep.subr.bf16.mxu1 %v10455_v20  ;;  %v10495_v50 = vld [vmem:[%s14621_s3 + $0x1d0] ss:$8 sps:$4 sm:$0xff]  }
  0x40   : > { %992 = vmatmul.mubr.bf16.gmra.mrb[12].mxu1 %v10397_v51  ;;  %10119 = vmatprep.mubr.msk.bf16.mxu0 %vm857_vm0, %v10399_v52  ;;  %v1081_v51 = vld [vmem:[#allocation4 + $0xc] sm:$0x1]  ;;  %v10498_v52 = vld [vmem:[%s14621_s3 + $0xd0] ss:$8 sps:$4 sm:$0xff]  }
  0x42   : > { %2755 = vmatpush1.bf16.msra.mxu1 %v10453_v21 }
  0x43   : > { %2756 = vmatprep.subr.bf16.mxu1 %v10461_v25 }
  0x46   : > { %2757 = vmatpush1.bf16.msra.mxu1 %v10459_v24 }
  0x47   : > { %10120 = vmatmul.mubr.msk.bf16.vlgmr.msra.gmra.mrb[16].mxu0 %vm857_vm0, %v10400_v53  ;;  %2758 = vmatprep.subr.bf16.mxu1 %v10467_v28  ;;  %v1082_v53 = vsel %vm11822_vm3, 0, %v1081_v51 }
  0x48   : > { %10123 = vmatprep.mubr.msk.bf16.mxu0 %vm857_vm0, %v10401_v54  ;;  %2690 = vmatpush1.bf16.msra.mxu0 %v10406_v59  ;;  %v10503_v54 = vld [vmem:[%s14621_s3 + $0x1e4] ss:$8 sps:$4 sm:$0xff]   ;;  %1083 = vst [vmem:[#allocation4 + $0xc] sm:$0x1] %v1082_v53  ;;  %v10508_v59 = vld [vmem:[%s14621_s3 + $0x1f0] ss:$8 sps:$4 sm:$0xff]  }
  0x49   : > { %2691 = vmatprep.subr.bf16.mxu0 %v10428_v2  ;;  %v1089_v2 = vld [vmem:[#allocation4 + $0x1c] sm:$0x1] }
  0x4a   : > { %2759 = vmatpush1.bf16.msra.mxu1 %v10465_v29 }
  0x4b   : > { %2760 = vmatprep.subr.bf16.mxu1 %v10473_v32 }
  0x4c   : > { %2692 = vmatpush1.bf16.msra.mxu0 %v10426_v3  ;;  %v1090_v3 = vsel %vm11822_vm3, 0, %v1089_v2 }
  0x4d   : > { %2693 = vmatprep.subr.bf16.mxu0 %v10434_v6  ;;  %1091 = vst [vmem:[#allocation4 + $0x1c] sm:$0x1] %v1090_v3 }
  0x4e   : > { %2761 = vmatpush1.bf16.msra.mxu1 %v10471_v33 }
  0x4f   : > { %10124 = vmatmul.mubr.msk.bf16.gmra.mrb[20].mxu0 %vm857_vm0, %v10402_v55  ;;  %2762 = vmatprep.subr.bf16.mxu1 %v10479_v36  ;;  %v10506_v55 = vld [vmem:[%s14621_s3 + $0xe4] ss:$8 sps:$4 sm:$0xff]   ;;  %vm12040_vm0 = vmand %vm1212_vm7, %vm1229_vm9 }
  0x50   : > { %2694 = vmatpush1.bf16.msra.mxu0 %v10432_v7  ;;  %vm12054_vm7 = vmand %vm1244_vm10, %vm1267_vm11 }
  0x51   : > { %2695 = vmatprep.subr.bf16.mxu0 %v10440_v10  ;;  %vm12060_vm9 = vmand %vm1320_vm15, %vm1321_vm12 }
  0x52   : > { %2763 = vmatpush1.bf16.msra.mxu1 %v10477_v37  ;;  %vm12070_vm10 = vmand %vm1320_vm15, %vm1332_vm1  ;;  %vm3269_vm15 = vsmask.f32 4352 }
  0x53   : > { %2764 = vmatprep.subr.bf16.mxu1 %v10485_v40  ;;  %vm12078_vm11 = vmand %vm1362_vm2, %vm1245_vm8  ;;  %vm3268_vm8 = vcmask 1044484  }
  0x54   : > { %2696 = vmatpush1.bf16.msra.mxu0 %v10438_v11  ;;  %vm12088_vm12 = vmand %vm1458_vm4, %vm1459_vm6 }
  0x55   : > { %2697 = vmatprep.subr.bf16.mxu0 %v10446_v14  ;;  %vm12416_vm1 = vmand %vm3268_vm8, %vm3269_vm15 }
  0x56   : > { %2765 = vmatpush1.bf16.msra.mxu1 %v10483_v42  ;;  %vm3012_vm2 = vmor %vm12032_vm14, %vm11822_vm3 }
  0x57   : > { %2766 = vmatprep.subr.bf16.mxu1 %v10491_v44  ;;  %vm3027_vm4 = vmor %vm12054_vm7, %vm12016_vm5 }
  0x58   : > { %2698 = vmatpush1.bf16.msra.mxu0 %v10444_v15  ;;  %vm3047_vm6 = vmor %vm12060_vm9, %vm12026_vm13 }
  0x59   : > { %2699 = vmatprep.subr.bf16.mxu0 %v10452_v19 }
  0x5a   : > { %2767 = vmatpush1.bf16.msra.mxu1 %v10489_v46 }
  0x5b   : > { %2768 = vmatprep.subr.bf16.mxu1 %v10497_v48 }
  0x5c   : > { %2700 = vmatpush1.bf16.msra.mxu0 %v10450_v18 }
  0x5d   : > { %2701 = vmatprep.subr.bf16.mxu0 %v10458_v22 }
  0x5e   : > { %2769 = vmatpush1.bf16.msra.mxu1 %v10495_v50 }
  0x5f   : > { %2770 = vmatprep.subr.bf16.mxu1 %v10503_v54 }
  0x60   : > { %2702 = vmatpush1.bf16.msra.mxu0 %v10456_v23 }
  0x61   : > { %2703 = vmatprep.subr.bf16.mxu0 %v10464_v26 }
  0x62   : > { %2771 = vmatpush1.bf16.msra.mxu1 %v10501_v56 }
  0x63   : > { %2772 = vmatprep.subr.bf16.mxu1 %v10510_v58 }
  0x64   : > { %2704 = vmatpush1.bf16.msra.mxu0 %v10462_v27 }
  0x65   : > { %2705 = vmatprep.subr.bf16.mxu0 %v10470_v30 }
  0x66   : > { %2773 = vmatpush1.bf16.msra.mxu1 %v10508_v59 }
  0x67   : > { %2795 = vmatprep.subr.bf16.mxu1 %v10516_v62 }
  0x68   : > { %2706 = vmatpush1.bf16.msra.mxu0 %v10468_v31 }
  0x69   : > { %2707 = vmatprep.subr.bf16.mxu0 %v10476_v34 }
  0x6c   : > { %2708 = vmatpush1.bf16.msra.mxu0 %v10474_v35 }
  0x6d   : > { %2709 = vmatprep.subr.bf16.mxu0 %v10482_v38 }
  0x70   : > { %2710 = vmatpush1.bf16.msra.mxu0 %v10480_v39 }
  0x71   : > { %2711 = vmatprep.subr.bf16.mxu0 %v10488_v41 }
  0x74   : > { %2712 = vmatpush1.bf16.msra.mxu0 %v10486_v43 }
  0x75   : > { %2713 = vmatprep.subr.bf16.mxu0 %v10494_v45 }
  0x78   : > { %2714 = vmatpush1.bf16.msra.mxu0 %v10492_v47 }
  0x79   : > { %2715 = vmatprep.subr.bf16.mxu0 %v10500_v49 }
  0x7c   : > { %2716 = vmatpush1.bf16.msra.mxu0 %v10498_v52 }
  0x7d   : > { %2717 = vmatprep.subr.bf16.mxu0 %v10506_v55 }
  0x80   : > { %2718 = vmatpush1.bf16.msra.mxu0 %v10504_v57 }
  0x81   : > { %2719 = vmatprep.subr.bf16.mxu0 %v10513_v60 }
  0x84   : > { %2720 = vmatpush1.bf16.msra.mxu0 %v10511_v61 }
  0xfa   : > { %v9977_v4 = vpop.f32.mrb[0].mxu0 }
  0xfb   : > { %v10017_v5 = vpop.f32.mrb[0].mxu1  ;;  %v9978_v6 = vpop.f32.mrb[1].mxu0 }
  0xfc   : > { %v9979_v7 = vadd.f32 %v9978_v6, %v9977_v4  ;;  %v10018_v8 = vpop.f32.mrb[1].mxu1  ;;  %v9980_v9 = vpop.f32.mrb[2].mxu0 }
  0xfd   : > { %v10019_v10 = vadd.f32 %v10018_v8, %v10017_v5  ;;  %v10020_v11 = vpop.f32.mrb[2].mxu1  ;;  %v9981_v12 = vpop.f32.mrb[3].mxu0 }
  0xfe   : > { %v9982_v13 = vadd.f32 %v9981_v12, %v9980_v9  ;;  %v10021_v14 = vpop.f32.mrb[3].mxu1 }
  0xff   : > { %v10022_v15 = vadd.f32 %v10021_v14, %v10020_v11  ;;  %v970_v16 = vadd.f32 %v10019_v10, %v9979_v7 }
 0x101   : > { %v973_v17 = vadd.f32 %v10022_v15, %v9982_v13  ;;  %v9093_v15 = vld [vmem:[%s14620_s2] ss:$0 sm:$0xff] }
 0x102   : > { %v9983_v18 = vpop.f32.mrb[4].mxu0 }
 0x103   : > { %v10023_v19 = vpop.f32.mrb[4].mxu1  ;;  %v9984_v20 = vpop.f32.mrb[5].mxu0 }
 0x104   : > { %v9985_v21 = vadd.f32 %v9984_v20, %v9983_v18  ;;  %v10024_v22 = vpop.f32.mrb[5].mxu1  ;;  %v9986_v23 = vpop.f32.mrb[6].mxu0 }
 0x105   : > { %v10025_v24 = vadd.f32 %v10024_v22, %v10023_v19  ;;  %v10026_v25 = vpop.f32.mrb[6].mxu1  ;;  %v9987_v26 = vpop.f32.mrb[7].mxu0 }
 0x106   : > { %v9988_v27 = vadd.f32 %v9987_v26, %v9986_v23  ;;  %v10027_v28 = vpop.f32.mrb[7].mxu1 }
 0x107   : > { %v10028_v29 = vadd.f32 %v10027_v28, %v10026_v25  ;;  %v978_v30 = vadd.f32 %v10025_v24, %v9985_v21  ;;  %v1179_v25 = vld [vmem:[#allocation4 + $0x18] sm:$0x1] }
 0x109   : > { %v981_v31 = vadd.f32 %v10028_v29, %v9988_v27  ;;  %v1186_v27 = vld [vmem:[#allocation4 + $0x10] sm:$0x1] }
 0x10a   : > { %v9989_v32 = vpop.f32.mrb[8].mxu0 }
 0x10b   : > { %v10029_v33 = vpop.f32.mrb[8].mxu1  ;;  %v9990_v34 = vpop.f32.mrb[9].mxu0 }
 0x10c   : > { %v9991_v35 = vadd.f32 %v9990_v34, %v9989_v32  ;;  %v10030_v36 = vpop.f32.mrb[9].mxu1  ;;  %v9992_v37 = vpop.f32.mrb[10].mxu0 }
 0x10d   : > { %v10031_v38 = vadd.f32 %v10030_v36, %v10029_v33  ;;  %v10032_v39 = vpop.f32.mrb[10].mxu1  ;;  %v9993_v40 = vpop.f32.mrb[11].mxu0  ;;  %v1215_v33 = vld [vmem:[#allocation4 + $0x10] sm:$0x2] }
 0x10e   : > { %v9994_v41 = vadd.f32 %v9993_v40, %v9992_v37  ;;  %v10033_v42 = vpop.f32.mrb[11].mxu1  ;;  %v1231_v40 = vld [vmem:[#allocation4 + $0x8] sm:$0x2] }
 0x10f   : > { %v10034_v43 = vadd.f32 %v10033_v42, %v10032_v39  ;;  %v986_v44 = vadd.f32 %v10031_v38, %v9991_v35  ;;  %v1247_v38 = vld [vmem:[#allocation4] sm:$0x4]  ;;  %v1257_v42 = vld [vmem:[#allocation4 + $0x8] sm:$0x4] }
 0x111   : > { %v989_v45 = vadd.f32 %v10034_v43, %v9994_v41 }
 0x112   : > { %v9995_v46 = vpop.f32.mrb[12].mxu0 }
 0x113   : > { %v10035_v47 = vpop.f32.mrb[12].mxu1  ;;  %v9996_v48 = vpop.f32.mrb[13].mxu0 }
 0x114   : > { %v9997_v49 = vadd.f32 %v9996_v48, %v9995_v46  ;;  %v10036_v50 = vpop.f32.mrb[13].mxu1  ;;  %v9998_v51 = vpop.f32.mrb[14].mxu0 }
 0x115   : > { %v10037_v52 = vadd.f32 %v10036_v50, %v10035_v47  ;;  %v10038_v53 = vpop.f32.mrb[14].mxu1  ;;  %v9999_v54 = vpop.f32.mrb[15].mxu0 }
 0x116   : > { %v10000_v55 = vadd.f32 %v9999_v54, %v9998_v51  ;;  %v10039_v56 = vpop.f32.mrb[15].mxu1 }
 0x117   : > { %v10040_v57 = vadd.f32 %v10039_v56, %v10038_v53  ;;  %v994_v58 = vadd.f32 %v10037_v52, %v9997_v49 }
 0x119   : > { %v997_v59 = vadd.f32 %v10040_v57, %v10000_v55 }
 0x11a   : > { %v10121_v60 = vpop.f32.mrb[16].mxu0 }
 0x11b   : > { %v1043_v61 = vadd.f32 %v10121_v60, %v978_v30  ;;  %v1034_v62 = vpop.f32.mrb[17].mxu0  ;;  %v1302_v60 = vld [vmem:[#allocation4 + $0x18] sm:$0x4] }
 0x11c   : > { %v1035_v63 = vadd.f32 %v1034_v62, %v970_v16  ;;  %v10122_v1 = vpop.f32.mrb[18].mxu0 }
 0x11d   : > { %v1046_v2 = vadd.f32 %v10122_v1, %v981_v31  ;;  %v1037_v3 = vpop.f32.mrb[19].mxu0 }
 0x11e   : > { %v1154_v4 = vmax.f32 %v1035_v63, %v1043_v61  ;;  %v1038_v5 = vadd.f32 %v1037_v3, %v973_v17  ;;  %v1293_v63 = vld [vmem:[#allocation4 + $0x10] sm:$0x4]  ;;  %v1323_v3 = vld [vmem:[#allocation4 + $0x8] sm:$0x8] }
 0x120   : > { %v1155_v6 = vmax.f32 %v1038_v5, %v1046_v2 }
 0x122   : > { %v10125_v7 = vpop.f32.mrb[20].mxu0 }
 0x123   : > { %v1059_v8 = vadd.f32 %v10125_v7, %v994_v58  ;;  %v1050_v9 = vpop.f32.mrb[21].mxu0  ;;  %v1281_v58 = vld [vmem:[#allocation4 + $0x18] sm:$0x2] }
 0x124   : > { %v1051_v10 = vadd.f32 %v1050_v9, %v986_v44  ;;  %v10126_v11 = vpop.f32.mrb[22].mxu0 }
 0x125   : > { %v1062_v12 = vadd.f32 %v10126_v11, %v997_v59  ;;  %v1053_v13 = vpop.f32.mrb[23].mxu0  ;;  %v1334_v11 = vld [vmem:[#allocation4] sm:$0x8] }
 0x126   : > { %v1160_v14 = vmax.f32 %v1051_v10, %v1059_v8  ;;  %v1054_v18 = vadd.f32 %v1053_v13, %v989_v45  ;;  %v3483_v10 = vld [vmem:[#allocation9 + $0x90] sm:$0x1] }
 0x128   : > { %v1162_v16 = vmax.f32 %v1154_v4, %v1160_v14  ;;  %v1161_v19 = vmax.f32 %v1054_v18, %v1062_v12  ;;  %v1368_v12 = vld [vmem:[#allocation5 + $0x8] sm:$0x7] }
 0x12a   : > { %v1171_v20 = vadd.f32 %v9093_v15, %v1162_v16  ;;  %v1163_v21 = vmax.f32 %v1155_v6, %v1161_v19 }
 0x12c   : > { %v1172_v22 = vadd.f32 %v9093_v15, %v1163_v21  ;;  %v1173_v17 = vmax.f32 %v1171_v20, 0.0 }
 0x12e   : > { %v1174_v23 = vmax.f32 %v1172_v22, 0.0 }
 0x130   : > { %v1175_v24 = vpack.c.bf16 %v1174_v23, %v1173_v17  ;;  %v10559_v17 = vld [vmem:[%s14621_s3 + $0x2b0] ss:$8 sps:$4 sm:$0xff]  }
 0x132   : > { %1176 = vst [vmem:[#allocation3] sm:$0xff] %v1175_v24 }
 0x139   : > { %v1177_v28 = vld [vmem:[#allocation3] sm:$0x1]  ;;  %v10418_v54 = vld [vmem:[#allocation3 + $0x4] ss:$0 sps:$4 sm:$0x11]  }
 0x13a   : > { %v1182_v29 = vld [vmem:[#allocation3] sm:$0x1]  ;;  %v1180_v30 = vsel %vm11822_vm3, %v1177_v28, %v1179_v25  ;;  %v10419_v59 = vld [vmem:[#allocation3 + $0x4] ss:$0 sps:$4 sm:$0x11]   ;;  %v1277_v62 = vshll.u32 %v10418_v54, 16 }
 0x13b   : > { %v1187_v31 = vsel %vm12016_vm5, %v1182_v29, %v1186_v27  ;;  %v10412_v32 = vld [vmem:[#allocation3] ss:$0 sps:$4 sm:$0x22]   ;;  %1181 = vst [vmem:[#allocation4 + $0x18] sm:$0x1] %v1180_v30  ;;  %v1289_v2 = vshrl.u32 %v10419_v59, 16 }
 0x13c   : > { %1188 = vst [vmem:[#allocation4 + $0x10] sm:$0x1] %v1187_v31  ;;  %v10413_v34 = vld [vmem:[#allocation3] ss:$0 sps:$4 sm:$0x22]   ;;  %v1194_v35 = vshll.u32 %v10412_v32, 16 }
 0x13d   : > { %v10414_v37 = vld [vmem:[#allocation3] ss:$0 sps:$4 sm:$0x44]   ;;  %v1207_v39 = vshrl.u32 %v10413_v34, 16  ;;  %v1279_v5 = vrot.slane %v1277_v62, 7  ;;  %v1291_v9 = vrot.slane %v1289_v2, 6 }
 0x13e   : > { %v10415_v41 = vld [vmem:[#allocation3] ss:$0 sps:$4 sm:$0x44]   ;;  %v1223_v43 = vshll.u32 %v10414_v37, 16  ;;  %v9095_v52 = vrot.slane %v1194_v35, 9 }
 0x13f   : > { %v10416_v45 = vld [vmem:[#allocation3] ss:$0 sps:$4 sm:$0x88]   ;;  %v1216_v46 = vsel %vm12026_vm13, %v1207_v39, %v1215_v33  ;;  %v1239_v48 = vshrl.u32 %v10415_v41, 16  ;;  %v1282_v13 = vsel %vm12040_vm0, %v1279_v5, %v1281_v58  ;;  %v1294_v19 = vsel %vm12032_vm14, %v1291_v9, %v1293_v63  ;;  %v1358_v27 = vld [vmem:[#allocation4 + $0x4] sm:$0x1] }
 0x140   : > { %1217 = vst [vmem:[#allocation4 + $0x10] sm:$0x2] %v1216_v46  ;;  %v9099_v49 = vrot.slane %v1223_v43, 9  ;;  %v9103_v50 = vrot.slane %v10416_v45, 9  ;;  %1283 = vst [vmem:[#allocation4 + $0x18] sm:$0x2] %v1282_v13 }
 0x141   : > { %v10417_v51 = vld [vmem:[#allocation3] ss:$0 sps:$4 sm:$0x88]   ;;  %v1248_v53 = vsel %vm12032_vm14, %v1239_v48, %v1247_v38  ;;  %v10420_v1 = vld [vmem:[#allocation3 + $0x4] ss:$0 sps:$4 sm:$0x22]  }
 0x142   : > { %v1199_v55 = vld [vmem:[#allocation4 + $0x18] sm:$0x1]  ;;  %v1232_v56 = vsel %vm12040_vm0, %v9099_v49, %v1231_v40  ;;  %1249 = vst [vmem:[#allocation4] sm:$0x4] %v1248_v53  ;;  %v1258_v57 = vsel %vm12032_vm14, %v9103_v50, %v1257_v42  ;;  %v1300_v6 = vrot.slane %v10420_v1, 7  ;;  %v9105_v8 = vrot.slane %v10417_v51, 9 }
 0x143   : > { %v1200_v61 = vsel %vm12016_vm5, %v9095_v52, %v1199_v55  ;;  %1233 = vst [vmem:[#allocation4 + $0x8] sm:$0x2] %v1232_v56  ;;  %1259 = vst [vmem:[#allocation4 + $0x8] sm:$0x4] %v1258_v57  ;;  %v1461_v28 = vld [vmem:[#allocation5] sm:$0x70] }
 0x144   : > { %1201 = vst [vmem:[#allocation4 + $0x18] sm:$0x1] %v1200_v61  ;;  %v10422_v7 = vld [vmem:[#allocation3 + $0x4] ss:$0 sps:$4 sm:$0x44]   ;;  %v1303_v14 = vsel %vm12032_vm14, %v1300_v6, %v1302_v60  ;;  %vm3066_vm5 = vmor %vm12070_vm10, %vm12040_vm0  ;;  %vm8970_vm13 = vcmask 130048  }
 0x145   : > { %v1318_v15 = vrot.slane %v10422_v7, 7  ;;  %v10423_v18 = vld [vmem:[#allocation3 + $0x4] ss:$0 sps:$4 sm:$0x44]   ;;  %1304 = vst [vmem:[#allocation4 + $0x18] sm:$0x4] %v1303_v14 }
 0x146   : > { %v10421_v20 = vld [vmem:[#allocation3 + $0x4] ss:$0 sps:$4 sm:$0x22]   ;;  %1295 = vst [vmem:[#allocation4 + $0x10] sm:$0x4] %v1294_v19  ;;  %v1330_v25 = vrot.slane %v10423_v18, 7 }
 0x147   : > { %v10424_v21 = vld [vmem:[#allocation3 + $0x4] ss:$0 sps:$4 sm:$0x88]   ;;  %v1324_v24 = vsel %vm12060_vm9, %v1318_v15, %v1323_v3  ;;  %v10519_v35 = vld [vmem:[#allocation4 + $0x8] ss:$0 sps:$4 sm:$0x77]  }
 0x148   : > { %v10425_v22 = vld [vmem:[#allocation3 + $0x4] ss:$0 sps:$4 sm:$0x88]   ;;  %1325 = vst [vmem:[#allocation4 + $0x8] sm:$0x8] %v1324_v24  ;;  %v1335_v33 = vsel %vm12070_vm10, %v1330_v25, %v1334_v11  ;;  %v1485_v39 = vshrl.u32 %v10519_v35, 16 }
 0x149   : > { %v1269_v23 = vld [vmem:[#allocation4] sm:$0x4]  ;;  %v1353_v30 = vshrl.u32 %v10425_v22, 16  ;;  %1336 = vst [vmem:[#allocation4] sm:$0x8] %v1335_v33  ;;  %v1488_v40 = vshll.u32 %v10519_v35, 16 }
 0x14a   : > { %v1270_v29 = vsel %vm12054_vm7, %v9105_v8, %v1269_v23  ;;  %v1367_v32 = vld [vmem:[#allocation4 + $0x8] sm:$0x7]  ;;  %v1309_v41 = vrot.slane %v10421_v20, 7  ;;  %v1342_v42 = vshll.u32 %v10424_v21, 16  ;;  %v1501_v45 = vld [vmem:[#allocation5 + $0x18] sm:$0x70] }
 0x14b   : > { %1271 = vst [vmem:[#allocation4] sm:$0x4] %v1270_v29  ;;  %v1369_v34 = vsel %vm12078_vm11, %v1367_v32, %v1368_v12  ;;  %v9114_v37 = vrot.slane %v1353_v30, 11  ;;  %v10520_v38 = vld [vmem:[#allocation4 + $0x8] ss:$0 sps:$4 sm:$0x77]  }
 0x14c   : > { %1370 = vst [vmem:[#allocation5 + $0x8] sm:$0x7] %v1369_v34  ;;  %v1462_v46 = vsel %vm12088_vm12, %v10520_v38, %v1461_v28  ;;  %v1581_v48 = vld [vmem:[#allocation5 + $0x50] sm:$0x7]  ;;  %v1487_v50 = vrot.slane %v1485_v39, 4  ;;  %v1490_v53 = vrot.slane %v1488_v40, 5 }
 0x14d   : > { %v1359_v43 = vsel %vm11822_vm3, %v9114_v37, %v1358_v27  ;;  %v10507_v49 = vld [vmem:[#allocation4 + $0x18] ss:$0 sps:$4 sm:$0x77]   ;;  %v1493_v51 = vld [vmem:[#allocation5 + $0x10] sm:$0x70] }
 0x14e   : > { %1360 = vst [vmem:[#allocation4 + $0x4] sm:$0x1] %v1359_v43  ;;  %1463 = vst [vmem:[#allocation5] sm:$0x70] %v1462_v46  ;;  %v1311_v52 = vld [vmem:[#allocation4 + $0x10] sm:$0x4]  ;;  %v1502_v58 = vsel %vm12088_vm12, %v10507_v49, %v1501_v45  ;;  %v1491_v62 = vor.u32 %v1490_v53, %v1487_v50 }
 0x14f   : > { %v1364_v54 = vld [vmem:[#allocation5] sm:$0x7]  ;;  %v1580_v55 = vld [vmem:[#allocation4 + $0x18] sm:$0x7]  ;;  %v1312_v56 = vsel %vm12054_vm7, %v1309_v41, %v1311_v52  ;;  %v1345_v57 = vld [vmem:[#allocation4 + $0x8] sm:$0x8] }
 0x150   : > { %v1582_v59 = vsel %vm12078_vm11, %v1580_v55, %v1581_v48  ;;  %1313 = vst [vmem:[#allocation4 + $0x10] sm:$0x4] %v1312_v56  ;;  %v1346_v60 = vsel %vm12070_vm10, %v1342_v42, %v1345_v57  ;;  %1503 = vst [vmem:[#allocation5 + $0x18] sm:$0x70] %v1502_v58  ;;  %v1494_v3 = vsel %vm12088_vm12, %v1491_v62, %v1493_v51  ;;  %v1692_v6 = vld [vmem:[#allocation5 + $0x48] sm:$0x70] }
 0x151   : > { %v10517_v61 = vld [vmem:[#allocation4] ss:$0 sps:$4 sm:$0x77]   ;;  %1583 = vst [vmem:[#allocation5 + $0x50] sm:$0x7] %v1582_v59 }
 0x152   : > { %1347 = vst [vmem:[#allocation4 + $0x8] sm:$0x8] %v1346_v60  ;;  %v10518_v63 = vld [vmem:[#allocation4] ss:$0 sps:$4 sm:$0x77]   ;;  %v1469_v1 = vshrl.u32 %v10517_v61, 16 }
 0x153   : > { %v1472_v2 = vshll.u32 %v10517_v61, 16  ;;  %v1361_v5 = vld [vmem:[#allocation4] sm:$0x7]  ;;  %v1387_v7 = vld [vmem:[#allocation5 + $0x18] sm:$0x7]  ;;  %v1376_v9 = vshrl.u32 %v10518_v63, 16 }
 0x154   : > { %v1477_v8 = vld [vmem:[#allocation5 + $0x8] sm:$0x70]  ;;  %v1378_v11 = vshll.u32 %v10518_v63, 16  ;;  %1495 = vst [vmem:[#allocation5 + $0x10] sm:$0x70] %v1494_v3  ;;  %v1365_v12 = vsel %vm12078_vm11, %v1361_v5, %v1364_v54  ;;  %v1471_v15 = vrot.slane %v1469_v1, 4 }
 0x155   : > { %v10521_v13 = vld [vmem:[#allocation4] ss:$0 sps:$4 sm:$0xee]   ;;  %v1474_v18 = vrot.slane %v1472_v2, 5  ;;  %v1383_v19 = vld [vmem:[#allocation5 + $0x10] sm:$0x7] }
 0x156   : > { %v1391_v14 = vld [vmem:[#allocation5 + $0x20] sm:$0x7]  ;;  %1366 = vst [vmem:[#allocation5] sm:$0x7] %v1365_v12  ;;  %v1380_v21 = vrot.slane %v1378_v11, 1  ;;  %v1604_v22 = vshrl.u32 %v10521_v13, 16 }
 0x157   : > { %v10531_v20 = vld [vmem:[#allocation4 + $0x18] ss:$0 sps:$4 sm:$0x77]   ;;  %v1607_v23 = vshll.u32 %v10521_v13, 16  ;;  %v1475_v25 = vor.u32 %v1474_v18, %v1471_v15  ;;  %v1612_v27 = vld [vmem:[#allocation5 + $0x60] sm:$0x7] }
 0x158   : > { %v10532_v24 = vld [vmem:[#allocation4 + $0x18] ss:$0 sps:$4 sm:$0x77]   ;;  %v1716_v28 = vshrl.u32 %v10531_v20, 16  ;;  %v1719_v29 = vshll.u32 %v10531_v20, 16  ;;  %v1381_v33 = vor.u32 %v1380_v21, %v1376_v9  ;;  %v1606_v34 = vrot.slane %v1604_v22, 1 }
 0x159   : > { %v1390_v30 = vld [vmem:[#allocation4 + $0x18] sm:$0x7]  ;;  %v1386_v32 = vld [vmem:[#allocation4 + $0x10] sm:$0x7]  ;;  %v1609_v35 = vrot.slane %v1607_v23, 2  ;;  %v1693_v37 = vsel %vm12088_vm12, %v10532_v24, %v1692_v6  ;;  %v1478_v39 = vsel %vm12088_vm12, %v1475_v25, %v1477_v8 }
 0x15a   : > { %v1388_v38 = vsel %vm12078_vm11, %v1386_v32, %v1387_v7  ;;  %v10522_v40 = vld [vmem:[#allocation4 + $0x8] ss:$0 sps:$4 sm:$0xee]   ;;  %v1718_v41 = vrot.slane %v1716_v28, 4  ;;  %v1724_v42 = vld [vmem:[#allocation5 + $0x58] sm:$0x70]  ;;  %v1392_v45 = vsel %vm12078_vm11, %v1390_v30, %v1391_v14  ;;  %v1384_v46 = vsel %vm12078_vm11, %v1381_v33, %v1383_v19 }
 0x15b   : > { %v1577_v43 = vld [vmem:[#allocation5 + $0x48] sm:$0x7]  ;;  %1694 = vst [vmem:[#allocation5 + $0x48] sm:$0x70] %v1693_v37  ;;  %1389 = vst [vmem:[#allocation5 + $0x18] sm:$0x7] %v1388_v38  ;;  %v1610_v48 = vor.u32 %v1609_v35, %v1606_v34 }
 0x15c   : > { %1479 = vst [vmem:[#allocation5 + $0x8] sm:$0x70] %v1478_v39  ;;  %v10523_v49 = vld [vmem:[#allocation4 + $0x10] ss:$0 sps:$4 sm:$0x77]   ;;  %v1721_v50 = vrot.slane %v1719_v29, 5 }
 0x15d   : > { %1393 = vst [vmem:[#allocation5 + $0x20] sm:$0x7] %v1392_v45  ;;  %1385 = vst [vmem:[#allocation5 + $0x10] sm:$0x7] %v1384_v46  ;;  %v1732_v51 = vshrl.u32 %v10522_v40, 16  ;;  %v1735_v52 = vshll.u32 %v10522_v40, 16  ;;  %v1613_v54 = vsel %vm12078_vm11, %v1610_v48, %v1612_v27 }
 0x15e   : > { %v10530_v53 = vld [vmem:[#allocation4 + $0x10] ss:$0 sps:$4 sm:$0x77]   ;;  %v1740_v55 = vld [vmem:[#allocation5 + $0x60] sm:$0x70]  ;;  %v1700_v56 = vshrl.u32 %v10523_v49, 16  ;;  %v1722_v58 = vor.u32 %v1721_v50, %v1718_v41 }
 0x15f   : > { %v1703_v57 = vshll.u32 %v10523_v49, 16  ;;  %v1576_v59 = vld [vmem:[#allocation4 + $0x10] sm:$0x7]  ;;  %1614 = vst [vmem:[#allocation5 + $0x60] sm:$0x7] %v1613_v54  ;;  %v1734_v60 = vrot.slane %v1732_v51, 5 }
 0x160   : > { %v1737_v61 = vrot.slane %v1735_v52, 6  ;;  %v1708_v62 = vld [vmem:[#allocation5 + $0x50] sm:$0x70]  ;;  %v1589_v63 = vshrl.u32 %v10530_v53, 16  ;;  %v1591_v1 = vshll.u32 %v10530_v53, 16  ;;  %v1702_v3 = vrot.slane %v1700_v56, 4 }
 0x161   : > { %v10514_v2 = vld [vmem:[%s14621_s3 + $0x200] ss:$8 sps:$4 sm:$0xff]   ;;  %v1705_v5 = vrot.slane %v1703_v57, 5  ;;  %v1725_v7 = vsel %vm12088_vm12, %v1722_v58, %v1724_v42  ;;  %v1578_v8 = vsel %vm12078_vm11, %v1576_v59, %v1577_v43  ;;  %v10533_v9 = vld [vmem:[#allocation4 + $0x10] ss:$0 sps:$4 sm:$0x77]  }
 0x162   : > { %v1596_v6 = vld [vmem:[#allocation5 + $0x58] sm:$0x7]  ;;  %v1738_v11 = vor.u32 %v1737_v61, %v1734_v60  ;;  %v10526_v12 = vld [vmem:[%s14621_s3 + $0x214] ss:$8 sps:$4 sm:$0xff]   ;;  %v1593_v13 = vrot.slane %v1591_v1, 1  ;;  %v1807_v15 = vld [vmem:[#allocation5] sm:$0xff] }
 0x163   : > { %1726 = vst [vmem:[#allocation5 + $0x58] sm:$0x70] %v1725_v7  ;;  %1579 = vst [vmem:[#allocation5 + $0x48] sm:$0x7] %v1578_v8  ;;  %v1706_v18 = vor.u32 %v1705_v5, %v1702_v3  ;;  %v1399_v19 = vshrl.u32 %v10533_v9, 16  ;;  %v1401_v20 = vshll.u32 %v10533_v9, 16 }
 0x164   : > { %v10534_v14 = vld [vmem:[#allocation4 + $0x18] ss:$0 sps:$4 sm:$0x77]   ;;  %v10574_v21 = vld [vmem:[#allocation4 + $0x10] ss:$0 sps:$4 sm:$0x77]   ;;  %v1741_v24 = vsel %vm12088_vm12, %v1738_v11, %v1740_v55  ;;  %v1594_v25 = vor.u32 %v1593_v13, %v1589_v63 }
 0x165   : > { %v1810_v22 = vld [vmem:[#allocation5 + $0x18] sm:$0xff]  ;;  %v1808_v23 = vld [vmem:[#allocation5 + $0x8] sm:$0xff]  ;;  %v1525_v28 = vshrl.u32 %v10534_v14, 16  ;;  %v1528_v29 = vshll.u32 %v10534_v14, 16  ;;  %v1809_v30 = vld [vmem:[#allocation5 + $0x10] sm:$0xff]  ;;  %v1709_v32 = vsel %vm12088_vm12, %v1706_v18, %v1708_v62  ;;  %v1403_v34 = vrot.slane %v1401_v20, 1 }
 0x166   : > { %v1406_v27 = vld [vmem:[#allocation5 + $0x28] sm:$0x7]  ;;  %2774 = vmatprep.mubr.bf16.mxu1 %v1810_v22  ;;  %2721 = vmatprep.mubr.bf16.mxu0 %v1808_v23  ;;  %1742 = vst [vmem:[#allocation5 + $0x60] sm:$0x70] %v1741_v24  ;;  %v1533_v35 = vld [vmem:[#allocation5 + $0x28] sm:$0x70]  ;;  %v1597_v41 = vsel %vm12078_vm11, %v1594_v25, %v1596_v6 }
 0x167   : > { %v10524_v33 = vld [vmem:[%s14621_s3 + $0x210] ss:$8 sps:$4 sm:$0xff]   ;;  %v1509_v37 = vshrl.u32 %v10574_v21, 16  ;;  %v1512_v38 = vshll.u32 %v10574_v21, 16  ;;  %2775 = vmatmul.mubr.bf16.vlgmr.msra.gmra.mrb[16].mxu1 %v1809_v30  ;;  %2722 = vmatmul.mubr.bf16.vlgmr.msra.gmra.mrb[24].mxu0 %v1807_v15  ;;  %1710 = vst [vmem:[#allocation5 + $0x50] sm:$0x70] %v1709_v32  ;;  %v1404_v49 = vor.u32 %v1403_v34, %v1399_v19 }
 0x168   : > { %v1640_v39 = vld [vmem:[#allocation5 + $0x70] sm:$0x7]  ;;  %v10529_v40 = vld [vmem:[%s14621_s3 + $0x224] ss:$8 sps:$4 sm:$0xff]   ;;  %v1527_v42 = vrot.slane %v1525_v28, 4  ;;  %v1530_v43 = vrot.slane %v1528_v29, 5  ;;  %2796 = vmatpush1.bf16.msra.mxu1 %v10514_v2 }
 0x169   : > { %v1517_v45 = vld [vmem:[#allocation5 + $0x20] sm:$0x70]  ;;  %v1764_v48 = vld [vmem:[#allocation5 + $0x70] sm:$0x70]  ;;  %1598 = vst [vmem:[#allocation5 + $0x58] sm:$0x7] %v1597_v41  ;;  %2797 = vmatprep.subr.bf16.mxu1 %v10526_v12  ;;  %v1407_v57 = vsel %vm12078_vm11, %v1404_v49, %v1406_v27 }
 0x16a   : > { %v10578_v46 = vld [vmem:[#allocation4] sm:$0x1c]   ;;  %v1511_v50 = vrot.slane %v1509_v37, 4  ;;  %v1514_v51 = vrot.slane %v1512_v38, 5  ;;  %v10579_v52 = vld [vmem:[#allocation4 + $0x8] sm:$0x1c]   ;;  %v1531_v53 = vor.u32 %v1530_v43, %v1527_v42 }
 0x16b   : > { %v1638_v54 = vrot.slane %v10578_v46, 2  ;;  %v10583_v55 = vld [vmem:[#allocation4 + $0x8] ss:$0 sps:$4 sm:$0xee]   ;;  %v1752_v56 = vld [vmem:[#allocation5 + $0x68] sm:$0x70] }
 0x16c   : > { %v1515_v58 = vor.u32 %v1514_v51, %v1511_v50  ;;  %v1762_v59 = vrot.slane %v10579_v52, 6  ;;  %v10584_v60 = vld [vmem:[#allocation4] sm:$0x1c]   ;;  %1408 = vst [vmem:[#allocation5 + $0x28] sm:$0x7] %v1407_v57  ;;  %v1534_v62 = vsel %vm12088_vm12, %v1531_v53, %v1533_v35  ;;  %v1620_v1 = vshrl.u32 %v10583_v55, 16  ;;  %2798 = vmatpush1.bf16.msra.mxu1 %v10524_v33 }
 0x16d   : > { %v10527_v61 = vld [vmem:[%s14621_s3 + $0x220] ss:$8 sps:$4 sm:$0xff]   ;;  %v1641_v63 = vsel %vm12078_vm11, %v1638_v54, %v1640_v39  ;;  %v1623_v2 = vshll.u32 %v10583_v55, 16  ;;  %1535 = vst [vmem:[#allocation5 + $0x28] sm:$0x70] %v1534_v62  ;;  %v1750_v8 = vrot.slane %v10584_v60, 6  ;;  %2799 = vmatprep.subr.bf16.mxu1 %v10529_v40 }
 0x16e   : > { %v10537_v3 = vld [vmem:[%s14621_s3 + $0x234] ss:$8 sps:$4 sm:$0xff]   ;;  %v1518_v5 = vsel %vm12088_vm12, %v1515_v58, %v1517_v45  ;;  %1642 = vst [vmem:[#allocation5 + $0x70] sm:$0x7] %v1641_v63  ;;  %v1765_v6 = vsel %vm12088_vm12, %v1762_v59, %v1764_v48  ;;  %v1628_v7 = vld [vmem:[#allocation5 + $0x68] sm:$0x7] }
 0x16f   : > { %v10588_v9 = vld [vmem:[#allocation4 + $0x8] ss:$0 sps:$4 sm:$0xee]   ;;  %v1819_v11 = vld [vmem:[#allocation5 + $0x60] sm:$0xff]  ;;  %1519 = vst [vmem:[#allocation5 + $0x20] sm:$0x70] %v1518_v5  ;;  %v1753_v18 = vsel %vm12088_vm12, %v1750_v8, %v1752_v56 }
 0x170   : > { %1766 = vst [vmem:[#allocation5 + $0x70] sm:$0x70] %v1765_v6  ;;  %v1622_v12 = vrot.slane %v1620_v1, 1  ;;  %v1625_v13 = vrot.slane %v1623_v2, 2  ;;  %v10589_v14 = vld [vmem:[#allocation4] sm:$0x1c]   ;;  %2784 = vmatprep.mubr.bf16.mxu1 %v1819_v11  ;;  %2800 = vmatpush1.bf16.msra.mxu1 %v10527_v61 }
 0x171   : > { %v1817_v15 = vld [vmem:[#allocation5 + $0x50] sm:$0xff]  ;;  %v1430_v19 = vshrl.u32 %v10588_v9, 16  ;;  %v1433_v20 = vshll.u32 %v10588_v9, 16  ;;  %v1561_v21 = vld [vmem:[#allocation5 + $0x38] sm:$0x70]  ;;  %v1816_v23 = vld [vmem:[#allocation5 + $0x48] sm:$0xff]  ;;  %2801 = vmatprep.subr.bf16.mxu1 %v10537_v3 }
 0x172   : > { %2731 = vmatprep.mubr.bf16.mxu0 %v1817_v15  ;;  %v1818_v22 = vld [vmem:[#allocation5 + $0x58] sm:$0xff]  ;;  %v1626_v24 = vor.u32 %v1625_v13, %v1622_v12  ;;  %1754 = vst [vmem:[#allocation5 + $0x68] sm:$0x70] %v1753_v18  ;;  %v1559_v25 = vrot.slane %v10589_v14, 6  ;;  %v10535_v29 = vld [vmem:[%s14621_s3 + $0x230] ss:$8 sps:$4 sm:$0xff]  }
 0x173   : > { %2785 = vmatmul.mubr.bf16.gmra.mrb[20].mxu1 %v1818_v22  ;;  %2732 = vmatmul.mubr.bf16.gmra.mrb[28].mxu0 %v1816_v23  ;;  %v1432_v27 = vrot.slane %v1430_v19, 1  ;;  %v1435_v28 = vrot.slane %v1433_v20, 2  ;;  %v1438_v32 = vld [vmem:[#allocation5 + $0x38] sm:$0x7]  ;;  %v10540_v34 = vld [vmem:[%s14621_s3 + $0x244] ss:$8 sps:$4 sm:$0xff]  }
 0x174   : > { %v1629_v30 = vsel %vm12078_vm11, %v1626_v24, %v1628_v7  ;;  %v1562_v33 = vsel %vm12088_vm12, %v1559_v25, %v1561_v21  ;;  %v1812_v37 = vld [vmem:[#allocation5 + $0x28] sm:$0xff]  ;;  %v10538_v38 = vld [vmem:[%s14621_s3 + $0x240] ss:$8 sps:$4 sm:$0xff]   ;;  %2802 = vmatpush1.bf16.msra.mxu1 %v10535_v29  ;;  %v10546_v48 = vld [vmem:[%s14621_s3 + $0x264] ss:$8 sps:$4 sm:$0xff]  }
 0x175   : > { %1630 = vst [vmem:[#allocation5 + $0x68] sm:$0x7] %v1629_v30  ;;  %v1436_v35 = vor.u32 %v1435_v28, %v1432_v27  ;;  %1563 = vst [vmem:[#allocation5 + $0x38] sm:$0x70] %v1562_v33  ;;  %2827 = vmatprep.mubr.bf16.mxu1 %v1812_v37  ;;  %2803 = vmatprep.subr.bf16.mxu1 %v10540_v34  ;;  %v10543_v41 = vld [vmem:[%s14621_s3 + $0x254] ss:$8 sps:$4 sm:$0xff]  }
 0x176   : > { %v10629_v40 = vld [vmem:[#allocation4] ss:$0 sps:$4 sm:$0xee]   ;;  %v10630_v42 = vld [vmem:[#allocation4 + $0x8] ss:$0 sps:$4 sm:$0xee]  }
 0x177   : > { %v1439_v39 = vsel %vm12078_vm11, %v1436_v35, %v1438_v32  ;;  %v10541_v43 = vld [vmem:[%s14621_s3 + $0x250] ss:$8 sps:$4 sm:$0xff]   ;;  %v1414_v45 = vshrl.u32 %v10629_v40, 16  ;;  %v1417_v46 = vshll.u32 %v10629_v40, 16  ;;  %v1541_v50 = vshrl.u32 %v10630_v42, 16 }
 0x178   : > { %1440 = vst [vmem:[#allocation5 + $0x38] sm:$0x7] %v1439_v39  ;;  %v1422_v49 = vld [vmem:[#allocation5 + $0x30] sm:$0x7]  ;;  %v1544_v51 = vshll.u32 %v10630_v42, 16  ;;  %2804 = vmatpush1.bf16.msra.mxu1 %v10538_v38 }
 0x179   : > { %v10634_v52 = vld [vmem:[#allocation4 + $0x18] ss:$0 sps:$4 sm:$0xee]   ;;  %v1416_v53 = vrot.slane %v1414_v45, 1  ;;  %v1419_v54 = vrot.slane %v1417_v46, 2  ;;  %2805 = vmatprep.subr.bf16.mxu1 %v10543_v41  ;;  %v1543_v56 = vrot.slane %v1541_v50, 5 }
 0x17a   : > { %v1549_v55 = vld [vmem:[#allocation5 + $0x30] sm:$0x70]  ;;  %v1546_v57 = vrot.slane %v1544_v51, 6  ;;  %v1664_v58 = vshrl.u32 %v10634_v52, 16  ;;  %v1667_v59 = vshll.u32 %v10634_v52, 16 }
 0x17b   : > { %v10635_v60 = vld [vmem:[#allocation4 + $0x10] sm:$0x1c]   ;;  %v10544_v61 = vld [vmem:[%s14621_s3 + $0x260] ss:$8 sps:$4 sm:$0xff]   ;;  %v1420_v62 = vor.u32 %v1419_v54, %v1416_v53  ;;  %v1792_v1 = vld [vmem:[#allocation5 + $0x80] sm:$0x70] }
 0x17c   : > { %v1672_v63 = vld [vmem:[#allocation5 + $0x80] sm:$0x7]  ;;  %v1547_v2 = vor.u32 %v1546_v57, %v1543_v56  ;;  %v1666_v3 = vrot.slane %v1664_v58, 1  ;;  %v1669_v5 = vrot.slane %v1667_v59, 2  ;;  %v1790_v6 = vrot.slane %v10635_v60, 6  ;;  %2806 = vmatpush1.bf16.msra.mxu1 %v10541_v43 }
 0x17d   : > { %v1423_v7 = vsel %vm12078_vm11, %v1420_v62, %v1422_v49  ;;  %v10639_v8 = vld [vmem:[#allocation4 + $0x10] ss:$0 sps:$4 sm:$0xee]   ;;  %v10640_v9 = vld [vmem:[#allocation4 + $0x18] ss:$0 sps:$4 sm:$0xee]   ;;  %2807 = vmatprep.subr.bf16.mxu1 %v10546_v48 }
 0x17e   : > { %v10549_v11 = vld [vmem:[%s14621_s3 + $0x274] ss:$8 sps:$4 sm:$0xff]   ;;  %1424 = vst [vmem:[#allocation5 + $0x30] sm:$0x7] %v1423_v7  ;;  %v1550_v12 = vsel %vm12088_vm12, %v1547_v2, %v1549_v55  ;;  %v1670_v13 = vor.u32 %v1669_v5, %v1666_v3  ;;  %v1793_v14 = vsel %vm12088_vm12, %v1790_v6, %v1792_v1  ;;  %v1648_v15 = vshrl.u32 %v10639_v8, 16 }
 0x17f   : > { %1551 = vst [vmem:[#allocation5 + $0x30] sm:$0x70] %v1550_v12  ;;  %1794 = vst [vmem:[#allocation5 + $0x80] sm:$0x70] %v1793_v14  ;;  %v1651_v18 = vshll.u32 %v10639_v8, 16  ;;  %v1772_v19 = vshrl.u32 %v10640_v9, 16 }
 0x180   : > { %v1775_v20 = vshll.u32 %v10640_v9, 16  ;;  %v1673_v21 = vsel %vm12078_vm11, %v1670_v13, %v1672_v63  ;;  %2808 = vmatpush1.bf16.msra.mxu1 %v10544_v61  ;;  %v10547_v22 = vld [vmem:[%s14621_s3 + $0x270] ss:$8 sps:$4 sm:$0xff]   ;;  %v1650_v23 = vrot.slane %v1648_v15, 1  ;;  %v10552_v28 = vld [vmem:[%s14621_s3 + $0x284] ss:$8 sps:$4 sm:$0xff]  }
 0x181   : > { %1674 = vst [vmem:[#allocation5 + $0x80] sm:$0x7] %v1673_v21  ;;  %v1653_v24 = vrot.slane %v1651_v18, 2  ;;  %v1774_v25 = vrot.slane %v1772_v19, 5  ;;  %2809 = vmatprep.subr.bf16.mxu1 %v10549_v11  ;;  %v1656_v29 = vld [vmem:[#allocation5 + $0x78] sm:$0x7] }
 0x182   : > { %v1777_v27 = vrot.slane %v1775_v20, 6  ;;  %v1780_v30 = vld [vmem:[#allocation5 + $0x78] sm:$0x70]  ;;  %v10550_v32 = vld [vmem:[%s14621_s3 + $0x280] ss:$8 sps:$4 sm:$0xff]   ;;  %v1821_v11 = vld [vmem:[#allocation5 + $0x70] sm:$0xff] }
 0x183   : > { %v1654_v33 = vor.u32 %v1653_v24, %v1650_v23  ;;  %v1450_v35 = vld [vmem:[#allocation5 + $0x40] sm:$0x7]  ;;  %v1573_v37 = vld [vmem:[#allocation5 + $0x40] sm:$0x70]  ;;  %v10555_v38 = vld [vmem:[%s14621_s3 + $0x294] ss:$8 sps:$4 sm:$0xff]  }
 0x184   : > { %v1778_v34 = vor.u32 %v1777_v27, %v1774_v25  ;;  %v10659_v39 = vld [vmem:[#allocation4] sm:$0x1c]   ;;  %v10660_v40 = vld [vmem:[#allocation4 + $0x8] sm:$0x1c]   ;;  %2810 = vmatpush1.bf16.msra.mxu1 %v10547_v22  ;;  %v10661_v45 = vld [vmem:[#allocation4 + $0x10] sm:$0x1c]  }
 0x185   : > { %v1684_v41 = vld [vmem:[#allocation5 + $0x88] sm:$0x7]  ;;  %v1657_v42 = vsel %vm12078_vm11, %v1654_v33, %v1656_v29  ;;  %v1804_v46 = vld [vmem:[#allocation5 + $0x88] sm:$0x70]  ;;  %2811 = vmatprep.subr.bf16.mxu1 %v10552_v28  ;;  %v1448_v48 = vrot.slane %v10659_v39, 2  ;;  %v1571_v49 = vrot.slane %v10660_v40, 6 }
 0x186   : > { %v1781_v43 = vsel %vm12088_vm12, %v1778_v34, %v1780_v30  ;;  %1658 = vst [vmem:[#allocation5 + $0x78] sm:$0x7] %v1657_v42  ;;  %v10662_v50 = vld [vmem:[#allocation4 + $0x18] sm:$0x1c]   ;;  %v10553_v51 = vld [vmem:[%s14621_s3 + $0x290] ss:$8 sps:$4 sm:$0xff]  }
 0x187   : > { %1782 = vst [vmem:[#allocation5 + $0x78] sm:$0x70] %v1781_v43  ;;  %v1682_v52 = vrot.slane %v10661_v45, 2  ;;  %v10558_v53 = vld [vmem:[%s14621_s3 + $0x2a4] ss:$8 sps:$4 sm:$0xff]   ;;  %v1451_v54 = vsel %vm12078_vm11, %v1448_v48, %v1450_v35  ;;  %v1574_v55 = vsel %vm12088_vm12, %v1571_v49, %v1573_v37  ;;  %v1802_v56 = vrot.slane %v10662_v50, 6 }
 0x188   : > { %2812 = vmatpush1.bf16.msra.mxu1 %v10550_v32  ;;  %1452 = vst [vmem:[#allocation5 + $0x40] sm:$0x7] %v1451_v54  ;;  %1575 = vst [vmem:[#allocation5 + $0x40] sm:$0x70] %v1574_v55  ;;  %v10556_v59 = vld [vmem:[%s14621_s3 + $0x2a0] ss:$8 sps:$4 sm:$0xff]  }
 0x189   : > { %v1685_v57 = vsel %vm12078_vm11, %v1682_v52, %v1684_v41  ;;  %2813 = vmatprep.subr.bf16.mxu1 %v10555_v38  ;;  %v1805_v58 = vsel %vm12088_vm12, %v1802_v56, %v1804_v46  ;;  %v10561_v60 = vld [vmem:[%s14621_s3 + $0x2b4] ss:$8 sps:$4 sm:$0xff]   ;;  %v10564_v31 = vld [vmem:[%s14621_s3 + $0x2c4] ss:$8 sps:$4 sm:$0xff]   ;;  %v10562_v61 = vld [vmem:[%s14621_s3 + $0x2c0] ss:$8 sps:$4 sm:$0xff]  }
 0x18a   : > { %1686 = vst [vmem:[#allocation5 + $0x88] sm:$0x7] %v1685_v57  ;;  %1806 = vst [vmem:[#allocation5 + $0x88] sm:$0x70] %v1805_v58  ;;  %v10567_v62 = vld [vmem:[%s14621_s3 + $0x2d4] ss:$8 sps:$4 sm:$0xff]  }
 0x18b   : > { %v10565_v63 = vld [vmem:[%s14621_s3 + $0x2d0] ss:$8 sps:$4 sm:$0xff]   ;;  %v10570_v1 = vld [vmem:[%s14621_s3 + $0x2e4] ss:$8 sps:$4 sm:$0xff]   ;;  %v10568_v2 = vld [vmem:[%s14621_s3 + $0x2e0] ss:$8 sps:$4 sm:$0xff]  }
 0x18c   : > { %2814 = vmatpush1.bf16.msra.mxu1 %v10553_v51  ;;  %v10573_v3 = vld [vmem:[%s14621_s3 + $0x2f4] ss:$8 sps:$4 sm:$0xff]   ;;  %v10571_v5 = vld [vmem:[%s14621_s3 + $0x2f0] ss:$8 sps:$4 sm:$0xff]   ;;  %v10577_v6 = vld [vmem:[%s14621_s3 + $0x304] ss:$8 sps:$4 sm:$0xff]  }
 0x18d   : > { %2815 = vmatprep.subr.bf16.mxu1 %v10558_v53  ;;  %v10575_v7 = vld [vmem:[%s14621_s3 + $0x300] ss:$8 sps:$4 sm:$0xff]   ;;  %v10582_v8 = vld [vmem:[%s14621_s3 + $0x314] ss:$8 sps:$4 sm:$0xff]   ;;  %v10580_v12 = vld [vmem:[%s14621_s3 + $0x310] ss:$8 sps:$4 sm:$0xff]  }
 0x18e   : > { %v1811_v9 = vld [vmem:[#allocation5 + $0x20] sm:$0xff]  ;;  %v10592_v15 = vld [vmem:[%s14621_s3 + $0x334] ss:$8 sps:$4 sm:$0xff]   ;;  %v1814_v19 = vld [vmem:[#allocation5 + $0x38] sm:$0xff] }
 0x18f   : > { %v10587_v13 = vld [vmem:[%s14621_s3 + $0x324] ss:$8 sps:$4 sm:$0xff]   ;;  %v10585_v14 = vld [vmem:[%s14621_s3 + $0x320] ss:$8 sps:$4 sm:$0xff]   ;;  %v1820_v18 = vld [vmem:[#allocation5 + $0x68] sm:$0xff] }
 0x190   : > { %2816 = vmatpush1.bf16.msra.mxu1 %v10556_v59  ;;  %v10590_v20 = vld [vmem:[%s14621_s3 + $0x330] ss:$8 sps:$4 sm:$0xff]   ;;  %v10595_v21 = vld [vmem:[%s14621_s3 + $0x344] ss:$8 sps:$4 sm:$0xff]   ;;  %v10593_v22 = vld [vmem:[%s14621_s3 + $0x340] ss:$8 sps:$4 sm:$0xff]  }
 0x191   : > { %2817 = vmatprep.subr.bf16.mxu1 %v10561_v60  ;;  %v10598_v23 = vld [vmem:[%s14621_s3 + $0x354] ss:$8 sps:$4 sm:$0xff]   ;;  %v10596_v24 = vld [vmem:[%s14621_s3 + $0x350] ss:$8 sps:$4 sm:$0xff]   ;;  %v10601_v25 = vld [vmem:[%s14621_s3 + $0x364] ss:$8 sps:$4 sm:$0xff]  }
 0x192   : > { %v10599_v27 = vld [vmem:[%s14621_s3 + $0x360] ss:$8 sps:$4 sm:$0xff]   ;;  %v10604_v28 = vld [vmem:[%s14621_s3 + $0x374] ss:$8 sps:$4 sm:$0xff]   ;;  %v10602_v29 = vld [vmem:[%s14621_s3 + $0x370] ss:$8 sps:$4 sm:$0xff]  }
 0x193   : > { %v10607_v30 = vld [vmem:[%s14621_s3 + $0x384] ss:$8 sps:$4 sm:$0xff]   ;;  %v10605_v32 = vld [vmem:[%s14621_s3 + $0x380] ss:$8 sps:$4 sm:$0xff]   ;;  %v10610_v33 = vld [vmem:[%s14621_s3 + $0x394] ss:$8 sps:$4 sm:$0xff]  }
 0x194   : > { %2818 = vmatpush1.bf16.msra.mxu1 %v10559_v17  ;;  %v10663_v34 = vld [vmem:[%s14623_s5] ss:$16 sps:$4 sm:$0xff]   ;;  %v10665_v35 = vld [vmem:[%s14623_s5 + $0x4] ss:$16 sps:$4 sm:$0xff]  }
 0x195   : > { %2819 = vmatprep.subr.bf16.mxu1 %v10564_v31  ;;  %v10671_v37 = vld [vmem:[%s14623_s5 + $0x24] ss:$16 sps:$4 sm:$0xff]   ;;  %7369 = vmatprep.subr.bf16.mxu0 %v10665_v35  ;;  %v10608_v38 = vld [vmem:[%s14621_s3 + $0x390] ss:$8 sps:$4 sm:$0xff]   ;;  %v10611_v42 = vld [vmem:[%s14621_s3 + $0x3a0] ss:$8 sps:$4 sm:$0xff]  }
 0x196   : > { %7370 = vmatpush1.bf16.msra.mxu0 %v10663_v34  ;;  %v10669_v39 = vld [vmem:[%s14623_s5 + $0x20] ss:$16 sps:$4 sm:$0xff]   ;;  %v10613_v40 = vld [vmem:[%s14621_s3 + $0x3a4] ss:$8 sps:$4 sm:$0xff]   ;;  %v10616_v45 = vld [vmem:[%s14621_s3 + $0x3b4] ss:$8 sps:$4 sm:$0xff]  }
 0x197   : > { %7371 = vmatprep.subr.bf16.mxu0 %v10671_v37  ;;  %v10677_v41 = vld [vmem:[%s14623_s5 + $0x44] ss:$16 sps:$4 sm:$0xff]   ;;  %v10675_v43 = vld [vmem:[%s14623_s5 + $0x40] ss:$16 sps:$4 sm:$0xff]  }
 0x198   : > { %2820 = vmatpush1.bf16.msra.mxu1 %v10562_v61  ;;  %v10683_v46 = vld [vmem:[%s14623_s5 + $0x64] ss:$16 sps:$4 sm:$0xff]   ;;  %v10614_v48 = vld [vmem:[%s14621_s3 + $0x3b0] ss:$8 sps:$4 sm:$0xff]   ;;  %v10617_v52 = vld [vmem:[%s14621_s3 + $0x3c0] ss:$8 sps:$4 sm:$0xff]  }
 0x199   : > { %2821 = vmatprep.subr.bf16.mxu1 %v10567_v62  ;;  %v10681_v49 = vld [vmem:[%s14623_s5 + $0x60] ss:$16 sps:$4 sm:$0xff]   ;;  %v10619_v50 = vld [vmem:[%s14621_s3 + $0x3c4] ss:$8 sps:$4 sm:$0xff]   ;;  %v10622_v54 = vld [vmem:[%s14621_s3 + $0x3d4] ss:$8 sps:$4 sm:$0xff]  }
 0x19a   : > { %7372 = vmatpush1.bf16.msra.mxu0 %v10669_v39  ;;  %v10689_v51 = vld [vmem:[%s14623_s5 + $0x84] ss:$16 sps:$4 sm:$0xff]   ;;  %v10687_v53 = vld [vmem:[%s14623_s5 + $0x80] ss:$16 sps:$4 sm:$0xff]   ;;  %v3085_v62 = vld [vmem:[#allocation9 + $0x8] sm:$0x1] }
 0x19b   : > { %7373 = vmatprep.subr.bf16.mxu0 %v10677_v41  ;;  %v10695_v55 = vld [vmem:[%s14623_s5 + $0xa4] ss:$16 sps:$4 sm:$0xff]   ;;  %v10620_v56 = vld [vmem:[%s14621_s3 + $0x3d0] ss:$8 sps:$4 sm:$0xff]   ;;  %v10623_v60 = vld [vmem:[%s14621_s3 + $0x3e0] ss:$8 sps:$4 sm:$0xff]  }
 0x19c   : > { %2822 = vmatpush1.bf16.msra.mxu1 %v10565_v63  ;;  %v10693_v57 = vld [vmem:[%s14623_s5 + $0xa0] ss:$16 sps:$4 sm:$0xff]   ;;  %v10625_v58 = vld [vmem:[%s14621_s3 + $0x3e4] ss:$8 sps:$4 sm:$0xff]   ;;  %v10646_v34 = vld [vmem:[%s14621_s3 + $0x434] ss:$8 sps:$4 sm:$0xff]  }
 0x19d   : > { %2823 = vmatprep.subr.bf16.mxu1 %v10570_v1  ;;  %v10701_v59 = vld [vmem:[%s14623_s5 + $0xc4] ss:$16 sps:$4 sm:$0xff]   ;;  %v10699_v17 = vld [vmem:[%s14623_s5 + $0xc0] ss:$16 sps:$4 sm:$0xff]  }
 0x19e   : > { %7374 = vmatpush1.bf16.msra.mxu0 %v10675_v43  ;;  %v12397_v31 = vld.sshfl [vmem:[#allocation8] sm:$0x11 pattern:$0x76325410]  ;;  %v10644_v39 = vld [vmem:[%s14621_s3 + $0x430] ss:$8 sps:$4 sm:$0xff]  }
 0x19f   : > { %7375 = vmatprep.subr.bf16.mxu0 %v10683_v46  ;;  %v12401_v61 = vcombine.high %v12397_v31, %v12397_v31  ;;  %v12403_v63 = vld.sshfl [vmem:[#allocation8 + $0x4] sm:$0x11 pattern:$0x76325410]  ;;  %v10723_v35 = vld [vmem:[%s14623_s5 + $0x140] ss:$16 sps:$4 sm:$0xff]  }
 0x1a0   : > { %2824 = vmatpush1.bf16.msra.mxu1 %v10568_v2  ;;  %v3265_v1 = vcombine.low %v12403_v63, %v12403_v63  ;;  %v3274_v2 = vld [vmem:[#allocation9 + $0x8] sm:$0x10]  ;;  %v1822_v37 = vld [vmem:[#allocation5 + $0x78] sm:$0xff] }
 0x1a1   : > { %2825 = vmatprep.subr.bf16.mxu1 %v10573_v3  ;;  %v10628_v3 = vld [vmem:[%s14621_s3 + $0x3f4] ss:$8 sps:$4 sm:$0xff]   ;;  %v10649_v41 = vld [vmem:[%s14621_s3 + $0x444] ss:$8 sps:$4 sm:$0xff]  }
 0x1a2   : > { %7376 = vmatpush1.bf16.msra.mxu0 %v10681_v49  ;;  %v10737_v43 = vld [vmem:[%s14623_s5 + $0x184] ss:$16 sps:$4 sm:$0xff]  }
 0x1a3   : > { %7377 = vmatprep.subr.bf16.mxu0 %v10689_v51  ;;  %v10652_v46 = vld [vmem:[%s14621_s3 + $0x454] ss:$8 sps:$4 sm:$0xff]   ;;  %v10655_v51 = vld [vmem:[%s14621_s3 + $0x464] ss:$8 sps:$4 sm:$0xff]  }
 0x1a4   : > { %2826 = vmatpush1.bf16.msra.mxu1 %v10571_v5  ;;  %v10707_v5 = vld [vmem:[%s14623_s5 + $0xe4] ss:$16 sps:$4 sm:$0xff]  }
 0x1a5   : > { %2848 = vmatprep.subr.bf16.mxu1 %v10577_v6  ;;  %v3086_v6 = vsel %vm11822_vm3, %v12401_v61, %v3085_v62  ;;  %v10743_v49 = vld [vmem:[%s14623_s5 + $0x1a4] ss:$16 sps:$4 sm:$0xff]   ;;  %v10666_v62 = vld [vmem:[%s14623_s5 + $0x8] ss:$16 sps:$4 sm:$0xff]  }
 0x1a6   : > { %7378 = vmatpush1.bf16.msra.mxu0 %v10687_v53  ;;  %3087 = vst [vmem:[#allocation9 + $0x8] sm:$0x1] %v3086_v6  ;;  %v10749_v53 = vld [vmem:[%s14623_s5 + $0x1c4] ss:$16 sps:$4 sm:$0xff]   ;;  %v10672_v6 = vld [vmem:[%s14623_s5 + $0x28] ss:$16 sps:$4 sm:$0xff]  }
 0x1a7   : > { %2828 = vmatmul.mubr.bf16.vlgmr.msra.gmra.mrb[16].mxu1 %v1811_v9  ;;  %7379 = vmatprep.subr.bf16.mxu0 %v10695_v55  ;;  %v10705_v9 = vld [vmem:[%s14623_s5 + $0xe0] ss:$16 sps:$4 sm:$0xff]   ;;  %v10658_v55 = vld [vmem:[%s14621_s3 + $0x474] ss:$8 sps:$4 sm:$0xff]  }
 0x1a8   : > { %2837 = vmatprep.mubr.bf16.mxu1 %v1821_v11  ;;  %2849 = vmatpush1.bf16.msra.mxu1 %v10575_v7  ;;  %v3275_v11 = vsel %vm12416_vm1, %v12403_v63, %v3274_v2  ;;  %v1815_v2 = vld [vmem:[#allocation5 + $0x40] sm:$0xff] }
 0x1a9   : > { %2850 = vmatprep.subr.bf16.mxu1 %v10582_v8  ;;  %v10626_v8 = vld [vmem:[%s14621_s3 + $0x3f0] ss:$8 sps:$4 sm:$0xff]   ;;  %3276 = vst [vmem:[#allocation9 + $0x8] sm:$0x10] %v3275_v11  ;;  %v10686_v11 = vld [vmem:[%s14623_s5 + $0x6c] ss:$16 sps:$4 sm:$0xff]  }
 0x1aa   : > { %7380 = vmatpush1.bf16.msra.mxu0 %v10693_v57  ;;  %v10755_v57 = vld [vmem:[%s14623_s5 + $0x1e4] ss:$16 sps:$4 sm:$0xff]   ;;  %v11356_v7 = vld [vmem:[%s14623_s5 + $0xe68] ss:$16 sps:$4 sm:$0xff]  }
 0x1ab   : > { %7381 = vmatprep.subr.bf16.mxu0 %v10701_v59  ;;  %v10668_v59 = vld [vmem:[%s14623_s5 + $0xc] ss:$16 sps:$4 sm:$0xff]  }
 0x1ac   : > { %2851 = vmatpush1.bf16.msra.mxu1 %v10580_v12  ;;  %v3082_v12 = vld [vmem:[#allocation9] sm:$0x1] }
 0x1ad   : > { %2852 = vmatprep.subr.bf16.mxu1 %v10587_v13  ;;  %v10633_v13 = vld [vmem:[%s14621_s3 + $0x404] ss:$8 sps:$4 sm:$0xff]  }
 0x1ae   : > { %7382 = vmatpush1.bf16.msra.mxu0 %v10699_v17  ;;  %v10761_v17 = vld [vmem:[%s14623_s5 + $0x204] ss:$16 sps:$4 sm:$0xff]  }
 0x1af   : > { %2838 = vmatmul.mubr.bf16.gmra.mrb[20].mxu1 %v1820_v18  ;;  %v3271_v18 = vld [vmem:[#allocation9] sm:$0x10]  ;;  %7383 = vmatprep.subr.bf16.mxu0 %v10707_v5 }
 0x1b0   : > { %2853 = vmatpush1.bf16.msra.mxu1 %v10585_v14  ;;  %2880 = vmatprep.mubr.bf16.mxu1 %v1814_v19  ;;  %v10713_v14 = vld [vmem:[%s14623_s5 + $0x104] ss:$16 sps:$4 sm:$0xff]   ;;  %v3272_v19 = vsel %vm12416_vm1, %v3265_v1, %v3271_v18  ;;  %v10674_v1 = vld [vmem:[%s14623_s5 + $0x2c] ss:$16 sps:$4 sm:$0xff]  }
 0x1b1   : > { %2854 = vmatprep.subr.bf16.mxu1 %v10592_v15  ;;  %v3083_v15 = vsel %vm11822_vm3, %v12397_v31, %v3082_v12  ;;  %3273 = vst [vmem:[#allocation9] sm:$0x10] %v3272_v19  ;;  %v1824_v12 = vld [vmem:[#allocation5 + $0x88] sm:$0xff]  ;;  %v10698_v18 = vld [vmem:[%s14623_s5 + $0xac] ss:$16 sps:$4 sm:$0xff]  }
 0x1b2   : > { %3084 = vst [vmem:[#allocation9] sm:$0x1] %v3083_v15  ;;  %7384 = vmatpush1.bf16.msra.mxu0 %v10705_v9  ;;  %v10678_v9 = vld [vmem:[%s14623_s5 + $0x48] ss:$16 sps:$4 sm:$0xff]  }
 0x1b3   : > { %7385 = vmatprep.subr.bf16.mxu0 %v10713_v14  ;;  %v10692_v14 = vld [vmem:[%s14623_s5 + $0x8c] ss:$16 sps:$4 sm:$0xff]   ;;  %v10690_v15 = vld [vmem:[%s14623_s5 + $0x88] ss:$16 sps:$4 sm:$0xff]  }
 0x1b4   : > { %2855 = vmatpush1.bf16.msra.mxu1 %v10590_v20  ;;  %v10631_v20 = vld [vmem:[%s14621_s3 + $0x400] ss:$8 sps:$4 sm:$0xff]  }
 0x1b5   : > { %2856 = vmatprep.subr.bf16.mxu1 %v10595_v21  ;;  %v10638_v21 = vld [vmem:[%s14621_s3 + $0x414] ss:$8 sps:$4 sm:$0xff]   ;;  %v10696_v19 = vld [vmem:[%s14623_s5 + $0xa8] ss:$16 sps:$4 sm:$0xff]  }
 0x1b8   : > { %2857 = vmatpush1.bf16.msra.mxu1 %v10593_v22  ;;  %v10711_v22 = vld [vmem:[%s14623_s5 + $0x100] ss:$16 sps:$4 sm:$0xff]  }
 0x1b9   : > { %2858 = vmatprep.subr.bf16.mxu1 %v10598_v23  ;;  %v1813_v23 = vld [vmem:[#allocation5 + $0x30] sm:$0xff]  ;;  %7386 = vmatpush1.bf16.msra.mxu0 %v10711_v22  ;;  %v12548_v5 = vld [vmem:[#allocation9] sm:$0xff] }
 0x1ba   : > { %v10710_v22 = vld [vmem:[%s14623_s5 + $0xec] ss:$16 sps:$4 sm:$0xff]  }
 0x1bc   : > { %2859 = vmatpush1.bf16.msra.mxu1 %v10596_v24  ;;  %v10719_v24 = vld [vmem:[%s14623_s5 + $0x124] ss:$16 sps:$4 sm:$0xff]  }
 0x1bd   : > { %2860 = vmatprep.subr.bf16.mxu1 %v10601_v25  ;;  %v12452_v25 = vld [vmem:[#allocation9 + $0x8] sm:$0xff]  ;;  %7387 = vmatprep.subr.bf16.mxu0 %v10719_v24 }
 0x1be   : > { %7401 = vmatprep.mubr.bf16.mxu0 %v12452_v25  ;;  %v10716_v24 = vld [vmem:[%s14623_s5 + $0x10c] ss:$16 sps:$4 sm:$0xff]  }
 0x1c0   : > { %2861 = vmatpush1.bf16.msra.mxu1 %v10599_v27  ;;  %v1823_v27 = vld [vmem:[#allocation5 + $0x80] sm:$0xff] }
 0x1c1   : > { %2862 = vmatprep.subr.bf16.mxu1 %v10604_v28  ;;  %v10636_v28 = vld [vmem:[%s14621_s3 + $0x410] ss:$8 sps:$4 sm:$0xff]  }
 0x1c4   : > { %2863 = vmatpush1.bf16.msra.mxu1 %v10602_v29  ;;  %v10643_v29 = vld [vmem:[%s14621_s3 + $0x424] ss:$8 sps:$4 sm:$0xff]  }
 0x1c5   : > { %2864 = vmatprep.subr.bf16.mxu1 %v10607_v30  ;;  %v10717_v30 = vld [vmem:[%s14623_s5 + $0x120] ss:$16 sps:$4 sm:$0xff]  }
 0x1c6   : > { %7388 = vmatpush1.bf16.msra.mxu0 %v10717_v30  ;;  %v10726_v30 = vld [vmem:[%s14623_s5 + $0x148] ss:$16 sps:$4 sm:$0xff]  }
 0x1c8   : > { %2865 = vmatpush1.bf16.msra.mxu1 %v10605_v32  ;;  %v10725_v32 = vld [vmem:[%s14623_s5 + $0x144] ss:$16 sps:$4 sm:$0xff]  }
 0x1c9   : > { %2866 = vmatprep.subr.bf16.mxu1 %v10610_v33  ;;  %v10641_v33 = vld [vmem:[%s14621_s3 + $0x420] ss:$8 sps:$4 sm:$0xff]   ;;  %7389 = vmatprep.subr.bf16.mxu0 %v10725_v32  ;;  %v10734_v32 = vld [vmem:[%s14623_s5 + $0x16c] ss:$16 sps:$4 sm:$0xff]  }
 0x1ca   : > { %7390 = vmatpush1.bf16.msra.mxu0 %v10723_v35  ;;  %v10738_v35 = vld [vmem:[%s14623_s5 + $0x188] ss:$16 sps:$4 sm:$0xff]  }
 0x1cc   : > { %2867 = vmatpush1.bf16.msra.mxu1 %v10608_v38  ;;  %v10731_v38 = vld [vmem:[%s14623_s5 + $0x164] ss:$16 sps:$4 sm:$0xff]  }
 0x1cd   : > { %2868 = vmatprep.subr.bf16.mxu1 %v10613_v40  ;;  %v11575_v40 = vld [vmem:[#allocation9 + $0x10] sm:$0xff]  ;;  %7391 = vmatprep.subr.bf16.mxu0 %v10731_v38  ;;  %v10744_v38 = vld [vmem:[%s14623_s5 + $0x1a8] ss:$16 sps:$4 sm:$0xff]  }
 0x1d0   : > { %2869 = vmatpush1.bf16.msra.mxu1 %v10611_v42  ;;  %v10729_v42 = vld [vmem:[%s14623_s5 + $0x160] ss:$16 sps:$4 sm:$0xff]  }
 0x1d1   : > { %2870 = vmatprep.subr.bf16.mxu1 %v10616_v45  ;;  %v10647_v45 = vld [vmem:[%s14621_s3 + $0x440] ss:$8 sps:$4 sm:$0xff]   ;;  %7392 = vmatpush1.bf16.msra.mxu0 %v10729_v42 }
 0x1d2   : > { %7393 = vmatprep.subr.bf16.mxu0 %v10737_v43 }
 0x1d4   : > { %2871 = vmatpush1.bf16.msra.mxu1 %v10614_v48  ;;  %v10735_v48 = vld [vmem:[%s14623_s5 + $0x180] ss:$16 sps:$4 sm:$0xff]  }
 0x1d5   : > { %2872 = vmatprep.subr.bf16.mxu1 %v10619_v50  ;;  %v10650_v50 = vld [vmem:[%s14621_s3 + $0x450] ss:$8 sps:$4 sm:$0xff]   ;;  %7394 = vmatpush1.bf16.msra.mxu0 %v10735_v48 }
 0x1d6   : > { %7395 = vmatprep.subr.bf16.mxu0 %v10743_v49  ;;  %v10756_v48 = vld [vmem:[%s14623_s5 + $0x1e8] ss:$16 sps:$4 sm:$0xff]   ;;  %v10764_v49 = vld [vmem:[%s14623_s5 + $0x20c] ss:$16 sps:$4 sm:$0xff]  }
 0x1d8   : > { %2873 = vmatpush1.bf16.msra.mxu1 %v10617_v52  ;;  %v10741_v52 = vld [vmem:[%s14623_s5 + $0x1a0] ss:$16 sps:$4 sm:$0xff]  }
 0x1d9   : > { %2874 = vmatprep.subr.bf16.mxu1 %v10622_v54  ;;  %v10653_v54 = vld [vmem:[%s14621_s3 + $0x460] ss:$8 sps:$4 sm:$0xff]   ;;  %7396 = vmatpush1.bf16.msra.mxu0 %v10741_v52 }
 0x1da   : > { %7397 = vmatprep.subr.bf16.mxu0 %v10749_v53  ;;  %v10762_v53 = vld [vmem:[%s14623_s5 + $0x208] ss:$16 sps:$4 sm:$0xff]  }
 0x1dc   : > { %2875 = vmatpush1.bf16.msra.mxu1 %v10620_v56  ;;  %v10747_v56 = vld [vmem:[%s14623_s5 + $0x1c0] ss:$16 sps:$4 sm:$0xff]  }
 0x1dd   : > { %2876 = vmatprep.subr.bf16.mxu1 %v10625_v58  ;;  %v10656_v58 = vld [vmem:[%s14621_s3 + $0x470] ss:$8 sps:$4 sm:$0xff]   ;;  %7398 = vmatpush1.bf16.msra.mxu0 %v10747_v56  ;;  %v10767_v56 = vld [vmem:[%s14623_s5 + $0x224] ss:$16 sps:$4 sm:$0xff]  }
 0x1de   : > { %7399 = vmatprep.subr.bf16.mxu0 %v10755_v57  ;;  %v10768_v57 = vld [vmem:[%s14623_s5 + $0x228] ss:$16 sps:$4 sm:$0xff]  }
 0x1e0   : > { %2877 = vmatpush1.bf16.msra.mxu1 %v10623_v60  ;;  %v10753_v60 = vld [vmem:[%s14623_s5 + $0x1e0] ss:$16 sps:$4 sm:$0xff]  }
 0x1e1   : > { %2878 = vmatprep.subr.bf16.mxu1 %v10628_v3  ;;  %7400 = vmatpush1.bf16.msra.mxu0 %v10753_v60  ;;  %v10759_v3 = vld [vmem:[%s14623_s5 + $0x200] ss:$16 sps:$4 sm:$0xff]   ;;  %v10773_v60 = vld [vmem:[%s14623_s5 + $0x244] ss:$16 sps:$4 sm:$0xff]  }
 0x1e2   : > { %7422 = vmatprep.subr.bf16.mxu0 %v10761_v17  ;;  %v10774_v17 = vld [vmem:[%s14623_s5 + $0x248] ss:$16 sps:$4 sm:$0xff]  }
 0x1e4   : > { %2879 = vmatpush1.bf16.msra.mxu1 %v10626_v8  ;;  %v10680_v8 = vld [vmem:[%s14623_s5 + $0x4c] ss:$16 sps:$4 sm:$0xff]   ;;  %7402 = vmatmul.mubr.bf16.vlgmr.msra.gmra.mrb[32].mxu0 %v12548_v5 }
 0x1e5   : > { %2901 = vmatprep.subr.bf16.mxu1 %v10633_v13  ;;  %7423 = vmatpush1.bf16.msra.mxu0 %v10759_v3  ;;  %v10684_v13 = vld [vmem:[%s14623_s5 + $0x68] ss:$16 sps:$4 sm:$0xff]  }
 0x1e6   : > { %7424 = vmatprep.subr.bf16.mxu0 %v10767_v56  ;;  %v10780_v3 = vld [vmem:[%s14623_s5 + $0x268] ss:$16 sps:$4 sm:$0xff]   ;;  %v10824_v56 = vld [vmem:[%s14623_s5 + $0x34c] ss:$16 sps:$4 sm:$0xff]  }
 0x1e7   : > { %2881 = vmatmul.mubr.bf16.vlgmr.msra.gmra.mrb[16].mxu1 %v1813_v23  ;;  %v10708_v23 = vld [vmem:[%s14623_s5 + $0xe8] ss:$16 sps:$4 sm:$0xff]  }
 0x1e8   : > { %2890 = vmatprep.mubr.bf16.mxu1 %v1823_v27  ;;  %2902 = vmatpush1.bf16.msra.mxu1 %v10631_v20  ;;  %v10704_v20 = vld [vmem:[%s14623_s5 + $0xcc] ss:$16 sps:$4 sm:$0xff]  }
 0x1e9   : > { %2903 = vmatprep.subr.bf16.mxu1 %v10638_v21  ;;  %v10702_v21 = vld [vmem:[%s14623_s5 + $0xc8] ss:$16 sps:$4 sm:$0xff]   ;;  %v10722_v27 = vld [vmem:[%s14623_s5 + $0x12c] ss:$16 sps:$4 sm:$0xff]  }
 0x1ec   : > { %2904 = vmatpush1.bf16.msra.mxu1 %v10636_v28  ;;  %v10720_v28 = vld [vmem:[%s14623_s5 + $0x128] ss:$16 sps:$4 sm:$0xff]  }
 0x1ed   : > { %2905 = vmatprep.subr.bf16.mxu1 %v10643_v29  ;;  %v10728_v29 = vld [vmem:[%s14623_s5 + $0x14c] ss:$16 sps:$4 sm:$0xff]  }
 0x1ef   : > { %2891 = vmatmul.mubr.bf16.gmra.mrb[20].mxu1 %v1822_v37  ;;  %v10746_v37 = vld [vmem:[%s14623_s5 + $0x1ac] ss:$16 sps:$4 sm:$0xff]  }
 0x1f0   : > { %2906 = vmatpush1.bf16.msra.mxu1 %v10641_v33  ;;  %2933 = vmatprep.mubr.bf16.mxu1 %v11575_v40  ;;  %v10732_v33 = vld [vmem:[%s14623_s5 + $0x168] ss:$16 sps:$4 sm:$0xff]  }
 0x1f1   : > { %2907 = vmatprep.subr.bf16.mxu1 %v10646_v34  ;;  %v10740_v34 = vld [vmem:[%s14623_s5 + $0x18c] ss:$16 sps:$4 sm:$0xff]  }
 0x1f4   : > { %2908 = vmatpush1.bf16.msra.mxu1 %v10644_v39 }
 0x1f5   : > { %2909 = vmatprep.subr.bf16.mxu1 %v10649_v41 }
 0x1f8   : > { %2910 = vmatpush1.bf16.msra.mxu1 %v10647_v45  ;;  %v10750_v45 = vld [vmem:[%s14623_s5 + $0x1c8] ss:$16 sps:$4 sm:$0xff]  }
 0x1f9   : > { %2911 = vmatprep.subr.bf16.mxu1 %v10652_v46  ;;  %v10758_v46 = vld [vmem:[%s14623_s5 + $0x1ec] ss:$16 sps:$4 sm:$0xff]  }
 0x1fc   : > { %2912 = vmatpush1.bf16.msra.mxu1 %v10650_v50 }
 0x1fd   : > { %2913 = vmatprep.subr.bf16.mxu1 %v10655_v51 }
 0x200   : > { %2914 = vmatpush1.bf16.msra.mxu1 %v10653_v54 }
 0x201   : > { %2915 = vmatprep.subr.bf16.mxu1 %v10658_v55  ;;  %v10765_v55 = vld [vmem:[%s14623_s5 + $0x220] ss:$16 sps:$4 sm:$0xff]  }
 0x202   : > { %7425 = vmatpush1.bf16.msra.mxu0 %v10765_v55  ;;  %v3297_v55 = vld [vmem:[#allocation9 + $0x10] sm:$0x10] }
 0x203   : > { %7426 = vmatprep.subr.bf16.mxu0 %v10773_v60  ;;  %v10819_v60 = vld [vmem:[%s14623_s5 + $0x340] ss:$16 sps:$4 sm:$0xff]  }
 0x204   : > { %2916 = vmatpush1.bf16.msra.mxu1 %v10656_v58  ;;  %v10770_v58 = vld [vmem:[%s14623_s5 + $0x22c] ss:$16 sps:$4 sm:$0xff]  }
 0x205   : > { %7846 = vmatprep.subr.bf16.mxu1 %v10668_v59  ;;  %v10771_v59 = vld [vmem:[%s14623_s5 + $0x240] ss:$16 sps:$4 sm:$0xff]  }
 0x206   : > { %7427 = vmatpush1.bf16.msra.mxu0 %v10771_v59 }
 0x207   : > { %2934 = vmatmul.mubr.bf16.vlgmr.msra.gmra.mrb[16].mxu1 %v1815_v2  ;;  %v10779_v2 = vld [vmem:[%s14623_s5 + $0x264] ss:$16 sps:$4 sm:$0xff]  }
 0x208   : > { %2943 = vmatprep.mubr.bf16.mxu1 %v11575_v40  ;;  %7847 = vmatpush1.bf16.msra.mxu1 %v10666_v62  ;;  %v10752_v40 = vld [vmem:[%s14623_s5 + $0x1cc] ss:$16 sps:$4 sm:$0xff]  }
 0x209   : > { %7848 = vmatprep.subr.bf16.mxu1 %v10674_v1  ;;  %v10776_v62 = vld [vmem:[%s14623_s5 + $0x24c] ss:$16 sps:$4 sm:$0xff]   ;;  %v10777_v1 = vld [vmem:[%s14623_s5 + $0x260] ss:$16 sps:$4 sm:$0xff]   ;;  %7428 = vmatprep.subr.bf16.mxu0 %v10779_v2  ;;  %v10828_v2 = vld [vmem:[%s14623_s5 + $0x368] ss:$16 sps:$4 sm:$0xff]  }
 0x20a   : > { %7429 = vmatpush1.bf16.msra.mxu0 %v10777_v1  ;;  %v10825_v1 = vld [vmem:[%s14623_s5 + $0x360] ss:$16 sps:$4 sm:$0xff]  }
 0x20c   : > { %7849 = vmatpush1.bf16.msra.mxu1 %v10672_v6  ;;  %v10783_v6 = vld [vmem:[%s14623_s5 + $0x280] ss:$16 sps:$4 sm:$0xff]  }
 0x20d   : > { %7850 = vmatprep.subr.bf16.mxu1 %v10680_v8  ;;  %v10785_v8 = vld [vmem:[%s14623_s5 + $0x284] ss:$16 sps:$4 sm:$0xff]  }
 0x20e   : > { %7430 = vmatprep.subr.bf16.mxu0 %v10785_v8  ;;  %v10834_v8 = vld [vmem:[%s14623_s5 + $0x388] ss:$16 sps:$4 sm:$0xff]  }
 0x20f   : > { %2944 = vmatmul.mubr.bf16.gmra.mrb[20].mxu1 %v1824_v12  ;;  %v10791_v12 = vld [vmem:[%s14623_s5 + $0x2a4] ss:$16 sps:$4 sm:$0xff]   ;;  %7431 = vmatpush1.bf16.msra.mxu0 %v10783_v6  ;;  %v10831_v6 = vld [vmem:[%s14623_s5 + $0x380] ss:$16 sps:$4 sm:$0xff]  }
 0x210   : > { %7851 = vmatpush1.bf16.msra.mxu1 %v10678_v9  ;;  %7878 = vmatprep.mubr.bf16.mxu1 %v12452_v25  ;;  %v10714_v25 = vld [vmem:[%s14623_s5 + $0x108] ss:$16 sps:$4 sm:$0xff]  }
 0x211   : > { %7852 = vmatprep.subr.bf16.mxu1 %v10686_v11  ;;  %v10786_v9 = vld [vmem:[%s14623_s5 + $0x288] ss:$16 sps:$4 sm:$0xff]   ;;  %v10788_v11 = vld [vmem:[%s14623_s5 + $0x28c] ss:$16 sps:$4 sm:$0xff]   ;;  %7432 = vmatprep.subr.bf16.mxu0 %v10791_v12  ;;  %v10837_v12 = vld [vmem:[%s14623_s5 + $0x3a0] ss:$16 sps:$4 sm:$0xff]  }
 0x214   : > { %7853 = vmatpush1.bf16.msra.mxu1 %v10684_v13  ;;  %v10794_v13 = vld [vmem:[%s14623_s5 + $0x2ac] ss:$16 sps:$4 sm:$0xff]  }
 0x215   : > { %7854 = vmatprep.subr.bf16.mxu1 %v10692_v14  ;;  %v10789_v14 = vld [vmem:[%s14623_s5 + $0x2a0] ss:$16 sps:$4 sm:$0xff]  }
 0x216   : > { %7433 = vmatpush1.bf16.msra.mxu0 %v10789_v14  ;;  %v10845_v14 = vld [vmem:[%s14623_s5 + $0x3c4] ss:$16 sps:$4 sm:$0xff]  }
 0x218   : > { %7855 = vmatpush1.bf16.msra.mxu1 %v10690_v15  ;;  %v10792_v15 = vld [vmem:[%s14623_s5 + $0x2a8] ss:$16 sps:$4 sm:$0xff]  }
 0x219   : > { %7856 = vmatprep.subr.bf16.mxu1 %v10698_v18  ;;  %v10797_v18 = vld [vmem:[%s14623_s5 + $0x2c4] ss:$16 sps:$4 sm:$0xff]  }
 0x21a   : > { %7434 = vmatprep.subr.bf16.mxu0 %v10797_v18  ;;  %v10843_v18 = vld [vmem:[%s14623_s5 + $0x3c0] ss:$16 sps:$4 sm:$0xff]  }
 0x21c   : > { %7857 = vmatpush1.bf16.msra.mxu1 %v10696_v19  ;;  %v10800_v19 = vld [vmem:[%s14623_s5 + $0x2cc] ss:$16 sps:$4 sm:$0xff]  }
 0x21d   : > { %7858 = vmatprep.subr.bf16.mxu1 %v10704_v20  ;;  %v10795_v20 = vld [vmem:[%s14623_s5 + $0x2c0] ss:$16 sps:$4 sm:$0xff]  }
 0x21e   : > { %7435 = vmatpush1.bf16.msra.mxu0 %v10795_v20  ;;  %v10851_v20 = vld [vmem:[%s14623_s5 + $0x3e4] ss:$16 sps:$4 sm:$0xff]  }
 0x220   : > { %7859 = vmatpush1.bf16.msra.mxu1 %v10702_v21  ;;  %v10798_v21 = vld [vmem:[%s14623_s5 + $0x2c8] ss:$16 sps:$4 sm:$0xff]  }
 0x221   : > { %7860 = vmatprep.subr.bf16.mxu1 %v10710_v22  ;;  %v10803_v22 = vld [vmem:[%s14623_s5 + $0x2e4] ss:$16 sps:$4 sm:$0xff]  }
 0x222   : > { %7436 = vmatprep.subr.bf16.mxu0 %v10803_v22  ;;  %v10849_v22 = vld [vmem:[%s14623_s5 + $0x3e0] ss:$16 sps:$4 sm:$0xff]  }
 0x224   : > { %7861 = vmatpush1.bf16.msra.mxu1 %v10708_v23  ;;  %v10806_v23 = vld [vmem:[%s14623_s5 + $0x2ec] ss:$16 sps:$4 sm:$0xff]  }
 0x225   : > { %7862 = vmatprep.subr.bf16.mxu1 %v10716_v24  ;;  %v10801_v24 = vld [vmem:[%s14623_s5 + $0x2e0] ss:$16 sps:$4 sm:$0xff]  }
 0x226   : > { %7437 = vmatpush1.bf16.msra.mxu0 %v10801_v24  ;;  %v10857_v24 = vld [vmem:[%s14623_s5 + $0x404] ss:$16 sps:$4 sm:$0xff]  }
 0x228   : > { %7863 = vmatpush1.bf16.msra.mxu1 %v10714_v25  ;;  %v10804_v25 = vld [vmem:[%s14623_s5 + $0x2e8] ss:$16 sps:$4 sm:$0xff]  }
 0x229   : > { %7864 = vmatprep.subr.bf16.mxu1 %v10722_v27  ;;  %v10809_v27 = vld [vmem:[%s14623_s5 + $0x304] ss:$16 sps:$4 sm:$0xff]  }
 0x22a   : > { %7438 = vmatprep.subr.bf16.mxu0 %v10809_v27  ;;  %v9297_v27 = vld.sshfl [vmem:[#allocation8] sm:$0x11 pattern:$0x76325410] }
 0x22c   : > { %7865 = vmatpush1.bf16.msra.mxu1 %v10720_v28  ;;  %v10812_v28 = vld [vmem:[%s14623_s5 + $0x30c] ss:$16 sps:$4 sm:$0xff]  }
 0x22d   : > { %7866 = vmatprep.subr.bf16.mxu1 %v10728_v29  ;;  %v3097_v29 = vcombine.high %v12403_v63, %v12403_v63 }
 0x230   : > { %7867 = vmatpush1.bf16.msra.mxu1 %v10726_v30  ;;  %v10807_v30 = vld [vmem:[%s14623_s5 + $0x300] ss:$16 sps:$4 sm:$0xff]  }
 0x231   : > { %7868 = vmatprep.subr.bf16.mxu1 %v10734_v32  ;;  %v10810_v32 = vld [vmem:[%s14623_s5 + $0x308] ss:$16 sps:$4 sm:$0xff]   ;;  %7439 = vmatpush1.bf16.msra.mxu0 %v10807_v30  ;;  %v9306_v30 = vld.sshfl [vmem:[#allocation8 + $0x4] sm:$0x11 pattern:$0x76325410] }
 0x234   : > { %7869 = vmatpush1.bf16.msra.mxu1 %v10732_v33  ;;  %v10815_v33 = vld [vmem:[%s14623_s5 + $0x324] ss:$16 sps:$4 sm:$0xff]  }
 0x235   : > { %7870 = vmatprep.subr.bf16.mxu1 %v10740_v34  ;;  %v10818_v34 = vld [vmem:[%s14623_s5 + $0x32c] ss:$16 sps:$4 sm:$0xff]   ;;  %7440 = vmatprep.subr.bf16.mxu0 %v10815_v33  ;;  %v3312_v33 = vcombine.high %v9306_v30, %v9306_v30 }
 0x238   : > { %7871 = vmatpush1.bf16.msra.mxu1 %v10738_v35  ;;  %v3103_v35 = vld [vmem:[#allocation9 + $0x18] sm:$0x1] }
 0x239   : > { %7872 = vmatprep.subr.bf16.mxu1 %v10746_v37  ;;  %v3288_v37 = vshrl.u32 %v12397_v31, 16  ;;  %v10821_v31 = vld [vmem:[%s14623_s5 + $0x344] ss:$16 sps:$4 sm:$0xff]  }
 0x23a   : > { %v12627_v39 = vpop.f32.mrb[24].mxu0 }
 0x23b   : > { %v12632_v41 = vpop.f32.mrb[25].mxu0 }
 0x23c   : > { %v12634_v42 = vpop.f32.mrb[26].mxu0  ;;  %7873 = vmatpush1.bf16.msra.mxu1 %v10744_v38  ;;  %v3292_v38 = vshrl.u32 %v12401_v61, 16  ;;  %v3100_v61 = vld [vmem:[#allocation9 + $0x10] sm:$0x1] }
 0x23d   : > { %v12636_v43 = vpop.f32.mrb[27].mxu0  ;;  %7874 = vmatprep.subr.bf16.mxu1 %v10752_v40  ;;  %v3104_v40 = vsel %vm11822_vm3, %v3097_v29, %v3103_v35  ;;  %v3117_v29 = vshrl.u32 %v9297_v27, 16  ;;  %v3124_v35 = vld [vmem:[#allocation9 + $0x20] sm:$0x1] }
 0x23e   : > { %3105 = vst [vmem:[#allocation9 + $0x18] sm:$0x1] %v3104_v40  ;;  %v3323_v40 = vld [vmem:[#allocation9 + $0x20] sm:$0x10] }
 0x240   : > { %7875 = vmatpush1.bf16.msra.mxu1 %v10750_v45  ;;  %v3300_v45 = vld [vmem:[#allocation9 + $0x18] sm:$0x10] }
 0x241   : > { %7876 = vmatprep.subr.bf16.mxu1 %v10758_v46  ;;  %v10813_v46 = vld [vmem:[%s14623_s5 + $0x320] ss:$16 sps:$4 sm:$0xff]  }
 0x242   : > { %7441 = vmatpush1.bf16.msra.mxu0 %v10813_v46  ;;  %v3318_v46 = vshrl.u32 %v3312_v33, 16 }
 0x243   : > { %7442 = vmatprep.subr.bf16.mxu0 %v10821_v31 }
 0x244   : > { %7877 = vmatpush1.bf16.msra.mxu1 %v10756_v48  ;;  %v10816_v48 = vld [vmem:[%s14623_s5 + $0x328] ss:$16 sps:$4 sm:$0xff]   ;;  %v3320_v31 = vrot.slane %v3318_v46, 4  ;;  %v3501_v46 = vld [vmem:[#allocation9 + $0xa0] sm:$0x1] }
 0x245   : > { %7899 = vmatprep.subr.bf16.mxu1 %v10764_v49  ;;  %v3290_v49 = vrot.slane %v3288_v37, 4 }
 0x246   : > { %v12650_v50 = vpop.f32.mrb[28].mxu0  ;;  %7443 = vmatpush1.bf16.msra.mxu0 %v10819_v60 }
 0x247   : > { %v12652_v51 = vpop.f32.mrb[29].mxu0  ;;  %7879 = vmatmul.mubr.bf16.vlgmr.msra.gmra.mrb[24].mxu1 %v12548_v5  ;;  %v10782_v5 = vld [vmem:[%s14623_s5 + $0x26c] ss:$16 sps:$4 sm:$0xff]   ;;  %v3298_v59 = vsel %vm12416_vm1, %v3290_v49, %v3297_v55 }
 0x248   : > { %v12654_v52 = vpop.f32.mrb[30].mxu0  ;;  %7900 = vmatpush1.bf16.msra.mxu1 %v10762_v53  ;;  %v3294_v53 = vrot.slane %v3292_v38, 4  ;;  %3299 = vst [vmem:[#allocation9 + $0x10] sm:$0x10] %v3298_v59  ;;  %v3125_v38 = vsel %vm11822_vm3, %v3117_v29, %v3124_v35  ;;  %v3326_v49 = vld [vmem:[#allocation9 + $0x28] sm:$0x10] }
 0x249   : > { %v12659_v54 = vpop.f32.mrb[31].mxu0  ;;  %7901 = vmatprep.subr.bf16.mxu1 %v10770_v58  ;;  %v3101_v58 = vsel %vm11822_vm3, %v12403_v63, %v3100_v61  ;;  %v10827_v63 = vld [vmem:[%s14623_s5 + $0x364] ss:$16 sps:$4 sm:$0xff]   ;;  %3126 = vst [vmem:[#allocation9 + $0x20] sm:$0x1] %v3125_v38  ;;  %v3327_v60 = vsel %vm12416_vm1, %v3320_v31, %v3326_v49 }
 0x24a   : > { %3102 = vst [vmem:[#allocation9 + $0x10] sm:$0x1] %v3101_v58  ;;  %7444 = vmatprep.subr.bf16.mxu0 %v10827_v63  ;;  %3328 = vst [vmem:[#allocation9 + $0x28] sm:$0x10] %v3327_v60  ;;  %v3678_v35 = vld [vmem:[#allocation9 + $0x98] sm:$0x10] }
 0x24b   : > { %7445 = vmatpush1.bf16.msra.mxu0 %v10825_v1  ;;  %v3142_v38 = vld [vmem:[#allocation9 + $0x30] sm:$0x1]  ;;  %v3704_v60 = vld [vmem:[#allocation9 + $0xa8] sm:$0x10] }
 0x24c   : > { %7902 = vmatpush1.bf16.msra.mxu1 %v10768_v57  ;;  %v3301_v57 = vsel %vm12416_vm1, %v3294_v53, %v3300_v45  ;;  %v3525_v31 = vld [vmem:[#allocation9 + $0xb0] sm:$0x1] }
 0x24d   : > { %7903 = vmatprep.subr.bf16.mxu1 %v10776_v62  ;;  %3302 = vst [vmem:[#allocation9 + $0x18] sm:$0x10] %v3301_v57  ;;  %v10830_v62 = vld [vmem:[%s14623_s5 + $0x36c] ss:$16 sps:$4 sm:$0xff]   ;;  %v2978_v57 = vlaneseq }
 0x250   : > { %7904 = vmatpush1.bf16.msra.mxu1 %v10774_v17  ;;  %v10822_v17 = vld [vmem:[%s14623_s5 + $0x348] ss:$16 sps:$4 sm:$0xff]  }
 0x251   : > { %7905 = vmatprep.subr.bf16.mxu1 %v10782_v5  ;;  %v10836_v5 = vld [vmem:[%s14623_s5 + $0x38c] ss:$16 sps:$4 sm:$0xff]  }
 0x254   : > { %7906 = vmatpush1.bf16.msra.mxu1 %v10780_v3  ;;  %v10833_v3 = vld [vmem:[%s14623_s5 + $0x384] ss:$16 sps:$4 sm:$0xff]  }
 0x255   : > { %7907 = vmatprep.subr.bf16.mxu1 %v10788_v11  ;;  %7446 = vmatprep.subr.bf16.mxu0 %v10833_v3  ;;  %v10842_v11 = vld [vmem:[%s14623_s5 + $0x3ac] ss:$16 sps:$4 sm:$0xff]  }
 0x256   : > { %7447 = vmatpush1.bf16.msra.mxu0 %v10831_v6 }
 0x258   : > { %7908 = vmatpush1.bf16.msra.mxu1 %v10786_v9  ;;  %v10839_v9 = vld [vmem:[%s14623_s5 + $0x3a4] ss:$16 sps:$4 sm:$0xff]  }
 0x259   : > { %7909 = vmatprep.subr.bf16.mxu1 %v10794_v13  ;;  %7448 = vmatprep.subr.bf16.mxu0 %v10839_v9  ;;  %v10840_v13 = vld [vmem:[%s14623_s5 + $0x3a8] ss:$16 sps:$4 sm:$0xff]  }
 0x25a   : > { %7449 = vmatpush1.bf16.msra.mxu0 %v10837_v12 }
 0x25b   : > { %7450 = vmatprep.subr.bf16.mxu0 %v10845_v14 }
 0x25c   : > { %7910 = vmatpush1.bf16.msra.mxu1 %v10792_v15  ;;  %v10848_v15 = vld [vmem:[%s14623_s5 + $0x3cc] ss:$16 sps:$4 sm:$0xff]  }
 0x25d   : > { %7911 = vmatprep.subr.bf16.mxu1 %v10800_v19  ;;  %v10846_v19 = vld [vmem:[%s14623_s5 + $0x3c8] ss:$16 sps:$4 sm:$0xff]  }
 0x25e   : > { %7451 = vmatpush1.bf16.msra.mxu0 %v10843_v18 }
 0x25f   : > { %7452 = vmatprep.subr.bf16.mxu0 %v10851_v20 }
 0x260   : > { %7912 = vmatpush1.bf16.msra.mxu1 %v10798_v21  ;;  %v10854_v21 = vld [vmem:[%s14623_s5 + $0x3ec] ss:$16 sps:$4 sm:$0xff]  }
 0x261   : > { %7913 = vmatprep.subr.bf16.mxu1 %v10806_v23  ;;  %v10852_v23 = vld [vmem:[%s14623_s5 + $0x3e8] ss:$16 sps:$4 sm:$0xff]  }
 0x262   : > { %7453 = vmatpush1.bf16.msra.mxu0 %v10849_v22 }
 0x263   : > { %7475 = vmatprep.subr.bf16.mxu0 %v10857_v24 }
 0x264   : > { %7914 = vmatpush1.bf16.msra.mxu1 %v10804_v25  ;;  %v10860_v25 = vld [vmem:[%s14623_s5 + $0x40c] ss:$16 sps:$4 sm:$0xff]  }
 0x265   : > { %7915 = vmatprep.subr.bf16.mxu1 %v10812_v28  ;;  %v3115_v28 = vcombine.high %v9297_v27, %v9297_v27 }
 0x267   : > { %v3120_v37 = vshrl.u32 %v3115_v28, 16 }
 0x268   : > { %7916 = vmatpush1.bf16.msra.mxu1 %v10810_v32  ;;  %v3127_v32 = vld [vmem:[#allocation9 + $0x28] sm:$0x1] }
 0x269   : > { %7917 = vmatprep.subr.bf16.mxu1 %v10818_v34  ;;  %v3314_v34 = vshrl.u32 %v9306_v30, 16  ;;  %v3048_v30 = vld [vmem:[#allocation8 + $0x4] sm:$0xa] }
 0x26b   : > { %v3316_v45 = vrot.slane %v3314_v34, 4  ;;  %v3067_v34 = vld [vmem:[#allocation8] sm:$0xa] }
 0x26c   : > { %7918 = vmatpush1.bf16.msra.mxu1 %v10816_v48  ;;  %v3128_v48 = vsel %vm11822_vm3, %v3120_v37, %v3127_v32  ;;  %v3486_v37 = vld [vmem:[#allocation9 + $0x98] sm:$0x1] }
 0x26d   : > { %7919 = vmatprep.subr.bf16.mxu1 %v10824_v56  ;;  %3129 = vst [vmem:[#allocation9 + $0x28] sm:$0x1] %v3128_v48  ;;  %v3324_v61 = vsel %vm12416_vm1, %v3316_v45, %v3323_v40  ;;  %v3675_v40 = vld [vmem:[#allocation9 + $0x90] sm:$0x10]  ;;  %v3504_v45 = vld [vmem:[#allocation9 + $0xa8] sm:$0x1] }
 0x26e   : > { %3325 = vst [vmem:[#allocation9 + $0x20] sm:$0x10] %v3324_v61 }
 0x270   : > { %7920 = vmatpush1.bf16.msra.mxu1 %v10822_v17 }
 0x271   : > { %7921 = vmatprep.subr.bf16.mxu1 %v10830_v62 }
 0x274   : > { %7922 = vmatpush1.bf16.msra.mxu1 %v10828_v2  ;;  %v12873_v2 = vshrl.u32 %v2978_v57, 7 }
 0x275   : > { %7923 = vmatprep.subr.bf16.mxu1 %v10836_v5 }
 0x278   : > { %7924 = vmatpush1.bf16.msra.mxu1 %v10834_v8 }
 0x279   : > { %7925 = vmatprep.subr.bf16.mxu1 %v10842_v11  ;;  %v2984_v11 = vsub.s32 1, %v12873_v2 }
 0x27c   : > { %7926 = vmatpush1.bf16.msra.mxu1 %v10840_v13 }
 0x27d   : > { %7927 = vmatprep.subr.bf16.mxu1 %v10848_v15 }
 0x280   : > { %7928 = vmatpush1.bf16.msra.mxu1 %v10846_v19 }
 0x281   : > { %7929 = vmatprep.subr.bf16.mxu1 %v10854_v21 }
 0x284   : > { %7930 = vmatpush1.bf16.msra.mxu1 %v10852_v23 }
 0x285   : > { %7952 = vmatprep.subr.bf16.mxu1 %v10860_v25 }
 0x2da   : > { %v2935_v53 = vpop.f32.mrb[16].mxu1 }
 0x2db   : > { %v10167_v55 = vadd.f32 %v2935_v53, %v12627_v39  ;;  %v2937_v56 = vpop.f32.mrb[17].mxu1  ;;  %v3701_v53 = vld [vmem:[#allocation9 + $0xa0] sm:$0x10] }
 0x2dc   : > { %v10168_v58 = vadd.f32 %v2937_v56, %v12632_v41  ;;  %v2939_v59 = vpop.f32.mrb[18].mxu1  ;;  %v2980_v41 = vsub.s32 0, %v12873_v2 }
 0x2dd   : > { %v10169_v17 = vadd.f32 %v2939_v59, %v12634_v42  ;;  %v2941_v63 = vpop.f32.mrb[19].mxu1  ;;  %v2976_v42 = vld [vmem:[%s14622_s4] sm:$0x3] }
 0x2de   : > { %v10170_v62 = vadd.f32 %v2941_v63, %v12636_v43  ;;  %v3528_v63 = vld [vmem:[#allocation9 + $0xb8] sm:$0x1] }
 0x2df   : > { %v2966_v1 = vmax.f32 %v10167_v55, %v10169_v17 }
 0x2e0   : > { %v2967_v3 = vmax.f32 %v10168_v58, %v10170_v62  ;;  %v3145_v62 = vld [vmem:[#allocation9 + $0x38] sm:$0x1] }
 0x2e2   : > { %v2945_v39 = vpop.f32.mrb[20].mxu1 }
 0x2e3   : > { %v10171_v5 = vadd.f32 %v2945_v39, %v12650_v50  ;;  %v2947_v6 = vpop.f32.mrb[21].mxu1  ;;  %v2981_v50 = vrot.slane %v2976_v42, %v2980_v41 }
 0x2e4   : > { %v10172_v8 = vadd.f32 %v2947_v6, %v12652_v51  ;;  %v2949_v9 = vpop.f32.mrb[22].mxu1  ;;  %v2985_v51 = vrot.slane %v2976_v42, %v2984_v11  ;;  %v3341_v6 = vld [vmem:[#allocation9 + $0x30] sm:$0x10] }
 0x2e5   : > { %v10173_v43 = vadd.f32 %v2949_v9, %v12654_v52  ;;  %v2951_v12 = vpop.f32.mrb[23].mxu1  ;;  %v3013_v52 = vld [vmem:[#allocation8 + $0xc] sm:$0x5] }
 0x2e6   : > { %v10174_v13 = vadd.f32 %v2951_v12, %v12659_v54  ;;  %v3028_v54 = vld [vmem:[#allocation8 + $0x8] sm:$0x5]  ;;  %v3730_v12 = vld [vmem:[#allocation9 + $0xb8] sm:$0x10] }
 0x2e7   : > { %v2972_v14 = vmax.f32 %v10171_v5, %v10173_v43 }
 0x2e8   : > { %v2973_v15 = vmax.f32 %v10172_v8, %v10174_v13  ;;  %v3160_v8 = vld [vmem:[#allocation9 + $0x40] sm:$0x1] }
 0x2e9   : > { %v2974_v18 = vmax.f32 %v2966_v1, %v2972_v14  ;;  %v3344_v1 = vld [vmem:[#allocation9 + $0x38] sm:$0x10]  ;;  %v3727_v14 = vld [vmem:[#allocation9 + $0xb0] sm:$0x10] }
 0x2ea   : > { %v2975_v19 = vmax.f32 %v2967_v3, %v2973_v15 }
 0x2eb   : > { %v2988_v20 = vadd.f32 %v2981_v50, %v2974_v18  ;;  %v3747_v50 = vld [vmem:[#allocation9 + $0xc0] sm:$0x10] }
 0x2ec   : > { %v2989_v21 = vadd.f32 %v2985_v51, %v2975_v19 }
 0x2ed   : > { %v2990_v22 = vmax.f32 %v2988_v20, 0.0 }
 0x2ee   : > { %v2991_v23 = vmax.f32 %v2989_v21, 0.0  ;;  %v3163_v21 = vld [vmem:[#allocation9 + $0x48] sm:$0x1] }
 0x2f0   : > { %v9960_v24 = vpack.c.bf16 %v2991_v23, %v2990_v22 }
 0x2f2   : > { %3000 = vst [vmem:[#allocation7] sm:$0xff] %v9960_v24 }
 0x2f9   : > { %v9290_v25 = vld.sshfl [vmem:[#allocation7] sm:$0x5 pattern:$0x76325410] }
 0x2fa   : > { %v3014_v27 = vsel %vm3012_vm2, %v9290_v25, %v3013_v52  ;;  %v3029_v28 = vsel %vm3027_vm4, %v9290_v25, %v3028_v54  ;;  %v9292_v29 = vld.sshfl [vmem:[#allocation7] sm:$0xa pattern:$0x76325410] }
 0x2fb   : > { %3015 = vst [vmem:[#allocation8 + $0xc] sm:$0x5] %v3014_v27  ;;  %3030 = vst [vmem:[#allocation8 + $0x8] sm:$0x5] %v3029_v28  ;;  %v3041_v44 = vshrl.u32 %v9292_v29, 16 }
 0x2fc   : > { %v9294_v32 = vld.sshfl [vmem:[#allocation7] sm:$0x50 pattern:$0x76325410]  ;;  %v3750_v29 = vld [vmem:[#allocation9 + $0xc8] sm:$0x10] }
 0x2fd   : > { %v3060_v33 = vcombine.high %v9294_v32, %v9294_v32  ;;  %v3049_v26 = vsel %vm3047_vm6, %v3041_v44, %v3048_v30  ;;  %v3565_v44 = vld [vmem:[#allocation9 + $0xd0] sm:$0x1] }
 0x2fe   : > { %3050 = vst [vmem:[#allocation8 + $0x4] sm:$0xa] %v3049_v26 }
 0x2ff   : > { %v3062_v4 = vshll.u32 %v3060_v33, 16  ;;  %v3545_v33 = vld [vmem:[#allocation9 + $0xc0] sm:$0x1] }
 0x301   : > { %v3064_v36 = vrot.slane %v3062_v4, 7 }
 0x302   : > { %v9313_v49 = vld.sshfl [vmem:[#allocation8 + $0x8] sm:$0x11 pattern:$0x76325410] }
 0x303   : > { %v3068_v48 = vsel %vm3066_vm5, %v3064_v36, %v3067_v34  ;;  %v3480_v61 = vcombine.high %v9313_v49, %v9313_v49  ;;  %v9322_v55 = vld.sshfl [vmem:[#allocation8 + $0xc] sm:$0x11 pattern:$0x76325410]  ;;  %v3484_v47 = vsel %vm11822_vm3, %v9313_v49, %v3483_v10  ;;  %v3692_v16 = vshrl.u32 %v9313_v49, 16 }
 0x304   : > { %3069 = vst [vmem:[#allocation8] sm:$0xa] %v3068_v48  ;;  %v3143_v56 = vsel %vm11822_vm3, %v9313_v49, %v3142_v38  ;;  %v3672_v57 = vcombine.low %v9322_v55, %v9322_v55  ;;  %v3679_v58 = vsel %vm12416_vm1, %v9322_v55, %v3678_v35  ;;  %3485 = vst [vmem:[#allocation9 + $0x90] sm:$0x1] %v3484_v47  ;;  %v3718_v19 = vshrl.u32 %v9322_v55, 16 }
 0x305   : > { %v3498_v59 = vcombine.high %v9322_v55, %v9322_v55  ;;  %v3502_v17 = vsel %vm11822_vm3, %v9322_v55, %v3501_v46  ;;  %3144 = vst [vmem:[#allocation9 + $0x30] sm:$0x1] %v3143_v56  ;;  %v3487_v3 = vsel %vm11822_vm3, %v3480_v61, %v3486_v37  ;;  %3680 = vst [vmem:[#allocation9 + $0x98] sm:$0x10] %v3679_v58  ;;  %v3696_v39 = vshrl.u32 %v3480_v61, 16 }
 0x306   : > { %3503 = vst [vmem:[#allocation9 + $0xa0] sm:$0x1] %v3502_v17  ;;  %v3694_v5 = vrot.slane %v3692_v16, 4  ;;  %3488 = vst [vmem:[#allocation9 + $0x98] sm:$0x1] %v3487_v3  ;;  %v3676_v9 = vsel %vm12416_vm1, %v3672_v57, %v3675_v40  ;;  %v3526_v13 = vsel %vm11822_vm3, %v3692_v16, %v3525_v31  ;;  %v3146_v23 = vsel %vm11822_vm3, %v3480_v61, %v3145_v62 }
 0x307   : > { %v3505_v42 = vsel %vm11822_vm3, %v3498_v59, %v3504_v45  ;;  %v3722_v43 = vshrl.u32 %v3498_v59, 16  ;;  %3677 = vst [vmem:[#allocation9 + $0x90] sm:$0x10] %v3676_v9  ;;  %v3698_v15 = vrot.slane %v3696_v39, 4  ;;  %v3529_v18 = vsel %vm11822_vm3, %v3696_v39, %v3528_v63  ;;  %3527 = vst [vmem:[#allocation9 + $0xb0] sm:$0x1] %v3526_v13 }
 0x308   : > { %3506 = vst [vmem:[#allocation9 + $0xa8] sm:$0x1] %v3505_v42  ;;  %v3702_v51 = vsel %vm12416_vm1, %v3694_v5, %v3701_v53  ;;  %v12924_v20 = vld.sshfl [vmem:[#allocation8 + $0xc] sm:$0x11 pattern:$0x76325410]  ;;  %v3345_v24 = vsel %vm12416_vm1, %v9322_v55, %v3344_v1  ;;  %v3342_v52 = vsel %vm12416_vm1, %v3672_v57, %v3341_v6 }
 0x309   : > { %3703 = vst [vmem:[#allocation9 + $0xa0] sm:$0x10] %v3702_v51  ;;  %3530 = vst [vmem:[#allocation9 + $0xb8] sm:$0x1] %v3529_v18  ;;  %v3724_v22 = vrot.slane %v3722_v43, 4  ;;  %v3705_v25 = vsel %vm12416_vm1, %v3698_v15, %v3704_v60  ;;  %v3720_v27 = vrot.slane %v3718_v19, 4  ;;  %v12945_v26 = vcombine.high %v12924_v20, %v12924_v20 }
 0x30a   : > { %v12932_v54 = vld.sshfl [vmem:[#allocation8 + $0x4] sm:$0x22 pattern:$0x76325410]  ;;  %3147 = vst [vmem:[#allocation9 + $0x38] sm:$0x1] %v3146_v23  ;;  %v3161_v4 = vsel %vm11822_vm3, %v12924_v20, %v3160_v8 }
 0x30b   : > { %3346 = vst [vmem:[#allocation9 + $0x38] sm:$0x10] %v3345_v24  ;;  %3343 = vst [vmem:[#allocation9 + $0x30] sm:$0x10] %v3342_v52  ;;  %v12938_v28 = vcombine.high %v12932_v54, %v12932_v54  ;;  %v3743_v30 = vrot.slane %v12932_v54, 5  ;;  %v3731_v32 = vsel %vm12416_vm1, %v3724_v22, %v3730_v12  ;;  %v3561_v35 = vrot.slane %v12932_v54, 1 }
 0x30c   : > { %3706 = vst [vmem:[#allocation9 + $0xa8] sm:$0x10] %v3705_v25  ;;  %v3568_v34 = vld [vmem:[#allocation9 + $0xd8] sm:$0x1]  ;;  %3732 = vst [vmem:[#allocation9 + $0xb8] sm:$0x10] %v3731_v32  ;;  %v3728_v36 = vsel %vm12416_vm1, %v3720_v27, %v3727_v14  ;;  %v3164_v49 = vsel %vm11822_vm3, %v12945_v26, %v3163_v21 }
 0x30d   : > { %v12953_v37 = vld.sshfl [vmem:[#allocation8] sm:$0x22 pattern:$0x76325410]  ;;  %v3744_v10 = vrot.slane %v12938_v28, 5  ;;  %v3748_v38 = vsel %vm12416_vm1, %v3743_v30, %v3747_v50  ;;  %v3562_v40 = vrot.slane %v12938_v28, 1  ;;  %v3566_v31 = vsel %vm11822_vm3, %v3561_v35, %v3565_v44 }
 0x30e   : > { %3162 = vst [vmem:[#allocation9 + $0x40] sm:$0x1] %v3161_v4  ;;  %v3880_v45 = vld [vmem:[#allocation9 + $0x18] sm:$0xff]  ;;  %3729 = vst [vmem:[#allocation9 + $0xb0] sm:$0x10] %v3728_v36  ;;  %v12961_v46 = vcombine.high %v12953_v37, %v12953_v37  ;;  %v3541_v48 = vrot.slane %v12953_v37, 1 }
 0x30f   : > { %3749 = vst [vmem:[#allocation9 + $0xc0] sm:$0x10] %v3748_v38  ;;  %v9308_v53 = vld.sshfl [vmem:[#allocation8 + $0x8] sm:$0x11 pattern:$0x76325410]  ;;  %v3751_v47 = vsel %vm12416_vm1, %v3744_v10, %v3750_v29  ;;  %v3569_v57 = vsel %vm11822_vm3, %v3562_v40, %v3568_v34 }
 0x310   : > { %v3896_v61 = vld [vmem:[#allocation9 + $0x98] sm:$0xff]  ;;  %v3548_v55 = vld [vmem:[#allocation9 + $0xc8] sm:$0x1]  ;;  %3165 = vst [vmem:[#allocation9 + $0x48] sm:$0x1] %v3164_v49  ;;  %v3356_v16 = vcombine.high %v9308_v53, %v9308_v53  ;;  %v3358_v56 = vshrl.u32 %v9308_v53, 16  ;;  %v3546_v17 = vsel %vm11822_vm3, %v3541_v48, %v3545_v33 }
 0x311   : > { %3567 = vst [vmem:[#allocation9 + $0xd0] sm:$0x1] %v3566_v31  ;;  %v3184_v58 = vld [vmem:[#allocation9 + $0x50] sm:$0x1]  ;;  %7411 = vmatprep.mubr.bf16.mxu0 %v3896_v61  ;;  %7888 = vmatprep.mubr.bf16.mxu1 %v3896_v61  ;;  %v3542_v60 = vrot.slane %v12961_v46, 1  ;;  %v3768_v39 = vshrl.u32 %v12961_v46, 16 }
 0x312   : > { %v3895_v59 = vld [vmem:[#allocation9 + $0x90] sm:$0xff]  ;;  %3752 = vst [vmem:[#allocation9 + $0xc8] sm:$0x10] %v3751_v47  ;;  %v3367_v63 = vld [vmem:[#allocation9 + $0x40] sm:$0x10]  ;;  %v3360_v1 = vrot.slane %v3358_v56, 4  ;;  %v3185_v43 = vsel %vm11822_vm3, %v3358_v56, %v3184_v58 }
 0x313   : > { %3570 = vst [vmem:[#allocation9 + $0xd8] sm:$0x1] %v3569_v57  ;;  %v3187_v62 = vld [vmem:[#allocation9 + $0x58] sm:$0x1]  ;;  %7412 = vmatmul.mubr.bf16.gmra.mrb[36].mxu0 %v3895_v59  ;;  %7889 = vmatmul.mubr.bf16.gmra.mrb[28].mxu1 %v3895_v59  ;;  %3547 = vst [vmem:[#allocation9 + $0xc0] sm:$0x1] %v3546_v17  ;;  %v3549_v6 = vsel %vm11822_vm3, %v3542_v60, %v3548_v55 }
 0x314   : > { %v3362_v3 = vshrl.u32 %v3356_v16, 16  ;;  %v3764_v5 = vshrl.u32 %v12953_v37, 16  ;;  %7454 = vmatprep.mubr.bf16.mxu0 %v3880_v45  ;;  %7931 = vmatprep.mubr.bf16.mxu1 %v3880_v45  ;;  %v3370_v8 = vld [vmem:[#allocation9 + $0x48] sm:$0x10]  ;;  %v3384_v9 = vshrl.u32 %v12924_v20, 16  ;;  %v3388_v42 = vshrl.u32 %v12945_v26, 16 }
 0x315   : > { %3550 = vst [vmem:[#allocation9 + $0xc8] sm:$0x1] %v3549_v6  ;;  %v3368_v13 = vsel %vm12416_vm1, %v3360_v1, %v3367_v63  ;;  %v3776_v14 = vld [vmem:[#allocation9 + $0xd8] sm:$0x10]  ;;  %3186 = vst [vmem:[#allocation9 + $0x50] sm:$0x1] %v3185_v43 }
 0x316   : > { %v3364_v12 = vrot.slane %v3362_v3, 4  ;;  %v3188_v50 = vsel %vm11822_vm3, %v3362_v3, %v3187_v62  ;;  %v3396_v15 = vld [vmem:[#allocation9 + $0x58] sm:$0x10]  ;;  %v10855_v51 = vld [vmem:[%s14623_s5 + $0x400] ss:$16 sps:$4 sm:$0xff]   ;;  %v3770_v19 = vrot.slane %v3768_v39, 5 }
 0x317   : > { %v10858_v18 = vld [vmem:[%s14623_s5 + $0x408] ss:$16 sps:$4 sm:$0xff]   ;;  %3369 = vst [vmem:[#allocation9 + $0x40] sm:$0x10] %v3368_v13  ;;  %v3773_v20 = vld [vmem:[#allocation9 + $0xd0] sm:$0x10] }
 0x318   : > { %3189 = vst [vmem:[#allocation9 + $0x58] sm:$0x1] %v3188_v50  ;;  %v3393_v21 = vld [vmem:[#allocation9 + $0x50] sm:$0x10]  ;;  %v3371_v22 = vsel %vm12416_vm1, %v3364_v12, %v3370_v8  ;;  %v3766_v23 = vrot.slane %v3764_v5, 5  ;;  %v3386_v24 = vrot.slane %v3384_v9, 4  ;;  %v3777_v32 = vsel %vm12416_vm1, %v3770_v19, %v3776_v14 }
 0x319   : > { %v3390_v52 = vrot.slane %v3388_v42, 4  ;;  %v3594_v25 = vld [vmem:[#allocation9 + $0xe8] sm:$0x1]  ;;  %v3591_v27 = vld [vmem:[#allocation9 + $0xe0] sm:$0x1]  ;;  %v3879_v29 = vld [vmem:[#allocation9 + $0x10] sm:$0xff] }
 0x31a   : > { %v10863_v30 = vld [vmem:[%s14623_s5 + $0x424] ss:$16 sps:$4 sm:$0xff]   ;;  %v10866_v44 = vld [vmem:[%s14623_s5 + $0x42c] ss:$16 sps:$4 sm:$0xff]   ;;  %3372 = vst [vmem:[#allocation9 + $0x48] sm:$0x10] %v3371_v22  ;;  %v3774_v34 = vsel %vm12416_vm1, %v3766_v23, %v3773_v20  ;;  %v3394_v36 = vsel %vm12416_vm1, %v3386_v24, %v3393_v21 }
 0x31b   : > { %v3794_v33 = vshrl.u32 %v12938_v28, 16  ;;  %v3802_v26 = vld [vmem:[#allocation9 + $0xe8] sm:$0x10]  ;;  %v3584_v4 = vrot.slane %v3764_v5, 1  ;;  %3778 = vst [vmem:[#allocation9 + $0xd8] sm:$0x10] %v3777_v32  ;;  %v3397_v35 = vsel %vm12416_vm1, %v3390_v52, %v3396_v15  ;;  %7455 = vmatmul.mubr.bf16.vlgmr.msra.gmra.mrb[32].mxu0 %v3879_v29  ;;  %7932 = vmatmul.mubr.bf16.vlgmr.msra.gmra.mrb[24].mxu1 %v3879_v29 }
 0x31c   : > { %v3790_v37 = vshrl.u32 %v12932_v54, 16  ;;  %v9301_v10 = vld.sshfl [vmem:[#allocation8] sm:$0x22 pattern:$0x76325410]  ;;  %v3588_v28 = vrot.slane %v3768_v39, 1  ;;  %7476 = vmatpush1.bf16.msra.mxu0 %v10855_v51  ;;  %7953 = vmatpush1.bf16.msra.mxu1 %v10858_v18 }
 0x31d   : > { %v10861_v38 = vld [vmem:[%s14623_s5 + $0x420] ss:$16 sps:$4 sm:$0xff]   ;;  %3775 = vst [vmem:[#allocation9 + $0xd0] sm:$0x10] %v3774_v34  ;;  %3398 = vst [vmem:[#allocation9 + $0x58] sm:$0x10] %v3397_v35  ;;  %v3592_v45 = vsel %vm11822_vm3, %v3584_v4, %v3591_v27  ;;  %v13017_v48 = vcombine.high %v9301_v10, %v9301_v10  ;;  %7477 = vmatprep.subr.bf16.mxu0 %v10863_v30  ;;  %7954 = vmatprep.subr.bf16.mxu1 %v10866_v44 }
 0x31e   : > { %3395 = vst [vmem:[#allocation9 + $0x50] sm:$0x10] %v3394_v36  ;;  %v3796_v40 = vrot.slane %v3794_v33, 5  ;;  %v3799_v46 = vld [vmem:[#allocation9 + $0xe0] sm:$0x10]  ;;  %v3792_v53 = vrot.slane %v3790_v37, 5  ;;  %v3595_v56 = vsel %vm11822_vm3, %v3588_v28, %v3594_v25 }
 0x31f   : > { %v3204_v49 = vld [vmem:[#allocation9 + $0x60] sm:$0x1]  ;;  %v10864_v54 = vld [vmem:[%s14623_s5 + $0x428] ss:$16 sps:$4 sm:$0xff]   ;;  %3593 = vst [vmem:[#allocation9 + $0xe0] sm:$0x1] %v3592_v45 }
 0x320   : > { %v3200_v31 = vrot.slane %v9301_v10, 1  ;;  %v3207_v61 = vld [vmem:[#allocation9 + $0x68] sm:$0x1]  ;;  %v10869_v47 = vld [vmem:[%s14623_s5 + $0x444] ss:$16 sps:$4 sm:$0xff]   ;;  %v3803_v57 = vsel %vm12416_vm1, %v3796_v40, %v3802_v26  ;;  %v3201_v58 = vrot.slane %v13017_v48, 1  ;;  %v3800_v59 = vsel %vm12416_vm1, %v3792_v53, %v3799_v46  ;;  %7478 = vmatpush1.bf16.msra.mxu0 %v10861_v38  ;;  %7955 = vmatpush1.bf16.msra.mxu1 %v10864_v54 }
 0x321   : > { %v3898_v55 = vld [vmem:[#allocation9 + $0xa8] sm:$0xff]  ;;  %3596 = vst [vmem:[#allocation9 + $0xe8] sm:$0x1] %v3595_v56  ;;  %3804 = vst [vmem:[#allocation9 + $0xe8] sm:$0x10] %v3803_v57  ;;  %v3430_v62 = vshrl.u32 %v9301_v10, 16  ;;  %7479 = vmatprep.subr.bf16.mxu0 %v10869_v47 }
 0x322   : > { %v10872_v16 = vld [vmem:[%s14623_s5 + $0x44c] ss:$16 sps:$4 sm:$0xff]   ;;  %7464 = vmatprep.mubr.bf16.mxu0 %v3898_v55  ;;  %7941 = vmatprep.mubr.bf16.mxu1 %v3898_v55  ;;  %v9310_v60 = vld.sshfl [vmem:[#allocation8 + $0x4] sm:$0x22 pattern:$0x76325410]  ;;  %v3205_v63 = vsel %vm11822_vm3, %v3200_v31, %v3204_v49  ;;  %v3208_v39 = vsel %vm11822_vm3, %v3201_v58, %v3207_v61 }
 0x323   : > { %v3416_v17 = vld [vmem:[#allocation9 + $0x68] sm:$0x10]  ;;  %v10867_v1 = vld [vmem:[%s14623_s5 + $0x440] ss:$16 sps:$4 sm:$0xff]   ;;  %v10870_v3 = vld [vmem:[%s14623_s5 + $0x448] ss:$16 sps:$4 sm:$0xff]   ;;  %v3408_v5 = vcombine.high %v9310_v60, %v9310_v60  ;;  %7956 = vmatprep.subr.bf16.mxu1 %v10872_v16 }
 0x324   : > { %3801 = vst [vmem:[#allocation9 + $0xe0] sm:$0x10] %v3800_v59  ;;  %3206 = vst [vmem:[#allocation9 + $0x60] sm:$0x1] %v3205_v63  ;;  %v3413_v6 = vld [vmem:[#allocation9 + $0x60] sm:$0x10]  ;;  %7480 = vmatpush1.bf16.msra.mxu0 %v10867_v1  ;;  %7957 = vmatpush1.bf16.msra.mxu1 %v10870_v3 }
 0x325   : > { %v3224_v8 = vld [vmem:[#allocation9 + $0x70] sm:$0x1]  ;;  %v3439_v9 = vld [vmem:[#allocation9 + $0x70] sm:$0x10]  ;;  %3209 = vst [vmem:[#allocation9 + $0x68] sm:$0x1] %v3208_v39 }
 0x326   : > { %v10875_v42 = vld [vmem:[%s14623_s5 + $0x464] ss:$16 sps:$4 sm:$0xff]   ;;  %v3409_v43 = vrot.slane %v9310_v60, 5  ;;  %v3220_v12 = vrot.slane %v9310_v60, 1  ;;  %v3227_v13 = vld [vmem:[#allocation9 + $0x78] sm:$0x1] }
 0x327   : > { %v3432_v14 = vrot.slane %v3430_v62, 5  ;;  %v3410_v50 = vrot.slane %v3408_v5, 5  ;;  %v3221_v15 = vrot.slane %v3408_v5, 1  ;;  %v3434_v51 = vshrl.u32 %v13017_v48, 16  ;;  %v3250_v19 = vld [vmem:[#allocation9 + $0x80] sm:$0x1]  ;;  %7481 = vmatprep.subr.bf16.mxu0 %v10875_v42 }
 0x328   : > { %v3243_v18 = vrot.slane %v3430_v62, 1  ;;  %v10878_v20 = vld [vmem:[%s14623_s5 + $0x46c] ss:$16 sps:$4 sm:$0xff]   ;;  %v3414_v21 = vsel %vm12416_vm1, %v3409_v43, %v3413_v6  ;;  %v3225_v23 = vsel %vm11822_vm3, %v3220_v12, %v3224_v8  ;;  %v3897_v52 = vld [vmem:[#allocation9 + $0xa0] sm:$0xff]  ;;  %v3253_v44 = vld [vmem:[#allocation9 + $0x88] sm:$0x1] }
 0x329   : > { %v3442_v22 = vld [vmem:[#allocation9 + $0x78] sm:$0x10]  ;;  %v3440_v24 = vsel %vm12416_vm1, %v3432_v14, %v3439_v9  ;;  %v10873_v25 = vld [vmem:[%s14623_s5 + $0x460] ss:$16 sps:$4 sm:$0xff]   ;;  %v3417_v27 = vsel %vm12416_vm1, %v3410_v50, %v3416_v17  ;;  %3415 = vst [vmem:[#allocation9 + $0x60] sm:$0x10] %v3414_v21  ;;  %v3228_v29 = vsel %vm11822_vm3, %v3221_v15, %v3227_v13  ;;  %7465 = vmatmul.mubr.bf16.gmra.mrb[36].mxu0 %v3897_v52 }
 0x32a   : > { %v3436_v30 = vrot.slane %v3434_v51, 5  ;;  %3226 = vst [vmem:[#allocation9 + $0x70] sm:$0x1] %v3225_v23  ;;  %3441 = vst [vmem:[#allocation9 + $0x70] sm:$0x10] %v3440_v24  ;;  %v3456_v32 = vshrl.u32 %v9310_v60, 16  ;;  %7942 = vmatmul.mubr.bf16.gmra.mrb[28].mxu1 %v3897_v52  ;;  %v3251_v34 = vsel %vm11822_vm3, %v3243_v18, %v3250_v19  ;;  %7958 = vmatprep.subr.bf16.mxu1 %v10878_v20 }
 0x32b   : > { %v3882_v33 = vld [vmem:[#allocation9 + $0x28] sm:$0xff]  ;;  %3418 = vst [vmem:[#allocation9 + $0x68] sm:$0x10] %v3417_v27  ;;  %3229 = vst [vmem:[#allocation9 + $0x78] sm:$0x1] %v3228_v29  ;;  %v3247_v26 = vrot.slane %v3434_v51, 1  ;;  %7482 = vmatpush1.bf16.msra.mxu0 %v10873_v25 }
 0x32c   : > { %v3460_v4 = vshrl.u32 %v3408_v5, 16  ;;  %v3465_v35 = vld [vmem:[#allocation9 + $0x80] sm:$0x10]  ;;  %v10876_v36 = vld [vmem:[%s14623_s5 + $0x468] ss:$16 sps:$4 sm:$0xff]   ;;  %v3443_v37 = vsel %vm12416_vm1, %v3436_v30, %v3442_v22  ;;  %v3458_v10 = vrot.slane %v3456_v32, 5  ;;  %7507 = vmatprep.mubr.bf16.mxu0 %v3882_v33  ;;  %7984 = vmatprep.mubr.bf16.mxu1 %v3882_v33 }
 0x32d   : > { %v3468_v38 = vld [vmem:[#allocation9 + $0x88] sm:$0x10]  ;;  %3252 = vst [vmem:[#allocation9 + $0x80] sm:$0x1] %v3251_v34  ;;  %v10881_v28 = vld [vmem:[%s14623_s5 + $0x484] ss:$16 sps:$4 sm:$0xff]   ;;  %v3254_v45 = vsel %vm11822_vm3, %v3247_v26, %v3253_v44  ;;  %7959 = vmatpush1.bf16.msra.mxu1 %v10876_v36 }
 0x32e   : > { %v10884_v40 = vld [vmem:[%s14623_s5 + $0x48c] ss:$16 sps:$4 sm:$0xff]   ;;  %3444 = vst [vmem:[#allocation9 + $0x78] sm:$0x10] %v3443_v37  ;;  %v3462_v46 = vrot.slane %v3460_v4, 5  ;;  %v3466_v48 = vsel %vm12416_vm1, %v3458_v10, %v3465_v35  ;;  %7483 = vmatprep.subr.bf16.mxu0 %v10881_v28  ;;  %v3881_v35 = vld [vmem:[#allocation9 + $0x20] sm:$0xff] }
 0x32f   : > { %3255 = vst [vmem:[#allocation9 + $0x88] sm:$0x1] %v3254_v45  ;;  %3467 = vst [vmem:[#allocation9 + $0x80] sm:$0x10] %v3466_v48  ;;  %v10879_v54 = vld [vmem:[%s14623_s5 + $0x480] ss:$16 sps:$4 sm:$0xff]   ;;  %7960 = vmatprep.subr.bf16.mxu1 %v10884_v40 }
 0x330   : > { %v3469_v49 = vsel %vm12416_vm1, %v3462_v46, %v3468_v38  ;;  %v10882_v53 = vld [vmem:[%s14623_s5 + $0x488] ss:$16 sps:$4 sm:$0xff]   ;;  %v10887_v31 = vld [vmem:[%s14623_s5 + $0x4a4] ss:$16 sps:$4 sm:$0xff]   ;;  %v10890_v61 = vld [vmem:[%s14623_s5 + $0x4ac] ss:$16 sps:$4 sm:$0xff]   ;;  %7484 = vmatpush1.bf16.msra.mxu0 %v10879_v54 }
 0x331   : > { %3470 = vst [vmem:[#allocation9 + $0x88] sm:$0x10] %v3469_v49  ;;  %7961 = vmatpush1.bf16.msra.mxu1 %v10882_v53  ;;  %v10885_v55 = vld [vmem:[%s14623_s5 + $0x4a0] ss:$16 sps:$4 sm:$0xff]   ;;  %v10888_v47 = vld [vmem:[%s14623_s5 + $0x4a8] ss:$16 sps:$4 sm:$0xff]   ;;  %7485 = vmatprep.subr.bf16.mxu0 %v10887_v31 }
 0x332   : > { %7962 = vmatprep.subr.bf16.mxu1 %v10890_v61  ;;  %v10893_v16 = vld [vmem:[%s14623_s5 + $0x4c4] ss:$16 sps:$4 sm:$0xff]   ;;  %v10896_v56 = vld [vmem:[%s14623_s5 + $0x4cc] ss:$16 sps:$4 sm:$0xff]   ;;  %v10891_v57 = vld [vmem:[%s14623_s5 + $0x4c0] ss:$16 sps:$4 sm:$0xff]  }
 0x333   : > { %v10894_v58 = vld [vmem:[%s14623_s5 + $0x4c8] ss:$16 sps:$4 sm:$0xff]   ;;  %v10899_v59 = vld [vmem:[%s14623_s5 + $0x4e4] ss:$16 sps:$4 sm:$0xff]   ;;  %v10902_v60 = vld [vmem:[%s14623_s5 + $0x4ec] ss:$16 sps:$4 sm:$0xff]  }
 0x334   : > { %7486 = vmatpush1.bf16.msra.mxu0 %v10885_v55  ;;  %v10897_v17 = vld [vmem:[%s14623_s5 + $0x4e0] ss:$16 sps:$4 sm:$0xff]   ;;  %v10900_v63 = vld [vmem:[%s14623_s5 + $0x4e8] ss:$16 sps:$4 sm:$0xff]   ;;  %v10905_v62 = vld [vmem:[%s14623_s5 + $0x504] ss:$16 sps:$4 sm:$0xff]  }
 0x335   : > { %7963 = vmatpush1.bf16.msra.mxu1 %v10888_v47  ;;  %7487 = vmatprep.subr.bf16.mxu0 %v10893_v16  ;;  %v10908_v1 = vld [vmem:[%s14623_s5 + $0x50c] ss:$16 sps:$4 sm:$0xff]   ;;  %v10903_v3 = vld [vmem:[%s14623_s5 + $0x500] ss:$16 sps:$4 sm:$0xff]   ;;  %v10906_v39 = vld [vmem:[%s14623_s5 + $0x508] ss:$16 sps:$4 sm:$0xff]  }
 0x336   : > { %7964 = vmatprep.subr.bf16.mxu1 %v10896_v56  ;;  %v10911_v5 = vld [vmem:[%s14623_s5 + $0x524] ss:$16 sps:$4 sm:$0xff]   ;;  %v10914_v6 = vld [vmem:[%s14623_s5 + $0x52c] ss:$16 sps:$4 sm:$0xff]   ;;  %v10909_v8 = vld [vmem:[%s14623_s5 + $0x520] ss:$16 sps:$4 sm:$0xff]  }
 0x337   : > { %v10912_v9 = vld [vmem:[%s14623_s5 + $0x528] ss:$16 sps:$4 sm:$0xff]   ;;  %v10917_v42 = vld [vmem:[%s14623_s5 + $0x544] ss:$16 sps:$4 sm:$0xff]   ;;  %v10920_v43 = vld [vmem:[%s14623_s5 + $0x54c] ss:$16 sps:$4 sm:$0xff]  }
 0x338   : > { %7488 = vmatpush1.bf16.msra.mxu0 %v10891_v57  ;;  %v10915_v12 = vld [vmem:[%s14623_s5 + $0x540] ss:$16 sps:$4 sm:$0xff]   ;;  %v10918_v13 = vld [vmem:[%s14623_s5 + $0x548] ss:$16 sps:$4 sm:$0xff]   ;;  %v10923_v14 = vld [vmem:[%s14623_s5 + $0x564] ss:$16 sps:$4 sm:$0xff]  }
 0x339   : > { %7965 = vmatpush1.bf16.msra.mxu1 %v10894_v58  ;;  %7489 = vmatprep.subr.bf16.mxu0 %v10899_v59  ;;  %v10926_v50 = vld [vmem:[%s14623_s5 + $0x56c] ss:$16 sps:$4 sm:$0xff]   ;;  %v10921_v15 = vld [vmem:[%s14623_s5 + $0x560] ss:$16 sps:$4 sm:$0xff]   ;;  %v10924_v51 = vld [vmem:[%s14623_s5 + $0x568] ss:$16 sps:$4 sm:$0xff]  }
 0x33a   : > { %7966 = vmatprep.subr.bf16.mxu1 %v10902_v60  ;;  %v10929_v18 = vld [vmem:[%s14623_s5 + $0x584] ss:$16 sps:$4 sm:$0xff]   ;;  %v10932_v19 = vld [vmem:[%s14623_s5 + $0x58c] ss:$16 sps:$4 sm:$0xff]   ;;  %v10927_v20 = vld [vmem:[%s14623_s5 + $0x580] ss:$16 sps:$4 sm:$0xff]  }
 0x33b   : > { %v10930_v21 = vld [vmem:[%s14623_s5 + $0x588] ss:$16 sps:$4 sm:$0xff]   ;;  %v10935_v22 = vld [vmem:[%s14623_s5 + $0x5a4] ss:$16 sps:$4 sm:$0xff]   ;;  %v10938_v23 = vld [vmem:[%s14623_s5 + $0x5ac] ss:$16 sps:$4 sm:$0xff]  }
 0x33c   : > { %7490 = vmatpush1.bf16.msra.mxu0 %v10897_v17  ;;  %v10933_v24 = vld [vmem:[%s14623_s5 + $0x5a0] ss:$16 sps:$4 sm:$0xff]   ;;  %v10936_v52 = vld [vmem:[%s14623_s5 + $0x5a8] ss:$16 sps:$4 sm:$0xff]   ;;  %v10941_v25 = vld [vmem:[%s14623_s5 + $0x5c4] ss:$16 sps:$4 sm:$0xff]  }
 0x33d   : > { %7967 = vmatpush1.bf16.msra.mxu1 %v10900_v63  ;;  %7491 = vmatprep.subr.bf16.mxu0 %v10905_v62  ;;  %v10944_v27 = vld [vmem:[%s14623_s5 + $0x5cc] ss:$16 sps:$4 sm:$0xff]   ;;  %v10939_v29 = vld [vmem:[%s14623_s5 + $0x5c0] ss:$16 sps:$4 sm:$0xff]   ;;  %v10942_v30 = vld [vmem:[%s14623_s5 + $0x5c8] ss:$16 sps:$4 sm:$0xff]  }
 0x33e   : > { %7968 = vmatprep.subr.bf16.mxu1 %v10908_v1  ;;  %v10947_v44 = vld [vmem:[%s14623_s5 + $0x5e4] ss:$16 sps:$4 sm:$0xff]   ;;  %v10950_v32 = vld [vmem:[%s14623_s5 + $0x5ec] ss:$16 sps:$4 sm:$0xff]   ;;  %v10945_v33 = vld [vmem:[%s14623_s5 + $0x5e0] ss:$16 sps:$4 sm:$0xff]  }
 0x33f   : > { %v10948_v26 = vld [vmem:[%s14623_s5 + $0x5e8] ss:$16 sps:$4 sm:$0xff]   ;;  %v10953_v4 = vld [vmem:[%s14623_s5 + $0x604] ss:$16 sps:$4 sm:$0xff]   ;;  %v10956_v34 = vld [vmem:[%s14623_s5 + $0x60c] ss:$16 sps:$4 sm:$0xff]  }
 0x340   : > { %7492 = vmatpush1.bf16.msra.mxu0 %v10903_v3  ;;  %v10951_v36 = vld [vmem:[%s14623_s5 + $0x600] ss:$16 sps:$4 sm:$0xff]   ;;  %v10954_v37 = vld [vmem:[%s14623_s5 + $0x608] ss:$16 sps:$4 sm:$0xff]   ;;  %v10959_v10 = vld [vmem:[%s14623_s5 + $0x624] ss:$16 sps:$4 sm:$0xff]  }
 0x341   : > { %7969 = vmatpush1.bf16.msra.mxu1 %v10906_v39  ;;  %7493 = vmatprep.subr.bf16.mxu0 %v10911_v5  ;;  %v10962_v38 = vld [vmem:[%s14623_s5 + $0x62c] ss:$16 sps:$4 sm:$0xff]   ;;  %v10957_v40 = vld [vmem:[%s14623_s5 + $0x620] ss:$16 sps:$4 sm:$0xff]   ;;  %v10960_v45 = vld [vmem:[%s14623_s5 + $0x628] ss:$16 sps:$4 sm:$0xff]  }
 0x342   : > { %7970 = vmatprep.subr.bf16.mxu1 %v10914_v6  ;;  %v3900_v28 = vld [vmem:[#allocation9 + $0xb8] sm:$0xff]  ;;  %v10965_v46 = vld [vmem:[%s14623_s5 + $0x644] ss:$16 sps:$4 sm:$0xff]   ;;  %v10963_v49 = vld [vmem:[%s14623_s5 + $0x640] ss:$16 sps:$4 sm:$0xff]  }
 0x343   : > { %v10968_v48 = vld [vmem:[%s14623_s5 + $0x64c] ss:$16 sps:$4 sm:$0xff]   ;;  %v10966_v54 = vld [vmem:[%s14623_s5 + $0x648] ss:$16 sps:$4 sm:$0xff]   ;;  %v3899_v53 = vld [vmem:[#allocation9 + $0xb0] sm:$0xff] }
 0x344   : > { %7494 = vmatpush1.bf16.msra.mxu0 %v10909_v8  ;;  %v10971_v31 = vld [vmem:[%s14623_s5 + $0x664] ss:$16 sps:$4 sm:$0xff]   ;;  %v10974_v61 = vld [vmem:[%s14623_s5 + $0x66c] ss:$16 sps:$4 sm:$0xff]   ;;  %v10969_v47 = vld [vmem:[%s14623_s5 + $0x660] ss:$16 sps:$4 sm:$0xff]  }
 0x345   : > { %7971 = vmatpush1.bf16.msra.mxu1 %v10912_v9  ;;  %7495 = vmatprep.subr.bf16.mxu0 %v10917_v42  ;;  %v3884_v55 = vld [vmem:[#allocation9 + $0x38] sm:$0xff]  ;;  %v10977_v56 = vld [vmem:[%s14623_s5 + $0x684] ss:$16 sps:$4 sm:$0xff]   ;;  %v10975_v58 = vld [vmem:[%s14623_s5 + $0x680] ss:$16 sps:$4 sm:$0xff]  }
 0x346   : > { %7972 = vmatprep.subr.bf16.mxu1 %v10920_v43  ;;  %v10972_v16 = vld [vmem:[%s14623_s5 + $0x668] ss:$16 sps:$4 sm:$0xff]   ;;  %v10980_v57 = vld [vmem:[%s14623_s5 + $0x68c] ss:$16 sps:$4 sm:$0xff]   ;;  %v10983_v60 = vld [vmem:[%s14623_s5 + $0x6a4] ss:$16 sps:$4 sm:$0xff]  }
 0x347   : > { %v10978_v59 = vld [vmem:[%s14623_s5 + $0x688] ss:$16 sps:$4 sm:$0xff]   ;;  %v10986_v17 = vld [vmem:[%s14623_s5 + $0x6ac] ss:$16 sps:$4 sm:$0xff]   ;;  %v10981_v63 = vld [vmem:[%s14623_s5 + $0x6a0] ss:$16 sps:$4 sm:$0xff]  }
 0x348   : > { %7496 = vmatpush1.bf16.msra.mxu0 %v10915_v12  ;;  %v10984_v62 = vld [vmem:[%s14623_s5 + $0x6a8] ss:$16 sps:$4 sm:$0xff]   ;;  %v10989_v1 = vld [vmem:[%s14623_s5 + $0x6c4] ss:$16 sps:$4 sm:$0xff]   ;;  %v10992_v3 = vld [vmem:[%s14623_s5 + $0x6cc] ss:$16 sps:$4 sm:$0xff]  }
 0x349   : > { %7973 = vmatpush1.bf16.msra.mxu1 %v10918_v13  ;;  %7497 = vmatprep.subr.bf16.mxu0 %v10923_v14  ;;  %v10987_v39 = vld [vmem:[%s14623_s5 + $0x6c0] ss:$16 sps:$4 sm:$0xff]   ;;  %v10990_v5 = vld [vmem:[%s14623_s5 + $0x6c8] ss:$16 sps:$4 sm:$0xff]   ;;  %v10995_v6 = vld [vmem:[%s14623_s5 + $0x6e4] ss:$16 sps:$4 sm:$0xff]  }
 0x34a   : > { %7974 = vmatprep.subr.bf16.mxu1 %v10926_v50  ;;  %v10998_v8 = vld [vmem:[%s14623_s5 + $0x6ec] ss:$16 sps:$4 sm:$0xff]   ;;  %v10993_v9 = vld [vmem:[%s14623_s5 + $0x6e0] ss:$16 sps:$4 sm:$0xff]   ;;  %v10996_v42 = vld [vmem:[%s14623_s5 + $0x6e8] ss:$16 sps:$4 sm:$0xff]  }
 0x34b   : > { %v11001_v43 = vld [vmem:[%s14623_s5 + $0x704] ss:$16 sps:$4 sm:$0xff]   ;;  %v11004_v12 = vld [vmem:[%s14623_s5 + $0x70c] ss:$16 sps:$4 sm:$0xff]   ;;  %v10999_v13 = vld [vmem:[%s14623_s5 + $0x700] ss:$16 sps:$4 sm:$0xff]  }
 0x34c   : > { %7498 = vmatpush1.bf16.msra.mxu0 %v10921_v15  ;;  %v11002_v14 = vld [vmem:[%s14623_s5 + $0x708] ss:$16 sps:$4 sm:$0xff]   ;;  %v11007_v50 = vld [vmem:[%s14623_s5 + $0x724] ss:$16 sps:$4 sm:$0xff]   ;;  %v11010_v15 = vld [vmem:[%s14623_s5 + $0x72c] ss:$16 sps:$4 sm:$0xff]  }
 0x34d   : > { %7975 = vmatpush1.bf16.msra.mxu1 %v10924_v51  ;;  %7499 = vmatprep.subr.bf16.mxu0 %v10929_v18  ;;  %v11005_v51 = vld [vmem:[%s14623_s5 + $0x720] ss:$16 sps:$4 sm:$0xff]   ;;  %v11008_v18 = vld [vmem:[%s14623_s5 + $0x728] ss:$16 sps:$4 sm:$0xff]  }
 0x34e   : > { %7976 = vmatprep.subr.bf16.mxu1 %v10932_v19  ;;  %v11013_v19 = vld [vmem:[%s14623_s5 + $0x744] ss:$16 sps:$4 sm:$0xff]  }
 0x350   : > { %7500 = vmatpush1.bf16.msra.mxu0 %v10927_v20  ;;  %v11016_v20 = vld [vmem:[%s14623_s5 + $0x74c] ss:$16 sps:$4 sm:$0xff]  }
 0x351   : > { %7977 = vmatpush1.bf16.msra.mxu1 %v10930_v21  ;;  %7501 = vmatprep.subr.bf16.mxu0 %v10935_v22  ;;  %v11011_v21 = vld [vmem:[%s14623_s5 + $0x740] ss:$16 sps:$4 sm:$0xff]   ;;  %v11014_v22 = vld [vmem:[%s14623_s5 + $0x748] ss:$16 sps:$4 sm:$0xff]  }
 0x352   : > { %7978 = vmatprep.subr.bf16.mxu1 %v10938_v23  ;;  %v11019_v23 = vld [vmem:[%s14623_s5 + $0x764] ss:$16 sps:$4 sm:$0xff]  }
 0x354   : > { %7502 = vmatpush1.bf16.msra.mxu0 %v10933_v24  ;;  %v11022_v24 = vld [vmem:[%s14623_s5 + $0x76c] ss:$16 sps:$4 sm:$0xff]  }
 0x355   : > { %7979 = vmatpush1.bf16.msra.mxu1 %v10936_v52  ;;  %7503 = vmatprep.subr.bf16.mxu0 %v10941_v25  ;;  %v11017_v52 = vld [vmem:[%s14623_s5 + $0x760] ss:$16 sps:$4 sm:$0xff]   ;;  %v11020_v25 = vld [vmem:[%s14623_s5 + $0x768] ss:$16 sps:$4 sm:$0xff]  }
 0x356   : > { %7980 = vmatprep.subr.bf16.mxu1 %v10944_v27  ;;  %v11025_v27 = vld [vmem:[%s14623_s5 + $0x784] ss:$16 sps:$4 sm:$0xff]  }
 0x358   : > { %7504 = vmatpush1.bf16.msra.mxu0 %v10939_v29  ;;  %v11028_v29 = vld [vmem:[%s14623_s5 + $0x78c] ss:$16 sps:$4 sm:$0xff]  }
 0x359   : > { %7981 = vmatpush1.bf16.msra.mxu1 %v10942_v30  ;;  %7505 = vmatprep.subr.bf16.mxu0 %v10947_v44  ;;  %v11023_v30 = vld [vmem:[%s14623_s5 + $0x780] ss:$16 sps:$4 sm:$0xff]   ;;  %v11026_v44 = vld [vmem:[%s14623_s5 + $0x788] ss:$16 sps:$4 sm:$0xff]  }
 0x35a   : > { %7982 = vmatprep.subr.bf16.mxu1 %v10950_v32  ;;  %v11031_v32 = vld [vmem:[%s14623_s5 + $0x7a4] ss:$16 sps:$4 sm:$0xff]  }
 0x35c   : > { %7506 = vmatpush1.bf16.msra.mxu0 %v10945_v33  ;;  %v11034_v33 = vld [vmem:[%s14623_s5 + $0x7ac] ss:$16 sps:$4 sm:$0xff]  }
 0x35d   : > { %7983 = vmatpush1.bf16.msra.mxu1 %v10948_v26  ;;  %7528 = vmatprep.subr.bf16.mxu0 %v10953_v4  ;;  %v11029_v26 = vld [vmem:[%s14623_s5 + $0x7a0] ss:$16 sps:$4 sm:$0xff]   ;;  %v11032_v4 = vld [vmem:[%s14623_s5 + $0x7a8] ss:$16 sps:$4 sm:$0xff]  }
 0x35e   : > { %8005 = vmatprep.subr.bf16.mxu1 %v10956_v34  ;;  %v11037_v34 = vld [vmem:[%s14623_s5 + $0x7c4] ss:$16 sps:$4 sm:$0xff]  }
 0x35f   : > { %7508 = vmatmul.mubr.bf16.vlgmr.msra.gmra.mrb[32].mxu0 %v3881_v35 }
 0x360   : > { %7985 = vmatmul.mubr.bf16.vlgmr.msra.gmra.mrb[24].mxu1 %v3881_v35  ;;  %7517 = vmatprep.mubr.bf16.mxu0 %v3900_v28  ;;  %v11040_v35 = vld [vmem:[%s14623_s5 + $0x7cc] ss:$16 sps:$4 sm:$0xff]  }
 0x361   : > { %7529 = vmatpush1.bf16.msra.mxu0 %v10951_v36  ;;  %7994 = vmatprep.mubr.bf16.mxu1 %v3900_v28  ;;  %v11035_v36 = vld [vmem:[%s14623_s5 + $0x7c0] ss:$16 sps:$4 sm:$0xff]  }
 0x362   : > { %8006 = vmatpush1.bf16.msra.mxu1 %v10954_v37  ;;  %7530 = vmatprep.subr.bf16.mxu0 %v10959_v10  ;;  %v11038_v37 = vld [vmem:[%s14623_s5 + $0x7c8] ss:$16 sps:$4 sm:$0xff]   ;;  %v11043_v10 = vld [vmem:[%s14623_s5 + $0x7e4] ss:$16 sps:$4 sm:$0xff]   ;;  %v11041_v28 = vld [vmem:[%s14623_s5 + $0x7e0] ss:$16 sps:$4 sm:$0xff]  }
 0x363   : > { %8007 = vmatprep.subr.bf16.mxu1 %v10962_v38  ;;  %v11046_v38 = vld [vmem:[%s14623_s5 + $0x7ec] ss:$16 sps:$4 sm:$0xff]  }
 0x365   : > { %7531 = vmatpush1.bf16.msra.mxu0 %v10957_v40  ;;  %v11044_v40 = vld [vmem:[%s14623_s5 + $0x7e8] ss:$16 sps:$4 sm:$0xff]  }
 0x366   : > { %8008 = vmatpush1.bf16.msra.mxu1 %v10960_v45  ;;  %7532 = vmatprep.subr.bf16.mxu0 %v10965_v46  ;;  %v11049_v45 = vld [vmem:[%s14623_s5 + $0x804] ss:$16 sps:$4 sm:$0xff]   ;;  %v11052_v46 = vld [vmem:[%s14623_s5 + $0x80c] ss:$16 sps:$4 sm:$0xff]  }
 0x367   : > { %8009 = vmatprep.subr.bf16.mxu1 %v10968_v48  ;;  %7518 = vmatmul.mubr.bf16.gmra.mrb[36].mxu0 %v3899_v53  ;;  %v11047_v48 = vld [vmem:[%s14623_s5 + $0x800] ss:$16 sps:$4 sm:$0xff]  }
 0x368   : > { %7995 = vmatmul.mubr.bf16.gmra.mrb[28].mxu1 %v3899_v53  ;;  %7560 = vmatprep.mubr.bf16.mxu0 %v3884_v55  ;;  %v11055_v53 = vld [vmem:[%s14623_s5 + $0x824] ss:$16 sps:$4 sm:$0xff]  }
 0x369   : > { %7533 = vmatpush1.bf16.msra.mxu0 %v10963_v49  ;;  %8037 = vmatprep.mubr.bf16.mxu1 %v3884_v55  ;;  %v3883_v49 = vld [vmem:[#allocation9 + $0x30] sm:$0xff] }
 0x36a   : > { %8010 = vmatpush1.bf16.msra.mxu1 %v10966_v54  ;;  %7534 = vmatprep.subr.bf16.mxu0 %v10971_v31  ;;  %v11050_v54 = vld [vmem:[%s14623_s5 + $0x808] ss:$16 sps:$4 sm:$0xff]   ;;  %v11053_v55 = vld [vmem:[%s14623_s5 + $0x820] ss:$16 sps:$4 sm:$0xff]  }
 0x36b   : > { %8011 = vmatprep.subr.bf16.mxu1 %v10974_v61  ;;  %v3902_v31 = vld [vmem:[#allocation9 + $0xc8] sm:$0xff] }
 0x36c   : > { %v11058_v61 = vld [vmem:[%s14623_s5 + $0x82c] ss:$16 sps:$4 sm:$0xff]  }
 0x36d   : > { %7535 = vmatpush1.bf16.msra.mxu0 %v10969_v47  ;;  %v11056_v47 = vld [vmem:[%s14623_s5 + $0x828] ss:$16 sps:$4 sm:$0xff]  }
 0x36e   : > { %8012 = vmatpush1.bf16.msra.mxu1 %v10972_v16  ;;  %7536 = vmatprep.subr.bf16.mxu0 %v10977_v56  ;;  %v11061_v16 = vld [vmem:[%s14623_s5 + $0x844] ss:$16 sps:$4 sm:$0xff]   ;;  %v11064_v56 = vld [vmem:[%s14623_s5 + $0x84c] ss:$16 sps:$4 sm:$0xff]  }
 0x36f   : > { %8013 = vmatprep.subr.bf16.mxu1 %v10980_v57  ;;  %v11059_v57 = vld [vmem:[%s14623_s5 + $0x840] ss:$16 sps:$4 sm:$0xff]  }
 0x371   : > { %7537 = vmatpush1.bf16.msra.mxu0 %v10975_v58  ;;  %v3901_v58 = vld [vmem:[#allocation9 + $0xc0] sm:$0xff] }
 0x372   : > { %8014 = vmatpush1.bf16.msra.mxu1 %v10978_v59  ;;  %7538 = vmatprep.subr.bf16.mxu0 %v10983_v60  ;;  %v11062_v59 = vld [vmem:[%s14623_s5 + $0x848] ss:$16 sps:$4 sm:$0xff]   ;;  %v11067_v60 = vld [vmem:[%s14623_s5 + $0x864] ss:$16 sps:$4 sm:$0xff]  }
 0x373   : > { %8015 = vmatprep.subr.bf16.mxu1 %v10986_v17  ;;  %v3886_v17 = vld [vmem:[#allocation9 + $0x48] sm:$0xff] }
 0x375   : > { %7539 = vmatpush1.bf16.msra.mxu0 %v10981_v63  ;;  %v11070_v63 = vld [vmem:[%s14623_s5 + $0x86c] ss:$16 sps:$4 sm:$0xff]  }
 0x376   : > { %8016 = vmatpush1.bf16.msra.mxu1 %v10984_v62  ;;  %7540 = vmatprep.subr.bf16.mxu0 %v10989_v1  ;;  %v11065_v62 = vld [vmem:[%s14623_s5 + $0x860] ss:$16 sps:$4 sm:$0xff]   ;;  %v11068_v1 = vld [vmem:[%s14623_s5 + $0x868] ss:$16 sps:$4 sm:$0xff]  }
 0x377   : > { %8017 = vmatprep.subr.bf16.mxu1 %v10992_v3  ;;  %v11073_v3 = vld [vmem:[%s14623_s5 + $0x884] ss:$16 sps:$4 sm:$0xff]  }
 0x379   : > { %7541 = vmatpush1.bf16.msra.mxu0 %v10987_v39  ;;  %v11076_v39 = vld [vmem:[%s14623_s5 + $0x88c] ss:$16 sps:$4 sm:$0xff]  }
 0x37a   : > { %8018 = vmatpush1.bf16.msra.mxu1 %v10990_v5  ;;  %7542 = vmatprep.subr.bf16.mxu0 %v10995_v6  ;;  %v11071_v5 = vld [vmem:[%s14623_s5 + $0x880] ss:$16 sps:$4 sm:$0xff]   ;;  %v11074_v6 = vld [vmem:[%s14623_s5 + $0x888] ss:$16 sps:$4 sm:$0xff]  }
 0x37b   : > { %8019 = vmatprep.subr.bf16.mxu1 %v10998_v8  ;;  %v11079_v8 = vld [vmem:[%s14623_s5 + $0x8a4] ss:$16 sps:$4 sm:$0xff]  }
 0x37d   : > { %7543 = vmatpush1.bf16.msra.mxu0 %v10993_v9  ;;  %v11082_v9 = vld [vmem:[%s14623_s5 + $0x8ac] ss:$16 sps:$4 sm:$0xff]  }
 0x37e   : > { %8020 = vmatpush1.bf16.msra.mxu1 %v10996_v42  ;;  %7544 = vmatprep.subr.bf16.mxu0 %v11001_v43  ;;  %v11077_v42 = vld [vmem:[%s14623_s5 + $0x8a0] ss:$16 sps:$4 sm:$0xff]   ;;  %v11080_v43 = vld [vmem:[%s14623_s5 + $0x8a8] ss:$16 sps:$4 sm:$0xff]  }
 0x37f   : > { %8021 = vmatprep.subr.bf16.mxu1 %v11004_v12  ;;  %v11085_v12 = vld [vmem:[%s14623_s5 + $0x8c4] ss:$16 sps:$4 sm:$0xff]  }
 0x381   : > { %7545 = vmatpush1.bf16.msra.mxu0 %v10999_v13  ;;  %v11088_v13 = vld [vmem:[%s14623_s5 + $0x8cc] ss:$16 sps:$4 sm:$0xff]  }
 0x382   : > { %8022 = vmatpush1.bf16.msra.mxu1 %v11002_v14  ;;  %7546 = vmatprep.subr.bf16.mxu0 %v11007_v50  ;;  %v11083_v14 = vld [vmem:[%s14623_s5 + $0x8c0] ss:$16 sps:$4 sm:$0xff]   ;;  %v11086_v50 = vld [vmem:[%s14623_s5 + $0x8c8] ss:$16 sps:$4 sm:$0xff]  }
 0x383   : > { %8023 = vmatprep.subr.bf16.mxu1 %v11010_v15  ;;  %v11091_v15 = vld [vmem:[%s14623_s5 + $0x8e4] ss:$16 sps:$4 sm:$0xff]  }
 0x385   : > { %7547 = vmatpush1.bf16.msra.mxu0 %v11005_v51  ;;  %v11094_v51 = vld [vmem:[%s14623_s5 + $0x8ec] ss:$16 sps:$4 sm:$0xff]  }
 0x386   : > { %8024 = vmatpush1.bf16.msra.mxu1 %v11008_v18  ;;  %7548 = vmatprep.subr.bf16.mxu0 %v11013_v19  ;;  %v11089_v18 = vld [vmem:[%s14623_s5 + $0x8e0] ss:$16 sps:$4 sm:$0xff]   ;;  %v11092_v19 = vld [vmem:[%s14623_s5 + $0x8e8] ss:$16 sps:$4 sm:$0xff]  }
 0x387   : > { %8025 = vmatprep.subr.bf16.mxu1 %v11016_v20  ;;  %v11097_v20 = vld [vmem:[%s14623_s5 + $0x904] ss:$16 sps:$4 sm:$0xff]  }
 0x389   : > { %7549 = vmatpush1.bf16.msra.mxu0 %v11011_v21  ;;  %v11100_v21 = vld [vmem:[%s14623_s5 + $0x90c] ss:$16 sps:$4 sm:$0xff]  }
 0x38a   : > { %8026 = vmatpush1.bf16.msra.mxu1 %v11014_v22  ;;  %7550 = vmatprep.subr.bf16.mxu0 %v11019_v23  ;;  %v11095_v22 = vld [vmem:[%s14623_s5 + $0x900] ss:$16 sps:$4 sm:$0xff]   ;;  %v11098_v23 = vld [vmem:[%s14623_s5 + $0x908] ss:$16 sps:$4 sm:$0xff]  }
 0x38b   : > { %8027 = vmatprep.subr.bf16.mxu1 %v11022_v24  ;;  %v11103_v24 = vld [vmem:[%s14623_s5 + $0x924] ss:$16 sps:$4 sm:$0xff]  }
 0x38d   : > { %7551 = vmatpush1.bf16.msra.mxu0 %v11017_v52  ;;  %v11106_v52 = vld [vmem:[%s14623_s5 + $0x92c] ss:$16 sps:$4 sm:$0xff]  }
 0x38e   : > { %8028 = vmatpush1.bf16.msra.mxu1 %v11020_v25  ;;  %7552 = vmatprep.subr.bf16.mxu0 %v11025_v27  ;;  %v11101_v25 = vld [vmem:[%s14623_s5 + $0x920] ss:$16 sps:$4 sm:$0xff]   ;;  %v11104_v27 = vld [vmem:[%s14623_s5 + $0x928] ss:$16 sps:$4 sm:$0xff]  }
 0x38f   : > { %8029 = vmatprep.subr.bf16.mxu1 %v11028_v29  ;;  %v11109_v29 = vld [vmem:[%s14623_s5 + $0x944] ss:$16 sps:$4 sm:$0xff]  }
 0x391   : > { %7553 = vmatpush1.bf16.msra.mxu0 %v11023_v30  ;;  %v11112_v30 = vld [vmem:[%s14623_s5 + $0x94c] ss:$16 sps:$4 sm:$0xff]  }
 0x392   : > { %8030 = vmatpush1.bf16.msra.mxu1 %v11026_v44  ;;  %7554 = vmatprep.subr.bf16.mxu0 %v11031_v32  ;;  %v11107_v44 = vld [vmem:[%s14623_s5 + $0x940] ss:$16 sps:$4 sm:$0xff]   ;;  %v11110_v32 = vld [vmem:[%s14623_s5 + $0x948] ss:$16 sps:$4 sm:$0xff]  }
 0x393   : > { %8031 = vmatprep.subr.bf16.mxu1 %v11034_v33  ;;  %v11115_v33 = vld [vmem:[%s14623_s5 + $0x964] ss:$16 sps:$4 sm:$0xff]  }
 0x395   : > { %7555 = vmatpush1.bf16.msra.mxu0 %v11029_v26  ;;  %v11118_v26 = vld [vmem:[%s14623_s5 + $0x96c] ss:$16 sps:$4 sm:$0xff]  }
 0x396   : > { %8032 = vmatpush1.bf16.msra.mxu1 %v11032_v4  ;;  %7556 = vmatprep.subr.bf16.mxu0 %v11037_v34  ;;  %v11113_v4 = vld [vmem:[%s14623_s5 + $0x960] ss:$16 sps:$4 sm:$0xff]   ;;  %v11116_v34 = vld [vmem:[%s14623_s5 + $0x968] ss:$16 sps:$4 sm:$0xff]  }
 0x397   : > { %8033 = vmatprep.subr.bf16.mxu1 %v11040_v35  ;;  %v11121_v35 = vld [vmem:[%s14623_s5 + $0x984] ss:$16 sps:$4 sm:$0xff]  }
 0x399   : > { %7557 = vmatpush1.bf16.msra.mxu0 %v11035_v36  ;;  %v11124_v36 = vld [vmem:[%s14623_s5 + $0x98c] ss:$16 sps:$4 sm:$0xff]  }
 0x39a   : > { %8034 = vmatpush1.bf16.msra.mxu1 %v11038_v37  ;;  %7558 = vmatprep.subr.bf16.mxu0 %v11043_v10  ;;  %v11119_v37 = vld [vmem:[%s14623_s5 + $0x980] ss:$16 sps:$4 sm:$0xff]   ;;  %v11122_v10 = vld [vmem:[%s14623_s5 + $0x988] ss:$16 sps:$4 sm:$0xff]  }
 0x39b   : > { %8035 = vmatprep.subr.bf16.mxu1 %v11046_v38  ;;  %v11127_v38 = vld [vmem:[%s14623_s5 + $0x9a4] ss:$16 sps:$4 sm:$0xff]  }
 0x39d   : > { %7559 = vmatpush1.bf16.msra.mxu0 %v11041_v28  ;;  %v11130_v28 = vld [vmem:[%s14623_s5 + $0x9ac] ss:$16 sps:$4 sm:$0xff]  }
 0x39e   : > { %8036 = vmatpush1.bf16.msra.mxu1 %v11044_v40  ;;  %7581 = vmatprep.subr.bf16.mxu0 %v11049_v45  ;;  %v11125_v40 = vld [vmem:[%s14623_s5 + $0x9a0] ss:$16 sps:$4 sm:$0xff]   ;;  %v11128_v45 = vld [vmem:[%s14623_s5 + $0x9a8] ss:$16 sps:$4 sm:$0xff]  }
 0x39f   : > { %8058 = vmatprep.subr.bf16.mxu1 %v11052_v46  ;;  %v11133_v46 = vld [vmem:[%s14623_s5 + $0x9c4] ss:$16 sps:$4 sm:$0xff]  }
 0x3a0   : > { %7561 = vmatmul.mubr.bf16.vlgmr.msra.gmra.mrb[32].mxu0 %v3883_v49 }
 0x3a1   : > { %8038 = vmatmul.mubr.bf16.vlgmr.msra.gmra.mrb[24].mxu1 %v3883_v49  ;;  %7570 = vmatprep.mubr.bf16.mxu0 %v3902_v31  ;;  %v11131_v49 = vld [vmem:[%s14623_s5 + $0x9c0] ss:$16 sps:$4 sm:$0xff]  }
 0x3a2   : > { %7582 = vmatpush1.bf16.msra.mxu0 %v11047_v48  ;;  %8047 = vmatprep.mubr.bf16.mxu1 %v3902_v31  ;;  %v11136_v48 = vld [vmem:[%s14623_s5 + $0x9cc] ss:$16 sps:$4 sm:$0xff]  }
 0x3a3   : > { %8059 = vmatpush1.bf16.msra.mxu1 %v11050_v54  ;;  %7583 = vmatprep.subr.bf16.mxu0 %v11055_v53  ;;  %v11134_v54 = vld [vmem:[%s14623_s5 + $0x9c8] ss:$16 sps:$4 sm:$0xff]   ;;  %v11139_v53 = vld [vmem:[%s14623_s5 + $0x9e4] ss:$16 sps:$4 sm:$0xff]   ;;  %v11142_v31 = vld [vmem:[%s14623_s5 + $0x9ec] ss:$16 sps:$4 sm:$0xff]  }
 0x3a4   : > { %8060 = vmatprep.subr.bf16.mxu1 %v11058_v61  ;;  %v11137_v61 = vld [vmem:[%s14623_s5 + $0x9e0] ss:$16 sps:$4 sm:$0xff]  }
 0x3a6   : > { %7584 = vmatpush1.bf16.msra.mxu0 %v11053_v55  ;;  %v11140_v55 = vld [vmem:[%s14623_s5 + $0x9e8] ss:$16 sps:$4 sm:$0xff]  }
 0x3a7   : > { %8061 = vmatpush1.bf16.msra.mxu1 %v11056_v47  ;;  %7585 = vmatprep.subr.bf16.mxu0 %v11061_v16  ;;  %v11145_v47 = vld [vmem:[%s14623_s5 + $0xa04] ss:$16 sps:$4 sm:$0xff]   ;;  %v11148_v16 = vld [vmem:[%s14623_s5 + $0xa0c] ss:$16 sps:$4 sm:$0xff]  }
 0x3a8   : > { %7571 = vmatmul.mubr.bf16.gmra.mrb[36].mxu0 %v3901_v58  ;;  %8062 = vmatprep.subr.bf16.mxu1 %v11064_v56  ;;  %v11143_v56 = vld [vmem:[%s14623_s5 + $0xa00] ss:$16 sps:$4 sm:$0xff]  }
 0x3a9   : > { %8048 = vmatmul.mubr.bf16.gmra.mrb[28].mxu1 %v3901_v58  ;;  %7613 = vmatprep.mubr.bf16.mxu0 %v3886_v17  ;;  %v11146_v58 = vld [vmem:[%s14623_s5 + $0xa08] ss:$16 sps:$4 sm:$0xff]  }
 0x3aa   : > { %7586 = vmatpush1.bf16.msra.mxu0 %v11059_v57  ;;  %8090 = vmatprep.mubr.bf16.mxu1 %v3886_v17  ;;  %v3885_v57 = vld [vmem:[#allocation9 + $0x40] sm:$0xff]  ;;  %v11154_v17 = vld [vmem:[%s14623_s5 + $0xa2c] ss:$16 sps:$4 sm:$0xff]  }
 0x3ab   : > { %8063 = vmatpush1.bf16.msra.mxu1 %v11062_v59  ;;  %7587 = vmatprep.subr.bf16.mxu0 %v11067_v60  ;;  %v11151_v59 = vld [vmem:[%s14623_s5 + $0xa24] ss:$16 sps:$4 sm:$0xff]   ;;  %v3904_v60 = vld [vmem:[#allocation9 + $0xd8] sm:$0xff] }
 0x3ac   : > { %8064 = vmatprep.subr.bf16.mxu1 %v11070_v63  ;;  %v11149_v63 = vld [vmem:[%s14623_s5 + $0xa20] ss:$16 sps:$4 sm:$0xff]  }
 0x3ae   : > { %7588 = vmatpush1.bf16.msra.mxu0 %v11065_v62  ;;  %v11152_v62 = vld [vmem:[%s14623_s5 + $0xa28] ss:$16 sps:$4 sm:$0xff]  }
 0x3af   : > { %8065 = vmatpush1.bf16.msra.mxu1 %v11068_v1  ;;  %7589 = vmatprep.subr.bf16.mxu0 %v11073_v3  ;;  %v11157_v1 = vld [vmem:[%s14623_s5 + $0xa44] ss:$16 sps:$4 sm:$0xff]   ;;  %v11160_v3 = vld [vmem:[%s14623_s5 + $0xa4c] ss:$16 sps:$4 sm:$0xff]  }
 0x3b0   : > { %8066 = vmatprep.subr.bf16.mxu1 %v11076_v39  ;;  %v3903_v39 = vld [vmem:[#allocation9 + $0xd0] sm:$0xff] }
 0x3b2   : > { %7590 = vmatpush1.bf16.msra.mxu0 %v11071_v5  ;;  %v11155_v5 = vld [vmem:[%s14623_s5 + $0xa40] ss:$16 sps:$4 sm:$0xff]  }
 0x3b3   : > { %8067 = vmatpush1.bf16.msra.mxu1 %v11074_v6  ;;  %7591 = vmatprep.subr.bf16.mxu0 %v11079_v8  ;;  %v11158_v6 = vld [vmem:[%s14623_s5 + $0xa48] ss:$16 sps:$4 sm:$0xff]  }
 0x3b4   : > { %8068 = vmatprep.subr.bf16.mxu1 %v11082_v9  ;;  %v3888_v8 = vld [vmem:[#allocation9 + $0x58] sm:$0xff]  ;;  %v11163_v9 = vld [vmem:[%s14623_s5 + $0xa64] ss:$16 sps:$4 sm:$0xff]  }
 0x3b6   : > { %7592 = vmatpush1.bf16.msra.mxu0 %v11077_v42  ;;  %v11161_v42 = vld [vmem:[%s14623_s5 + $0xa60] ss:$16 sps:$4 sm:$0xff]  }
 0x3b7   : > { %8069 = vmatpush1.bf16.msra.mxu1 %v11080_v43  ;;  %7593 = vmatprep.subr.bf16.mxu0 %v11085_v12  ;;  %v11166_v43 = vld [vmem:[%s14623_s5 + $0xa6c] ss:$16 sps:$4 sm:$0xff]   ;;  %v13651_v12 = vld.sshfl [vmem:[#allocation8 + $0x8] sm:$0x22 pattern:$0x76325410] }
 0x3b8   : > { %8070 = vmatprep.subr.bf16.mxu1 %v11088_v13  ;;  %v11164_v13 = vld [vmem:[%s14623_s5 + $0xa68] ss:$16 sps:$4 sm:$0xff]  }
 0x3ba   : > { %7594 = vmatpush1.bf16.msra.mxu0 %v11083_v14  ;;  %v13658_v14 = vcombine.high %v13651_v12, %v13651_v12 }
 0x3bb   : > { %8071 = vmatpush1.bf16.msra.mxu1 %v11086_v50  ;;  %7595 = vmatprep.subr.bf16.mxu0 %v11091_v15  ;;  %v3614_v50 = vld [vmem:[#allocation9 + $0xf8] sm:$0x1]  ;;  %v13660_v15 = vld.sshfl [vmem:[#allocation8 + $0xc] sm:$0x22 pattern:$0x76325410] }
 0x3bc   : > { %8072 = vmatprep.subr.bf16.mxu1 %v11094_v51  ;;  %v13664_v51 = vcombine.high %v13660_v15, %v13660_v15 }
 0x3be   : > { %7596 = vmatpush1.bf16.msra.mxu0 %v11089_v18  ;;  %v3607_v18 = vrot.slane %v13651_v12, 1 }
 0x3bf   : > { %8073 = vmatpush1.bf16.msra.mxu1 %v11092_v19  ;;  %7597 = vmatprep.subr.bf16.mxu0 %v11097_v20  ;;  %v3611_v19 = vld [vmem:[#allocation9 + $0xf0] sm:$0x1]  ;;  %v3815_v20 = vrot.slane %v13660_v15, 5 }
 0x3c0   : > { %8074 = vmatprep.subr.bf16.mxu1 %v11100_v21  ;;  %v3819_v21 = vld [vmem:[#allocation9 + $0xf0] sm:$0x10] }
 0x3c2   : > { %7598 = vmatpush1.bf16.msra.mxu0 %v11095_v22  ;;  %v11169_v22 = vld [vmem:[%s14623_s5 + $0xa84] ss:$16 sps:$4 sm:$0xff]  }
 0x3c3   : > { %8075 = vmatpush1.bf16.msra.mxu1 %v11098_v23  ;;  %7599 = vmatprep.subr.bf16.mxu0 %v11103_v24  ;;  %v3608_v23 = vrot.slane %v13658_v14, 1  ;;  %v3822_v24 = vld [vmem:[#allocation9 + $0xf8] sm:$0x10] }
 0x3c4   : > { %8076 = vmatprep.subr.bf16.mxu1 %v11106_v52  ;;  %v11172_v52 = vld [vmem:[%s14623_s5 + $0xa8c] ss:$16 sps:$4 sm:$0xff]  }
 0x3c6   : > { %7600 = vmatpush1.bf16.msra.mxu0 %v11101_v25  ;;  %v3816_v25 = vrot.slane %v13664_v51, 5 }
 0x3c7   : > { %8077 = vmatpush1.bf16.msra.mxu1 %v11104_v27  ;;  %7601 = vmatprep.subr.bf16.mxu0 %v11109_v29  ;;  %v3612_v27 = vsel %vm11822_vm3, %v3607_v18, %v3611_v19  ;;  %v3820_v29 = vsel %vm12416_vm1, %v3815_v20, %v3819_v21  ;;  %v11235_v18 = vld [vmem:[%s14623_s5 + $0xbe4] ss:$16 sps:$4 sm:$0xff]   ;;  %v11238_v19 = vld [vmem:[%s14623_s5 + $0xbec] ss:$16 sps:$4 sm:$0xff]   ;;  %v11233_v20 = vld [vmem:[%s14623_s5 + $0xbe0] ss:$16 sps:$4 sm:$0xff]  }
 0x3c8   : > { %8078 = vmatprep.subr.bf16.mxu1 %v11112_v30  ;;  %v3615_v30 = vsel %vm11822_vm3, %v3608_v23, %v3614_v50  ;;  %3613 = vst [vmem:[#allocation9 + $0xf0] sm:$0x1] %v3612_v27  ;;  %3821 = vst [vmem:[#allocation9 + $0xf0] sm:$0x10] %v3820_v29  ;;  %v11230_v50 = vld [vmem:[%s14623_s5 + $0xbc8] ss:$16 sps:$4 sm:$0xff]  }
 0x3c9   : > { %3616 = vst [vmem:[#allocation9 + $0xf8] sm:$0x1] %v3615_v30  ;;  %v11236_v21 = vld [vmem:[%s14623_s5 + $0xbe8] ss:$16 sps:$4 sm:$0xff]   ;;  %v11244_v23 = vld [vmem:[%s14623_s5 + $0xc0c] ss:$16 sps:$4 sm:$0xff]  }
 0x3ca   : > { %7602 = vmatpush1.bf16.msra.mxu0 %v11107_v44  ;;  %v11167_v44 = vld [vmem:[%s14623_s5 + $0xa80] ss:$16 sps:$4 sm:$0xff]   ;;  %v11247_v27 = vld [vmem:[%s14623_s5 + $0xc24] ss:$16 sps:$4 sm:$0xff]   ;;  %v3906_v29 = vld [vmem:[#allocation9 + $0xe8] sm:$0xff] }
 0x3cb   : > { %8079 = vmatpush1.bf16.msra.mxu1 %v11110_v32  ;;  %7603 = vmatprep.subr.bf16.mxu0 %v11115_v33  ;;  %v3823_v32 = vsel %vm12416_vm1, %v3816_v25, %v3822_v24  ;;  %v11170_v33 = vld [vmem:[%s14623_s5 + $0xa88] ss:$16 sps:$4 sm:$0xff]   ;;  %v11239_v24 = vld [vmem:[%s14623_s5 + $0xc00] ss:$16 sps:$4 sm:$0xff]   ;;  %v11250_v30 = vld [vmem:[%s14623_s5 + $0xc2c] ss:$16 sps:$4 sm:$0xff]  }
 0x3cc   : > { %8080 = vmatprep.subr.bf16.mxu1 %v11118_v26  ;;  %v11175_v26 = vld [vmem:[%s14623_s5 + $0xaa4] ss:$16 sps:$4 sm:$0xff]   ;;  %3824 = vst [vmem:[#allocation9 + $0xf8] sm:$0x10] %v3823_v32  ;;  %v11242_v25 = vld [vmem:[%s14623_s5 + $0xc08] ss:$16 sps:$4 sm:$0xff]  }
 0x3cd   : > { %v11248_v32 = vld [vmem:[%s14623_s5 + $0xc28] ss:$16 sps:$4 sm:$0xff]  }
 0x3ce   : > { %7604 = vmatpush1.bf16.msra.mxu0 %v11113_v4  ;;  %v11178_v4 = vld [vmem:[%s14623_s5 + $0xaac] ss:$16 sps:$4 sm:$0xff]  }
 0x3cf   : > { %8081 = vmatpush1.bf16.msra.mxu1 %v11116_v34  ;;  %7605 = vmatprep.subr.bf16.mxu0 %v11121_v35  ;;  %v11173_v34 = vld [vmem:[%s14623_s5 + $0xaa0] ss:$16 sps:$4 sm:$0xff]   ;;  %v11176_v35 = vld [vmem:[%s14623_s5 + $0xaa8] ss:$16 sps:$4 sm:$0xff]  }
 0x3d0   : > { %8082 = vmatprep.subr.bf16.mxu1 %v11124_v36  ;;  %v11181_v36 = vld [vmem:[%s14623_s5 + $0xac4] ss:$16 sps:$4 sm:$0xff]  }
 0x3d2   : > { %7606 = vmatpush1.bf16.msra.mxu0 %v11119_v37  ;;  %v11184_v37 = vld [vmem:[%s14623_s5 + $0xacc] ss:$16 sps:$4 sm:$0xff]  }
 0x3d3   : > { %8083 = vmatpush1.bf16.msra.mxu1 %v11122_v10  ;;  %7607 = vmatprep.subr.bf16.mxu0 %v11127_v38  ;;  %v11179_v10 = vld [vmem:[%s14623_s5 + $0xac0] ss:$16 sps:$4 sm:$0xff]   ;;  %v11182_v38 = vld [vmem:[%s14623_s5 + $0xac8] ss:$16 sps:$4 sm:$0xff]  }
 0x3d4   : > { %8084 = vmatprep.subr.bf16.mxu1 %v11130_v28  ;;  %v11187_v28 = vld [vmem:[%s14623_s5 + $0xae4] ss:$16 sps:$4 sm:$0xff]  }
 0x3d6   : > { %7608 = vmatpush1.bf16.msra.mxu0 %v11125_v40  ;;  %v11190_v40 = vld [vmem:[%s14623_s5 + $0xaec] ss:$16 sps:$4 sm:$0xff]  }
 0x3d7   : > { %8085 = vmatpush1.bf16.msra.mxu1 %v11128_v45  ;;  %7609 = vmatprep.subr.bf16.mxu0 %v11133_v46  ;;  %v11185_v45 = vld [vmem:[%s14623_s5 + $0xae0] ss:$16 sps:$4 sm:$0xff]   ;;  %v11188_v46 = vld [vmem:[%s14623_s5 + $0xae8] ss:$16 sps:$4 sm:$0xff]  }
 0x3d8   : > { %8086 = vmatprep.subr.bf16.mxu1 %v11136_v48  ;;  %v11193_v48 = vld [vmem:[%s14623_s5 + $0xb04] ss:$16 sps:$4 sm:$0xff]  }
 0x3da   : > { %7610 = vmatpush1.bf16.msra.mxu0 %v11131_v49  ;;  %v11196_v49 = vld [vmem:[%s14623_s5 + $0xb0c] ss:$16 sps:$4 sm:$0xff]  }
 0x3db   : > { %8087 = vmatpush1.bf16.msra.mxu1 %v11134_v54  ;;  %7611 = vmatprep.subr.bf16.mxu0 %v11139_v53  ;;  %v11191_v54 = vld [vmem:[%s14623_s5 + $0xb00] ss:$16 sps:$4 sm:$0xff]   ;;  %v11194_v53 = vld [vmem:[%s14623_s5 + $0xb08] ss:$16 sps:$4 sm:$0xff]  }
 0x3dc   : > { %8088 = vmatprep.subr.bf16.mxu1 %v11142_v31  ;;  %v11199_v31 = vld [vmem:[%s14623_s5 + $0xb24] ss:$16 sps:$4 sm:$0xff]  }
 0x3de   : > { %7612 = vmatpush1.bf16.msra.mxu0 %v11137_v61  ;;  %v11202_v61 = vld [vmem:[%s14623_s5 + $0xb2c] ss:$16 sps:$4 sm:$0xff]  }
 0x3df   : > { %8089 = vmatpush1.bf16.msra.mxu1 %v11140_v55  ;;  %7634 = vmatprep.subr.bf16.mxu0 %v11145_v47  ;;  %v11197_v55 = vld [vmem:[%s14623_s5 + $0xb20] ss:$16 sps:$4 sm:$0xff]   ;;  %v11200_v47 = vld [vmem:[%s14623_s5 + $0xb28] ss:$16 sps:$4 sm:$0xff]  }
 0x3e0   : > { %8111 = vmatprep.subr.bf16.mxu1 %v11148_v16  ;;  %v11205_v16 = vld [vmem:[%s14623_s5 + $0xb44] ss:$16 sps:$4 sm:$0xff]  }
 0x3e1   : > { %7614 = vmatmul.mubr.bf16.vlgmr.msra.gmra.mrb[32].mxu0 %v3885_v57 }
 0x3e2   : > { %8091 = vmatmul.mubr.bf16.vlgmr.msra.gmra.mrb[24].mxu1 %v3885_v57  ;;  %7623 = vmatprep.mubr.bf16.mxu0 %v3904_v60  ;;  %v11203_v57 = vld [vmem:[%s14623_s5 + $0xb40] ss:$16 sps:$4 sm:$0xff]  }
 0x3e3   : > { %7635 = vmatpush1.bf16.msra.mxu0 %v11143_v56  ;;  %8100 = vmatprep.mubr.bf16.mxu1 %v3904_v60  ;;  %v11208_v56 = vld [vmem:[%s14623_s5 + $0xb4c] ss:$16 sps:$4 sm:$0xff]  }
 0x3e4   : > { %8112 = vmatpush1.bf16.msra.mxu1 %v11146_v58  ;;  %7636 = vmatprep.subr.bf16.mxu0 %v11151_v59  ;;  %v11206_v58 = vld [vmem:[%s14623_s5 + $0xb48] ss:$16 sps:$4 sm:$0xff]   ;;  %v11211_v59 = vld [vmem:[%s14623_s5 + $0xb64] ss:$16 sps:$4 sm:$0xff]   ;;  %v11214_v60 = vld [vmem:[%s14623_s5 + $0xb6c] ss:$16 sps:$4 sm:$0xff]  }
 0x3e5   : > { %8113 = vmatprep.subr.bf16.mxu1 %v11154_v17  ;;  %v11209_v17 = vld [vmem:[%s14623_s5 + $0xb60] ss:$16 sps:$4 sm:$0xff]  }
 0x3e7   : > { %7637 = vmatpush1.bf16.msra.mxu0 %v11149_v63  ;;  %v11212_v63 = vld [vmem:[%s14623_s5 + $0xb68] ss:$16 sps:$4 sm:$0xff]  }
 0x3e8   : > { %8114 = vmatpush1.bf16.msra.mxu1 %v11152_v62  ;;  %7638 = vmatprep.subr.bf16.mxu0 %v11157_v1  ;;  %v11217_v62 = vld [vmem:[%s14623_s5 + $0xb84] ss:$16 sps:$4 sm:$0xff]   ;;  %v11220_v1 = vld [vmem:[%s14623_s5 + $0xb8c] ss:$16 sps:$4 sm:$0xff]  }
 0x3e9   : > { %7624 = vmatmul.mubr.bf16.gmra.mrb[36].mxu0 %v3903_v39  ;;  %8115 = vmatprep.subr.bf16.mxu1 %v11160_v3  ;;  %v11215_v3 = vld [vmem:[%s14623_s5 + $0xb80] ss:$16 sps:$4 sm:$0xff]  }
 0x3ea   : > { %8101 = vmatmul.mubr.bf16.gmra.mrb[28].mxu1 %v3903_v39  ;;  %7666 = vmatprep.mubr.bf16.mxu0 %v3888_v8  ;;  %v11218_v39 = vld [vmem:[%s14623_s5 + $0xb88] ss:$16 sps:$4 sm:$0xff]  }
 0x3eb   : > { %7639 = vmatpush1.bf16.msra.mxu0 %v11155_v5  ;;  %8143 = vmatprep.mubr.bf16.mxu1 %v3888_v8  ;;  %v11223_v5 = vld [vmem:[%s14623_s5 + $0xba4] ss:$16 sps:$4 sm:$0xff]   ;;  %v11221_v8 = vld [vmem:[%s14623_s5 + $0xba0] ss:$16 sps:$4 sm:$0xff]  }
 0x3ec   : > { %8116 = vmatpush1.bf16.msra.mxu1 %v11158_v6  ;;  %7640 = vmatprep.subr.bf16.mxu0 %v11163_v9  ;;  %v11226_v6 = vld [vmem:[%s14623_s5 + $0xbac] ss:$16 sps:$4 sm:$0xff]   ;;  %v11224_v9 = vld [vmem:[%s14623_s5 + $0xba8] ss:$16 sps:$4 sm:$0xff]  }
 0x3ed   : > { %8117 = vmatprep.subr.bf16.mxu1 %v11166_v43  ;;  %v11232_v43 = vld [vmem:[%s14623_s5 + $0xbcc] ss:$16 sps:$4 sm:$0xff]  }
 0x3ef   : > { %7641 = vmatpush1.bf16.msra.mxu0 %v11161_v42  ;;  %v11229_v42 = vld [vmem:[%s14623_s5 + $0xbc4] ss:$16 sps:$4 sm:$0xff]  }
 0x3f0   : > { %8118 = vmatpush1.bf16.msra.mxu1 %v11164_v13  ;;  %7642 = vmatprep.subr.bf16.mxu0 %v11169_v22  ;;  %v11227_v13 = vld [vmem:[%s14623_s5 + $0xbc0] ss:$16 sps:$4 sm:$0xff]   ;;  %v11241_v22 = vld [vmem:[%s14623_s5 + $0xc04] ss:$16 sps:$4 sm:$0xff]  }
 0x3f1   : > { %8119 = vmatprep.subr.bf16.mxu1 %v11172_v52  ;;  %v3887_v52 = vld [vmem:[#allocation9 + $0x50] sm:$0xff] }
 0x3f3   : > { %7643 = vmatpush1.bf16.msra.mxu0 %v11167_v44  ;;  %v11245_v44 = vld [vmem:[%s14623_s5 + $0xc20] ss:$16 sps:$4 sm:$0xff]  }
 0x3f4   : > { %8120 = vmatpush1.bf16.msra.mxu1 %v11170_v33  ;;  %7644 = vmatprep.subr.bf16.mxu0 %v11175_v26  ;;  %v11253_v33 = vld [vmem:[%s14623_s5 + $0xc44] ss:$16 sps:$4 sm:$0xff]   ;;  %v11256_v26 = vld [vmem:[%s14623_s5 + $0xc4c] ss:$16 sps:$4 sm:$0xff]  }
 0x3f5   : > { %8121 = vmatprep.subr.bf16.mxu1 %v11178_v4  ;;  %v3905_v4 = vld [vmem:[#allocation9 + $0xe0] sm:$0xff] }
 0x3f7   : > { %7645 = vmatpush1.bf16.msra.mxu0 %v11173_v34  ;;  %v11251_v34 = vld [vmem:[%s14623_s5 + $0xc40] ss:$16 sps:$4 sm:$0xff]  }
 0x3f8   : > { %8122 = vmatpush1.bf16.msra.mxu1 %v11176_v35  ;;  %7646 = vmatprep.subr.bf16.mxu0 %v11181_v36  ;;  %v11254_v35 = vld [vmem:[%s14623_s5 + $0xc48] ss:$16 sps:$4 sm:$0xff]  }
 0x3f9   : > { %8123 = vmatprep.subr.bf16.mxu1 %v11184_v37  ;;  %v3890_v36 = vld [vmem:[#allocation9 + $0x68] sm:$0xff]  ;;  %v11259_v37 = vld [vmem:[%s14623_s5 + $0xc64] ss:$16 sps:$4 sm:$0xff]  }
 0x3fb   : > { %7647 = vmatpush1.bf16.msra.mxu0 %v11179_v10  ;;  %v11262_v10 = vld [vmem:[%s14623_s5 + $0xc6c] ss:$16 sps:$4 sm:$0xff]  }
 0x3fc   : > { %8124 = vmatpush1.bf16.msra.mxu1 %v11182_v38  ;;  %7648 = vmatprep.subr.bf16.mxu0 %v11187_v28  ;;  %v3628_v38 = vrot.slane %v13664_v51, 1  ;;  %v3634_v28 = vld [vmem:[#allocation9 + $0x108] sm:$0x1] }
 0x3fd   : > { %8125 = vmatprep.subr.bf16.mxu1 %v11190_v40  ;;  %v3840_v40 = vshrl.u32 %v13658_v14, 16 }
 0x3ff   : > { %7649 = vmatpush1.bf16.msra.mxu0 %v11185_v45  ;;  %v3848_v45 = vld [vmem:[#allocation9 + $0x108] sm:$0x10] }
 0x400   : > { %8126 = vmatpush1.bf16.msra.mxu1 %v11188_v46  ;;  %7650 = vmatprep.subr.bf16.mxu0 %v11193_v48  ;;  %v3627_v46 = vrot.slane %v13660_v15, 1  ;;  %v3631_v48 = vld [vmem:[#allocation9 + $0x100] sm:$0x1] }
 0x401   : > { %8127 = vmatprep.subr.bf16.mxu1 %v11196_v49  ;;  %v3836_v49 = vshrl.u32 %v13651_v12, 16 }
 0x403   : > { %7651 = vmatpush1.bf16.msra.mxu0 %v11191_v54  ;;  %v3635_v54 = vsel %vm11822_vm3, %v3628_v38, %v3634_v28  ;;  %v11320_v38 = vld [vmem:[%s14623_s5 + $0xda8] ss:$16 sps:$4 sm:$0xff]   ;;  %v11325_v28 = vld [vmem:[%s14623_s5 + $0xdc4] ss:$16 sps:$4 sm:$0xff]  }
 0x404   : > { %8128 = vmatpush1.bf16.msra.mxu1 %v11194_v53  ;;  %7652 = vmatprep.subr.bf16.mxu0 %v11199_v31  ;;  %v3842_v53 = vrot.slane %v3840_v40, 5  ;;  %v3845_v31 = vld [vmem:[#allocation9 + $0x100] sm:$0x10]  ;;  %3636 = vst [vmem:[#allocation9 + $0x108] sm:$0x1] %v3635_v54 }
 0x405   : > { %8129 = vmatprep.subr.bf16.mxu1 %v11202_v61  ;;  %v11257_v61 = vld [vmem:[%s14623_s5 + $0xc60] ss:$16 sps:$4 sm:$0xff]   ;;  %v11331_v54 = vld [vmem:[%s14623_s5 + $0xde4] ss:$16 sps:$4 sm:$0xff]  }
 0x407   : > { %7653 = vmatpush1.bf16.msra.mxu0 %v11197_v55  ;;  %v3632_v55 = vsel %vm11822_vm3, %v3627_v46, %v3631_v48  ;;  %v11323_v46 = vld [vmem:[%s14623_s5 + $0xdc0] ss:$16 sps:$4 sm:$0xff]   ;;  %v11326_v48 = vld [vmem:[%s14623_s5 + $0xdc8] ss:$16 sps:$4 sm:$0xff]  }
 0x408   : > { %8130 = vmatpush1.bf16.msra.mxu1 %v11200_v47  ;;  %7654 = vmatprep.subr.bf16.mxu0 %v11205_v16  ;;  %v3838_v47 = vrot.slane %v3836_v49, 5  ;;  %v11260_v16 = vld [vmem:[%s14623_s5 + $0xc68] ss:$16 sps:$4 sm:$0xff]   ;;  %3633 = vst [vmem:[#allocation9 + $0x100] sm:$0x1] %v3632_v55 }
 0x409   : > { %8131 = vmatprep.subr.bf16.mxu1 %v11208_v56  ;;  %v11265_v56 = vld [vmem:[%s14623_s5 + $0xc84] ss:$16 sps:$4 sm:$0xff]  }
 0x40a   : > { %v11337_v55 = vld [vmem:[%s14623_s5 + $0xe04] ss:$16 sps:$4 sm:$0xff]  }
 0x40b   : > { %7655 = vmatpush1.bf16.msra.mxu0 %v11203_v57  ;;  %v3849_v57 = vsel %vm12416_vm1, %v3842_v53, %v3848_v45  ;;  %v11328_v45 = vld [vmem:[%s14623_s5 + $0xdcc] ss:$16 sps:$4 sm:$0xff]  }
 0x40c   : > { %8132 = vmatpush1.bf16.msra.mxu1 %v11206_v58  ;;  %7656 = vmatprep.subr.bf16.mxu0 %v11211_v59  ;;  %v11268_v58 = vld [vmem:[%s14623_s5 + $0xc8c] ss:$16 sps:$4 sm:$0xff]   ;;  %3850 = vst [vmem:[#allocation9 + $0x108] sm:$0x10] %v3849_v57  ;;  %v3846_v59 = vsel %vm12416_vm1, %v3838_v47, %v3845_v31  ;;  %v11329_v31 = vld [vmem:[%s14623_s5 + $0xde0] ss:$16 sps:$4 sm:$0xff]  }
 0x40d   : > { %8133 = vmatprep.subr.bf16.mxu1 %v11214_v60  ;;  %3847 = vst [vmem:[#allocation9 + $0x100] sm:$0x10] %v3846_v59  ;;  %v11263_v60 = vld [vmem:[%s14623_s5 + $0xc80] ss:$16 sps:$4 sm:$0xff]   ;;  %v11334_v53 = vld [vmem:[%s14623_s5 + $0xdec] ss:$16 sps:$4 sm:$0xff]  }
 0x40e   : > { %v11340_v47 = vld [vmem:[%s14623_s5 + $0xe0c] ss:$16 sps:$4 sm:$0xff]   ;;  %v11343_v57 = vld [vmem:[%s14623_s5 + $0xe24] ss:$16 sps:$4 sm:$0xff]  }
 0x40f   : > { %7657 = vmatpush1.bf16.msra.mxu0 %v11209_v17  ;;  %v11266_v17 = vld [vmem:[%s14623_s5 + $0xc88] ss:$16 sps:$4 sm:$0xff]   ;;  %v11346_v59 = vld [vmem:[%s14623_s5 + $0xe2c] ss:$16 sps:$4 sm:$0xff]  }
 0x410   : > { %8134 = vmatpush1.bf16.msra.mxu1 %v11212_v63  ;;  %7658 = vmatprep.subr.bf16.mxu0 %v11217_v62  ;;  %v11271_v63 = vld [vmem:[%s14623_s5 + $0xca4] ss:$16 sps:$4 sm:$0xff]   ;;  %v11274_v62 = vld [vmem:[%s14623_s5 + $0xcac] ss:$16 sps:$4 sm:$0xff]  }
 0x411   : > { %8135 = vmatprep.subr.bf16.mxu1 %v11220_v1  ;;  %v11269_v1 = vld [vmem:[%s14623_s5 + $0xca0] ss:$16 sps:$4 sm:$0xff]  }
 0x413   : > { %7659 = vmatpush1.bf16.msra.mxu0 %v11215_v3  ;;  %v11272_v3 = vld [vmem:[%s14623_s5 + $0xca8] ss:$16 sps:$4 sm:$0xff]  }
 0x414   : > { %8136 = vmatpush1.bf16.msra.mxu1 %v11218_v39  ;;  %7660 = vmatprep.subr.bf16.mxu0 %v11223_v5  ;;  %v11277_v39 = vld [vmem:[%s14623_s5 + $0xcc4] ss:$16 sps:$4 sm:$0xff]   ;;  %v11280_v5 = vld [vmem:[%s14623_s5 + $0xccc] ss:$16 sps:$4 sm:$0xff]  }
 0x415   : > { %8137 = vmatprep.subr.bf16.mxu1 %v11226_v6  ;;  %v11275_v6 = vld [vmem:[%s14623_s5 + $0xcc0] ss:$16 sps:$4 sm:$0xff]  }
 0x417   : > { %7661 = vmatpush1.bf16.msra.mxu0 %v11221_v8  ;;  %v11278_v8 = vld [vmem:[%s14623_s5 + $0xcc8] ss:$16 sps:$4 sm:$0xff]  }
 0x418   : > { %8138 = vmatpush1.bf16.msra.mxu1 %v11224_v9  ;;  %7662 = vmatprep.subr.bf16.mxu0 %v11229_v42  ;;  %v11283_v9 = vld [vmem:[%s14623_s5 + $0xce4] ss:$16 sps:$4 sm:$0xff]   ;;  %v11286_v42 = vld [vmem:[%s14623_s5 + $0xcec] ss:$16 sps:$4 sm:$0xff]  }
 0x419   : > { %8139 = vmatprep.subr.bf16.mxu1 %v11232_v43  ;;  %v11281_v43 = vld [vmem:[%s14623_s5 + $0xce0] ss:$16 sps:$4 sm:$0xff]  }
 0x41b   : > { %7663 = vmatpush1.bf16.msra.mxu0 %v11227_v13  ;;  %v11284_v13 = vld [vmem:[%s14623_s5 + $0xce8] ss:$16 sps:$4 sm:$0xff]  }
 0x41c   : > { %8140 = vmatpush1.bf16.msra.mxu1 %v11230_v50  ;;  %7664 = vmatprep.subr.bf16.mxu0 %v11235_v18  ;;  %v11289_v50 = vld [vmem:[%s14623_s5 + $0xd04] ss:$16 sps:$4 sm:$0xff]   ;;  %v11292_v18 = vld [vmem:[%s14623_s5 + $0xd0c] ss:$16 sps:$4 sm:$0xff]  }
 0x41d   : > { %8141 = vmatprep.subr.bf16.mxu1 %v11238_v19  ;;  %v11287_v19 = vld [vmem:[%s14623_s5 + $0xd00] ss:$16 sps:$4 sm:$0xff]  }
 0x41f   : > { %7665 = vmatpush1.bf16.msra.mxu0 %v11233_v20  ;;  %v11290_v20 = vld [vmem:[%s14623_s5 + $0xd08] ss:$16 sps:$4 sm:$0xff]  }
 0x420   : > { %8142 = vmatpush1.bf16.msra.mxu1 %v11236_v21  ;;  %7687 = vmatprep.subr.bf16.mxu0 %v11241_v22  ;;  %v11295_v21 = vld [vmem:[%s14623_s5 + $0xd24] ss:$16 sps:$4 sm:$0xff]   ;;  %v11298_v22 = vld [vmem:[%s14623_s5 + $0xd2c] ss:$16 sps:$4 sm:$0xff]  }
 0x421   : > { %8164 = vmatprep.subr.bf16.mxu1 %v11244_v23  ;;  %v11293_v23 = vld [vmem:[%s14623_s5 + $0xd20] ss:$16 sps:$4 sm:$0xff]  }
 0x422   : > { %7667 = vmatmul.mubr.bf16.vlgmr.msra.gmra.mrb[32].mxu0 %v3887_v52 }
 0x423   : > { %8144 = vmatmul.mubr.bf16.vlgmr.msra.gmra.mrb[24].mxu1 %v3887_v52  ;;  %7676 = vmatprep.mubr.bf16.mxu0 %v3906_v29  ;;  %v11301_v52 = vld [vmem:[%s14623_s5 + $0xd44] ss:$16 sps:$4 sm:$0xff]  }
 0x424   : > { %7688 = vmatpush1.bf16.msra.mxu0 %v11239_v24  ;;  %8153 = vmatprep.mubr.bf16.mxu1 %v3906_v29  ;;  %v11296_v24 = vld [vmem:[%s14623_s5 + $0xd28] ss:$16 sps:$4 sm:$0xff]  }
 0x425   : > { %8165 = vmatpush1.bf16.msra.mxu1 %v11242_v25  ;;  %7689 = vmatprep.subr.bf16.mxu0 %v11247_v27  ;;  %v11304_v25 = vld [vmem:[%s14623_s5 + $0xd4c] ss:$16 sps:$4 sm:$0xff]   ;;  %v11299_v27 = vld [vmem:[%s14623_s5 + $0xd40] ss:$16 sps:$4 sm:$0xff]   ;;  %v11302_v29 = vld [vmem:[%s14623_s5 + $0xd48] ss:$16 sps:$4 sm:$0xff]  }
 0x426   : > { %8166 = vmatprep.subr.bf16.mxu1 %v11250_v30  ;;  %v11307_v30 = vld [vmem:[%s14623_s5 + $0xd64] ss:$16 sps:$4 sm:$0xff]  }
 0x428   : > { %7690 = vmatpush1.bf16.msra.mxu0 %v11245_v44  ;;  %v11310_v44 = vld [vmem:[%s14623_s5 + $0xd6c] ss:$16 sps:$4 sm:$0xff]  }
 0x429   : > { %8167 = vmatpush1.bf16.msra.mxu1 %v11248_v32  ;;  %7691 = vmatprep.subr.bf16.mxu0 %v11253_v33  ;;  %v11305_v32 = vld [vmem:[%s14623_s5 + $0xd60] ss:$16 sps:$4 sm:$0xff]   ;;  %v11308_v33 = vld [vmem:[%s14623_s5 + $0xd68] ss:$16 sps:$4 sm:$0xff]  }
 0x42a   : > { %7677 = vmatmul.mubr.bf16.gmra.mrb[36].mxu0 %v3905_v4  ;;  %8168 = vmatprep.subr.bf16.mxu1 %v11256_v26  ;;  %v11313_v26 = vld [vmem:[%s14623_s5 + $0xd84] ss:$16 sps:$4 sm:$0xff]  }
 0x42b   : > { %8154 = vmatmul.mubr.bf16.gmra.mrb[28].mxu1 %v3905_v4  ;;  %7719 = vmatprep.mubr.bf16.mxu0 %v3890_v36  ;;  %v11316_v4 = vld [vmem:[%s14623_s5 + $0xd8c] ss:$16 sps:$4 sm:$0xff]  }
 0x42c   : > { %7692 = vmatpush1.bf16.msra.mxu0 %v11251_v34  ;;  %8196 = vmatprep.mubr.bf16.mxu1 %v3890_v36  ;;  %v11311_v34 = vld [vmem:[%s14623_s5 + $0xd80] ss:$16 sps:$4 sm:$0xff]   ;;  %v11319_v36 = vld [vmem:[%s14623_s5 + $0xda4] ss:$16 sps:$4 sm:$0xff]  }
 0x42d   : > { %8169 = vmatpush1.bf16.msra.mxu1 %v11254_v35  ;;  %7693 = vmatprep.subr.bf16.mxu0 %v11259_v37  ;;  %v11314_v35 = vld [vmem:[%s14623_s5 + $0xd88] ss:$16 sps:$4 sm:$0xff]   ;;  %v11322_v37 = vld [vmem:[%s14623_s5 + $0xdac] ss:$16 sps:$4 sm:$0xff]  }
 0x42e   : > { %8170 = vmatprep.subr.bf16.mxu1 %v11262_v10  ;;  %v11317_v10 = vld [vmem:[%s14623_s5 + $0xda0] ss:$16 sps:$4 sm:$0xff]  }
 0x430   : > { %7694 = vmatpush1.bf16.msra.mxu0 %v11257_v61  ;;  %v11332_v61 = vld [vmem:[%s14623_s5 + $0xde8] ss:$16 sps:$4 sm:$0xff]  }
 0x431   : > { %8171 = vmatpush1.bf16.msra.mxu1 %v11260_v16  ;;  %7695 = vmatprep.subr.bf16.mxu0 %v11265_v56  ;;  %v11335_v16 = vld [vmem:[%s14623_s5 + $0xe00] ss:$16 sps:$4 sm:$0xff]   ;;  %v11338_v56 = vld [vmem:[%s14623_s5 + $0xe08] ss:$16 sps:$4 sm:$0xff]  }
 0x432   : > { %8172 = vmatprep.subr.bf16.mxu1 %v11268_v58  ;;  %v3889_v58 = vld [vmem:[#allocation9 + $0x60] sm:$0xff] }
 0x434   : > { %7696 = vmatpush1.bf16.msra.mxu0 %v11263_v60  ;;  %v11341_v60 = vld [vmem:[%s14623_s5 + $0xe20] ss:$16 sps:$4 sm:$0xff]  }
 0x435   : > { %8173 = vmatpush1.bf16.msra.mxu1 %v11266_v17  ;;  %7697 = vmatprep.subr.bf16.mxu0 %v11271_v63  ;;  %v11344_v17 = vld [vmem:[%s14623_s5 + $0xe28] ss:$16 sps:$4 sm:$0xff]  }
 0x436   : > { %8174 = vmatprep.subr.bf16.mxu1 %v11274_v62  ;;  %v3908_v63 = vld [vmem:[#allocation9 + $0xf8] sm:$0xff]  ;;  %v11349_v62 = vld [vmem:[%s14623_s5 + $0xe44] ss:$16 sps:$4 sm:$0xff]  }
 0x438   : > { %7698 = vmatpush1.bf16.msra.mxu0 %v11269_v1  ;;  %v3660_v1 = vld [vmem:[#allocation9 + $0x118] sm:$0x1] }
 0x439   : > { %8175 = vmatpush1.bf16.msra.mxu1 %v11272_v3  ;;  %7699 = vmatprep.subr.bf16.mxu0 %v11277_v39  ;;  %v3866_v3 = vshrl.u32 %v13664_v51, 16  ;;  %v3874_v39 = vld [vmem:[#allocation9 + $0x118] sm:$0x10]  ;;  %v3871_v51 = vld [vmem:[#allocation9 + $0x110] sm:$0x10] }
 0x43a   : > { %8176 = vmatprep.subr.bf16.mxu1 %v11280_v5  ;;  %v3650_v5 = vrot.slane %v3836_v49, 1  ;;  %v3907_v49 = vld [vmem:[#allocation9 + $0xf0] sm:$0xff] }
 0x43c   : > { %7700 = vmatpush1.bf16.msra.mxu0 %v11275_v6  ;;  %v3657_v6 = vld [vmem:[#allocation9 + $0x110] sm:$0x1] }
 0x43d   : > { %8177 = vmatpush1.bf16.msra.mxu1 %v11278_v8  ;;  %7701 = vmatprep.subr.bf16.mxu0 %v11283_v9  ;;  %v3862_v8 = vshrl.u32 %v13660_v15, 16  ;;  %v11352_v9 = vld [vmem:[%s14623_s5 + $0xe4c] ss:$16 sps:$4 sm:$0xff]   ;;  %v11347_v15 = vld [vmem:[%s14623_s5 + $0xe40] ss:$16 sps:$4 sm:$0xff]  }
 0x43e   : > { %8178 = vmatprep.subr.bf16.mxu1 %v11286_v42  ;;  %v3654_v42 = vrot.slane %v3840_v40, 1  ;;  %v11350_v40 = vld [vmem:[%s14623_s5 + $0xe48] ss:$16 sps:$4 sm:$0xff]  }
 0x43f   : > { %v3864_v12 = vrot.slane %v3862_v8, 5  ;;  %v11422_v8 = vld [vmem:[%s14623_s5 + $0xfc8] ss:$16 sps:$4 sm:$0xff]  }
 0x440   : > { %7702 = vmatpush1.bf16.msra.mxu0 %v11281_v43  ;;  %v3868_v43 = vrot.slane %v3866_v3, 5  ;;  %v11416_v3 = vld [vmem:[%s14623_s5 + $0xfa8] ss:$16 sps:$4 sm:$0xff]  }
 0x441   : > { %8179 = vmatpush1.bf16.msra.mxu1 %v11284_v13  ;;  %7703 = vmatprep.subr.bf16.mxu0 %v11289_v50  ;;  %v3658_v13 = vsel %vm11822_vm3, %v3650_v5, %v3657_v6  ;;  %v3661_v50 = vsel %vm11822_vm3, %v3654_v42, %v3660_v1  ;;  %v11413_v1 = vld [vmem:[%s14623_s5 + $0xfa0] ss:$16 sps:$4 sm:$0xff]   ;;  %v11424_v5 = vld [vmem:[%s14623_s5 + $0xfcc] ss:$16 sps:$4 sm:$0xff]   ;;  %vm11586_vm3 = vmmov 0  }
 0x442   : > { %8180 = vmatprep.subr.bf16.mxu1 %v11292_v18  ;;  %v3875_v14 = vsel %vm12416_vm1, %v3868_v43, %v3874_v39  ;;  %3659 = vst [vmem:[#allocation9 + $0x110] sm:$0x1] %v3658_v13  ;;  %3662 = vst [vmem:[#allocation9 + $0x118] sm:$0x1] %v3661_v50  ;;  %v3872_v18 = vsel %vm12416_vm1, %v3864_v12, %v3871_v51  ;;  %v11421_v39 = vld [vmem:[%s14623_s5 + $0xfc4] ss:$16 sps:$4 sm:$0xff]  }
 0x443   : > { %3876 = vst [vmem:[#allocation9 + $0x118] sm:$0x10] %v3875_v14  ;;  %3873 = vst [vmem:[#allocation9 + $0x110] sm:$0x10] %v3872_v18  ;;  %v11419_v6 = vld [vmem:[%s14623_s5 + $0xfc0] ss:$16 sps:$4 sm:$0xff]  }
 0x444   : > { %7704 = vmatpush1.bf16.msra.mxu0 %v11287_v19  ;;  %v11358_v19 = vld [vmem:[%s14623_s5 + $0xe6c] ss:$16 sps:$4 sm:$0xff]   ;;  %v11425_v43 = vld [vmem:[%s14623_s5 + $0xfe0] ss:$16 sps:$4 sm:$0xff]   ;;  %v11428_v51 = vld [vmem:[%s14623_s5 + $0xfe8] ss:$16 sps:$4 sm:$0xff]  }
 0x445   : > { %8181 = vmatpush1.bf16.msra.mxu1 %v11290_v20  ;;  %7705 = vmatprep.subr.bf16.mxu0 %v11295_v21  ;;  %v3892_v20 = vld [vmem:[#allocation9 + $0x78] sm:$0xff]  ;;  %v11353_v21 = vld [vmem:[%s14623_s5 + $0xe60] ss:$16 sps:$4 sm:$0xff]   ;;  %v11433_v13 = vld [vmem:[%s14623_s5 + $0x1004] ss:$16 sps:$4 sm:$0xff]  }
 0x446   : > { %8182 = vmatprep.subr.bf16.mxu1 %v11298_v22  ;;  %v11361_v22 = vld [vmem:[%s14623_s5 + $0xe84] ss:$16 sps:$4 sm:$0xff]   ;;  %v11430_v42 = vld [vmem:[%s14623_s5 + $0xfec] ss:$16 sps:$4 sm:$0xff]  }
 0x447   : > { %v11436_v12 = vld [vmem:[%s14623_s5 + $0x100c] ss:$16 sps:$4 sm:$0xff]   ;;  %v11439_v50 = vld [vmem:[%s14623_s5 + $0x1024] ss:$16 sps:$4 sm:$0xff]  }
 0x448   : > { %7706 = vmatpush1.bf16.msra.mxu0 %v11293_v23  ;;  %v11364_v23 = vld [vmem:[%s14623_s5 + $0xe8c] ss:$16 sps:$4 sm:$0xff]   ;;  %v3891_v14 = vld [vmem:[#allocation9 + $0x70] sm:$0xff] }
 0x449   : > { %8183 = vmatpush1.bf16.msra.mxu1 %v11296_v24  ;;  %7707 = vmatprep.subr.bf16.mxu0 %v11301_v52  ;;  %v11359_v24 = vld [vmem:[%s14623_s5 + $0xe80] ss:$16 sps:$4 sm:$0xff]   ;;  %v11362_v52 = vld [vmem:[%s14623_s5 + $0xe88] ss:$16 sps:$4 sm:$0xff]  }
 0x44a   : > { %8184 = vmatprep.subr.bf16.mxu1 %v11304_v25  ;;  %v11367_v25 = vld [vmem:[%s14623_s5 + $0xea4] ss:$16 sps:$4 sm:$0xff]   ;;  %v3910_v18 = vld [vmem:[#allocation9 + $0x108] sm:$0xff] }
 0x44c   : > { %7708 = vmatpush1.bf16.msra.mxu0 %v11299_v27  ;;  %v11370_v27 = vld [vmem:[%s14623_s5 + $0xeac] ss:$16 sps:$4 sm:$0xff]  }
 0x44d   : > { %8185 = vmatpush1.bf16.msra.mxu1 %v11302_v29  ;;  %7709 = vmatprep.subr.bf16.mxu0 %v11307_v30  ;;  %v11365_v29 = vld [vmem:[%s14623_s5 + $0xea0] ss:$16 sps:$4 sm:$0xff]   ;;  %v11368_v30 = vld [vmem:[%s14623_s5 + $0xea8] ss:$16 sps:$4 sm:$0xff]  }
 0x44e   : > { %8186 = vmatprep.subr.bf16.mxu1 %v11310_v44  ;;  %v11373_v44 = vld [vmem:[%s14623_s5 + $0xec4] ss:$16 sps:$4 sm:$0xff]  }
 0x450   : > { %7710 = vmatpush1.bf16.msra.mxu0 %v11305_v32  ;;  %v11376_v32 = vld [vmem:[%s14623_s5 + $0xecc] ss:$16 sps:$4 sm:$0xff]  }
 0x451   : > { %8187 = vmatpush1.bf16.msra.mxu1 %v11308_v33  ;;  %7711 = vmatprep.subr.bf16.mxu0 %v11313_v26  ;;  %v11371_v33 = vld [vmem:[%s14623_s5 + $0xec0] ss:$16 sps:$4 sm:$0xff]   ;;  %v11374_v26 = vld [vmem:[%s14623_s5 + $0xec8] ss:$16 sps:$4 sm:$0xff]  }
 0x452   : > { %8188 = vmatprep.subr.bf16.mxu1 %v11316_v4  ;;  %v11379_v4 = vld [vmem:[%s14623_s5 + $0xee4] ss:$16 sps:$4 sm:$0xff]  }
 0x454   : > { %7712 = vmatpush1.bf16.msra.mxu0 %v11311_v34  ;;  %v11382_v34 = vld [vmem:[%s14623_s5 + $0xeec] ss:$16 sps:$4 sm:$0xff]  }
 0x455   : > { %8189 = vmatpush1.bf16.msra.mxu1 %v11314_v35  ;;  %7713 = vmatprep.subr.bf16.mxu0 %v11319_v36  ;;  %v11377_v35 = vld [vmem:[%s14623_s5 + $0xee0] ss:$16 sps:$4 sm:$0xff]   ;;  %v11380_v36 = vld [vmem:[%s14623_s5 + $0xee8] ss:$16 sps:$4 sm:$0xff]  }
 0x456   : > { %8190 = vmatprep.subr.bf16.mxu1 %v11322_v37  ;;  %v11385_v37 = vld [vmem:[%s14623_s5 + $0xf04] ss:$16 sps:$4 sm:$0xff]  }
 0x458   : > { %7714 = vmatpush1.bf16.msra.mxu0 %v11317_v10  ;;  %v11388_v10 = vld [vmem:[%s14623_s5 + $0xf0c] ss:$16 sps:$4 sm:$0xff]  }
 0x459   : > { %8191 = vmatpush1.bf16.msra.mxu1 %v11320_v38  ;;  %7715 = vmatprep.subr.bf16.mxu0 %v11325_v28  ;;  %v11383_v38 = vld [vmem:[%s14623_s5 + $0xf00] ss:$16 sps:$4 sm:$0xff]   ;;  %v11386_v28 = vld [vmem:[%s14623_s5 + $0xf08] ss:$16 sps:$4 sm:$0xff]  }
 0x45a   : > { %8192 = vmatprep.subr.bf16.mxu1 %v11328_v45  ;;  %v11391_v45 = vld [vmem:[%s14623_s5 + $0xf24] ss:$16 sps:$4 sm:$0xff]  }
 0x45c   : > { %7716 = vmatpush1.bf16.msra.mxu0 %v11323_v46  ;;  %v11394_v46 = vld [vmem:[%s14623_s5 + $0xf2c] ss:$16 sps:$4 sm:$0xff]  }
 0x45d   : > { %8193 = vmatpush1.bf16.msra.mxu1 %v11326_v48  ;;  %7717 = vmatprep.subr.bf16.mxu0 %v11331_v54  ;;  %v11389_v48 = vld [vmem:[%s14623_s5 + $0xf20] ss:$16 sps:$4 sm:$0xff]   ;;  %v11392_v54 = vld [vmem:[%s14623_s5 + $0xf28] ss:$16 sps:$4 sm:$0xff]  }
 0x45e   : > { %8194 = vmatprep.subr.bf16.mxu1 %v11334_v53  ;;  %v11397_v53 = vld [vmem:[%s14623_s5 + $0xf44] ss:$16 sps:$4 sm:$0xff]  }
 0x460   : > { %7718 = vmatpush1.bf16.msra.mxu0 %v11329_v31  ;;  %v11400_v31 = vld [vmem:[%s14623_s5 + $0xf4c] ss:$16 sps:$4 sm:$0xff]  }
 0x461   : > { %8195 = vmatpush1.bf16.msra.mxu1 %v11332_v61  ;;  %7740 = vmatprep.subr.bf16.mxu0 %v11337_v55  ;;  %v11395_v61 = vld [vmem:[%s14623_s5 + $0xf40] ss:$16 sps:$4 sm:$0xff]   ;;  %v11398_v55 = vld [vmem:[%s14623_s5 + $0xf48] ss:$16 sps:$4 sm:$0xff]  }
 0x462   : > { %8217 = vmatprep.subr.bf16.mxu1 %v11340_v47  ;;  %v11403_v47 = vld [vmem:[%s14623_s5 + $0xf64] ss:$16 sps:$4 sm:$0xff]  }
 0x463   : > { %7720 = vmatmul.mubr.bf16.vlgmr.msra.gmra.mrb[32].mxu0 %v3889_v58 }
 0x464   : > { %8197 = vmatmul.mubr.bf16.vlgmr.msra.gmra.mrb[24].mxu1 %v3889_v58  ;;  %7741 = vmatpush1.bf16.msra.mxu0 %v11335_v16  ;;  %v11406_v16 = vld [vmem:[%s14623_s5 + $0xf6c] ss:$16 sps:$4 sm:$0xff]   ;;  %v11409_v58 = vld [vmem:[%s14623_s5 + $0xf84] ss:$16 sps:$4 sm:$0xff]  }
 0x465   : > { %8218 = vmatpush1.bf16.msra.mxu1 %v11338_v56  ;;  %7742 = vmatprep.subr.bf16.mxu0 %v11343_v57  ;;  %v11401_v56 = vld [vmem:[%s14623_s5 + $0xf60] ss:$16 sps:$4 sm:$0xff]   ;;  %v11404_v57 = vld [vmem:[%s14623_s5 + $0xf68] ss:$16 sps:$4 sm:$0xff]  }
 0x466   : > { %8219 = vmatprep.subr.bf16.mxu1 %v11346_v59  ;;  %7729 = vmatprep.mubr.bf16.mxu0 %v3908_v63  ;;  %v11412_v59 = vld [vmem:[%s14623_s5 + $0xf8c] ss:$16 sps:$4 sm:$0xff]  }
 0x467   : > { %8206 = vmatprep.mubr.bf16.mxu1 %v3908_v63  ;;  %v11415_v63 = vld [vmem:[%s14623_s5 + $0xfa4] ss:$16 sps:$4 sm:$0xff]  }
 0x468   : > { %7743 = vmatpush1.bf16.msra.mxu0 %v11341_v60  ;;  %v11407_v60 = vld [vmem:[%s14623_s5 + $0xf80] ss:$16 sps:$4 sm:$0xff]  }
 0x469   : > { %8220 = vmatpush1.bf16.msra.mxu1 %v11344_v17  ;;  %7744 = vmatprep.subr.bf16.mxu0 %v11349_v62  ;;  %v11410_v17 = vld [vmem:[%s14623_s5 + $0xf88] ss:$16 sps:$4 sm:$0xff]   ;;  %v11418_v62 = vld [vmem:[%s14623_s5 + $0xfac] ss:$16 sps:$4 sm:$0xff]  }
 0x46a   : > { %8221 = vmatprep.subr.bf16.mxu1 %v11352_v9  ;;  %v11427_v9 = vld [vmem:[%s14623_s5 + $0xfe4] ss:$16 sps:$4 sm:$0xff]  }
 0x46b   : > { %7730 = vmatmul.mubr.bf16.gmra.mrb[36].mxu0 %v3907_v49 }
 0x46c   : > { %8207 = vmatmul.mubr.bf16.gmra.mrb[28].mxu1 %v3907_v49  ;;  %7745 = vmatpush1.bf16.msra.mxu0 %v11347_v15  ;;  %v11431_v49 = vld [vmem:[%s14623_s5 + $0x1000] ss:$16 sps:$4 sm:$0xff]   ;;  %v11434_v15 = vld [vmem:[%s14623_s5 + $0x1008] ss:$16 sps:$4 sm:$0xff]  }
 0x46d   : > { %7772 = vmatprep.mubr.bf16.mxu0 %v3892_v20  ;;  %8222 = vmatpush1.bf16.msra.mxu1 %v11350_v40  ;;  %v11442_v40 = vld [vmem:[%s14623_s5 + $0x102c] ss:$16 sps:$4 sm:$0xff]  }
 0x46e   : > { %8249 = vmatprep.mubr.bf16.mxu1 %v3892_v20  ;;  %7746 = vmatprep.subr.bf16.mxu0 %v11355_v0  ;;  %v11437_v0 = vld [vmem:[%s14623_s5 + $0x1020] ss:$16 sps:$4 sm:$0xff]   ;;  %v11445_v20 = vld [vmem:[%s14623_s5 + $0x1044] ss:$16 sps:$4 sm:$0xff]  }
 0x46f   : > { %8223 = vmatprep.subr.bf16.mxu1 %v11358_v19  ;;  %v11440_v19 = vld [vmem:[%s14623_s5 + $0x1028] ss:$16 sps:$4 sm:$0xff]  }
 0x470   : > { %7747 = vmatpush1.bf16.msra.mxu0 %v11353_v21  ;;  %v11448_v21 = vld [vmem:[%s14623_s5 + $0x104c] ss:$16 sps:$4 sm:$0xff]  }
 0x471   : > { %8224 = vmatpush1.bf16.msra.mxu1 %v11356_v7  ;;  %7748 = vmatprep.subr.bf16.mxu0 %v11361_v22  ;;  %v3909_v7 = vld [vmem:[#allocation9 + $0x100] sm:$0xff] }
 0x472   : > { %8225 = vmatprep.subr.bf16.mxu1 %v11364_v23  ;;  %v11443_v22 = vld [vmem:[%s14623_s5 + $0x1040] ss:$16 sps:$4 sm:$0xff]   ;;  %v11446_v23 = vld [vmem:[%s14623_s5 + $0x1048] ss:$16 sps:$4 sm:$0xff]  }
 0x474   : > { %7749 = vmatpush1.bf16.msra.mxu0 %v11359_v24  ;;  %v11451_v24 = vld [vmem:[%s14623_s5 + $0x1064] ss:$16 sps:$4 sm:$0xff]  }
 0x475   : > { %8226 = vmatpush1.bf16.msra.mxu1 %v11362_v52  ;;  %7750 = vmatprep.subr.bf16.mxu0 %v11367_v25  ;;  %v11454_v52 = vld [vmem:[%s14623_s5 + $0x106c] ss:$16 sps:$4 sm:$0xff]  }
 0x476   : > { %8227 = vmatprep.subr.bf16.mxu1 %v11370_v27  ;;  %v3894_v25 = vld [vmem:[#allocation9 + $0x88] sm:$0xff]  ;;  %v11449_v27 = vld [vmem:[%s14623_s5 + $0x1060] ss:$16 sps:$4 sm:$0xff]  }
 0x478   : > { %7751 = vmatpush1.bf16.msra.mxu0 %v11365_v29  ;;  %v11452_v29 = vld [vmem:[%s14623_s5 + $0x1068] ss:$16 sps:$4 sm:$0xff]  }
 0x479   : > { %8228 = vmatpush1.bf16.msra.mxu1 %v11368_v30  ;;  %7752 = vmatprep.subr.bf16.mxu0 %v11373_v44  ;;  %v11457_v30 = vld [vmem:[%s14623_s5 + $0x1084] ss:$16 sps:$4 sm:$0xff]   ;;  %v11460_v44 = vld [vmem:[%s14623_s5 + $0x108c] ss:$16 sps:$4 sm:$0xff]  }
 0x47a   : > { %8229 = vmatprep.subr.bf16.mxu1 %v11376_v32  ;;  %v11455_v32 = vld [vmem:[%s14623_s5 + $0x1080] ss:$16 sps:$4 sm:$0xff]  }
 0x47c   : > { %7753 = vmatpush1.bf16.msra.mxu0 %v11371_v33  ;;  %v11458_v33 = vld [vmem:[%s14623_s5 + $0x1088] ss:$16 sps:$4 sm:$0xff]  }
 0x47d   : > { %8230 = vmatpush1.bf16.msra.mxu1 %v11374_v26  ;;  %7754 = vmatprep.subr.bf16.mxu0 %v11379_v4  ;;  %v11463_v26 = vld [vmem:[%s14623_s5 + $0x10a4] ss:$16 sps:$4 sm:$0xff]   ;;  %v11466_v4 = vld [vmem:[%s14623_s5 + $0x10ac] ss:$16 sps:$4 sm:$0xff]  }
 0x47e   : > { %8231 = vmatprep.subr.bf16.mxu1 %v11382_v34  ;;  %v11461_v34 = vld [vmem:[%s14623_s5 + $0x10a0] ss:$16 sps:$4 sm:$0xff]  }
 0x480   : > { %7755 = vmatpush1.bf16.msra.mxu0 %v11377_v35  ;;  %v11464_v35 = vld [vmem:[%s14623_s5 + $0x10a8] ss:$16 sps:$4 sm:$0xff]  }
 0x481   : > { %8232 = vmatpush1.bf16.msra.mxu1 %v11380_v36  ;;  %7756 = vmatprep.subr.bf16.mxu0 %v11385_v37  ;;  %v11469_v36 = vld [vmem:[%s14623_s5 + $0x10c4] ss:$16 sps:$4 sm:$0xff]   ;;  %v11472_v37 = vld [vmem:[%s14623_s5 + $0x10cc] ss:$16 sps:$4 sm:$0xff]  }
 0x482   : > { %8233 = vmatprep.subr.bf16.mxu1 %v11388_v10  ;;  %v11467_v10 = vld [vmem:[%s14623_s5 + $0x10c0] ss:$16 sps:$4 sm:$0xff]  }
 0x484   : > { %7757 = vmatpush1.bf16.msra.mxu0 %v11383_v38  ;;  %v11470_v38 = vld [vmem:[%s14623_s5 + $0x10c8] ss:$16 sps:$4 sm:$0xff]  }
 0x485   : > { %8234 = vmatpush1.bf16.msra.mxu1 %v11386_v28  ;;  %7758 = vmatprep.subr.bf16.mxu0 %v11391_v45  ;;  %v11475_v28 = vld [vmem:[%s14623_s5 + $0x10e4] ss:$16 sps:$4 sm:$0xff]   ;;  %v11478_v45 = vld [vmem:[%s14623_s5 + $0x10ec] ss:$16 sps:$4 sm:$0xff]  }
 0x486   : > { %8235 = vmatprep.subr.bf16.mxu1 %v11394_v46  ;;  %v11473_v46 = vld [vmem:[%s14623_s5 + $0x10e0] ss:$16 sps:$4 sm:$0xff]  }
 0x488   : > { %7759 = vmatpush1.bf16.msra.mxu0 %v11389_v48  ;;  %v11476_v48 = vld [vmem:[%s14623_s5 + $0x10e8] ss:$16 sps:$4 sm:$0xff]  }
 0x489   : > { %8236 = vmatpush1.bf16.msra.mxu1 %v11392_v54  ;;  %7760 = vmatprep.subr.bf16.mxu0 %v11397_v53  ;;  %v11481_v54 = vld [vmem:[%s14623_s5 + $0x1104] ss:$16 sps:$4 sm:$0xff]   ;;  %v11484_v53 = vld [vmem:[%s14623_s5 + $0x110c] ss:$16 sps:$4 sm:$0xff]  }
 0x48a   : > { %8237 = vmatprep.subr.bf16.mxu1 %v11400_v31  ;;  %v11479_v31 = vld [vmem:[%s14623_s5 + $0x1100] ss:$16 sps:$4 sm:$0xff]  }
 0x48c   : > { %7761 = vmatpush1.bf16.msra.mxu0 %v11395_v61  ;;  %v11482_v61 = vld [vmem:[%s14623_s5 + $0x1108] ss:$16 sps:$4 sm:$0xff]  }
 0x48d   : > { %8238 = vmatpush1.bf16.msra.mxu1 %v11398_v55  ;;  %7762 = vmatprep.subr.bf16.mxu0 %v11403_v47  ;;  %v11487_v55 = vld [vmem:[%s14623_s5 + $0x1124] ss:$16 sps:$4 sm:$0xff]   ;;  %v11490_v47 = vld [vmem:[%s14623_s5 + $0x112c] ss:$16 sps:$4 sm:$0xff]  }
 0x48e   : > { %8239 = vmatprep.subr.bf16.mxu1 %v11406_v16  ;;  %v11485_v16 = vld [vmem:[%s14623_s5 + $0x1120] ss:$16 sps:$4 sm:$0xff]  }
 0x490   : > { %7763 = vmatpush1.bf16.msra.mxu0 %v11401_v56  ;;  %v11488_v56 = vld [vmem:[%s14623_s5 + $0x1128] ss:$16 sps:$4 sm:$0xff]  }
 0x491   : > { %8240 = vmatpush1.bf16.msra.mxu1 %v11404_v57  ;;  %7764 = vmatprep.subr.bf16.mxu0 %v11409_v58  ;;  %v11493_v57 = vld [vmem:[%s14623_s5 + $0x1144] ss:$16 sps:$4 sm:$0xff]   ;;  %v11496_v58 = vld [vmem:[%s14623_s5 + $0x114c] ss:$16 sps:$4 sm:$0xff]  }
 0x492   : > { %8241 = vmatprep.subr.bf16.mxu1 %v11412_v59  ;;  %v11491_v59 = vld [vmem:[%s14623_s5 + $0x1140] ss:$16 sps:$4 sm:$0xff]  }
 0x494   : > { %7765 = vmatpush1.bf16.msra.mxu0 %v11407_v60  ;;  %v11494_v60 = vld [vmem:[%s14623_s5 + $0x1148] ss:$16 sps:$4 sm:$0xff]  }
 0x495   : > { %8242 = vmatpush1.bf16.msra.mxu1 %v11410_v17  ;;  %7766 = vmatprep.subr.bf16.mxu0 %v11415_v63  ;;  %v11499_v17 = vld [vmem:[%s14623_s5 + $0x1164] ss:$16 sps:$4 sm:$0xff]   ;;  %v11502_v63 = vld [vmem:[%s14623_s5 + $0x116c] ss:$16 sps:$4 sm:$0xff]  }
 0x496   : > { %8243 = vmatprep.subr.bf16.mxu1 %v11418_v62  ;;  %v11497_v62 = vld [vmem:[%s14623_s5 + $0x1160] ss:$16 sps:$4 sm:$0xff]  }
 0x498   : > { %7767 = vmatpush1.bf16.msra.mxu0 %v11413_v1  ;;  %v11500_v1 = vld [vmem:[%s14623_s5 + $0x1168] ss:$16 sps:$4 sm:$0xff]  }
 0x499   : > { %8244 = vmatpush1.bf16.msra.mxu1 %v11416_v3  ;;  %7768 = vmatprep.subr.bf16.mxu0 %v11421_v39  ;;  %v11505_v3 = vld [vmem:[%s14623_s5 + $0x1184] ss:$16 sps:$4 sm:$0xff]   ;;  %v11508_v39 = vld [vmem:[%s14623_s5 + $0x118c] ss:$16 sps:$4 sm:$0xff]  }
 0x49a   : > { %8245 = vmatprep.subr.bf16.mxu1 %v11424_v5  ;;  %v11503_v5 = vld [vmem:[%s14623_s5 + $0x1180] ss:$16 sps:$4 sm:$0xff]  }
 0x49c   : > { %7769 = vmatpush1.bf16.msra.mxu0 %v11419_v6  ;;  %v11506_v6 = vld [vmem:[%s14623_s5 + $0x1188] ss:$16 sps:$4 sm:$0xff]  }
 0x49d   : > { %8246 = vmatpush1.bf16.msra.mxu1 %v11422_v8  ;;  %7770 = vmatprep.subr.bf16.mxu0 %v11427_v9  ;;  %v11511_v8 = vld [vmem:[%s14623_s5 + $0x11a4] ss:$16 sps:$4 sm:$0xff]   ;;  %v11514_v9 = vld [vmem:[%s14623_s5 + $0x11ac] ss:$16 sps:$4 sm:$0xff]  }
 0x49e   : > { %8247 = vmatprep.subr.bf16.mxu1 %v11430_v42  ;;  %v11509_v42 = vld [vmem:[%s14623_s5 + $0x11a0] ss:$16 sps:$4 sm:$0xff]  }
 0x4a0   : > { %7771 = vmatpush1.bf16.msra.mxu0 %v11425_v43  ;;  %v11512_v43 = vld [vmem:[%s14623_s5 + $0x11a8] ss:$16 sps:$4 sm:$0xff]  }
 0x4a1   : > { %8248 = vmatpush1.bf16.msra.mxu1 %v11428_v51  ;;  %7793 = vmatprep.subr.bf16.mxu0 %v11433_v13  ;;  %v11517_v51 = vld [vmem:[%s14623_s5 + $0x11c4] ss:$16 sps:$4 sm:$0xff]   ;;  %v11520_v13 = vld [vmem:[%s14623_s5 + $0x11cc] ss:$16 sps:$4 sm:$0xff]  }
 0x4a2   : > { %8270 = vmatprep.subr.bf16.mxu1 %v11436_v12  ;;  %v11515_v12 = vld [vmem:[%s14623_s5 + $0x11c0] ss:$16 sps:$4 sm:$0xff]  }
 0x4a3   : > { %7773 = vmatmul.mubr.bf16.vlgmr.msra.gmra.mrb[32].mxu0 %v3891_v14 }
 0x4a4   : > { %8250 = vmatmul.mubr.bf16.vlgmr.msra.gmra.mrb[24].mxu1 %v3891_v14  ;;  %7794 = vmatpush1.bf16.msra.mxu0 %v11431_v49  ;;  %v11518_v49 = vld [vmem:[%s14623_s5 + $0x11c8] ss:$16 sps:$4 sm:$0xff]   ;;  %v11521_v14 = vld [vmem:[%s14623_s5 + $0x11e0] ss:$16 sps:$4 sm:$0xff]  }
 0x4a5   : > { %8271 = vmatpush1.bf16.msra.mxu1 %v11434_v15  ;;  %7795 = vmatprep.subr.bf16.mxu0 %v11439_v50  ;;  %v11523_v15 = vld [vmem:[%s14623_s5 + $0x11e4] ss:$16 sps:$4 sm:$0xff]   ;;  %v11526_v50 = vld [vmem:[%s14623_s5 + $0x11ec] ss:$16 sps:$4 sm:$0xff]  }
 0x4a6   : > { %8272 = vmatprep.subr.bf16.mxu1 %v11442_v40  ;;  %7782 = vmatprep.mubr.bf16.mxu0 %v3910_v18  ;;  %v11524_v40 = vld [vmem:[%s14623_s5 + $0x11e8] ss:$16 sps:$4 sm:$0xff]  }
 0x4a7   : > { %8259 = vmatprep.mubr.bf16.mxu1 %v3910_v18  ;;  %v11527_v18 = vld [vmem:[%s14625_s7 + $0x40] sm:$0xff]  }
 0x4a8   : > { %7796 = vmatpush1.bf16.msra.mxu0 %v11437_v0  ;;  %v3912_v0 = vld [vmem:[#allocation9 + $0x118] sm:$0xff] }
 0x4a9   : > { %8273 = vmatpush1.bf16.msra.mxu1 %v11440_v19  ;;  %7797 = vmatprep.subr.bf16.mxu0 %v11445_v20  ;;  %v11528_v19 = vld [vmem:[%s14625_s7] sm:$0xff]   ;;  %v3893_v20 = vld [vmem:[#allocation9 + $0x80] sm:$0xff] }
 0x4aa   : > { %8274 = vmatprep.subr.bf16.mxu1 %v11448_v21  ;;  %v11529_v21 = vld [vmem:[%s14625_s7 + $0x48] sm:$0xff]  }
 0x4ab   : > { %7783 = vmatmul.mubr.bf16.gmra.mrb[36].mxu0 %v3909_v7 }
 0x4ac   : > { %8260 = vmatmul.mubr.bf16.gmra.mrb[28].mxu1 %v3909_v7  ;;  %7798 = vmatpush1.bf16.msra.mxu0 %v11443_v22  ;;  %v11530_v7 = vld [vmem:[%s14625_s7 + $0x8] sm:$0xff]   ;;  %v11531_v22 = vld [vmem:[%s14625_s7 + $0x50] sm:$0xff]  }
 0x4ad   : > { %7825 = vmatprep.mubr.bf16.mxu0 %v3894_v25  ;;  %8275 = vmatpush1.bf16.msra.mxu1 %v11446_v23  ;;  %v3911_v23 = vld [vmem:[#allocation9 + $0x110] sm:$0xff] }
 0x4ae   : > { %8302 = vmatprep.mubr.bf16.mxu1 %v3894_v25  ;;  %7799 = vmatprep.subr.bf16.mxu0 %v11451_v24  ;;  %v11532_v24 = vld [vmem:[%s14625_s7 + $0x10] sm:$0xff]   ;;  %v11534_v25 = vld [vmem:[%s14625_s7 + $0x18] sm:$0xff]  }
 0x4af   : > { %8276 = vmatprep.subr.bf16.mxu1 %v11454_v52  ;;  %v11533_v52 = vld [vmem:[%s14625_s7 + $0x58] sm:$0xff]  }
 0x4b0   : > { %7800 = vmatpush1.bf16.msra.mxu0 %v11449_v27  ;;  %v11535_v27 = vld [vmem:[%s14625_s7 + $0x60] sm:$0xff]  }
 0x4b1   : > { %8277 = vmatpush1.bf16.msra.mxu1 %v11452_v29  ;;  %7801 = vmatprep.subr.bf16.mxu0 %v11457_v30  ;;  %v11536_v29 = vld [vmem:[%s14625_s7 + $0x20] sm:$0xff]   ;;  %v11537_v30 = vld [vmem:[%s14625_s7 + $0x68] sm:$0xff]  }
 0x4b2   : > { %8278 = vmatprep.subr.bf16.mxu1 %v11460_v44  ;;  %v11538_v44 = vld [vmem:[%s14625_s7 + $0x28] sm:$0xff]  }
 0x4b4   : > { %7802 = vmatpush1.bf16.msra.mxu0 %v11455_v32  ;;  %v11539_v32 = vld [vmem:[%s14625_s7 + $0x70] sm:$0xff]  }
 0x4b5   : > { %8279 = vmatpush1.bf16.msra.mxu1 %v11458_v33  ;;  %7803 = vmatprep.subr.bf16.mxu0 %v11463_v26  ;;  %v11540_v33 = vld [vmem:[%s14625_s7 + $0x30] sm:$0xff]   ;;  %v11541_v26 = vld [vmem:[%s14625_s7 + $0x78] sm:$0xff]  }
 0x4b6   : > { %8280 = vmatprep.subr.bf16.mxu1 %v11466_v4  ;;  %v11542_v4 = vld [vmem:[%s14625_s7 + $0x38] sm:$0xff]  }
 0x4b8   : > { %7804 = vmatpush1.bf16.msra.mxu0 %v11461_v34  ;;  %v11543_v34 = vld [vmem:[%s14625_s7 + $0xc0] sm:$0xff]  }
 0x4b9   : > { %8281 = vmatpush1.bf16.msra.mxu1 %v11464_v35  ;;  %7805 = vmatprep.subr.bf16.mxu0 %v11469_v36 }
 0x4ba   : > { %8282 = vmatprep.subr.bf16.mxu1 %v11472_v37 }
 0x4bc   : > { %7806 = vmatpush1.bf16.msra.mxu0 %v11467_v10 }
 0x4bd   : > { %8283 = vmatpush1.bf16.msra.mxu1 %v11470_v38  ;;  %7807 = vmatprep.subr.bf16.mxu0 %v11475_v28 }
 0x4be   : > { %8284 = vmatprep.subr.bf16.mxu1 %v11478_v45 }
 0x4c0   : > { %7808 = vmatpush1.bf16.msra.mxu0 %v11473_v46 }
 0x4c1   : > { %8285 = vmatpush1.bf16.msra.mxu1 %v11476_v48  ;;  %7809 = vmatprep.subr.bf16.mxu0 %v11481_v54 }
 0x4c2   : > { %8286 = vmatprep.subr.bf16.mxu1 %v11484_v53 }
 0x4c4   : > { %7810 = vmatpush1.bf16.msra.mxu0 %v11479_v31 }
 0x4c5   : > { %8287 = vmatpush1.bf16.msra.mxu1 %v11482_v61  ;;  %7811 = vmatprep.subr.bf16.mxu0 %v11487_v55  ;;  %v8367_v55 = vld [vmem:[%s14624_s6] sm:$0xf] }
 0x4c6   : > { %8288 = vmatprep.subr.bf16.mxu1 %v11490_v47 }
 0x4c8   : > { %7812 = vmatpush1.bf16.msra.mxu0 %v11485_v16 }
 0x4c9   : > { %8289 = vmatpush1.bf16.msra.mxu1 %v11488_v56  ;;  %7813 = vmatprep.subr.bf16.mxu0 %v11493_v57  ;;  %v8383_v56 = vsub.s32 3, %v12873_v2 }
 0x4ca   : > { %8290 = vmatprep.subr.bf16.mxu1 %v11496_v58 }
 0x4cc   : > { %7814 = vmatpush1.bf16.msra.mxu0 %v11491_v59 }
 0x4cd   : > { %8291 = vmatpush1.bf16.msra.mxu1 %v11494_v60  ;;  %7815 = vmatprep.subr.bf16.mxu0 %v11499_v17  ;;  %v8372_v60 = vrot.slane %v8367_v55, %v2980_v41 }
 0x4ce   : > { %8292 = vmatprep.subr.bf16.mxu1 %v11502_v63 }
 0x4d0   : > { %7816 = vmatpush1.bf16.msra.mxu0 %v11497_v62 }
 0x4d1   : > { %8293 = vmatpush1.bf16.msra.mxu1 %v11500_v1  ;;  %7817 = vmatprep.subr.bf16.mxu0 %v11505_v3  ;;  %v8376_v3 = vrot.slane %v8367_v55, %v2984_v11  ;;  %v11545_v11 = vld [vmem:[%s14625_s7 + $0xc8] sm:$0xff]  }
 0x4d2   : > { %8294 = vmatprep.subr.bf16.mxu1 %v11508_v39 }
 0x4d4   : > { %7818 = vmatpush1.bf16.msra.mxu0 %v11503_v5 }
 0x4d5   : > { %8295 = vmatpush1.bf16.msra.mxu1 %v11506_v6  ;;  %7819 = vmatprep.subr.bf16.mxu0 %v11511_v8  ;;  %v8384_v8 = vrot.slane %v8367_v55, %v8383_v56 }
 0x4d6   : > { %8296 = vmatprep.subr.bf16.mxu1 %v11514_v9 }
 0x4d8   : > { %7820 = vmatpush1.bf16.msra.mxu0 %v11509_v42 }
 0x4d9   : > { %8297 = vmatpush1.bf16.msra.mxu1 %v11512_v43  ;;  %7821 = vmatprep.subr.bf16.mxu0 %v11517_v51 }
 0x4da   : > { %8298 = vmatprep.subr.bf16.mxu1 %v11520_v13 }
 0x4dc   : > { %7822 = vmatpush1.bf16.msra.mxu0 %v11515_v12 }
 0x4dd   : > { %8299 = vmatpush1.bf16.msra.mxu1 %v11518_v49  ;;  %7823 = vmatprep.subr.bf16.mxu0 %v11523_v15 }
 0x4de   : > { %8300 = vmatprep.subr.bf16.mxu1 %v11526_v50 }
 0x4e0   : > { %7824 = vmatpush1.bf16.msra.mxu0 %v11521_v14  ;;  %v11544_v14 = vld [vmem:[%s14625_s7 + $0x80] sm:$0xff]  }
 0x4e1   : > { %8301 = vmatpush1.bf16.msra.mxu1 %v11524_v40  ;;  %10049 = vmatprep.subr.bf16.mxu0 %v11527_v18 }
 0x4e3   : > { %7826 = vmatmul.mubr.bf16.vlgmr.msra.gmra.mrb[32].mxu0 %v3893_v20 }
 0x4e4   : > { %8303 = vmatmul.mubr.bf16.vlgmr.msra.gmra.mrb[24].mxu1 %v3893_v20  ;;  %7835 = vmatprep.mubr.bf16.mxu0 %v3912_v0  ;;  %v11548_v20 = vld [vmem:[%s14625_s7 + $0x90] sm:$0xff]  }
 0x4e5   : > { %8312 = vmatprep.mubr.bf16.mxu1 %v3912_v0  ;;  %10050 = vmatpush3.bf16.msra.mxu0 %v11528_v19  ;;  %v11546_v0 = vld [vmem:[%s14625_s7 + $0x88] sm:$0xff]   ;;  %v11547_v19 = vld [vmem:[%s14625_s7 + $0xd0] sm:$0xff]  }
 0x4e6   : > { %10051 = vmatprep.subr.bf16.mxu0 %v11529_v21  ;;  %v11549_v21 = vld [vmem:[%s14625_s7 + $0xd8] sm:$0xff]  }
 0x4e9   : > { %10052 = vmatpush3.bf16.msra.mxu0 %v11530_v7  ;;  %v11550_v7 = vld [vmem:[%s14625_s7 + $0x98] sm:$0xff]  }
 0x4ea   : > { %10053 = vmatprep.subr.bf16.mxu0 %v11531_v22  ;;  %v11551_v22 = vld [vmem:[%s14625_s7 + $0xe0] sm:$0xff]  }
 0x4eb   : > { %7836 = vmatmul.mubr.bf16.gmra.mrb[36].mxu0 %v3911_v23 }
 0x4ec   : > { %8313 = vmatmul.mubr.bf16.gmra.mrb[28].mxu1 %v3911_v23  ;;  %v11552_v23 = vld [vmem:[%s14625_s7 + $0xa0] sm:$0xff]  }
 0x4ed   : > { %10054 = vmatpush3.bf16.msra.mxu0 %v11532_v24  ;;  %v8379_v24 = vsub.s32 2, %v12873_v2  ;;  %v11556_v2 = vld [vmem:[%s14625_s7 + $0xb0] sm:$0xff]  }
 0x4ee   : > { %10055 = vmatprep.subr.bf16.mxu0 %v11533_v52  ;;  %v11553_v52 = vld [vmem:[%s14625_s7 + $0xe8] sm:$0xff]  }
 0x4f1   : > { %10056 = vmatpush3.bf16.msra.mxu0 %v11534_v25  ;;  %v11554_v25 = vld [vmem:[%s14625_s7 + $0xa8] sm:$0xff]  }
 0x4f2   : > { %10057 = vmatprep.subr.bf16.mxu0 %v11535_v27  ;;  %v8380_v27 = vrot.slane %v8367_v55, %v8379_v24 }
 0x4f5   : > { %10058 = vmatpush3.bf16.msra.mxu0 %v11536_v29  ;;  %v11555_v29 = vld [vmem:[%s14625_s7 + $0xf0] sm:$0xff]  }
 0x4f6   : > { %10059 = vmatprep.subr.bf16.mxu0 %v11537_v30 }
 0x4f9   : > { %10060 = vmatpush3.bf16.msra.mxu0 %v11538_v44  ;;  %v11557_v44 = vld [vmem:[%s14625_s7 + $0xf8] sm:$0xff]  }
 0x4fa   : > { %10061 = vmatprep.subr.bf16.mxu0 %v11539_v32  ;;  %v11558_v32 = vld [vmem:[%s14625_s7 + $0xb8] sm:$0xff]  }
 0x4fd   : > { %10062 = vmatpush3.bf16.msra.mxu0 %v11540_v33 }
 0x4fe   : > { %10063 = vmatprep.subr.bf16.mxu0 %v11541_v26 }
 0x501   : > { %10064 = vmatpush3.bf16.msra.mxu0 %v11542_v4  ;;  %v11559_v4 = vld [vmem:[%s14627_s9] sm:$0xff]  }
 0x502   : > { %10071 = vmatprep.subr.bf16.mxu0 %v11543_v34  ;;  %v11585_v34 = vmov 0.0  }
 0x5b6   : > { %v7827_v35 = vpop.f32.mrb[32].mxu0 }
 0x5b7   : > { %v8304_v36 = vpop.f32.mrb[24].mxu1  ;;  %v7829_v37 = vpop.f32.mrb[33].mxu0 }
 0x5b8   : > { %v8306_v10 = vpop.f32.mrb[25].mxu1  ;;  %v7831_v38 = vpop.f32.mrb[34].mxu0 }
 0x5b9   : > { %v8347_v28 = vmax.f32 %v7827_v35, %v7831_v38  ;;  %v8308_v45 = vpop.f32.mrb[26].mxu1  ;;  %v7833_v46 = vpop.f32.mrb[35].mxu0  ;;  %v11560_v35 = vld [vmem:[%s14627_s9 + $0x8] sm:$0xff]  }
 0x5ba   : > { %v8349_v48 = vmax.f32 %v8304_v36, %v8308_v45  ;;  %v8348_v54 = vmax.f32 %v7829_v37, %v7833_v46  ;;  %v8310_v53 = vpop.f32.mrb[27].mxu1  ;;  %v11561_v36 = vld [vmem:[%s14627_s9 + $0x10] sm:$0xff]   ;;  %v11562_v37 = vld [vmem:[%s14627_s9 + $0x18] sm:$0xff]   ;;  %v11564_v38 = vld [vmem:[%s14627_s9 + $0x28] sm:$0xff]  }
 0x5bb   : > { %v8350_v31 = vmax.f32 %v8306_v10, %v8310_v53  ;;  %v11563_v10 = vld [vmem:[%s14627_s9 + $0x20] sm:$0xff]   ;;  %v11566_v45 = vld [vmem:[%s14627_s9 + $0x38] sm:$0xff]  }
 0x5be   : > { %v7837_v61 = vpop.f32.mrb[36].mxu0 }
 0x5bf   : > { %v8314_v47 = vpop.f32.mrb[28].mxu1  ;;  %v7839_v16 = vpop.f32.mrb[37].mxu0 }
 0x5c0   : > { %v8316_v57 = vpop.f32.mrb[29].mxu1  ;;  %v7841_v58 = vpop.f32.mrb[38].mxu0 }
 0x5c1   : > { %v8359_v59 = vmax.f32 %v7837_v61, %v7841_v58  ;;  %v8318_v17 = vpop.f32.mrb[30].mxu1  ;;  %v7843_v63 = vpop.f32.mrb[39].mxu0  ;;  %v9907_v61 = vld [vmem:[%s14626_s8] ss:$0 sm:$0xff] }
 0x5c2   : > { %v8361_v62 = vmax.f32 %v8314_v47, %v8318_v17  ;;  %v8360_v1 = vmax.f32 %v7839_v16, %v7843_v63  ;;  %v8320_v39 = vpop.f32.mrb[31].mxu1  ;;  %v11567_v17 = vld [vmem:[%s14629_s11] sm:$0xff]  }
 0x5c3   : > { %v8363_v5 = vmax.f32 %v8347_v28, %v8359_v59  ;;  %v8362_v6 = vmax.f32 %v8316_v57, %v8320_v39  ;;  %v11565_v28 = vld [vmem:[%s14627_s9 + $0x30] sm:$0xff]   ;;  %v11571_v39 = vld [vmem:[%s14629_s11 + $0x20] sm:$0xff]  }
 0x5c4   : > { %v8365_v9 = vmax.f32 %v8349_v48, %v8361_v62  ;;  %v8364_v42 = vmax.f32 %v8348_v54, %v8360_v1  ;;  %v11568_v62 = vld [vmem:[%s14629_s11 + $0x8] sm:$0xff]   ;;  %v11569_v1 = vld [vmem:[%s14629_s11 + $0x10] sm:$0xff]  }
 0x5c5   : > { %v8389_v43 = vadd.f32 %v8372_v60, %v8363_v5  ;;  %v8366_v51 = vmax.f32 %v8350_v31, %v8362_v6  ;;  %v11572_v5 = vld [vmem:[%s14629_s11 + $0x28] sm:$0xff]   ;;  %v11573_v6 = vld [vmem:[%s14629_s11 + $0x30] sm:$0xff]  }
 0x5c6   : > { %v8390_v13 = vadd.f32 %v8376_v3, %v8364_v42  ;;  %v8391_v30 = vadd.f32 %v8380_v27, %v8365_v9  ;;  %v11570_v3 = vld [vmem:[%s14629_s11 + $0x18] sm:$0xff]   ;;  %v9940_v9 = vld [vmem:[%s14628_s10] ss:$0 sm:$0xff] }
 0x5c7   : > { %v8393_v12 = vmax.f32 %v8389_v43, 0.0  ;;  %v8392_v49 = vadd.f32 %v8384_v8, %v8366_v51  ;;  %v11574_v8 = vld [vmem:[%s14629_s11 + $0x38] sm:$0xff]  }
 0x5c8   : > { %v8394_v15 = vmax.f32 %v8390_v13, 0.0  ;;  %v8395_v33 = vmax.f32 %v8391_v30, 0.0 }
 0x5c9   : > { %v8396_v41 = vmax.f32 %v8392_v49, 0.0  ;;  %v8397_v40 = vpack.c.bf16 %v8393_v12, %v8393_v12 }
 0x5ca   : > { %v8398_v50 = vpack.c.bf16 %v8394_v15, %v8394_v15  ;;  %v8399_v26 = vpack.c.bf16 %v8395_v33, %v8395_v33 }
 0x5cb   : > { %v8400_v18 = vpack.c.bf16 %v8396_v41, %v8396_v41  ;;  %v9949_v41 = vld [vmem:[%s14630_s12] ss:$0 sm:$0xff] }
 0x5cc   : > { %8696 = vmatprep.mubr.bf16.mxu0 %v8398_v50 }
 0x5cd   : > { %8697 = vmatmul.mubr.bf16.vlgmr.msra.gmra.mrb[40].mxu0 %v8397_v40 }
 0x5ce   : > { %10072 = vmatpush3.bf16.msra.mxu0 %v11544_v14  ;;  %8736 = vmatprep.mubr.bf16.mxu0 %v8400_v18 }
 0x5cf   : > { %10073 = vmatprep.subr.bf16.mxu0 %v11545_v11 }
 0x5d2   : > { %10074 = vmatpush3.bf16.msra.mxu0 %v11546_v0 }
 0x5d3   : > { %10075 = vmatprep.subr.bf16.mxu0 %v11547_v19 }
 0x5d6   : > { %10076 = vmatpush3.bf16.msra.mxu0 %v11548_v20 }
 0x5d7   : > { %10077 = vmatprep.subr.bf16.mxu0 %v11549_v21 }
 0x5da   : > { %10078 = vmatpush3.bf16.msra.mxu0 %v11550_v7 }
 0x5db   : > { %10079 = vmatprep.subr.bf16.mxu0 %v11551_v22 }
 0x5de   : > { %10080 = vmatpush3.bf16.msra.mxu0 %v11552_v23 }
 0x5df   : > { %10081 = vmatprep.subr.bf16.mxu0 %v11553_v52 }
 0x5e2   : > { %10082 = vmatpush3.bf16.msra.mxu0 %v11554_v25 }
 0x5e3   : > { %10083 = vmatprep.subr.bf16.mxu0 %v11555_v29 }
 0x5e6   : > { %10084 = vmatpush3.bf16.msra.mxu0 %v11556_v2 }
 0x5e7   : > { %10085 = vmatprep.subr.bf16.mxu0 %v11557_v44 }
 0x5ea   : > { %10086 = vmatpush3.bf16.msra.mxu0 %v11558_v32 }
 0x5eb   : > { %10127 = vmatprep.subr.bf16.mxu0 %v11585_v34 }
 0x5ed   : > { %8737 = vmatmul.mubr.bf16.vlgmr.msra.gmra.mrb[44].mxu0 %v8399_v26 }
 0x5ee   : > { %10128 = vmatpush3.bf16.msra.mxu0 %v11559_v4  ;;  %10143 = vmatprep.mubr.msk.bf16.mxu0 %vm11586_vm3, %v11585_v34 }
 0x5ef   : > { %10129 = vmatprep.subr.bf16.mxu0 %v11585_v34 }
 0x5f2   : > { %10130 = vmatpush3.bf16.msra.mxu0 %v11560_v35 }
 0x5f3   : > { %10131 = vmatprep.subr.bf16.mxu0 %v11585_v34 }
 0x5f6   : > { %10132 = vmatpush3.bf16.msra.mxu0 %v11561_v36 }
 0x5f7   : > { %10133 = vmatprep.subr.bf16.mxu0 %v11585_v34 }
 0x5fa   : > { %10134 = vmatpush3.bf16.msra.mxu0 %v11562_v37 }
 0x5fb   : > { %10135 = vmatprep.subr.bf16.mxu0 %v11585_v34 }
 0x5fe   : > { %10136 = vmatpush3.bf16.msra.mxu0 %v11563_v10 }
 0x5ff   : > { %10137 = vmatprep.subr.bf16.mxu0 %v11585_v34 }
 0x602   : > { %10138 = vmatpush3.bf16.msra.mxu0 %v11564_v38 }
 0x603   : > { %10139 = vmatprep.subr.bf16.mxu0 %v11585_v34 }
 0x606   : > { %10140 = vmatpush3.bf16.msra.mxu0 %v11565_v28 }
 0x607   : > { %10141 = vmatprep.subr.bf16.mxu0 %v11585_v34 }
 0x60a   : > { %10142 = vmatpush3.bf16.msra.mxu0 %v11566_v45 }
 0x60b   : > { %10147 = vmatprep.subr.bf16.mxu0 %v11585_v34 }
 0x6a0   : > { %v10065_v46 = vpop.f32.mrb[40].mxu0 }
 0x6a1   : > { %v10066_v48 = vpop.f32.mrb[41].mxu0 }
 0x6a2   : > { %v10067_v54 = vadd.f32 %v10066_v48, %v10065_v46  ;;  %v10068_v53 = vpop.f32.mrb[42].mxu0 }
 0x6a3   : > { %v10069_v31 = vpop.f32.mrb[43].mxu0 }
 0x6a4   : > { %v8699_v16 = vadd.f32 %v10067_v54, %v9907_v61 }
 0x6c0   : > { %v10087_v55 = vpop.f32.mrb[44].mxu0 }
 0x6c1   : > { %v10088_v47 = vpop.f32.mrb[45].mxu0 }
 0x6c2   : > { %v10089_v56 = vadd.f32 %v10088_v47, %v10087_v55  ;;  %v10090_v57 = vpop.f32.mrb[46].mxu0 }
 0x6c3   : > { %v10091_v58 = vpop.f32.mrb[47].mxu0 }
 0x6c4   : > { %v8739_v59 = vadd.f32 %v10089_v56, %v8699_v16 }
 0x6c6   : > { %v8744_v60 = vmax.f32 %v8739_v59, 0.0 }
 0x6c8   : > { %v8745_v63 = vpack.c.bf16 %v8744_v60, %v8744_v60 }
 0x6ca   : > { %10144 = vmatmul.mubr.bf16.vlgmr.msra.gmra.mrb[48].mxu0 %v8745_v63 }
 0x6cb   : > { %10148 = vmatpush3.bf16.msra.mxu0 %v11567_v17  ;;  %10163 = vmatprep.mubr.msk.bf16.mxu0 %vm11586_vm3, %v11585_v34 }
 0x6cc   : > { %10149 = vmatprep.subr.bf16.mxu0 %v11585_v34 }
 0x6cf   : > { %10150 = vmatpush3.bf16.msra.mxu0 %v11568_v62 }
 0x6d0   : > { %10151 = vmatprep.subr.bf16.mxu0 %v11585_v34 }
 0x6d3   : > { %10152 = vmatpush3.bf16.msra.mxu0 %v11569_v1 }
 0x6d4   : > { %10153 = vmatprep.subr.bf16.mxu0 %v11585_v34 }
 0x6d7   : > { %10154 = vmatpush3.bf16.msra.mxu0 %v11570_v3 }
 0x6d8   : > { %10155 = vmatprep.subr.bf16.mxu0 %v11585_v34 }
 0x6db   : > { %10156 = vmatpush3.bf16.msra.mxu0 %v11571_v39 }
 0x6dc   : > { %10157 = vmatprep.subr.bf16.mxu0 %v11585_v34 }
 0x6df   : > { %10158 = vmatpush3.bf16.msra.mxu0 %v11572_v5 }
 0x6e0   : > { %10159 = vmatprep.subr.bf16.mxu0 %v11585_v34 }
 0x6e3   : > { %10160 = vmatpush3.bf16.msra.mxu0 %v11573_v6 }
 0x6e4   : > { %10161 = vmatprep.subr.bf16.mxu0 %v11585_v34 }
 0x6e7   : > { %10162 = vmatpush3.bf16.msra.mxu0 %v11574_v8 }
 0x79d   : > { %v8851_v42 = vpop.f32.mrb[48].mxu0 }
 0x79e   : > { %v8852_v43 = vadd.f32 %v9940_v9, %v8851_v42  ;;  %v10145_v51 = vpop.f32.mrb[49].mxu0 }
 0x79f   : > { %v8854_v13 = vpop.f32.mrb[50].mxu0 }
 0x7a0   : > { %v8857_v12 = vmax.f32 %v8852_v43, 0.0  ;;  %v10146_v49 = vpop.f32.mrb[51].mxu0 }
 0x7a2   : > { %v8858_v15 = vpack.c.bf16 %v8857_v12, %v8857_v12 }
 0x7a4   : > { %10164 = vmatmul.mubr.bf16.vlgmr.msra.gmra.mrb[52].mxu0 %v8858_v15 }
 0x877   : > { %v8964_v50 = vpop.f32.mrb[52].mxu0 }
 0x878   : > { %v8965_v14 = vadd.f32 %v9949_v41, %v8964_v50  ;;  %v10165_v40 = vpop.f32.mrb[53].mxu0 }
 0x879   : > { %v8967_v11 = vpop.f32.mrb[54].mxu0 }
 0x87a   : > { %8971 = vst.msk [vmem:[%s443_s19] sm:$0xff] %vm8970_vm13, %v8965_v14  ;;  %v10166_v18 = vpop.f32.mrb[55].mxu0 }
 0x87b PF: > { %s23_s25 = sadd.s32 1, %s11582_s25  }
 0x87c   : > { %p20_p5 = scmp.ge.s32.totalorder %s23_s25, 4  }
 0x87e   :  { %22 = sbr.rel (!%p20_p5) target bundleno = 1 (0x1), region = 108 }

</bundles_post_ra>
